<compile_context>
chip_gen: v7x
topology: tpu7x:2x2x1
jax: 0.10.0
libtpu: 0.0.40
codegen_flags: <defaults>
</compile_context>

<pallas_src>
import math
import functools

import jax
import jax.numpy as jnp
from jax import lax
from jax.experimental import pallas as pl
from jax.experimental.pallas import tpu as pltpu


def _layer_norm(v, g, b, eps=1e-6):
    # module uses nn.LayerNorm(..., eps=1e-06)
    mu = jnp.mean(v, axis=-1, keepdims=True)
    var = jnp.mean((v - mu) ** 2, axis=-1, keepdims=True)
    return (v - mu) * lax.rsqrt(var + eps) * g + b


def _gelu_exact(v):
    # nn.GELU() default: exact erf-based GELU
    return 0.5 * v * (1.0 + lax.erf(v / math.sqrt(2.0)))


def _vmem_capacity_bytes():
    try:
        info = pltpu.get_tpu_info()
        cap = getattr(info, "vmem_capacity_bytes", None)
        if cap:
            return int(cap)
    except Exception:
        pass
    return 64 * 2**20  # conservative default (v7x per-TensorCore VMEM)


# --------------------- prepass: LN1 + QKV projection -------------------------
def qkv_kernel(x_ref, ln1_g, ln1_b, wq, wk, wv, bq, bk, bv,
               q_ref, kt_ref, v_ref, *, n_head):
    H = n_head
    E = x_ref.shape[-1]
    Dh = E // H
    scale = 1.0 / math.sqrt(Dh)
    bf16 = jnp.bfloat16

    h1 = _layer_norm(x_ref[0], ln1_g[...], ln1_b[...]).astype(bf16)     # (Ts,E)
    q = (jnp.dot(h1, wq[...], preferred_element_type=jnp.float32)
         + bq[...]) * scale
    k = jnp.dot(h1, wk[...], preferred_element_type=jnp.float32) + bk[...]
    v = jnp.dot(h1, wv[...], preferred_element_type=jnp.float32) + bv[...]
    q = q.astype(bf16)
    k = k.astype(bf16)
    v = v.astype(bf16)
    # Per-head re-layout (once per token tile; keeps the flash inner loop free
    # of lane slicing and XLU transposes).
    for h in range(H):
        lo = h * Dh
        q_ref[0, h] = q[:, lo:lo + Dh]          # (Ts, Dh), pre-scaled
        kt_ref[0, h] = k[:, lo:lo + Dh].T       # (Dh, Ts)
        v_ref[0, h] = v[:, lo:lo + Dh]          # (Ts, Dh)


# ------------- flash attention + out-proj + residual + LN2 + MLP -------------
def attn_mlp_kernel(x_ref, q_ref, kt_ref, v_ref,
                    out_w, out_b, ln2_g, ln2_b,
                    fc1_w, fc1_b, fc2_w, fc2_b,
                    o_ref,
                    m_sc, l_sc, acc_sc,
                    *, n_head, mlp_chunk):
    ki = pl.program_id(2)
    nk = pl.num_programs(2)
    H = n_head
    Tq = x_ref.shape[1]
    E = x_ref.shape[2]
    residual_scale = 0.7
    bf16 = jnp.bfloat16

    # ---- init (first kv step of this (b, q-tile)) ---------------------------
    @pl.when(ki == 0)
    def _init():
        m_sc[...] = jnp.full(m_sc.shape, -jnp.inf, jnp.float32)
        l_sc[...] = jnp.zeros(l_sc.shape, jnp.float32)
        acc_sc[...] = jnp.zeros(acc_sc.shape, jnp.float32)

    # ---- online-softmax attention; per-head refs via leading-axis views -----
    for h in range(H):
        q_h = q_ref[0, h]        # (Tq, Dh)  bf16, pre-scaled
        kt_h = kt_ref[0, h]      # (Dh, Tkv) bf16  (pre-transposed)
        v_h = v_ref[0, h]        # (Tkv, Dh) bf16
        s = jnp.dot(q_h, kt_h, preferred_element_type=jnp.float32)   # (Tq,Tkv)
        m_prev = m_sc[h]                                              # (Tq, 1)
        m_new = jnp.maximum(m_prev, jnp.max(s, axis=-1, keepdims=True))
        alpha = jnp.exp(m_prev - m_new)
        p = jnp.exp(s - m_new)
        l_sc[h] = alpha * l_sc[h] + jnp.sum(p, axis=-1, keepdims=True)
        acc_sc[h] = alpha * acc_sc[h] + jnp.dot(
            p.astype(bf16), v_h, preferred_element_type=jnp.float32)
        m_sc[h] = m_new

    # ---- finalize: out-proj + residual, LN2 + chunked MLP + residual --------
    @pl.when(ki == nk - 1)
    def _finalize():
        # Output projection accumulated per head (no ctx relayout needed).
        attn = jnp.zeros((Tq, E), jnp.float32) + out_b[...]
        for h in range(H):
            ctx_h = (acc_sc[h] * pl.reciprocal(l_sc[h], approx=True)).astype(bf16)
            attn = attn + jnp.dot(ctx_h, out_w[h],
                                  preferred_element_type=jnp.float32)
        x1 = x_ref[0] + residual_scale * attn

        h2 = _layer_norm(x1, ln2_g[...], ln2_b[...]).astype(bf16)
        # MLP chunked over the hidden (4E) dimension.
        mlp = jnp.zeros((Tq, E), jnp.float32) + fc2_b[...]
        hidden = fc1_w.shape[-1]
        for c in range(0, hidden, mlp_chunk):
            m1 = (jnp.dot(h2, fc1_w[:, c:c + mlp_chunk],
                          preferred_element_type=jnp.float32)
                  + fc1_b[:, c:c + mlp_chunk])
            m1 = _gelu_exact(m1).astype(bf16)
            mlp = mlp + jnp.dot(m1, fc2_w[c:c + mlp_chunk, :],
                                preferred_element_type=jnp.float32)
        o_ref[0] = (x1 + residual_scale * mlp).astype(o_ref.dtype)


def block_forward(x, params, n_head, *, block_q=256, block_kv=256,
                  block_s=256, mlp_chunk=512):
    """x: (B, S, E) float32. params: PyTorch-layout weights (see init_params)."""
    B, S, E = x.shape
    H = n_head
    assert E % H == 0, "n_embd must divide n_head"
    Dh = E // H
    assert Dh % 8 == 0
    block_q = min(block_q, S)
    block_kv = min(block_kv, S)
    block_s = min(block_s, S)
    assert S % block_q == 0 and S % block_kv == 0 and S % block_s == 0
    nq, nk, ns = S // block_q, S // block_kv, S // block_s
    hidden = 4 * E
    mlp_chunk = min(mlp_chunk, hidden)
    assert hidden % mlp_chunk == 0

    f32, bf16 = jnp.float32, jnp.bfloat16
    # K-major weights (in_features, out_features), matmul weights in bf16,
    # biases / LN params in f32 (added after f32 accumulation).
    in_w_t = params['in_w'].T.astype(bf16)            # (E, 3E)
    wq, wk, wv = in_w_t[:, :E], in_w_t[:, E:2 * E], in_w_t[:, 2 * E:]
    in_b = params['in_b'].astype(f32)                 # (1, 3E)
    bq, bk, bv = in_b[:, :E], in_b[:, E:2 * E], in_b[:, 2 * E:]
    out_w_h = params['out_w'].T.reshape(H, Dh, E).astype(bf16)   # per-head
    fc1_w_t = params['fc1_w'].T.astype(bf16)          # (E, 4E)
    fc2_w_t = params['fc2_w'].T.astype(bf16)          # (4E, E)

    qkv_weights = [params['ln1_g'].astype(f32), params['ln1_b'].astype(f32),
                   wq, wk, wv, bq, bk, bv]
    blk_weights = [out_w_h, params['out_b'].astype(f32),
                   params['ln2_g'].astype(f32), params['ln2_b'].astype(f32),
                   fc1_w_t, params['fc1_b'].astype(f32),
                   fc2_w_t, params['fc2_b'].astype(f32)]

    def _const_spec(w):
        return pl.BlockSpec(w.shape, lambda *_, _nd=w.ndim: (0,) * _nd)

    def _nbytes(arrs):
        return sum(int(a.size) * a.dtype.itemsize for a in arrs)

    cap = _vmem_capacity_bytes()
    headroom = 8 << 20

    # ---------------- prepass call -------------------------------------------
    qkv_w_bytes = _nbytes(qkv_weights)
    pre_act = block_s * E * 4 + 3 * block_s * E * 2
    pre_need = 2 * pre_act + 2 * qkv_w_bytes + (4 << 20)
    vmem_pre = int(min(cap - headroom, max(32 << 20, pre_need)))

    q_hd, kt_hd, v_hd = pl.pallas_call(
        functools.partial(qkv_kernel, n_head=H),
        out_shape=(jax.ShapeDtypeStruct((B, H, S, Dh), bf16),
                   jax.ShapeDtypeStruct((B, H, Dh, S), bf16),
                   jax.ShapeDtypeStruct((B, H, S, Dh), bf16)),
        grid_spec=pltpu.PrefetchScalarGridSpec(
            num_scalar_prefetch=0,
            grid=(B, ns),
            in_specs=[pl.BlockSpec((1, block_s, E), lambda b, si: (b, si, 0))]
                     + [_const_spec(w) for w in qkv_weights],
            out_specs=[pl.BlockSpec((1, H, block_s, Dh),
                                    lambda b, si: (b, 0, si, 0)),
                       pl.BlockSpec((1, H, Dh, block_s),
                                    lambda b, si: (b, 0, 0, si)),
                       pl.BlockSpec((1, H, block_s, Dh),
                                    lambda b, si: (b, 0, si, 0))],
        ),
        compiler_params=pltpu.CompilerParams(
            dimension_semantics=("parallel", "parallel"),
            vmem_limit_bytes=vmem_pre),
        cost_estimate=pl.CostEstimate(
            flops=6 * B * S * E * E,
            transcendentals=B * S,
            bytes_accessed=B * S * E * 4 + 3 * B * S * E * 2 + qkv_w_bytes),
    )(x, *qkv_weights)

    # ---------------- flash attention + MLP call -----------------------------
    blk_w_bytes = _nbytes(blk_weights)
    blk_act = 2 * block_q * E * 4 + block_q * E * 2 + 2 * block_kv * E * 2
    blk_scratch = 2 * H * block_q * 128 * 4 + block_q * E * 4
    blk_need = 2 * blk_act + 2 * blk_w_bytes + blk_scratch + (4 << 20)
    vmem_blk = int(min(cap - headroom, max(32 << 20, blk_need)))

    flops = 4 * B * S * S * E + 18 * B * S * E * E
    transcendentals = B * H * S * S + 4 * B * S * E
    bytes_accessed = (2 * B * S * E * 4 + B * S * E * 2
                      + 2 * nq * B * S * E * 2 + blk_w_bytes)

    out = pl.pallas_call(
        functools.partial(attn_mlp_kernel, n_head=H, mlp_chunk=mlp_chunk),
        out_shape=jax.ShapeDtypeStruct((B, S, E), x.dtype),
        grid_spec=pltpu.PrefetchScalarGridSpec(
            num_scalar_prefetch=0,
            grid=(B, nq, nk),
            in_specs=[pl.BlockSpec((1, block_q, E),
                                   lambda b, qi, ki: (b, qi, 0)),
                      pl.BlockSpec((1, H, block_q, Dh),
                                   lambda b, qi, ki: (b, 0, qi, 0)),
                      pl.BlockSpec((1, H, Dh, block_kv),
                                   lambda b, qi, ki: (b, 0, 0, ki)),
                      pl.BlockSpec((1, H, block_kv, Dh),
                                   lambda b, qi, ki: (b, 0, ki, 0))]
                     + [_const_spec(w) for w in blk_weights],
            out_specs=pl.BlockSpec((1, block_q, E),
                                   lambda b, qi, ki: (b, qi, 0)),
            scratch_shapes=[
                pltpu.VMEM((H, block_q, 1), f32),    # running max m
                pltpu.VMEM((H, block_q, 1), f32),    # running denom l
                pltpu.VMEM((H, block_q, Dh), f32),   # per-head attention acc
            ],
        ),
        compiler_params=pltpu.CompilerParams(
            dimension_semantics=("parallel", "parallel", "arbitrary"),
            vmem_limit_bytes=vmem_blk),
        cost_estimate=pl.CostEstimate(
            flops=flops, transcendentals=transcendentals,
            bytes_accessed=bytes_accessed),
    )(x, q_hd, kt_hd, v_hd, *blk_weights)
    return out


def init_params(key, n_embd):
    E = n_embd
    ks = jax.random.split(key, 6)
    scale = 0.02
    # PyTorch-style (out_features, in_features) layout; biases as (1, N).
    return {
        'ln1_g': jnp.ones((1, E), jnp.float32),
        'ln1_b': jnp.zeros((1, E), jnp.float32),
        'in_w': scale * jax.random.normal(ks[0], (3 * E, E), jnp.float32),
        'in_b': scale * jax.random.normal(ks[1], (1, 3 * E), jnp.float32),
        'out_w': scale * jax.random.normal(ks[2], (E, E), jnp.float32),
        'out_b': jnp.zeros((1, E), jnp.float32),
        'ln2_g': jnp.ones((1, E), jnp.float32),
        'ln2_b': jnp.zeros((1, E), jnp.float32),
        'fc1_w': scale * jax.random.normal(ks[3], (4 * E, E), jnp.float32),
        'fc1_b': scale * jax.random.normal(ks[4], (1, 4 * E), jnp.float32),
        'fc2_w': scale * jax.random.normal(ks[5], (E, 4 * E), jnp.float32),
        'fc2_b': jnp.zeros((1, E), jnp.float32),
    }


def block_reference(x, params, n_head):
    """Pure-JAX f32 reference of the PyTorch Block forward (dropout = identity)."""
    B, S, E = x.shape
    H = n_head
    Dh = E // H

    def ln(v, g, b):
        mu = v.mean(-1, keepdims=True)
        var = ((v - mu) ** 2).mean(-1, keepdims=True)
        return (v - mu) * lax.rsqrt(var + 1e-6) * g + b

    h = ln(x, params['ln1_g'][0], params['ln1_b'][0])
    qkv = h @ params['in_w'].T + params['in_b'][0]
    q, k, v = qkv[..., :E], qkv[..., E:2 * E], qkv[..., 2 * E:]
    qh = q.reshape(B, S, H, Dh).transpose(0, 2, 1, 3)
    kh = k.reshape(B, S, H, Dh).transpose(0, 2, 1, 3)
    vh = v.reshape(B, S, H, Dh).transpose(0, 2, 1, 3)
    s = jnp.einsum('bhqd,bhkd->bhqk', qh, kh) / math.sqrt(Dh)
    p = jax.nn.softmax(s, axis=-1)
    ctx = jnp.einsum('bhqk,bhkd->bhqd', p, vh).transpose(0, 2, 1, 3).reshape(B, S, E)
    attn = ctx @ params['out_w'].T + params['out_b'][0]
    x = x + 0.7 * attn
    h2 = ln(x, params['ln2_g'][0], params['ln2_b'][0])
    m = h2 @ params['fc1_w'].T + params['fc1_b'][0]
    m = 0.5 * m * (1.0 + lax.erf(m / math.sqrt(2.0)))
    m = m @ params['fc2_w'].T + params['fc2_b'][0]
    return x + 0.7 * m


if __name__ == "__main__":
    # Shapes matching GPTConfig: n_embd=512, n_head=8, seq = block_size = 256.
    B, S, E, H = 2, 256, 512, 8
    key = jax.random.PRNGKey(0)
    k_x, k_p = jax.random.split(key)
    x = jax.random.normal(k_x, (B, S, E), jnp.float32)
    params = init_params(k_p, E)

    ref = jax.block_until_ready(block_reference(x, params, H))

    # Default 256 tiles (single kv step) and 128 tiles (multi-step online
    # softmax + multi q-tile) — both must match the f32 reference.
    for bq_, bkv_ in ((256, 256), (128, 128)):
        out = jax.block_until_ready(
            block_forward(x, params, n_head=H, block_q=bq_, block_kv=bkv_))
        assert out.shape == (B, S, E) and out.dtype == jnp.float32
        assert bool(jnp.all(jnp.isfinite(out)))
        max_err = float(jnp.max(jnp.abs(out - ref)))
        assert max_err < 0.1, (
            f"max abs error vs reference too large: {max_err} "
            f"(tiles {bq_}x{bkv_})")
    print("KERNEL_OK")
</pallas_src>

<mosaic_0001>
module attributes {stable_mosaic.version = 11 : i64} {
  func.func @qkv_kernel(%arg0: i32, %arg1: i32, %arg2: memref<1x256x512xf32, #tpu.memory_space<vmem>>, %arg3: memref<1x512xf32, #tpu.memory_space<vmem>>, %arg4: memref<1x512xf32, #tpu.memory_space<vmem>>, %arg5: memref<512x512xbf16, #tpu.memory_space<vmem>>, %arg6: memref<512x512xbf16, #tpu.memory_space<vmem>>, %arg7: memref<512x512xbf16, #tpu.memory_space<vmem>>, %arg8: memref<1x512xf32, #tpu.memory_space<vmem>>, %arg9: memref<1x512xf32, #tpu.memory_space<vmem>>, %arg10: memref<1x512xf32, #tpu.memory_space<vmem>>, %arg11: memref<1x8x256x64xbf16, #tpu.memory_space<vmem>>, %arg12: memref<1x8x64x256xbf16, #tpu.memory_space<vmem>>, %arg13: memref<1x8x256x64xbf16, #tpu.memory_space<vmem>>) attributes {dimension_semantics = [#tpu.dimension_semantics<parallel>, #tpu.dimension_semantics<parallel>], iteration_bounds = array<i64: 2, 1>, scalar_prefetch = 0 : i64, scratch_operands = 0 : i64, tpu.core_type = #tpu.core_type<tc>, window_params = [{transform_indices = @transform_0, window_bounds = array<i64: 1, 256, 512>}, {pipeline_mode = #tpu.pipeline_mode<synchronous>, transform_indices = @transform_1, window_bounds = array<i64: 1, 512>}, {pipeline_mode = #tpu.pipeline_mode<synchronous>, transform_indices = @transform_2, window_bounds = array<i64: 1, 512>}, {pipeline_mode = #tpu.pipeline_mode<synchronous>, transform_indices = @transform_3, window_bounds = array<i64: 512, 512>}, {pipeline_mode = #tpu.pipeline_mode<synchronous>, transform_indices = @transform_4, window_bounds = array<i64: 512, 512>}, {pipeline_mode = #tpu.pipeline_mode<synchronous>, transform_indices = @transform_5, window_bounds = array<i64: 512, 512>}, {pipeline_mode = #tpu.pipeline_mode<synchronous>, transform_indices = @transform_6, window_bounds = array<i64: 1, 512>}, {pipeline_mode = #tpu.pipeline_mode<synchronous>, transform_indices = @transform_7, window_bounds = array<i64: 1, 512>}, {pipeline_mode = #tpu.pipeline_mode<synchronous>, transform_indices = @transform_8, window_bounds = array<i64: 1, 512>}, {transform_indices = @transform_9, window_bounds = array<i64: 1, 8, 256, 64>}, {transform_indices = @transform_10, window_bounds = array<i64: 1, 8, 64, 256>}, {transform_indices = @transform_11, window_bounds = array<i64: 1, 8, 256, 64>}]} {
    %c0 = arith.constant 0 : index
    %c0_0 = arith.constant 0 : index
    %c0_1 = arith.constant 0 : index
    %0 = vector.load %arg2[%c0, %c0_0, %c0_1] : memref<1x256x512xf32, #tpu.memory_space<vmem>>, vector<1x256x512xf32>
    %1 = vector.shape_cast %0 : vector<1x256x512xf32> to vector<256x512xf32>
    %c0_2 = arith.constant 0 : index
    %c0_3 = arith.constant 0 : index
    %2 = vector.load %arg3[%c0_2, %c0_3] : memref<1x512xf32, #tpu.memory_space<vmem>>, vector<1x512xf32>
    %c0_4 = arith.constant 0 : index
    %c0_5 = arith.constant 0 : index
    %3 = vector.load %arg4[%c0_4, %c0_5] : memref<1x512xf32, #tpu.memory_space<vmem>>, vector<1x512xf32>
    %cst = arith.constant dense<0.000000e+00> : vector<256xf32>
    %4 = vector.multi_reduction <add>, %1, %cst [1] : vector<256x512xf32> to vector<256xf32>
    %5 = vector.shape_cast %4 : vector<256xf32> to vector<256x1xf32>
    %cst_6 = arith.constant 5.120000e+02 : f32
    %6 = vector.broadcast %cst_6 : f32 to vector<256x1xf32>
    %7 = arith.divf %5, %6 : vector<256x1xf32>
    %8 = vector.broadcast %7 : vector<256x1xf32> to vector<256x512xf32>
    %9 = arith.subf %1, %8 : vector<256x512xf32>
    %10 = arith.mulf %9, %9 : vector<256x512xf32>
    %cst_7 = arith.constant dense<0.000000e+00> : vector<256xf32>
    %11 = vector.multi_reduction <add>, %10, %cst_7 [1] : vector<256x512xf32> to vector<256xf32>
    %12 = vector.shape_cast %11 : vector<256xf32> to vector<256x1xf32>
    %cst_8 = arith.constant 5.120000e+02 : f32
    %13 = vector.broadcast %cst_8 : f32 to vector<256x1xf32>
    %14 = arith.divf %12, %13 : vector<256x1xf32>
    %15 = vector.broadcast %7 : vector<256x1xf32> to vector<256x512xf32>
    %16 = arith.subf %1, %15 : vector<256x512xf32>
    %cst_9 = arith.constant 9.99999997E-7 : f32
    %17 = vector.broadcast %cst_9 : f32 to vector<256x1xf32>
    %18 = arith.addf %14, %17 : vector<256x1xf32>
    %19 = math.rsqrt %18 : vector<256x1xf32>
    %20 = vector.broadcast %19 : vector<256x1xf32> to vector<256x512xf32>
    %21 = arith.mulf %16, %20 : vector<256x512xf32>
    %22 = vector.broadcast %2 : vector<1x512xf32> to vector<256x512xf32>
    %23 = arith.mulf %21, %22 : vector<256x512xf32>
    %24 = vector.broadcast %3 : vector<1x512xf32> to vector<256x512xf32>
    %25 = arith.addf %23, %24 : vector<256x512xf32>
    %26 = arith.truncf %25 : vector<256x512xf32> to vector<256x512xbf16>
    %c0_10 = arith.constant 0 : index
    %c0_11 = arith.constant 0 : index
    %27 = vector.load %arg5[%c0_10, %c0_11] : memref<512x512xbf16, #tpu.memory_space<vmem>>, vector<512x512xbf16>
    %cst_12 = arith.constant dense<0.000000e+00> : vector<256x512xf32>
    %28 = tpu.matmul %26, %27, %cst_12 {dimension_numbers = #tpu.dot_dimension_numbers<[1], [0], [0], [1], [0, 0, 1, 1], [], []>} : vector<256x512xbf16>, vector<512x512xbf16>, vector<256x512xf32> -> vector<256x512xf32>
    %c0_13 = arith.constant 0 : index
    %c0_14 = arith.constant 0 : index
    %29 = vector.load %arg8[%c0_13, %c0_14] : memref<1x512xf32, #tpu.memory_space<vmem>>, vector<1x512xf32>
    %30 = vector.broadcast %29 : vector<1x512xf32> to vector<256x512xf32>
    %31 = arith.addf %28, %30 : vector<256x512xf32>
    %cst_15 = arith.constant 1.250000e-01 : f32
    %32 = vector.broadcast %cst_15 : f32 to vector<256x512xf32>
    %33 = arith.mulf %31, %32 : vector<256x512xf32>
    %c0_16 = arith.constant 0 : index
    %c0_17 = arith.constant 0 : index
    %34 = vector.load %arg6[%c0_16, %c0_17] : memref<512x512xbf16, #tpu.memory_space<vmem>>, vector<512x512xbf16>
    %cst_18 = arith.constant dense<0.000000e+00> : vector<256x512xf32>
    %35 = tpu.matmul %26, %34, %cst_18 {dimension_numbers = #tpu.dot_dimension_numbers<[1], [0], [0], [1], [0, 0, 1, 1], [], []>} : vector<256x512xbf16>, vector<512x512xbf16>, vector<256x512xf32> -> vector<256x512xf32>
    %c0_19 = arith.constant 0 : index
    %c0_20 = arith.constant 0 : index
    %36 = vector.load %arg9[%c0_19, %c0_20] : memref<1x512xf32, #tpu.memory_space<vmem>>, vector<1x512xf32>
    %37 = vector.broadcast %36 : vector<1x512xf32> to vector<256x512xf32>
    %38 = arith.addf %35, %37 : vector<256x512xf32>
    %c0_21 = arith.constant 0 : index
    %c0_22 = arith.constant 0 : index
    %39 = vector.load %arg7[%c0_21, %c0_22] : memref<512x512xbf16, #tpu.memory_space<vmem>>, vector<512x512xbf16>
    %cst_23 = arith.constant dense<0.000000e+00> : vector<256x512xf32>
    %40 = tpu.matmul %26, %39, %cst_23 {dimension_numbers = #tpu.dot_dimension_numbers<[1], [0], [0], [1], [0, 0, 1, 1], [], []>} : vector<256x512xbf16>, vector<512x512xbf16>, vector<256x512xf32> -> vector<256x512xf32>
    %c0_24 = arith.constant 0 : index
    %c0_25 = arith.constant 0 : index
    %41 = vector.load %arg10[%c0_24, %c0_25] : memref<1x512xf32, #tpu.memory_space<vmem>>, vector<1x512xf32>
    %42 = vector.broadcast %41 : vector<1x512xf32> to vector<256x512xf32>
    %43 = arith.addf %40, %42 : vector<256x512xf32>
    %44 = arith.truncf %33 : vector<256x512xf32> to vector<256x512xbf16>
    %45 = arith.truncf %38 : vector<256x512xf32> to vector<256x512xbf16>
    %46 = arith.truncf %43 : vector<256x512xf32> to vector<256x512xbf16>
    %47 = vector.extract_strided_slice %44 {offsets = [0, 0], sizes = [256, 64], strides = [1, 1]} : vector<256x512xbf16> to vector<256x64xbf16>
    %c0_26 = arith.constant 0 : index
    %c0_27 = arith.constant 0 : index
    %c0_28 = arith.constant 0 : index
    %c0_29 = arith.constant 0 : index
    %48 = vector.load %arg11[%c0_26, %c0_27, %c0_28, %c0_29] : memref<1x8x256x64xbf16, #tpu.memory_space<vmem>>, vector<1x1x256x64xbf16>
    %49 = vector.shape_cast %48 : vector<1x1x256x64xbf16> to vector<256x64xbf16>
    %50 = vector.shape_cast %47 : vector<256x64xbf16> to vector<1x1x256x64xbf16>
    tpu.vector_store %arg11[%c0_26, %c0_27, %c0_28, %c0_29], %50 {strides = array<i32>} : memref<1x8x256x64xbf16, #tpu.memory_space<vmem>>, vector<1x1x256x64xbf16>,
    %51 = vector.extract_strided_slice %45 {offsets = [0, 0], sizes = [256, 64], strides = [1, 1]} : vector<256x512xbf16> to vector<256x64xbf16>
    %52 = tpu.transpose %51, [1, 0] : vector<256x64xbf16> -> vector<64x256xbf16>
    %c0_30 = arith.constant 0 : index
    %c0_31 = arith.constant 0 : index
    %c0_32 = arith.constant 0 : index
    %c0_33 = arith.constant 0 : index
    %53 = vector.load %arg12[%c0_30, %c0_31, %c0_32, %c0_33] : memref<1x8x64x256xbf16, #tpu.memory_space<vmem>>, vector<1x1x64x256xbf16>
    %54 = vector.shape_cast %53 : vector<1x1x64x256xbf16> to vector<64x256xbf16>
    %55 = vector.shape_cast %52 : vector<64x256xbf16> to vector<1x1x64x256xbf16>
    tpu.vector_store %arg12[%c0_30, %c0_31, %c0_32, %c0_33], %55 {strides = array<i32>} : memref<1x8x64x256xbf16, #tpu.memory_space<vmem>>, vector<1x1x64x256xbf16>,
    %56 = vector.extract_strided_slice %46 {offsets = [0, 0], sizes = [256, 64], strides = [1, 1]} : vector<256x512xbf16> to vector<256x64xbf16>
    %c0_34 = arith.constant 0 : index
    %c0_35 = arith.constant 0 : index
    %c0_36 = arith.constant 0 : index
    %c0_37 = arith.constant 0 : index
    %57 = vector.load %arg13[%c0_34, %c0_35, %c0_36, %c0_37] : memref<1x8x256x64xbf16, #tpu.memory_space<vmem>>, vector<1x1x256x64xbf16>
    %58 = vector.shape_cast %57 : vector<1x1x256x64xbf16> to vector<256x64xbf16>
    %59 = vector.shape_cast %56 : vector<256x64xbf16> to vector<1x1x256x64xbf16>
    tpu.vector_store %arg13[%c0_34, %c0_35, %c0_36, %c0_37], %59 {strides = array<i32>} : memref<1x8x256x64xbf16, #tpu.memory_space<vmem>>, vector<1x1x256x64xbf16>,
    %60 = vector.extract_strided_slice %44 {offsets = [0, 64], sizes = [256, 64], strides = [1, 1]} : vector<256x512xbf16> to vector<256x64xbf16>
    %c0_38 = arith.constant 0 : index
    %c1 = arith.constant 1 : index
    %c0_39 = arith.constant 0 : index
    %c0_40 = arith.constant 0 : index
    %61 = vector.load %arg11[%c0_38, %c1, %c0_39, %c0_40] : memref<1x8x256x64xbf16, #tpu.memory_space<vmem>>, vector<1x1x256x64xbf16>
    %62 = vector.shape_cast %61 : vector<1x1x256x64xbf16> to vector<256x64xbf16>
    %63 = vector.shape_cast %60 : vector<256x64xbf16> to vector<1x1x256x64xbf16>
    tpu.vector_store %arg11[%c0_38, %c1, %c0_39, %c0_40], %63 {strides = array<i32>} : memref<1x8x256x64xbf16, #tpu.memory_space<vmem>>, vector<1x1x256x64xbf16>,
    %64 = vector.extract_strided_slice %45 {offsets = [0, 64], sizes = [256, 64], strides = [1, 1]} : vector<256x512xbf16> to vector<256x64xbf16>
    %65 = tpu.transpose %64, [1, 0] : vector<256x64xbf16> -> vector<64x256xbf16>
    %c0_41 = arith.constant 0 : index
    %c1_42 = arith.constant 1 : index
    %c0_43 = arith.constant 0 : index
    %c0_44 = arith.constant 0 : index
    %66 = vector.load %arg12[%c0_41, %c1_42, %c0_43, %c0_44] : memref<1x8x64x256xbf16, #tpu.memory_space<vmem>>, vector<1x1x64x256xbf16>
    %67 = vector.shape_cast %66 : vector<1x1x64x256xbf16> to vector<64x256xbf16>
    %68 = vector.shape_cast %65 : vector<64x256xbf16> to vector<1x1x64x256xbf16>
    tpu.vector_store %arg12[%c0_41, %c1_42, %c0_43, %c0_44], %68 {strides = array<i32>} : memref<1x8x64x256xbf16, #tpu.memory_space<vmem>>, vector<1x1x64x256xbf16>,
    %69 = vector.extract_strided_slice %46 {offsets = [0, 64], sizes = [256, 64], strides = [1, 1]} : vector<256x512xbf16> to vector<256x64xbf16>
    %c0_45 = arith.constant 0 : index
    %c1_46 = arith.constant 1 : index
    %c0_47 = arith.constant 0 : index
    %c0_48 = arith.constant 0 : index
    %70 = vector.load %arg13[%c0_45, %c1_46, %c0_47, %c0_48] : memref<1x8x256x64xbf16, #tpu.memory_space<vmem>>, vector<1x1x256x64xbf16>
    %71 = vector.shape_cast %70 : vector<1x1x256x64xbf16> to vector<256x64xbf16>
    %72 = vector.shape_cast %69 : vector<256x64xbf16> to vector<1x1x256x64xbf16>
    tpu.vector_store %arg13[%c0_45, %c1_46, %c0_47, %c0_48], %72 {strides = array<i32>} : memref<1x8x256x64xbf16, #tpu.memory_space<vmem>>, vector<1x1x256x64xbf16>,
    %73 = vector.extract_strided_slice %44 {offsets = [0, 128], sizes = [256, 64], strides = [1, 1]} : vector<256x512xbf16> to vector<256x64xbf16>
    %c0_49 = arith.constant 0 : index
    %c2 = arith.constant 2 : index
    %c0_50 = arith.constant 0 : index
    %c0_51 = arith.constant 0 : index
    %74 = vector.load %arg11[%c0_49, %c2, %c0_50, %c0_51] : memref<1x8x256x64xbf16, #tpu.memory_space<vmem>>, vector<1x1x256x64xbf16>
    %75 = vector.shape_cast %74 : vector<1x1x256x64xbf16> to vector<256x64xbf16>
    %76 = vector.shape_cast %73 : vector<256x64xbf16> to vector<1x1x256x64xbf16>
    tpu.vector_store %arg11[%c0_49, %c2, %c0_50, %c0_51], %76 {strides = array<i32>} : memref<1x8x256x64xbf16, #tpu.memory_space<vmem>>, vector<1x1x256x64xbf16>,
    %77 = vector.extract_strided_slice %45 {offsets = [0, 128], sizes = [256, 64], strides = [1, 1]} : vector<256x512xbf16> to vector<256x64xbf16>
    %78 = tpu.transpose %77, [1, 0] : vector<256x64xbf16> -> vector<64x256xbf16>
    %c0_52 = arith.constant 0 : index
    %c2_53 = arith.constant 2 : index
    %c0_54 = arith.constant 0 : index
    %c0_55 = arith.constant 0 : index
    %79 = vector.load %arg12[%c0_52, %c2_53, %c0_54, %c0_55] : memref<1x8x64x256xbf16, #tpu.memory_space<vmem>>, vector<1x1x64x256xbf16>
    %80 = vector.shape_cast %79 : vector<1x1x64x256xbf16> to vector<64x256xbf16>
    %81 = vector.shape_cast %78 : vector<64x256xbf16> to vector<1x1x64x256xbf16>
    tpu.vector_store %arg12[%c0_52, %c2_53, %c0_54, %c0_55], %81 {strides = array<i32>} : memref<1x8x64x256xbf16, #tpu.memory_space<vmem>>, vector<1x1x64x256xbf16>,
    %82 = vector.extract_strided_slice %46 {offsets = [0, 128], sizes = [256, 64], strides = [1, 1]} : vector<256x512xbf16> to vector<256x64xbf16>
    %c0_56 = arith.constant 0 : index
    %c2_57 = arith.constant 2 : index
    %c0_58 = arith.constant 0 : index
    %c0_59 = arith.constant 0 : index
    %83 = vector.load %arg13[%c0_56, %c2_57, %c0_58, %c0_59] : memref<1x8x256x64xbf16, #tpu.memory_space<vmem>>, vector<1x1x256x64xbf16>
    %84 = vector.shape_cast %83 : vector<1x1x256x64xbf16> to vector<256x64xbf16>
    %85 = vector.shape_cast %82 : vector<256x64xbf16> to vector<1x1x256x64xbf16>
    tpu.vector_store %arg13[%c0_56, %c2_57, %c0_58, %c0_59], %85 {strides = array<i32>} : memref<1x8x256x64xbf16, #tpu.memory_space<vmem>>, vector<1x1x256x64xbf16>,
    %86 = vector.extract_strided_slice %44 {offsets = [0, 192], sizes = [256, 64], strides = [1, 1]} : vector<256x512xbf16> to vector<256x64xbf16>
    %c0_60 = arith.constant 0 : index
    %c3 = arith.constant 3 : index
    %c0_61 = arith.constant 0 : index
    %c0_62 = arith.constant 0 : index
    %87 = vector.load %arg11[%c0_60, %c3, %c0_61, %c0_62] : memref<1x8x256x64xbf16, #tpu.memory_space<vmem>>, vector<1x1x256x64xbf16>
    %88 = vector.shape_cast %87 : vector<1x1x256x64xbf16> to vector<256x64xbf16>
    %89 = vector.shape_cast %86 : vector<256x64xbf16> to vector<1x1x256x64xbf16>
    tpu.vector_store %arg11[%c0_60, %c3, %c0_61, %c0_62], %89 {strides = array<i32>} : memref<1x8x256x64xbf16, #tpu.memory_space<vmem>>, vector<1x1x256x64xbf16>,
    %90 = vector.extract_strided_slice %45 {offsets = [0, 192], sizes = [256, 64], strides = [1, 1]} : vector<256x512xbf16> to vector<256x64xbf16>
    %91 = tpu.transpose %90, [1, 0] : vector<256x64xbf16> -> vector<64x256xbf16>
    %c0_63 = arith.constant 0 : index
    %c3_64 = arith.constant 3 : index
    %c0_65 = arith.constant 0 : index
    %c0_66 = arith.constant 0 : index
    %92 = vector.load %arg12[%c0_63, %c3_64, %c0_65, %c0_66] : memref<1x8x64x256xbf16, #tpu.memory_space<vmem>>, vector<1x1x64x256xbf16>
    %93 = vector.shape_cast %92 : vector<1x1x64x256xbf16> to vector<64x256xbf16>
    %94 = vector.shape_cast %91 : vector<64x256xbf16> to vector<1x1x64x256xbf16>
    tpu.vector_store %arg12[%c0_63, %c3_64, %c0_65, %c0_66], %94 {strides = array<i32>} : memref<1x8x64x256xbf16, #tpu.memory_space<vmem>>, vector<1x1x64x256xbf16>,
    %95 = vector.extract_strided_slice %46 {offsets = [0, 192], sizes = [256, 64], strides = [1, 1]} : vector<256x512xbf16> to vector<256x64xbf16>
    %c0_67 = arith.constant 0 : index
    %c3_68 = arith.constant 3 : index
    %c0_69 = arith.constant 0 : index
    %c0_70 = arith.constant 0 : index
    %96 = vector.load %arg13[%c0_67, %c3_68, %c0_69, %c0_70] : memref<1x8x256x64xbf16, #tpu.memory_space<vmem>>, vector<1x1x256x64xbf16>
    %97 = vector.shape_cast %96 : vector<1x1x256x64xbf16> to vector<256x64xbf16>
    %98 = vector.shape_cast %95 : vector<256x64xbf16> to vector<1x1x256x64xbf16>
    tpu.vector_store %arg13[%c0_67, %c3_68, %c0_69, %c0_70], %98 {strides = array<i32>} : memref<1x8x256x64xbf16, #tpu.memory_space<vmem>>, vector<1x1x256x64xbf16>,
    %99 = vector.extract_strided_slice %44 {offsets = [0, 256], sizes = [256, 64], strides = [1, 1]} : vector<256x512xbf16> to vector<256x64xbf16>
    %c0_71 = arith.constant 0 : index
    %c4 = arith.constant 4 : index
    %c0_72 = arith.constant 0 : index
    %c0_73 = arith.constant 0 : index
    %100 = vector.load %arg11[%c0_71, %c4, %c0_72, %c0_73] : memref<1x8x256x64xbf16, #tpu.memory_space<vmem>>, vector<1x1x256x64xbf16>
    %101 = vector.shape_cast %100 : vector<1x1x256x64xbf16> to vector<256x64xbf16>
    %102 = vector.shape_cast %99 : vector<256x64xbf16> to vector<1x1x256x64xbf16>
    tpu.vector_store %arg11[%c0_71, %c4, %c0_72, %c0_73], %102 {strides = array<i32>} : memref<1x8x256x64xbf16, #tpu.memory_space<vmem>>, vector<1x1x256x64xbf16>,
    %103 = vector.extract_strided_slice %45 {offsets = [0, 256], sizes = [256, 64], strides = [1, 1]} : vector<256x512xbf16> to vector<256x64xbf16>
    %104 = tpu.transpose %103, [1, 0] : vector<256x64xbf16> -> vector<64x256xbf16>
    %c0_74 = arith.constant 0 : index
    %c4_75 = arith.constant 4 : index
    %c0_76 = arith.constant 0 : index
    %c0_77 = arith.constant 0 : index
    %105 = vector.load %arg12[%c0_74, %c4_75, %c0_76, %c0_77] : memref<1x8x64x256xbf16, #tpu.memory_space<vmem>>, vector<1x1x64x256xbf16>
    %106 = vector.shape_cast %105 : vector<1x1x64x256xbf16> to vector<64x256xbf16>
    %107 = vector.shape_cast %104 : vector<64x256xbf16> to vector<1x1x64x256xbf16>
    tpu.vector_store %arg12[%c0_74, %c4_75, %c0_76, %c0_77], %107 {strides = array<i32>} : memref<1x8x64x256xbf16, #tpu.memory_space<vmem>>, vector<1x1x64x256xbf16>,
    %108 = vector.extract_strided_slice %46 {offsets = [0, 256], sizes = [256, 64], strides = [1, 1]} : vector<256x512xbf16> to vector<256x64xbf16>
    %c0_78 = arith.constant 0 : index
    %c4_79 = arith.constant 4 : index
    %c0_80 = arith.constant 0 : index
    %c0_81 = arith.constant 0 : index
    %109 = vector.load %arg13[%c0_78, %c4_79, %c0_80, %c0_81] : memref<1x8x256x64xbf16, #tpu.memory_space<vmem>>, vector<1x1x256x64xbf16>
    %110 = vector.shape_cast %109 : vector<1x1x256x64xbf16> to vector<256x64xbf16>
    %111 = vector.shape_cast %108 : vector<256x64xbf16> to vector<1x1x256x64xbf16>
    tpu.vector_store %arg13[%c0_78, %c4_79, %c0_80, %c0_81], %111 {strides = array<i32>} : memref<1x8x256x64xbf16, #tpu.memory_space<vmem>>, vector<1x1x256x64xbf16>,
    %112 = vector.extract_strided_slice %44 {offsets = [0, 320], sizes = [256, 64], strides = [1, 1]} : vector<256x512xbf16> to vector<256x64xbf16>
    %c0_82 = arith.constant 0 : index
    %c5 = arith.constant 5 : index
    %c0_83 = arith.constant 0 : index
    %c0_84 = arith.constant 0 : index
    %113 = vector.load %arg11[%c0_82, %c5, %c0_83, %c0_84] : memref<1x8x256x64xbf16, #tpu.memory_space<vmem>>, vector<1x1x256x64xbf16>
    %114 = vector.shape_cast %113 : vector<1x1x256x64xbf16> to vector<256x64xbf16>
    %115 = vector.shape_cast %112 : vector<256x64xbf16> to vector<1x1x256x64xbf16>
    tpu.vector_store %arg11[%c0_82, %c5, %c0_83, %c0_84], %115 {strides = array<i32>} : memref<1x8x256x64xbf16, #tpu.memory_space<vmem>>, vector<1x1x256x64xbf16>,
    %116 = vector.extract_strided_slice %45 {offsets = [0, 320], sizes = [256, 64], strides = [1, 1]} : vector<256x512xbf16> to vector<256x64xbf16>
    %117 = tpu.transpose %116, [1, 0] : vector<256x64xbf16> -> vector<64x256xbf16>
    %c0_85 = arith.constant 0 : index
    %c5_86 = arith.constant 5 : index
    %c0_87 = arith.constant 0 : index
    %c0_88 = arith.constant 0 : index
    %118 = vector.load %arg12[%c0_85, %c5_86, %c0_87, %c0_88] : memref<1x8x64x256xbf16, #tpu.memory_space<vmem>>, vector<1x1x64x256xbf16>
    %119 = vector.shape_cast %118 : vector<1x1x64x256xbf16> to vector<64x256xbf16>
    %120 = vector.shape_cast %117 : vector<64x256xbf16> to vector<1x1x64x256xbf16>
    tpu.vector_store %arg12[%c0_85, %c5_86, %c0_87, %c0_88], %120 {strides = array<i32>} : memref<1x8x64x256xbf16, #tpu.memory_space<vmem>>, vector<1x1x64x256xbf16>,
    %121 = vector.extract_strided_slice %46 {offsets = [0, 320], sizes = [256, 64], strides = [1, 1]} : vector<256x512xbf16> to vector<256x64xbf16>
    %c0_89 = arith.constant 0 : index
    %c5_90 = arith.constant 5 : index
    %c0_91 = arith.constant 0 : index
    %c0_92 = arith.constant 0 : index
    %122 = vector.load %arg13[%c0_89, %c5_90, %c0_91, %c0_92] : memref<1x8x256x64xbf16, #tpu.memory_space<vmem>>, vector<1x1x256x64xbf16>
    %123 = vector.shape_cast %122 : vector<1x1x256x64xbf16> to vector<256x64xbf16>
    %124 = vector.shape_cast %121 : vector<256x64xbf16> to vector<1x1x256x64xbf16>
    tpu.vector_store %arg13[%c0_89, %c5_90, %c0_91, %c0_92], %124 {strides = array<i32>} : memref<1x8x256x64xbf16, #tpu.memory_space<vmem>>, vector<1x1x256x64xbf16>,
    %125 = vector.extract_strided_slice %44 {offsets = [0, 384], sizes = [256, 64], strides = [1, 1]} : vector<256x512xbf16> to vector<256x64xbf16>
    %c0_93 = arith.constant 0 : index
    %c6 = arith.constant 6 : index
    %c0_94 = arith.constant 0 : index
    %c0_95 = arith.constant 0 : index
    %126 = vector.load %arg11[%c0_93, %c6, %c0_94, %c0_95] : memref<1x8x256x64xbf16, #tpu.memory_space<vmem>>, vector<1x1x256x64xbf16>
    %127 = vector.shape_cast %126 : vector<1x1x256x64xbf16> to vector<256x64xbf16>
    %128 = vector.shape_cast %125 : vector<256x64xbf16> to vector<1x1x256x64xbf16>
    tpu.vector_store %arg11[%c0_93, %c6, %c0_94, %c0_95], %128 {strides = array<i32>} : memref<1x8x256x64xbf16, #tpu.memory_space<vmem>>, vector<1x1x256x64xbf16>,
    %129 = vector.extract_strided_slice %45 {offsets = [0, 384], sizes = [256, 64], strides = [1, 1]} : vector<256x512xbf16> to vector<256x64xbf16>
    %130 = tpu.transpose %129, [1, 0] : vector<256x64xbf16> -> vector<64x256xbf16>
    %c0_96 = arith.constant 0 : index
    %c6_97 = arith.constant 6 : index
    %c0_98 = arith.constant 0 : index
    %c0_99 = arith.constant 0 : index
    %131 = vector.load %arg12[%c0_96, %c6_97, %c0_98, %c0_99] : memref<1x8x64x256xbf16, #tpu.memory_space<vmem>>, vector<1x1x64x256xbf16>
    %132 = vector.shape_cast %131 : vector<1x1x64x256xbf16> to vector<64x256xbf16>
    %133 = vector.shape_cast %130 : vector<64x256xbf16> to vector<1x1x64x256xbf16>
    tpu.vector_store %arg12[%c0_96, %c6_97, %c0_98, %c0_99], %133 {strides = array<i32>} : memref<1x8x64x256xbf16, #tpu.memory_space<vmem>>, vector<1x1x64x256xbf16>,
    %134 = vector.extract_strided_slice %46 {offsets = [0, 384], sizes = [256, 64], strides = [1, 1]} : vector<256x512xbf16> to vector<256x64xbf16>
    %c0_100 = arith.constant 0 : index
    %c6_101 = arith.constant 6 : index
    %c0_102 = arith.constant 0 : index
    %c0_103 = arith.constant 0 : index
    %135 = vector.load %arg13[%c0_100, %c6_101, %c0_102, %c0_103] : memref<1x8x256x64xbf16, #tpu.memory_space<vmem>>, vector<1x1x256x64xbf16>
    %136 = vector.shape_cast %135 : vector<1x1x256x64xbf16> to vector<256x64xbf16>
    %137 = vector.shape_cast %134 : vector<256x64xbf16> to vector<1x1x256x64xbf16>
    tpu.vector_store %arg13[%c0_100, %c6_101, %c0_102, %c0_103], %137 {strides = array<i32>} : memref<1x8x256x64xbf16, #tpu.memory_space<vmem>>, vector<1x1x256x64xbf16>,
    %138 = vector.extract_strided_slice %44 {offsets = [0, 448], sizes = [256, 64], strides = [1, 1]} : vector<256x512xbf16> to vector<256x64xbf16>
    %c0_104 = arith.constant 0 : index
    %c7 = arith.constant 7 : index
    %c0_105 = arith.constant 0 : index
    %c0_106 = arith.constant 0 : index
    %139 = vector.load %arg11[%c0_104, %c7, %c0_105, %c0_106] : memref<1x8x256x64xbf16, #tpu.memory_space<vmem>>, vector<1x1x256x64xbf16>
    %140 = vector.shape_cast %139 : vector<1x1x256x64xbf16> to vector<256x64xbf16>
    %141 = vector.shape_cast %138 : vector<256x64xbf16> to vector<1x1x256x64xbf16>
    tpu.vector_store %arg11[%c0_104, %c7, %c0_105, %c0_106], %141 {strides = array<i32>} : memref<1x8x256x64xbf16, #tpu.memory_space<vmem>>, vector<1x1x256x64xbf16>,
    %142 = vector.extract_strided_slice %45 {offsets = [0, 448], sizes = [256, 64], strides = [1, 1]} : vector<256x512xbf16> to vector<256x64xbf16>
    %143 = tpu.transpose %142, [1, 0] : vector<256x64xbf16> -> vector<64x256xbf16>
    %c0_107 = arith.constant 0 : index
    %c7_108 = arith.constant 7 : index
    %c0_109 = arith.constant 0 : index
    %c0_110 = arith.constant 0 : index
    %144 = vector.load %arg12[%c0_107, %c7_108, %c0_109, %c0_110] : memref<1x8x64x256xbf16, #tpu.memory_space<vmem>>, vector<1x1x64x256xbf16>
    %145 = vector.shape_cast %144 : vector<1x1x64x256xbf16> to vector<64x256xbf16>
    %146 = vector.shape_cast %143 : vector<64x256xbf16> to vector<1x1x64x256xbf16>
    tpu.vector_store %arg12[%c0_107, %c7_108, %c0_109, %c0_110], %146 {strides = array<i32>} : memref<1x8x64x256xbf16, #tpu.memory_space<vmem>>, vector<1x1x64x256xbf16>,
    %147 = vector.extract_strided_slice %46 {offsets = [0, 448], sizes = [256, 64], strides = [1, 1]} : vector<256x512xbf16> to vector<256x64xbf16>
    %c0_111 = arith.constant 0 : index
    %c7_112 = arith.constant 7 : index
    %c0_113 = arith.constant 0 : index
    %c0_114 = arith.constant 0 : index
    %148 = vector.load %arg13[%c0_111, %c7_112, %c0_113, %c0_114] : memref<1x8x256x64xbf16, #tpu.memory_space<vmem>>, vector<1x1x256x64xbf16>
    %149 = vector.shape_cast %148 : vector<1x1x256x64xbf16> to vector<256x64xbf16>
    %150 = vector.shape_cast %147 : vector<256x64xbf16> to vector<1x1x256x64xbf16>
    tpu.vector_store %arg13[%c0_111, %c7_112, %c0_113, %c0_114], %150 {strides = array<i32>} : memref<1x8x256x64xbf16, #tpu.memory_space<vmem>>, vector<1x1x256x64xbf16>,
    return
  }
  func.func @transform_0(%arg0: i32, %arg1: i32) -> (i32, i32, i32) {
    %c0_i32 = arith.constant 0 : i32
    %c0_i32_0 = arith.constant 0 : i32
    return %arg0, %arg1, %c0_i32 : i32, i32, i32
  }
  func.func @transform_1(%arg0: i32, %arg1: i32) -> (i32, i32) {
    %c0_i32 = arith.constant 0 : i32
    %c0_i32_0 = arith.constant 0 : i32
    %c0_i32_1 = arith.constant 0 : i32
    return %c0_i32, %c0_i32_0 : i32, i32
  }
  func.func @transform_2(%arg0: i32, %arg1: i32) -> (i32, i32) {
    %c0_i32 = arith.constant 0 : i32
    %c0_i32_0 = arith.constant 0 : i32
    %c0_i32_1 = arith.constant 0 : i32
    return %c0_i32, %c0_i32_0 : i32, i32
  }
  func.func @transform_3(%arg0: i32, %arg1: i32) -> (i32, i32) {
    %c0_i32 = arith.constant 0 : i32
    %c0_i32_0 = arith.constant 0 : i32
    %c0_i32_1 = arith.constant 0 : i32
    return %c0_i32, %c0_i32_0 : i32, i32
  }
  func.func @transform_4(%arg0: i32, %arg1: i32) -> (i32, i32) {
    %c0_i32 = arith.constant 0 : i32
    %c0_i32_0 = arith.constant 0 : i32
    %c0_i32_1 = arith.constant 0 : i32
    return %c0_i32, %c0_i32_0 : i32, i32
  }
  func.func @transform_5(%arg0: i32, %arg1: i32) -> (i32, i32) {
    %c0_i32 = arith.constant 0 : i32
    %c0_i32_0 = arith.constant 0 : i32
    %c0_i32_1 = arith.constant 0 : i32
    return %c0_i32, %c0_i32_0 : i32, i32
  }
  func.func @transform_6(%arg0: i32, %arg1: i32) -> (i32, i32) {
    %c0_i32 = arith.constant 0 : i32
    %c0_i32_0 = arith.constant 0 : i32
    %c0_i32_1 = arith.constant 0 : i32
    return %c0_i32, %c0_i32_0 : i32, i32
  }
  func.func @transform_7(%arg0: i32, %arg1: i32) -> (i32, i32) {
    %c0_i32 = arith.constant 0 : i32
    %c0_i32_0 = arith.constant 0 : i32
    %c0_i32_1 = arith.constant 0 : i32
    return %c0_i32, %c0_i32_0 : i32, i32
  }
  func.func @transform_8(%arg0: i32, %arg1: i32) -> (i32, i32) {
    %c0_i32 = arith.constant 0 : i32
    %c0_i32_0 = arith.constant 0 : i32
    %c0_i32_1 = arith.constant 0 : i32
    return %c0_i32, %c0_i32_0 : i32, i32
  }
  func.func @transform_9(%arg0: i32, %arg1: i32) -> (i32, i32, i32, i32) {
    %c0_i32 = arith.constant 0 : i32
    %c0_i32_0 = arith.constant 0 : i32
    %c0_i32_1 = arith.constant 0 : i32
    return %arg0, %c0_i32, %arg1, %c0_i32_0 : i32, i32, i32, i32
  }
  func.func @transform_10(%arg0: i32, %arg1: i32) -> (i32, i32, i32, i32) {
    %c0_i32 = arith.constant 0 : i32
    %c0_i32_0 = arith.constant 0 : i32
    %c0_i32_1 = arith.constant 0 : i32
    return %arg0, %c0_i32, %c0_i32_0, %arg1 : i32, i32, i32, i32
  }
  func.func @transform_11(%arg0: i32, %arg1: i32) -> (i32, i32, i32, i32) {
    %c0_i32 = arith.constant 0 : i32
    %c0_i32_0 = arith.constant 0 : i32
    %c0_i32_1 = arith.constant 0 : i32
    return %arg0, %c0_i32, %arg1, %c0_i32_0 : i32, i32, i32, i32
  }
}

</mosaic_0001>

<bundles_post_ra>
// kernel: tpu_custom_call.1
= control target key start
LH: loop header
LB: loop body
LE: loop exit
PB: predicated region body
PF: predicated region fallthrough
CT: control target
= control target key end

     0   :  { %s19305_s0 = inlined_call_operand.hbm [shape: f32[2,256,512], index: 0, kind: input, shape index: {}]   ;;  %s19306_s1 = inlined_call_operand.hbm [shape: f32[1,512], index: 1, kind: input, shape index: {}]   ;;  %s19307_s2 = inlined_call_operand.vmem [shape: f32[1,512], index: 2, kind: input, shape index: {}]   ;;  %s19308_s3 = inlined_call_operand.hbm [shape: bf16[512,512], index: 3, kind: input, shape index: {}]   ;;  %s19309_s4 = inlined_call_operand.hbm [shape: bf16[512,512], index: 4, kind: input, shape index: {}]   ;;  %s19310_s5 = inlined_call_operand.hbm [shape: bf16[512,512], index: 5, kind: input, shape index: {}]   ;;  %s19311_s6 = inlined_call_operand.vmem [shape: f32[1,512], index: 6, kind: input, shape index: {}]   ;;  %s19312_s7 = inlined_call_operand.vmem [shape: f32[1,512], index: 7, kind: input, shape index: {}]   ;;  %s19313_s8 = inlined_call_operand.vmem [shape: f32[1,512], index: 8, kind: input, shape index: {}]   ;;  %s19314_s9 = inlined_call_operand.vmem [shape: bf16[2,8,256,64], index: 9, kind: output, shape index: {0}]   ;;  %s19315_s10 = inlined_call_operand.hbm [shape: bf16[2,8,64,256], index: 10, kind: output, shape index: {1}]   ;;  %s19316_s11 = inlined_call_operand.vmem [shape: bf16[2,8,256,64], index: 11, kind: output, shape index: {2}]  }
   0x1   :  { %19730 = sst [smem:[#allocation134_spill]] %s19306_s1 }
   0x2   :  { %19731 = sst [smem:[#allocation135_spill]] %s19309_s4 }
   0x3   :  { %19732 = sst [smem:[#allocation136_spill]] %s19312_s7 }
   0x4   :  { %19733 = sst [smem:[#allocation137_spill]] %s19313_s8 }
   0x5   :  { %19734 = sst [smem:[#allocation138_spill]] %s19315_s10 }
   0x6   :  { %19735 = sst [smem:[#allocation139_spill]] %s19316_s11 }
   0x7   :  { %17 = vsyncpa [#allocation3], 0 }
   0x8   :  { %19 = vsyncpa [#allocation3 + $0x1], 0 }
   0x9   :  { %20 = vsyncpa [#allocation6], 0 }
   0xa   :  { %21 = vsyncpa [#allocation9], 0 }
   0xb   :  { %22 = vsyncpa [#allocation4], 0 }
   0xc   :  { %24 = vsyncpa [#allocation4 + $0x1], 0  ;;  %s13645_s17 = smov 0   ;;  %s13647_s18 = smov 0  }
   0xd   :  { %s13649_s19 = smov 0   ;;  %s13651_s20 = smov 0  }
   0xe   :  { %s13653_s21 = smov 0   ;;  %s13655_s22 = smov 0  }
   0xf LB: > { %19736 = sst [smem:[#allocation16_spill]] %s13550_s17  ;;  %s10195_s23 = sadd.s32 4294967295, %s13570_s22   ;;  %s13570_s22 = sphi %s13655_s22, %s30_s22   ;;  %s13566_s21 = sphi %s13653_s21, %s20436_s21   ;;  %s13562_s20 = sphi %s13651_s20, %s20435_s20   ;;  %s13558_s19 = sphi %s13649_s19, %s20434_s19   ;;  %s13554_s18 = sphi %s13647_s18, %s20433_s18   ;;  %s13550_s17 = sphi %s13645_s17, %s20432_s17  }
  0x10   : > { %s10196_s24 = sadd.s32 4294967294, %s13570_s22   ;;  %p64_p0 = scmp.ne.s32.totalorder %s13554_s18, %s13550_s17 }
  0x11   : > { %p13679_p1 = scmp.eq.s32.totalorder %s10195_s23, 0  ;;  %p13683_p2 = scmp.eq.s32.totalorder %s10195_s23, 1 }
  0x12   : > { %p292_p3 = scmp.eq.s32.totalorder %s10196_s24, 1  ;;  %p10197_p5 = scmp.ge.s32.totalorder %s13570_s22, 1 }
  0x13   : > { %s19737_s25 = scalar_select %p13679_p1, 1, 0 }
  0x14   : > { %s19738_s26 = scalar_select %p13683_p2, 1, 0 }
  0x15   : > { %p13689_p4 = por %p13679_p1, %p64_p0  ;;  %p13694_p6 = por %p292_p3, %p64_p0 }
  0x16   : > { %p327_p7 = scmp.lt.s32.totalorder %s13570_s22, 3  ;;  %s13572_s30 = smov [#allocation5]  }
  0x17   : > { %s19739_s27 = scalar_select %p13689_p4, 1, 0 }
  0x18   : > { %s19740_s28 = scalar_select %p13694_p6, 1, 0 }
  0x19   : > { %p13699_p8 = pnand %p10197_p5, %p327_p7  ;;  %s340_s12 = sshll.u32 %s13572_s30, 4  ;;  %s341_s12 = int_to_ptr.vmem [resolvable:$true] %s340_s12 }
  0x1a   : > { %19741 = sst [smem:[#allocation17_spill]] %s19740_s28  ;;  %s13573_s14 = smov [#allocation8]  }
  0x1b   : > { %s19742_s29 = scalar_select %p13699_p8, 1, 0 }
  0x1c   : > { %p12478_p10 = pneg %p13699_p8  ;;  %s366_s15 = sshll.u32 %s13573_s14, 4  ;;  %s13712_s15 = int_to_ptr.vmem [resolvable:$true] %s366_s15 }
  0x1d   : > { %s13574_s16 = smov [#allocation7]   ;;  %s19744_s1 = sld [smem:[#allocation134_spill]] }
  0x1e   : > { %p13708_p11 = pnand %p12478_p10, %p13679_p1  ;;  %s13714_s23 = sshll.u32 %s13574_s16, 4  ;;  %s354_s23 = int_to_ptr.vmem [resolvable:$true] %s13714_s23 }
  0x20   : > { %p13724_p13 = pneg %p13708_p11 }
  0x23   : > { %s13338_s30 = scalar_lea.hbm %s19744_s1, 64 }
  0x24   : > { %p13339_p12 = scmp.ne.s32.totalorder %s19744_s1, %s13338_s30  ;;  %p13345_p5 = scmp.lt.u32.totalorder %s13338_s30, %s19744_s1 }
  0x26   : > { %p13341_p0 = pnand %p13724_p13, %p13339_p12 }
  0x28   : > { %p13342_p3 = pneg %p13341_p0 }
  0x2a   : > { %p13347_p7 = pnand %p13345_p5, %p13342_p3 }
  0x2c   : > { %13350 = shalt.err (!%p13347_p7)
}
  0x2d   : > { %s13351_s28 = scalar_lea.vmem %s341_s12, 64  ;;  %p13359_p1 = scmp.lt.s32.totalorder %s341_s12, %s341_s12 }
  0x2e   : > { %p13352_p10 = scmp.ne.s32.totalorder %s341_s12, %s13351_s28  ;;  %p13360_p4 = scmp.lt.s32.totalorder %s13351_s28, %s13351_s28 }
  0x30   : > { %p13354_p9 = pnand %p13352_p10, %p13724_p13  ;;  %p13361_p8 = por %p13360_p4, %p13359_p1 }
  0x32   : > { %p13355_p6 = pneg %p13354_p9 }
  0x34   : > { %p13362_p2 = pnand %p13361_p8, %p13355_p6 }
  0x36   : > { %13365 = shalt.err (!%p13362_p2)
}
  0x37   : > { %12481 = dma.hbm_to_vmem [thread:$0]  (!%p13708_p11), %s19744_s1, 64, %s341_s12, [#allocation6]  }
  0x38   : > { %s19746_s4 = sld [smem:[#allocation135_spill]] }
  0x3e   : > { %s13366_s14 = scalar_lea.hbm %s19746_s4, 16384 }
  0x3f   : > { %p13367_p9 = scmp.ne.s32.totalorder %s19746_s4, %s13366_s14  ;;  %p13373_p2 = scmp.lt.u32.totalorder %s13366_s14, %s19746_s4 }
  0x41   : > { %p13369_p12 = pnand %p13367_p9, %p13724_p13 }
  0x43   : > { %p13370_p1 = pneg %p13369_p12 }
  0x45   : > { %p13375_p4 = pnand %p13373_p2, %p13370_p1 }
  0x47   : > { %13378 = shalt.err (!%p13375_p4)
}
  0x48   : > { %s13379_s12 = scalar_lea.vmem %s13712_s15, 16384  ;;  %p13387_p3 = scmp.lt.s32.totalorder %s13712_s15, %s13712_s15 }
  0x49   : > { %p13380_p6 = scmp.ne.s32.totalorder %s13712_s15, %s13379_s12  ;;  %p13388_p5 = scmp.lt.s32.totalorder %s13379_s12, %s13379_s12 }
  0x4b   : > { %p13382_p8 = pnand %p13380_p6, %p13724_p13  ;;  %p13389_p7 = por %p13388_p5, %p13387_p3 }
  0x4d   : > { %p13383_p0 = pneg %p13382_p8 }
  0x4f   : > { %p13390_p10 = pnand %p13389_p7, %p13383_p0 }
  0x51   : > { %13393 = shalt.err (!%p13390_p10)
}
  0x52   : > { %s13575_s8 = smov 256   ;;  %s13576_s7 = smov 16  }
  0x53   : > { %12487 = dma.hbm_to_vmem [thread:$0]  (!%p13708_p11), %s19746_s4, 16384, %s13712_s15, [#allocation9], %s13575_s8, %s13575_s8, %s13576_s7  }
  0x54   : > { %s13394_s14 = scalar_lea.hbm %s19308_s3, 16384 }
  0x55   : > { %p13395_p9 = scmp.ne.s32.totalorder %s19308_s3, %s13394_s14  ;;  %p13401_p2 = scmp.lt.u32.totalorder %s13394_s14, %s19308_s3 }
  0x57   : > { %p13397_p12 = pnand %p13395_p9, %p13724_p13 }
  0x59   : > { %p13398_p1 = pneg %p13397_p12 }
  0x5b   : > { %p13403_p4 = pnand %p13401_p2, %p13398_p1 }
  0x5d   : > { %13406 = shalt.err (!%p13403_p4)
}
  0x5e   : > { %s13407_s10 = scalar_lea.vmem %s354_s23, 16384  ;;  %p13415_p3 = scmp.lt.s32.totalorder %s354_s23, %s354_s23 }
  0x5f   : > { %p13408_p6 = scmp.ne.s32.totalorder %s354_s23, %s13407_s10  ;;  %p13416_p5 = scmp.lt.s32.totalorder %s13407_s10, %s13407_s10 }
  0x61   : > { %p13410_p8 = pnand %p13408_p6, %p13724_p13  ;;  %p13417_p7 = por %p13416_p5, %p13415_p3 }
  0x63   : > { %p13411_p0 = pneg %p13410_p8 }
  0x65   : > { %p13418_p10 = pnand %p13417_p7, %p13411_p0 }
  0x67   : > { %13421 = shalt.err (!%p13418_p10)
}
  0x68   : > { %12484 = dma.hbm_to_vmem [thread:$0]  (!%p13708_p11), %s19308_s3, 16384, %s354_s23, [#allocation6], %s13575_s8, %s13575_s8, %s13576_s7  }
  0x69   : > { %s13577_s17 = smov [#allocation10]   ;;  %s13422_s16 = scalar_lea.hbm %s19310_s5, 16384 }
  0x6a   : > { %s379_s24 = sshll.u32 %s13577_s17, 4  ;;  %p13423_p9 = scmp.ne.s32.totalorder %s19310_s5, %s13422_s16  ;;  %s380_s24 = int_to_ptr.vmem [resolvable:$true] %s379_s24 }
  0x6b   : > { %p13429_p2 = scmp.lt.u32.totalorder %s13422_s16, %s19310_s5 }
  0x6c   : > { %p13425_p12 = pnand %p13423_p9, %p13724_p13 }
  0x6e   : > { %p13426_p1 = pneg %p13425_p12 }
  0x70   : > { %p13431_p4 = pnand %p13429_p2, %p13426_p1 }
  0x72   : > { %13434 = shalt.err (!%p13431_p4)
}
  0x73   : > { %s13435_s23 = scalar_lea.vmem %s380_s24, 16384  ;;  %p13443_p3 = scmp.lt.s32.totalorder %s380_s24, %s380_s24 }
  0x74   : > { %p13436_p6 = scmp.ne.s32.totalorder %s380_s24, %s13435_s23  ;;  %p13444_p5 = scmp.lt.s32.totalorder %s13435_s23, %s13435_s23 }
  0x76   : > { %p13438_p8 = pnand %p13436_p6, %p13724_p13  ;;  %p13445_p7 = por %p13444_p5, %p13443_p3 }
  0x78   : > { %p13439_p0 = pneg %p13438_p8 }
  0x7a   : > { %p13446_p10 = pnand %p13445_p7, %p13439_p0 }
  0x7c   : > { %13449 = shalt.err (!%p13446_p10)
}
  0x7d   : > { %12490 = dma.hbm_to_vmem [thread:$0]  (!%p13708_p11), %s19310_s5, 16384, %s380_s24, [#allocation9], %s13575_s8, %s13575_s8, %s13576_s7  }
  0x7e   : > { %s42_s11 = sadd.s32 1, %s13566_s21  ;;  %s51_s13 = sadd.s32 1, %s13558_s19 }
  0x7f   : > { %p44_p13 = scmp.ge.s32.totalorder %s42_s11, 2  ;;  %p58_p9 = scmp.ne.s32.totalorder %s13558_s19, %s13554_s18 }
  0x80   : > { %p59_p12 = scmp.eq.s32.totalorder %s13570_s22, 0  ;;  %p12503_p1 = scmp.lt.s32.totalorder %s13570_s22, 2 }
  0x81   : > { %s20438_s11 = smov (%p44_p13, %s42_s11), 0  ;;  %p19747_p4 = scmp.ne.s32.totalorder %s19738_s26, 0 }
  0x82   : > { %p60_p2 = por %p59_p12, %p58_p9  ;;  %s46_s17 = ssub.s32 %s13566_s21, %s20438_s11 }
  0x83   : > { %p13819_p6 = por %p19747_p4, %p58_p9  ;;  %s402_s30 = sand.u32 1, %s13558_s19  }
  0x84   : > { %p49_p8 = scmp.eq.s32.totalorder %s46_s17, 0  ;;  %s10203_s8 = sshll.u32 %s402_s30, 10 }
  0x85   : > { %s11430_s7 = sshll.u32 %s13566_s21, 14  ;;  %s406_s26 = scalar_lea.vmem [#allocation2], %s10203_s8 }
  0x86   : > { %s13828_s24 = scalar_select %p49_p8, %s13558_s19, %s51_s13  }
  0x87   : > { %s13833_s28 = scalar_lea.hbm %s19305_s0, %s11430_s7  ;;  %s416_s12 = sshll.u32 %s406_s26, 4  ;;  %s13841_s12 = int_to_ptr.vmem [resolvable:$true] %s416_s12 }
  0x88   : > { %p13837_p11 = pnand %p12503_p1, %p60_p2  ;;  %s13843_s23 = scalar_lea.sflag [#allocation3], %s402_s30 }
  0x89   : > { %s13450_s4 = scalar_lea.hbm %s13833_s28, 16384  ;;  %s13455_s17 = scalar_lea.hbm %s19305_s0, 32768 }
  0x8a   : > { %p13451_p0 = scmp.ne.s32.totalorder %s13833_s28, %s13450_s4  ;;  %p13452_p3 = pneg %p13837_p11 }
  0x8b   : > { %p13456_p10 = scmp.lt.u32.totalorder %s13833_s28, %s19305_s0  ;;  %p13457_p13 = scmp.lt.u32.totalorder %s13455_s17, %s13450_s4 }
  0x8c   : > { %p13453_p5 = pnand %p13452_p3, %p13451_p0  ;;  %p13459_p12 = scmp.lt.u32.totalorder %s13450_s4, %s13833_s28 }
  0x8d   : > { %p13458_p9 = por %p13457_p13, %p13456_p10 }
  0x8e   : > { %p13454_p7 = pneg %p13453_p5 }
  0x8f   : > { %p13460_p1 = por %p13459_p12, %p13458_p9 }
  0x91   : > { %p13461_p2 = pnand %p13460_p1, %p13454_p7 }
  0x93   : > { %13464 = shalt.err (!%p13461_p2)
}
  0x94   : > { %s13465_s30 = scalar_lea.vmem %s13841_s12, 16384  ;;  %s13578_s14 = smov [#allocation2]  }
  0x95   : > { %p13466_p4 = scmp.ne.s32.totalorder %s13841_s12, %s13465_s30  ;;  %s13470_s16 = sshll.u32 %s13578_s14, 4  ;;  %s13471_s16 = int_to_ptr.vmem [resolvable:$false] %s13470_s16 }
  0x96   : > { %s13472_s26 = scalar_lea.vmem %s13471_s16, 32768  ;;  %p13473_p5 = scmp.lt.s32.totalorder %s13841_s12, %s13471_s16 }
  0x97   : > { %p13468_p8 = pnand %p13466_p4, %p13452_p3  ;;  %p13474_p10 = scmp.lt.s32.totalorder %s13472_s26, %s13465_s30 }
  0x99   : > { %p13469_p0 = pneg %p13468_p8  ;;  %p13475_p13 = por %p13474_p10, %p13473_p5 }
  0x9b   : > { %p13476_p9 = pnand %p13475_p13, %p13469_p0 }
  0x9d   : > { %13479 = shalt.err (!%p13476_p9)
}
  0x9e   : > { %s13579_s4 = smov 512   ;;  %s13580_s1 = smov 32  }
  0x9f   : > { %12494 = dma.hbm_to_vmem [thread:$0]  (!%p13837_p11), %s13833_s28, 16384, %s13841_s12, %s13843_s23, %s13579_s4, %s13579_s4, %s13580_s1  }
  0xa0   : > { %p19750_p3 = scmp.ne.s32.totalorder %s19742_s29, 0 }
  0xa2   : > { %428 = sbr.rel (%p19750_p3) target bundleno = 2128 (0x850), region = 56 }
  0xa9   : > { %s13874_s13 = sand.u32 1, %s13554_s18   ;;  %p19751_p7 = scmp.ne.s32.totalorder %s19739_s27, 0 }
  0xaa   : > { %s10207_s17 = sshll.u32 %s13874_s13, 10  ;;  %s431_s8 = scalar_lea.sflag [#allocation3], %s13874_s13 }
  0xab   : > { %s13878_s7 = scalar_lea.vmem [#allocation2], %s10207_s17 }
  0xac   : > { %13533 = dma.done.wait (%p19751_p7), %s431_s8, 16384  }
  0xad   : > { %13535 = vsyncadd (%p19751_p7), %s431_s8, 4294950912  ;;  %p19752_p11 = scmp.ne.s32.totalorder %s19737_s25, 0 }
  0xaf   : > { %13537 = dma.done.wait (%p19752_p11), [#allocation6], 16448  }
  0xb0   : > { %13539 = vsyncadd (%p19752_p11), [#allocation6], 4294950848 }
  0xb1   : > { %13541 = dma.done.wait (%p19752_p11), [#allocation9], 32768  }
  0xb2   : > { %13543 = vsyncadd (%p19752_p11), [#allocation9], 4294934528  ;;  %v529_v0 = vld [vmem:[%s13878_s7] sm:$0xff]  ;;  %v530_v1 = vld [vmem:[%s13878_s7 + $0x8] sm:$0xff]  ;;  %p509_p12 = scmp.lt.s32.totalorder %s13562_s20, 1  ;;  %vm6972_vm0 = vcmask 519168  }
  0xb3   : > { %v531_v2 = vld [vmem:[%s13878_s7 + $0x10] sm:$0xff]  ;;  %v659_v3 = vadd.f32 %v530_v1, %v529_v0  ;;  %v537_v4 = vld [vmem:[%s13878_s7 + $0x40] sm:$0xff]  ;;  %v538_v5 = vld [vmem:[%s13878_s7 + $0x48] sm:$0xff]  ;;  %s13581_s4 = smov 64   ;;  %s20112_s8 = sld [smem:[#allocation136_spill]] }
  0xb4   : > { %v532_v6 = vld [vmem:[%s13878_s7 + $0x18] sm:$0xff]  ;;  %v539_v7 = vld [vmem:[%s13878_s7 + $0x50] sm:$0xff]  ;;  %v669_v8 = vadd.f32 %v538_v5, %v537_v4  ;;  %v533_v9 = vld [vmem:[%s13878_s7 + $0x20] sm:$0xff]  ;;  %s15652_s23 = scalar_select %p509_p12, %s13562_s20, 1 }
  0xb5   : > { %v660_v10 = vadd.f32 %v659_v3, %v531_v2  ;;  %v540_v11 = vld [vmem:[%s13878_s7 + $0x58] sm:$0xff]  ;;  %v534_v12 = vld [vmem:[%s13878_s7 + $0x28] sm:$0xff]  ;;  %v535_v13 = vld [vmem:[%s13878_s7 + $0x30] sm:$0xff]  ;;  %s20192_s27 = sld [smem:[#allocation137_spill]]  ;;  %s20199_s12 = sld [smem:[#allocation139_spill]] }
  0xb6   : > { %v670_v14 = vadd.f32 %v669_v8, %v539_v7  ;;  %v664_v15 = vadd.f32 %v534_v12, %v533_v9  ;;  %v541_v16 = vld [vmem:[%s13878_s7 + $0x60] sm:$0xff]  ;;  %v542_v17 = vld [vmem:[%s13878_s7 + $0x68] sm:$0xff]  ;;  %v543_v18 = vld [vmem:[%s13878_s7 + $0x70] sm:$0xff]  ;;  %s11431_s30 = sshll.u32 %s15652_s23, 10  ;;  %s10212_s14 = sshll.u32 %s13874_s13, 9 }
  0xb7   : > { %v661_v19 = vadd.f32 %v660_v10, %v532_v6  ;;  %v536_v20 = vld [vmem:[%s13878_s7 + $0x38] sm:$0xff]  ;;  %v674_v21 = vadd.f32 %v542_v17, %v541_v16  ;;  %v545_v22 = vld [vmem:[%s13878_s7 + $0x80] sm:$0xff]  ;;  %v546_v23 = vld [vmem:[%s13878_s7 + $0x88] sm:$0xff]  ;;  %s15680_s26 = scalar_lea.vmem %s19314_s9, %s11431_s30  ;;  %s17736_s23 = scalar_lea.vmem [#allocation11], %s10212_s14 }
  0xb8   : > { %v671_v24 = vadd.f32 %v670_v14, %v540_v11  ;;  %v665_v25 = vadd.f32 %v664_v15, %v535_v13  ;;  %v544_v26 = vld [vmem:[%s13878_s7 + $0x78] sm:$0xff]  ;;  %v547_v27 = vld [vmem:[%s13878_s7 + $0x90] sm:$0xff]  ;;  %v679_v28 = vadd.f32 %v546_v23, %v545_v22  ;;  %v549_v29 = vld [vmem:[%s13878_s7 + $0xa0] sm:$0xff]  ;;  %s20427_s1 = sld [smem:[#allocation138_spill]]  ;;  %s13582_s25 = smov [#allocation11]  }
  0xb9   : > { %662 = vadd.xlane.f32.xlu0 %v661_v19  ;;  %v675_v30 = vadd.f32 %v674_v21, %v543_v18  ;;  %v548_v31 = vld [vmem:[%s13878_s7 + $0x98] sm:$0xff]  ;;  %v550_v32 = vld [vmem:[%s13878_s7 + $0xa8] sm:$0xff]  ;;  %v551_v33 = vld [vmem:[%s13878_s7 + $0xb0] sm:$0xff] }
  0xba   : > { %672 = vadd.xlane.f32.xlu1 %v671_v24  ;;  %v666_v34 = vadd.f32 %v665_v25, %v536_v20  ;;  %v680_v35 = vadd.f32 %v679_v28, %v547_v27  ;;  %v684_v36 = vadd.f32 %v550_v32, %v549_v29  ;;  %v553_v37 = vld [vmem:[%s13878_s7 + $0xc0] sm:$0xff]  ;;  %v554_v38 = vld [vmem:[%s13878_s7 + $0xc8] sm:$0xff]  ;;  %v555_v39 = vld [vmem:[%s13878_s7 + $0xd0] sm:$0xff] }
  0xbb   : > { %v676_v40 = vadd.f32 %v675_v30, %v544_v26  ;;  %v552_v41 = vld [vmem:[%s13878_s7 + $0xb8] sm:$0xff]  ;;  %v689_v42 = vadd.f32 %v554_v38, %v553_v37  ;;  %v557_v43 = vld [vmem:[%s13878_s7 + $0xe0] sm:$0xff]  ;;  %v558_v44 = vld [vmem:[%s13878_s7 + $0xe8] sm:$0xff]  ;;  %s17677_s10 = scalar_lea.vmem %s20199_s12, %s11431_s30  ;;  %s11689_s30 = sshll.u32 %s13562_s20, 13 }
  0xbc   : > { %v685_v45 = vadd.f32 %v684_v36, %v551_v33  ;;  %v559_v46 = vld [vmem:[%s13878_s7 + $0xf0] sm:$0xff]  ;;  %v694_v47 = vadd.f32 %v558_v44, %v557_v43  ;;  %v561_v48 = vld [vmem:[%s13878_s7 + $0x100] sm:$0xff]  ;;  %v681_v49 = vadd.f32 %v680_v35, %v548_v31  ;;  %v556_v50 = vld [vmem:[%s13878_s7 + $0xd8] sm:$0xff]  ;;  %s9964_s20 = scalar_lea.sflag [#allocation4], %s13874_s13 }
  0xbd   : > { %667 = vadd.xlane.f32.xlu0 %v666_v34  ;;  %v690_v51 = vadd.f32 %v689_v42, %v555_v39  ;;  %v560_v52 = vld [vmem:[%s13878_s7 + $0xf8] sm:$0xff]  ;;  %v562_v53 = vld [vmem:[%s13878_s7 + $0x108] sm:$0xff]  ;;  %v563_v56 = vld [vmem:[%s13878_s7 + $0x110] sm:$0xff] }
  0xbe   : > { %677 = vadd.xlane.f32.xlu1 %v676_v40  ;;  %v686_v54 = vadd.f32 %v685_v45, %v552_v41  ;;  %v695_v55 = vadd.f32 %v694_v47, %v559_v46  ;;  %v699_v57 = vadd.f32 %v562_v53, %v561_v48  ;;  %v565_v58 = vld [vmem:[%s13878_s7 + $0x120] sm:$0xff]  ;;  %v566_v59 = vld [vmem:[%s13878_s7 + $0x128] sm:$0xff]  ;;  %v567_v60 = vld [vmem:[%s13878_s7 + $0x130] sm:$0xff]  ;;  %s19169_s17 = scalar_lea.hbm %s20427_s1, %s11689_s30 }
  0xbf   : > { %v704_v61 = vadd.f32 %v566_v59, %v565_v58  ;;  %v573_v62 = vld [vmem:[%s13878_s7 + $0x160] sm:$0xff]  ;;  %v574_v63 = vld [vmem:[%s13878_s7 + $0x168] sm:$0xff]  ;;  %v691_v1 = vadd.f32 %v690_v51, %v556_v50  ;;  %v564_v2 = vld [vmem:[%s13878_s7 + $0x118] sm:$0xff] }
  0xc0   : > { %v569_v0 = vld [vmem:[%s13878_s7 + $0x140] sm:$0xff]  ;;  %v700_v3 = vadd.f32 %v699_v57, %v563_v56  ;;  %v568_v4 = vld [vmem:[%s13878_s7 + $0x138] sm:$0xff]  ;;  %v570_v5 = vld [vmem:[%s13878_s7 + $0x148] sm:$0xff]  ;;  %v696_v6 = vadd.f32 %v695_v55, %v560_v52  ;;  %v714_v9 = vadd.f32 %v574_v63, %v573_v62 }
  0xc1   : > { %682 = vadd.xlane.f32.xlu0 %v681_v49  ;;  %v705_v7 = vadd.f32 %v704_v61, %v567_v60  ;;  %v575_v8 = vld [vmem:[%s13878_s7 + $0x170] sm:$0xff]  ;;  %v709_v11 = vadd.f32 %v570_v5, %v569_v0  ;;  %v581_v12 = vld [vmem:[%s13878_s7 + $0x1a0] sm:$0xff]  ;;  %v582_v13 = vld [vmem:[%s13878_s7 + $0x1a8] sm:$0xff] }
  0xc2   : > { %687 = vadd.xlane.f32.xlu1 %v686_v54  ;;  %v571_v10 = vld [vmem:[%s13878_s7 + $0x150] sm:$0xff]  ;;  %v577_v14 = vld [vmem:[%s13878_s7 + $0x180] sm:$0xff]  ;;  %v578_v15 = vld [vmem:[%s13878_s7 + $0x188] sm:$0xff]  ;;  %v701_v16 = vadd.f32 %v700_v3, %v564_v2  ;;  %v715_v22 = vadd.f32 %v714_v9, %v575_v8  ;;  %v724_v23 = vadd.f32 %v582_v13, %v581_v12 }
  0xc3   : > { %v576_v17 = vld [vmem:[%s13878_s7 + $0x178] sm:$0xff]  ;;  %v710_v19 = vadd.f32 %v709_v11, %v571_v10  ;;  %v719_v20 = vadd.f32 %v578_v15, %v577_v14  ;;  %v706_v21 = vadd.f32 %v705_v7, %v568_v4  ;;  %v579_v24 = vld [vmem:[%s13878_s7 + $0x190] sm:$0xff]  ;;  %v585_v25 = vld [vmem:[%s13878_s7 + $0x1c0] sm:$0xff] }
  0xc4   : > { %v572_v18 = vld [vmem:[%s13878_s7 + $0x158] sm:$0xff]  ;;  %v586_v26 = vld [vmem:[%s13878_s7 + $0x1c8] sm:$0xff]  ;;  %v583_v27 = vld [vmem:[%s13878_s7 + $0x1b0] sm:$0xff]  ;;  %v716_v35 = vadd.f32 %v715_v22, %v576_v17 }
  0xc5   : > { %692 = vadd.xlane.f32.xlu0 %v691_v1  ;;  %v589_v28 = vld [vmem:[%s13878_s7 + $0x1e0] sm:$0xff]  ;;  %v590_v29 = vld [vmem:[%s13878_s7 + $0x1e8] sm:$0xff]  ;;  %v711_v30 = vadd.f32 %v710_v19, %v572_v18  ;;  %v584_v31 = vld [vmem:[%s13878_s7 + $0x1b8] sm:$0xff]  ;;  %v720_v33 = vadd.f32 %v719_v20, %v579_v24  ;;  %v729_v34 = vadd.f32 %v586_v26, %v585_v25  ;;  %v725_v36 = vadd.f32 %v724_v23, %v583_v27 }
  0xc6   : > { %697 = vadd.xlane.f32.xlu1 %v696_v6  ;;  %v580_v32 = vld [vmem:[%s13878_s7 + $0x198] sm:$0xff]  ;;  %v734_v37 = vadd.f32 %v590_v29, %v589_v28  ;;  %v587_v38 = vld [vmem:[%s13878_s7 + $0x1d0] sm:$0xff]  ;;  %v593_v39 = vld [vmem:[%s13878_s7 + $0x200] sm:$0xff] }
  0xc7   : > { %v594_v40 = vld [vmem:[%s13878_s7 + $0x208] sm:$0xff]  ;;  %v591_v41 = vld [vmem:[%s13878_s7 + $0x1f0] sm:$0xff]  ;;  %v597_v42 = vld [vmem:[%s13878_s7 + $0x220] sm:$0xff]  ;;  %v721_v44 = vadd.f32 %v720_v33, %v580_v32  ;;  %v730_v47 = vadd.f32 %v729_v34, %v587_v38  ;;  %v726_v49 = vadd.f32 %v725_v36, %v584_v31 }
  0xc8   : > { %v598_v43 = vld [vmem:[%s13878_s7 + $0x228] sm:$0xff]  ;;  %v592_v45 = vld [vmem:[%s13878_s7 + $0x1f8] sm:$0xff]  ;;  %v739_v48 = vadd.f32 %v594_v40, %v593_v39  ;;  %v735_v50 = vadd.f32 %v734_v37, %v591_v41  ;;  %v595_v52 = vld [vmem:[%s13878_s7 + $0x210] sm:$0xff] }
  0xc9   : > { %702 = vadd.xlane.f32.xlu0 %v701_v16  ;;  %v588_v46 = vld [vmem:[%s13878_s7 + $0x1d8] sm:$0xff]  ;;  %v744_v51 = vadd.f32 %v598_v43, %v597_v42  ;;  %v601_v53 = vld [vmem:[%s13878_s7 + $0x240] sm:$0xff]  ;;  %v602_v54 = vld [vmem:[%s13878_s7 + $0x248] sm:$0xff] }
  0xca   : > { %707 = vadd.xlane.f32.xlu1 %v706_v21  ;;  %v599_v55 = vld [vmem:[%s13878_s7 + $0x230] sm:$0xff]  ;;  %v605_v56 = vld [vmem:[%s13878_s7 + $0x260] sm:$0xff]  ;;  %v606_v57 = vld [vmem:[%s13878_s7 + $0x268] sm:$0xff]  ;;  %v731_v60 = vadd.f32 %v730_v47, %v588_v46  ;;  %v740_v62 = vadd.f32 %v739_v48, %v595_v52  ;;  %v749_v0 = vadd.f32 %v602_v54, %v601_v53  ;;  %v736_v3 = vadd.f32 %v735_v50, %v592_v45 }
  0xcb   : > { %v596_v58 = vld [vmem:[%s13878_s7 + $0x218] sm:$0xff]  ;;  %v603_v59 = vld [vmem:[%s13878_s7 + $0x250] sm:$0xff]  ;;  %v609_v1 = vld [vmem:[%s13878_s7 + $0x280] sm:$0xff]  ;;  %v745_v4 = vadd.f32 %v744_v51, %v599_v55  ;;  %v754_v5 = vadd.f32 %v606_v57, %v605_v56 }
  0xcc   : > { %v600_v61 = vld [vmem:[%s13878_s7 + $0x238] sm:$0xff]  ;;  %v607_v63 = vld [vmem:[%s13878_s7 + $0x270] sm:$0xff]  ;;  %v610_v2 = vld [vmem:[%s13878_s7 + $0x288] sm:$0xff]  ;;  %v741_v9 = vadd.f32 %v740_v62, %v596_v58  ;;  %v750_v11 = vadd.f32 %v749_v0, %v603_v59 }
  0xcd   : > { %712 = vadd.xlane.f32.xlu0 %v711_v30  ;;  %v613_v6 = vld [vmem:[%s13878_s7 + $0x2a0] sm:$0xff]  ;;  %v614_v7 = vld [vmem:[%s13878_s7 + $0x2a8] sm:$0xff]  ;;  %v604_v8 = vld [vmem:[%s13878_s7 + $0x258] sm:$0xff]  ;;  %v759_v14 = vadd.f32 %v610_v2, %v609_v1  ;;  %v746_v16 = vadd.f32 %v745_v4, %v600_v61  ;;  %v755_v17 = vadd.f32 %v754_v5, %v607_v63 }
  0xce   : > { %717 = vadd.xlane.f32.xlu1 %v716_v35  ;;  %v608_v10 = vld [vmem:[%s13878_s7 + $0x278] sm:$0xff]  ;;  %v615_v12 = vld [vmem:[%s13878_s7 + $0x2b0] sm:$0xff]  ;;  %v621_v15 = vld [vmem:[%s13878_s7 + $0x2e0] sm:$0xff]  ;;  %v764_v18 = vadd.f32 %v614_v7, %v613_v6  ;;  %v751_v20 = vadd.f32 %v750_v11, %v604_v8 }
  0xcf   : > { %v611_v13 = vld [vmem:[%s13878_s7 + $0x290] sm:$0xff]  ;;  %v622_v19 = vld [vmem:[%s13878_s7 + $0x2e8] sm:$0xff]  ;;  %v612_v21 = vld [vmem:[%s13878_s7 + $0x298] sm:$0xff]  ;;  %v756_v23 = vadd.f32 %v755_v17, %v608_v10 }
  0xd0   : > { %v760_v22 = vadd.f32 %v759_v14, %v611_v13  ;;  %v765_v24 = vadd.f32 %v764_v18, %v615_v12  ;;  %v774_v25 = vadd.f32 %v622_v19, %v621_v15  ;;  %v616_v26 = vld [vmem:[%s13878_s7 + $0x2b8] sm:$0xff]  ;;  %v623_v27 = vld [vmem:[%s13878_s7 + $0x2f0] sm:$0xff]  ;;  %v617_v5 = vld [vmem:[%s13878_s7 + $0x2c0] sm:$0xff] }
  0xd1   : > { %722 = vadd.xlane.f32.xlu0 %v721_v44  ;;  %v624_v31 = vld [vmem:[%s13878_s7 + $0x2f8] sm:$0xff]  ;;  %v12570_v34 = vld [vmem:[#allocation7 + $0xc] ss:$16 sps:$4 sm:$0xff]   ;;  %v12572_v35 = vld [vmem:[#allocation7] ss:$16 sps:$4 sm:$0xff]  }
  0xd2   : > { %727 = vadd.xlane.f32.xlu1 %v726_v49  ;;  %v761_v28 = vadd.f32 %v760_v22, %v612_v21  ;;  %v766_v29 = vadd.f32 %v765_v24, %v616_v26  ;;  %v775_v30 = vadd.f32 %v774_v25, %v623_v27  ;;  %v12568_v33 = vld [vmem:[#allocation7 + $0x4] ss:$16 sps:$4 sm:$0xff]   ;;  %v12573_v36 = vld [vmem:[#allocation7 + $0x8] ss:$16 sps:$4 sm:$0xff]   ;;  %v12576_v38 = vld [vmem:[#allocation7 + $0x2c] ss:$16 sps:$4 sm:$0xff]   ;;  %3030 = vmatprep.subr.bf16.mxu1 %v12570_v34 }
  0xd3   : > { %v12574_v37 = vld [vmem:[#allocation7 + $0x24] ss:$16 sps:$4 sm:$0xff]   ;;  %2644 = vmatprep.subr.bf16.mxu0 %v12568_v33  ;;  %3031 = vmatpush1.bf16.msra.mxu1 %v12573_v36  ;;  %v12578_v39 = vld [vmem:[#allocation7 + $0x20] ss:$16 sps:$4 sm:$0xff]   ;;  %v12579_v40 = vld [vmem:[#allocation7 + $0x28] ss:$16 sps:$4 sm:$0xff]  }
  0xd4   : > { %v776_v32 = vadd.f32 %v775_v30, %v624_v31  ;;  %2645 = vmatpush1.bf16.msra.mxu0 %v12572_v35  ;;  %3032 = vmatprep.subr.bf16.mxu1 %v12576_v38  ;;  %v12580_v41 = vld [vmem:[#allocation7 + $0x44] ss:$16 sps:$4 sm:$0xff]   ;;  %v12582_v42 = vld [vmem:[#allocation7 + $0x4c] ss:$16 sps:$4 sm:$0xff]   ;;  %v12584_v43 = vld [vmem:[#allocation7 + $0x40] ss:$16 sps:$4 sm:$0xff]  }
  0xd5   : > { %732 = vadd.xlane.f32.xlu0 %v731_v60  ;;  %2646 = vmatprep.subr.bf16.mxu0 %v12574_v37  ;;  %v12585_v44 = vld [vmem:[#allocation7 + $0x48] ss:$16 sps:$4 sm:$0xff]   ;;  %v12586_v45 = vld [vmem:[#allocation7 + $0x64] ss:$16 sps:$4 sm:$0xff]   ;;  %v12588_v46 = vld [vmem:[#allocation7 + $0x6c] ss:$16 sps:$4 sm:$0xff]  }
  0xd6   : > { %737 = vadd.xlane.f32.xlu1 %v736_v3  ;;  %v12590_v47 = vld [vmem:[#allocation7 + $0x60] ss:$16 sps:$4 sm:$0xff]   ;;  %v12591_v48 = vld [vmem:[#allocation7 + $0x68] ss:$16 sps:$4 sm:$0xff]   ;;  %v12592_v49 = vld [vmem:[#allocation7 + $0x84] ss:$16 sps:$4 sm:$0xff]  }
  0xd7   : > { %3033 = vmatpush1.bf16.msra.mxu1 %v12579_v40  ;;  %v12594_v50 = vld [vmem:[#allocation7 + $0x8c] ss:$16 sps:$4 sm:$0xff]   ;;  %v12596_v51 = vld [vmem:[#allocation7 + $0x80] ss:$16 sps:$4 sm:$0xff]   ;;  %v12597_v52 = vld [vmem:[#allocation7 + $0x88] ss:$16 sps:$4 sm:$0xff]  }
  0xd8   : > { %2647 = vmatpush1.bf16.msra.mxu0 %v12578_v39  ;;  %3034 = vmatprep.subr.bf16.mxu1 %v12582_v42  ;;  %v12598_v53 = vld [vmem:[#allocation7 + $0xa4] ss:$16 sps:$4 sm:$0xff]   ;;  %v12600_v54 = vld [vmem:[#allocation7 + $0xac] ss:$16 sps:$4 sm:$0xff]   ;;  %v12602_v55 = vld [vmem:[#allocation7 + $0xa0] ss:$16 sps:$4 sm:$0xff]  }
  0xd9   : > { %742 = vadd.xlane.f32.xlu0 %v741_v9  ;;  %2648 = vmatprep.subr.bf16.mxu0 %v12580_v41  ;;  %v12603_v56 = vld [vmem:[#allocation7 + $0xa8] ss:$16 sps:$4 sm:$0xff]   ;;  %v12604_v57 = vld [vmem:[#allocation7 + $0xc4] ss:$16 sps:$4 sm:$0xff]   ;;  %v12606_v58 = vld [vmem:[#allocation7 + $0xcc] ss:$16 sps:$4 sm:$0xff]  }
  0xda   : > { %747 = vadd.xlane.f32.xlu1 %v746_v16  ;;  %v12608_v59 = vld [vmem:[#allocation7 + $0xc0] ss:$16 sps:$4 sm:$0xff]   ;;  %v12609_v60 = vld [vmem:[#allocation7 + $0xc8] ss:$16 sps:$4 sm:$0xff]   ;;  %v12610_v61 = vld [vmem:[#allocation7 + $0xe4] ss:$16 sps:$4 sm:$0xff]  }
  0xdb   : > { %3035 = vmatpush1.bf16.msra.mxu1 %v12585_v44  ;;  %v12612_v62 = vld [vmem:[#allocation7 + $0xec] ss:$16 sps:$4 sm:$0xff]   ;;  %v12614_v63 = vld [vmem:[#allocation7 + $0xe0] ss:$16 sps:$4 sm:$0xff]   ;;  %v12615_v0 = vld [vmem:[#allocation7 + $0xe8] ss:$16 sps:$4 sm:$0xff]  }
  0xdc   : > { %2649 = vmatpush1.bf16.msra.mxu0 %v12584_v43  ;;  %3036 = vmatprep.subr.bf16.mxu1 %v12588_v46  ;;  %v12616_v1 = vld [vmem:[#allocation7 + $0x104] ss:$16 sps:$4 sm:$0xff]   ;;  %v12618_v2 = vld [vmem:[#allocation7 + $0x10c] ss:$16 sps:$4 sm:$0xff]   ;;  %v12620_v3 = vld [vmem:[#allocation7 + $0x100] ss:$16 sps:$4 sm:$0xff]  }
  0xdd   : > { %752 = vadd.xlane.f32.xlu0 %v751_v20  ;;  %2650 = vmatprep.subr.bf16.mxu0 %v12586_v45  ;;  %v12621_v4 = vld [vmem:[#allocation7 + $0x108] ss:$16 sps:$4 sm:$0xff]   ;;  %v629_v7 = vld [vmem:[%s13878_s7 + $0x320] sm:$0xff]  ;;  %v619_v21 = vld [vmem:[%s13878_s7 + $0x2d0] sm:$0xff] }
  0xde   : > { %757 = vadd.xlane.f32.xlu1 %v756_v23  ;;  %v618_v6 = vld [vmem:[%s13878_s7 + $0x2c8] sm:$0xff]  ;;  %v625_v9 = vld [vmem:[%s13878_s7 + $0x300] sm:$0xff]  ;;  %v631_v22 = vld [vmem:[%s13878_s7 + $0x330] sm:$0xff] }
  0xdf   : > { %3037 = vmatpush1.bf16.msra.mxu1 %v12591_v48  ;;  %v630_v8 = vld [vmem:[%s13878_s7 + $0x328] sm:$0xff]  ;;  %v637_v11 = vld [vmem:[%s13878_s7 + $0x360] sm:$0xff]  ;;  %v769_v23 = vadd.f32 %v618_v6, %v617_v5  ;;  %v627_v25 = vld [vmem:[%s13878_s7 + $0x310] sm:$0xff] }
  0xe0   : > { %2651 = vmatpush1.bf16.msra.mxu0 %v12590_v47  ;;  %3038 = vmatprep.subr.bf16.mxu1 %v12594_v50  ;;  %v626_v10 = vld [vmem:[%s13878_s7 + $0x308] sm:$0xff]  ;;  %v633_v13 = vld [vmem:[%s13878_s7 + $0x340] sm:$0xff]  ;;  %v784_v24 = vadd.f32 %v630_v8, %v629_v7  ;;  %v639_v26 = vld [vmem:[%s13878_s7 + $0x370] sm:$0xff] }
  0xe1   : > { %762 = vadd.xlane.f32.xlu0 %v761_v28  ;;  %2652 = vmatprep.subr.bf16.mxu0 %v12592_v49  ;;  %v638_v12 = vld [vmem:[%s13878_s7 + $0x368] sm:$0xff]  ;;  %v645_v15 = vld [vmem:[%s13878_s7 + $0x3a0] sm:$0xff]  ;;  %v635_v27 = vld [vmem:[%s13878_s7 + $0x350] sm:$0xff]  ;;  %v779_v28 = vadd.f32 %v626_v10, %v625_v9  ;;  %v770_v41 = vadd.f32 %v769_v23, %v619_v21 }
  0xe2   : > { %767 = vadd.xlane.f32.xlu1 %v766_v29  ;;  %v634_v14 = vld [vmem:[%s13878_s7 + $0x348] sm:$0xff]  ;;  %v641_v17 = vld [vmem:[%s13878_s7 + $0x380] sm:$0xff]  ;;  %v794_v29 = vadd.f32 %v638_v12, %v637_v11  ;;  %v647_v31 = vld [vmem:[%s13878_s7 + $0x3b0] sm:$0xff]  ;;  %v785_v42 = vadd.f32 %v784_v24, %v631_v22 }
  0xe3   : > { %3039 = vmatpush1.bf16.msra.mxu1 %v12597_v52  ;;  %v646_v16 = vld [vmem:[%s13878_s7 + $0x3a8] sm:$0xff]  ;;  %v653_v19 = vld [vmem:[%s13878_s7 + $0x3e0] sm:$0xff]  ;;  %v789_v30 = vadd.f32 %v634_v14, %v633_v13  ;;  %v655_v33 = vld [vmem:[%s13878_s7 + $0x3f0] sm:$0xff]  ;;  %v780_v46 = vadd.f32 %v779_v28, %v627_v25 }
  0xe4   : > { %2653 = vmatpush1.bf16.msra.mxu0 %v12596_v51  ;;  %3040 = vmatprep.subr.bf16.mxu1 %v12600_v54  ;;  %v642_v18 = vld [vmem:[%s13878_s7 + $0x388] sm:$0xff]  ;;  %v804_v34 = vadd.f32 %v646_v16, %v645_v15  ;;  %v649_v37 = vld [vmem:[%s13878_s7 + $0x3c0] sm:$0xff]  ;;  %v620_v39 = vld [vmem:[%s13878_s7 + $0x2d8] sm:$0xff]  ;;  %v795_v47 = vadd.f32 %v794_v29, %v639_v26 }
  0xe5   : > { %2654 = vmatprep.subr.bf16.mxu0 %v12598_v53  ;;  %v654_v20 = vld [vmem:[%s13878_s7 + $0x3e8] sm:$0xff]  ;;  %v799_v35 = vadd.f32 %v642_v18, %v641_v17  ;;  %v632_v40 = vld [vmem:[%s13878_s7 + $0x338] sm:$0xff]  ;;  %v790_v48 = vadd.f32 %v789_v30, %v635_v27  ;;  %v13208_v5 = vld [vmem:[%s13878_s7] sm:$0xff] }
  0xe6   : > { %777 = vadd.xlane.f32.xlu1 %v776_v32  ;;  %v643_v32 = vld [vmem:[%s13878_s7 + $0x390] sm:$0xff]  ;;  %v814_v36 = vadd.f32 %v654_v20, %v653_v19  ;;  %v650_v38 = vld [vmem:[%s13878_s7 + $0x3c8] sm:$0xff]  ;;  %v628_v43 = vld [vmem:[%s13878_s7 + $0x318] sm:$0xff]  ;;  %v805_v52 = vadd.f32 %v804_v34, %v647_v31 }
  0xe7   : > { %3041 = vmatpush1.bf16.msra.mxu1 %v12603_v56  ;;  %v640_v44 = vld [vmem:[%s13878_s7 + $0x378] sm:$0xff]  ;;  %v800_v53 = vadd.f32 %v799_v35, %v643_v32  ;;  %v809_v56 = vadd.f32 %v650_v38, %v649_v37  ;;  %v13209_v7 = vld [vmem:[%s13878_s7 + $0x8] sm:$0xff]  ;;  %v13210_v9 = vld [vmem:[%s13878_s7 + $0x10] sm:$0xff] }
  0xe8   : > { %2655 = vmatpush1.bf16.msra.mxu0 %v12602_v55  ;;  %3042 = vmatprep.subr.bf16.mxu1 %v12606_v58  ;;  %v636_v45 = vld [vmem:[%s13878_s7 + $0x358] sm:$0xff]  ;;  %v815_v54 = vadd.f32 %v814_v36, %v655_v33  ;;  %v651_v55 = vld [vmem:[%s13878_s7 + $0x3d0] sm:$0xff]  ;;  %v14019_v58 = vadd.f32 %v770_v41, %v620_v39  ;;  %v13212_v15 = vld [vmem:[%s13878_s7 + $0x40] sm:$0xff] }
  0xe9   : > { %2656 = vmatprep.subr.bf16.mxu0 %v12604_v57  ;;  %v648_v49 = vld [vmem:[%s13878_s7 + $0x3b8] sm:$0xff]  ;;  %v810_v11 = vadd.f32 %v809_v56, %v651_v55  ;;  %v13213_v17 = vld [vmem:[%s13878_s7 + $0x48] sm:$0xff]  ;;  %v13214_v19 = vld [vmem:[%s13878_s7 + $0x50] sm:$0xff] }
  0xea   : > { %v644_v50 = vld [vmem:[%s13878_s7 + $0x398] sm:$0xff]  ;;  %v13216_v33 = vld [vmem:[%s13878_s7 + $0x20] sm:$0xff]  ;;  %v13217_v35 = vld [vmem:[%s13878_s7 + $0x28] sm:$0xff] }
  0xeb   : > { %3043 = vmatpush1.bf16.msra.mxu1 %v12609_v60  ;;  %v656_v51 = vld [vmem:[%s13878_s7 + $0x3f8] sm:$0xff]  ;;  %v13218_v37 = vld [vmem:[%s13878_s7 + $0x30] sm:$0xff]  ;;  %v13220_v56 = vld [vmem:[%s13878_s7 + $0x60] sm:$0xff] }
  0xec   : > { %2657 = vmatpush1.bf16.msra.mxu0 %v12608_v59  ;;  %3044 = vmatprep.subr.bf16.mxu1 %v12612_v62  ;;  %v14021_v59 = vadd.f32 %v785_v42, %v632_v40  ;;  %v14023_v62 = vadd.f32 %v780_v46, %v628_v43  ;;  %v13211_v13 = vld [vmem:[%s13878_s7 + $0x18] sm:$0xff] }
  0xed   : > { %2658 = vmatprep.subr.bf16.mxu0 %v12610_v61  ;;  %v13215_v25 = vld [vmem:[%s13878_s7 + $0x58] sm:$0xff] }
  0xee   : > { %v652_v27 = vld [vmem:[%s13878_s7 + $0x3d8] sm:$0xff] }
  0xef   : > { %3045 = vmatpush1.bf16.msra.mxu1 %v12615_v0  ;;  %v14027_v0 = vadd.f32 %v790_v48, %v636_v45  ;;  %v13219_v41 = vld [vmem:[%s13878_s7 + $0x38] sm:$0xff] }
  0xf0   : > { %2659 = vmatpush1.bf16.msra.mxu0 %v12614_v63  ;;  %3046 = vmatprep.subr.bf16.mxu1 %v12618_v2  ;;  %v14025_v63 = vadd.f32 %v795_v47, %v640_v44  ;;  %v14029_v2 = vadd.f32 %v805_v52, %v648_v49 }
  0xf1   : > { %2660 = vmatprep.subr.bf16.mxu0 %v12616_v1 }
  0xf3   : > { %3047 = vmatpush1.bf16.msra.mxu1 %v12621_v4  ;;  %v14033_v4 = vadd.f32 %v815_v54, %v656_v51 }
  0xf4   : > { %2661 = vmatpush1.bf16.msra.mxu0 %v12620_v3  ;;  %v14031_v3 = vadd.f32 %v800_v53, %v644_v50  ;;  %v14096_v53 = vadd.f32 %v810_v11, %v652_v27  ;;  %v13224_v11 = vld [vmem:[%s13878_s7 + $0x80] sm:$0xff] }
 0x146   : > { %v663_v57 = vpop.xlane.xlu0 %662 }
 0x147   : > { %v820_v60 = vmul.f32 0.001953125, %v663_v57  ;;  %v673_v61 = vpop.xlane.xlu1 %672 }
 0x148   : > { %v822_v1 = vmul.f32 0.001953125, %v673_v61 }
 0x149   : > { %v14036_v6 = vsub.f32 %v13208_v5, %v820_v60  ;;  %v14039_v8 = vsub.f32 %v13209_v7, %v820_v60  ;;  %v14042_v10 = vsub.f32 %v13210_v9, %v820_v60  ;;  %v14045_v14 = vsub.f32 %v13211_v13, %v820_v60  ;;  %v13221_v60 = vld [vmem:[%s13878_s7 + $0x68] sm:$0xff]  ;;  %v13222_v7 = vld [vmem:[%s13878_s7 + $0x70] sm:$0xff] }
 0x14a   : > { %v668_v12 = vpop.xlane.xlu0 %667  ;;  %v14048_v16 = vsub.f32 %v13212_v15, %v822_v1  ;;  %v14051_v18 = vsub.f32 %v13213_v17, %v822_v1  ;;  %v14054_v20 = vsub.f32 %v13214_v19, %v822_v1  ;;  %v14061_v26 = vsub.f32 %v13215_v25, %v822_v1 }
 0x14b   : > { %19753 = vst [vmem:[#allocation18_spill] sm:$0xff] %v14042_v10  ;;  %19754 = vst [vmem:[#allocation19_spill] sm:$0xff] %v14045_v14  ;;  %v821_v21 = vmul.f32 0.001953125, %v668_v12  ;;  %v678_v22 = vpop.xlane.xlu1 %677  ;;  %v980_v23 = vmul.f32 %v14036_v6, %v14036_v6  ;;  %v981_v24 = vmul.f32 %v14039_v8, %v14039_v8  ;;  %v982_v29 = vmul.f32 %v14042_v10, %v14042_v10  ;;  %v13223_v12 = vld [vmem:[%s13878_s7 + $0x78] sm:$0xff] }
 0x14c   : > { %19755 = vst [vmem:[#allocation20_spill] sm:$0xff] %v14054_v20  ;;  %19756 = vst [vmem:[#allocation21_spill] sm:$0xff] %v14061_v26  ;;  %v823_v28 = vmul.f32 0.001953125, %v678_v22  ;;  %v988_v30 = vmul.f32 %v14048_v16, %v14048_v16  ;;  %v989_v31 = vmul.f32 %v14051_v18, %v14051_v18  ;;  %v983_v40 = vmul.f32 %v14045_v14, %v14045_v14 }
 0x14d   : > { %v1108_v32 = vadd.f32 %v981_v24, %v980_v23  ;;  %v14071_v34 = vsub.f32 %v13216_v33, %v821_v21  ;;  %v14074_v36 = vsub.f32 %v13217_v35, %v821_v21  ;;  %v14077_v38 = vsub.f32 %v13218_v37, %v821_v21  ;;  %v13227_v35 = vld [vmem:[%s13878_s7 + $0x98] sm:$0xff] }
 0x14e   : > { %v683_v39 = vpop.xlane.xlu0 %682  ;;  %v14082_v42 = vsub.f32 %v13219_v41, %v821_v21  ;;  %v990_v43 = vmul.f32 %v14054_v20, %v14054_v20  ;;  %v1118_v44 = vadd.f32 %v989_v31, %v988_v30  ;;  %v991_v52 = vmul.f32 %v14061_v26, %v14061_v26  ;;  %v12624_v20 = vld [vmem:[#allocation7 + $0x12c] ss:$16 sps:$4 sm:$0xff]  }
 0x14f   : > { %19757 = vst [vmem:[#allocation22_spill] sm:$0xff] %v14077_v38  ;;  %v824_v45 = vmul.f32 0.001953125, %v683_v39  ;;  %v1109_v46 = vadd.f32 %v1108_v32, %v982_v29  ;;  %v984_v47 = vmul.f32 %v14071_v34, %v14071_v34  ;;  %v985_v48 = vmul.f32 %v14074_v36, %v14074_v36  ;;  %v688_v49 = vpop.xlane.xlu1 %687  ;;  %v13226_v32 = vld [vmem:[%s13878_s7 + $0x90] sm:$0xff]  ;;  %3048 = vmatprep.subr.bf16.mxu1 %v12624_v20 }
 0x150   : > { %19758 = vst [vmem:[#allocation23_spill] sm:$0xff] %v14082_v42  ;;  %v986_v50 = vmul.f32 %v14077_v38, %v14077_v38  ;;  %v987_v51 = vmul.f32 %v14082_v42, %v14082_v42  ;;  %v14099_v57 = vsub.f32 %v13220_v56, %v823_v28  ;;  %v14102_v61 = vsub.f32 %v13221_v60, %v823_v28  ;;  %v13231_v56 = vld [vmem:[%s13878_s7 + $0xb8] sm:$0xff]  ;;  %v13248_v42 = vld [vmem:[%s13878_s7 + $0x160] sm:$0xff] }
 0x151   : > { %v1110_v54 = vadd.f32 %v1109_v46, %v983_v40  ;;  %v1113_v55 = vadd.f32 %v985_v48, %v984_v47  ;;  %v825_v1 = vmul.f32 0.001953125, %v688_v49  ;;  %v14105_v9 = vsub.f32 %v13222_v7, %v823_v28  ;;  %v13229_v46 = vld [vmem:[%s13878_s7 + $0xa8] sm:$0xff] }
 0x152   : > { %v693_v5 = vpop.xlane.xlu0 %692  ;;  %v14108_v13 = vsub.f32 %v13223_v12, %v823_v28  ;;  %v14111_v15 = vsub.f32 %v13224_v11, %v824_v45  ;;  %v1119_v19 = vadd.f32 %v1118_v44, %v990_v43  ;;  %v992_v21 = vmul.f32 %v14099_v57, %v14099_v57  ;;  %v13225_v28 = vld [vmem:[%s13878_s7 + $0x88] sm:$0xff]  ;;  %v13228_v43 = vld [vmem:[%s13878_s7 + $0xa0] sm:$0xff] }
 0x153   : > { %19759 = vst [vmem:[#allocation24_spill] sm:$0xff] %v14105_v9  ;;  %1111 = vadd.xlane.f32.xlu0 %v1110_v54  ;;  %v1114_v17 = vadd.f32 %v1113_v55, %v986_v50  ;;  %v993_v22 = vmul.f32 %v14102_v61, %v14102_v61  ;;  %v698_v23 = vpop.xlane.xlu1 %697  ;;  %v826_v24 = vmul.f32 0.001953125, %v693_v5  ;;  %v994_v25 = vmul.f32 %v14105_v9, %v14105_v9  ;;  %v13230_v54 = vld [vmem:[%s13878_s7 + $0xb0] sm:$0xff]  ;;  %v13232_v12 = vld [vmem:[%s13878_s7 + $0xc0] sm:$0xff]  ;;  %v13245_v9 = vld [vmem:[%s13878_s7 + $0x128] sm:$0xff] }
 0x154   : > { %19760 = vst [vmem:[#allocation25_spill] sm:$0xff] %v14108_v13  ;;  %v995_v27 = vmul.f32 %v14108_v13, %v14108_v13  ;;  %v14122_v29 = vsub.f32 %v13225_v28, %v824_v45  ;;  %v14125_v33 = vsub.f32 %v13226_v32, %v824_v45  ;;  %v14128_v37 = vsub.f32 %v13227_v35, %v824_v45  ;;  %v13247_v13 = vld [vmem:[%s13878_s7 + $0x138] sm:$0xff] }
 0x155   : > { %v1115_v30 = vadd.f32 %v1114_v17, %v987_v51  ;;  %v1123_v31 = vadd.f32 %v993_v22, %v992_v21  ;;  %v996_v40 = vmul.f32 %v14111_v15, %v14111_v15  ;;  %v14135_v44 = vsub.f32 %v13228_v43, %v825_v1  ;;  %v13233_v21 = vld [vmem:[%s13878_s7 + $0xc8] sm:$0xff] }
 0x156   : > { %19761 = vst [vmem:[#allocation26_spill] sm:$0xff] %v14125_v33  ;;  %19762 = vst [vmem:[#allocation27_spill] sm:$0xff] %v14128_v37  ;;  %v703_v39 = vpop.xlane.xlu0 %702  ;;  %v997_v41 = vmul.f32 %v14122_v29, %v14122_v29  ;;  %v14138_v47 = vsub.f32 %v13229_v46, %v825_v1  ;;  %v1120_v45 = vadd.f32 %v1119_v19, %v991_v52 }
 0x157   : > { %772 = vadd.xlane.f32.xlu0 %v14019_v58  ;;  %1116 = vadd.xlane.f32.xlu1 %v1115_v30  ;;  %v1124_v48 = vadd.f32 %v1123_v31, %v994_v25  ;;  %v998_v49 = vmul.f32 %v14125_v33, %v14125_v33  ;;  %v708_v50 = vpop.xlane.xlu1 %707  ;;  %v14144_v55 = vsub.f32 %v13230_v54, %v825_v1  ;;  %v827_v58 = vmul.f32 0.001953125, %v698_v23  ;;  %v13234_v30 = vld [vmem:[%s13878_s7 + $0xd0] sm:$0xff] }
 0x158   : > { %v1128_v51 = vadd.f32 %v997_v41, %v996_v40  ;;  %v14147_v60 = vsub.f32 %v13231_v56, %v825_v1  ;;  %v1000_v5 = vmul.f32 %v14135_v44, %v14135_v44  ;;  %v999_v52 = vmul.f32 %v14128_v37, %v14128_v37  ;;  %v13238_v54 = vld [vmem:[%s13878_s7 + $0xf0] sm:$0xff] }
 0x159   : > { %19763 = vst [vmem:[#allocation28_spill] sm:$0xff] %v14144_v55  ;;  %v1001_v7 = vmul.f32 %v14138_v47, %v14138_v47  ;;  %v14156_v11 = vsub.f32 %v13232_v12, %v826_v24  ;;  %v1125_v17 = vadd.f32 %v1124_v48, %v995_v27  ;;  %v1002_v1 = vmul.f32 %v14144_v55, %v14144_v55  ;;  %v13235_v27 = vld [vmem:[%s13878_s7 + $0xd8] sm:$0xff]  ;;  %v13273_v55 = vld [vmem:[%s13878_s7 + $0x228] sm:$0xff]  ;;  %v13278_v37 = vld [vmem:[%s13878_s7 + $0x210] sm:$0xff] }
 0x15a   : > { %19764 = vst [vmem:[#allocation29_spill] sm:$0xff] %v14147_v60  ;;  %v1129_v19 = vadd.f32 %v1128_v51, %v998_v49  ;;  %v14161_v22 = vsub.f32 %v13233_v21, %v826_v24  ;;  %v713_v25 = vpop.xlane.xlu0 %712  ;;  %v828_v23 = vmul.f32 0.001953125, %v703_v39  ;;  %v14165_v31 = vsub.f32 %v13234_v30, %v826_v24  ;;  %v13240_v30 = vld [vmem:[%s13878_s7 + $0x100] sm:$0xff] }
 0x15b   : > { %1121 = vadd.xlane.f32.xlu0 %v1120_v45  ;;  %787 = vadd.xlane.f32.xlu1 %v14021_v59  ;;  %v1133_v28 = vadd.f32 %v1001_v7, %v1000_v5  ;;  %v14168_v32 = vsub.f32 %v13235_v27, %v826_v24  ;;  %v1003_v35 = vmul.f32 %v14147_v60, %v14147_v60  ;;  %v829_v40 = vmul.f32 0.001953125, %v708_v50  ;;  %v718_v39 = vpop.xlane.xlu1 %717  ;;  %v13236_v45 = vld [vmem:[%s13878_s7 + $0xe0] sm:$0xff]  ;;  %v13237_v50 = vld [vmem:[%s13878_s7 + $0xe8] sm:$0xff]  ;;  %v13239_v5 = vld [vmem:[%s13878_s7 + $0xf8] sm:$0xff] }
 0x15c   : > { %19765 = vst [vmem:[#allocation30_spill] sm:$0xff] %v14165_v31  ;;  %v1004_v41 = vmul.f32 %v14156_v11, %v14156_v11  ;;  %v1005_v59 = vmul.f32 %v14161_v22, %v14161_v22  ;;  %v1006_v46 = vmul.f32 %v14165_v31, %v14165_v31  ;;  %v14181_v48 = vsub.f32 %v13236_v45, %v827_v58  ;;  %v13275_v60 = vld [vmem:[%s13878_s7 + $0x238] sm:$0xff] }
 0x15d   : > { %19766 = vst [vmem:[#allocation31_spill] sm:$0xff] %v14168_v32  ;;  %v1134_v43 = vadd.f32 %v1133_v28, %v1002_v1  ;;  %v1007_v24 = vmul.f32 %v14168_v32, %v14168_v32  ;;  %v14184_v51 = vsub.f32 %v13237_v50, %v827_v58  ;;  %v14187_v56 = vsub.f32 %v13238_v54, %v827_v58  ;;  %v13243_v50 = vld [vmem:[%s13878_s7 + $0x118] sm:$0xff] }
 0x15e   : > { %v1138_v49 = vadd.f32 %v1005_v59, %v1004_v41  ;;  %v14190_v7 = vsub.f32 %v13239_v5, %v827_v58  ;;  %v723_v12 = vpop.xlane.xlu0 %722  ;;  %v1130_v1 = vadd.f32 %v1129_v19, %v999_v52  ;;  %v14193_v21 = vmul.f32 0.001953125, %v718_v39  ;;  %v13242_v39 = vld [vmem:[%s13878_s7 + $0x110] sm:$0xff]  ;;  %v13244_v5 = vld [vmem:[%s13878_s7 + $0x120] sm:$0xff] }
 0x15f   : > { %19767 = vst [vmem:[#allocation32_spill] sm:$0xff] %v14187_v56  ;;  %782 = vadd.xlane.f32.xlu0 %v14023_v62  ;;  %1126 = vadd.xlane.f32.xlu1 %v1125_v17  ;;  %v1008_v28 = vmul.f32 %v14181_v48, %v14181_v48  ;;  %v14198_v27 = vsub.f32 %v13240_v30, %v828_v23  ;;  %v13241_v17 = vld [vmem:[%s13878_s7 + $0x108] sm:$0xff] }
 0x160   : > { %19768 = vst [vmem:[#allocation33_spill] sm:$0xff] %v14190_v7  ;;  %v1135_v41 = vadd.f32 %v1134_v43, %v1003_v35  ;;  %v1139_v59 = vadd.f32 %v1138_v49, %v1006_v46  ;;  %v1009_v58 = vmul.f32 %v14184_v51, %v14184_v51  ;;  %v1010_v62 = vmul.f32 %v14187_v56, %v14187_v56  ;;  %v728_v46 = vpop.xlane.xlu1 %727 }
 0x161   : > { %v1011_v52 = vmul.f32 %v14190_v7, %v14190_v7  ;;  %v14207_v19 = vsub.f32 %v13241_v17, %v828_v23  ;;  %v14210_v45 = vsub.f32 %v13242_v39, %v828_v23  ;;  %v14213_v54 = vsub.f32 %v13243_v50, %v828_v23  ;;  %v12622_v17 = vld [vmem:[#allocation7 + $0x124] ss:$16 sps:$4 sm:$0xff]  }
 0x162   : > { %v14215_v35 = vadd.f32 %v1139_v59, %v1007_v24  ;;  %v1143_v43 = vadd.f32 %v1009_v58, %v1008_v28  ;;  %v1012_v49 = vmul.f32 %v14198_v27, %v14198_v27  ;;  %v14220_v30 = vsub.f32 %v13244_v5, %v829_v40  ;;  %v12626_v59 = vld [vmem:[#allocation7 + $0x120] ss:$16 sps:$4 sm:$0xff]   ;;  %v12627_v58 = vld [vmem:[#allocation7 + $0x128] ss:$16 sps:$4 sm:$0xff]   ;;  %v733_v5 = vpop.xlane.xlu0 %732  ;;  %2662 = vmatprep.subr.bf16.mxu0 %v12622_v17 }
 0x163   : > { %19769 = vst [vmem:[#allocation34_spill] sm:$0xff] %v14210_v45  ;;  %19770 = vst [vmem:[#allocation35_spill] sm:$0xff] %v14213_v54  ;;  %797 = vadd.xlane.f32.xlu1 %v14025_v63  ;;  %1131 = vadd.xlane.f32.xlu0 %v1130_v1  ;;  %v1013_v23 = vmul.f32 %v14207_v19, %v14207_v19  ;;  %v1014_v24 = vmul.f32 %v14210_v45, %v14210_v45  ;;  %v830_v39 = vmul.f32 0.001953125, %v713_v25  ;;  %v13246_v1 = vld [vmem:[%s13878_s7 + $0x130] sm:$0xff]  ;;  %v12634_v45 = vld [vmem:[#allocation7 + $0x164] ss:$16 sps:$4 sm:$0xff]  }
 0x164   : > { %v1015_v28 = vmul.f32 %v14213_v54, %v14213_v54  ;;  %v1144_v50 = vadd.f32 %v1143_v43, %v1010_v62  ;;  %v14230_v63 = vsub.f32 %v13245_v9, %v829_v40  ;;  %v14233_v26 = vsub.f32 %v13246_v1, %v829_v40  ;;  %2663 = vmatpush1.bf16.msra.mxu0 %v12626_v59  ;;  %v13249_v43 = vld [vmem:[%s13878_s7 + $0x168] sm:$0xff]  ;;  %v13258_v54 = vld [vmem:[%s13878_s7 + $0x1b0] sm:$0xff] }
 0x165   : > { %v1148_v10 = vadd.f32 %v1013_v23, %v1012_v49  ;;  %v14236_v38 = vsub.f32 %v13247_v13, %v829_v40  ;;  %v1016_v14 = vmul.f32 %v14220_v30, %v14220_v30  ;;  %v14242_v25 = vsub.f32 %v13248_v42, %v14193_v21  ;;  %3049 = vmatpush1.bf16.msra.mxu1 %v12627_v58  ;;  %v12628_v40 = vld [vmem:[#allocation7 + $0x144] ss:$16 sps:$4 sm:$0xff]   ;;  %v12630_v49 = vld [vmem:[#allocation7 + $0x14c] ss:$16 sps:$4 sm:$0xff]   ;;  %v12633_v1 = vld [vmem:[#allocation7 + $0x148] ss:$16 sps:$4 sm:$0xff]   ;;  %v738_v58 = vpop.xlane.xlu1 %737 }
 0x166   : > { %19771 = vst [vmem:[#allocation36_spill] sm:$0xff] %v14233_v26  ;;  %v14244_v9 = vadd.f32 %v1144_v50, %v1011_v52  ;;  %v1017_v62 = vmul.f32 %v14230_v63, %v14230_v63  ;;  %v1018_v20 = vmul.f32 %v14233_v26, %v14233_v26  ;;  %v14252_v13 = vsub.f32 %v13249_v43, %v14193_v21  ;;  %v13250_v23 = vld [vmem:[%s13878_s7 + $0x170] sm:$0xff] }
 0x167   : > { %19772 = vst [vmem:[#allocation37_spill] sm:$0xff] %v14236_v38  ;;  %1136 = vadd.xlane.f32.xlu1 %v1135_v41  ;;  %792 = vadd.xlane.f32.xlu0 %v14027_v0  ;;  %v14255_v42 = vmul.f32 0.001953125, %v723_v12  ;;  %v1149_v52 = vadd.f32 %v1148_v10, %v1014_v24  ;;  %v1019_v17 = vmul.f32 %v14236_v38, %v14236_v38  ;;  %v12632_v50 = vld [vmem:[#allocation7 + $0x140] ss:$16 sps:$4 sm:$0xff]   ;;  %v833_v43 = vmul.f32 0.001953125, %v728_v46  ;;  %v13251_v41 = vld [vmem:[%s13878_s7 + $0x178] sm:$0xff] }
 0x168   : > { %v14261_v59 = vsub.f32 %v13250_v23, %v14193_v21  ;;  %v1153_v26 = vadd.f32 %v1017_v62, %v1016_v14  ;;  %v14265_v0 = vsub.f32 %v13251_v41, %v14193_v21  ;;  %v1024_v10 = vmul.f32 %v14242_v25, %v14242_v25  ;;  %2664 = vmatprep.subr.bf16.mxu0 %v12628_v40  ;;  %v13252_v23 = vld [vmem:[%s13878_s7 + $0x140] sm:$0xff]  ;;  %v743_v62 = vpop.xlane.xlu0 %742  ;;  %v13253_v40 = vld [vmem:[%s13878_s7 + $0x148] sm:$0xff] }
 0x169   : > { %3050 = vmatprep.subr.bf16.mxu1 %v12630_v49  ;;  %v14269_v12 = vadd.f32 %v1149_v52, %v1015_v28  ;;  %v1025_v24 = vmul.f32 %v14252_v13, %v14252_v13  ;;  %v14276_v14 = vsub.f32 %v13252_v23, %v830_v39  ;;  %2665 = vmatpush1.bf16.msra.mxu0 %v12632_v50  ;;  %v13254_v28 = vld [vmem:[%s13878_s7 + $0x150] sm:$0xff]  ;;  %v14288_v50 = vmul.f32 0.001953125, %v733_v5 }
 0x16a   : > { %19773 = vst [vmem:[#allocation38_spill] sm:$0xff] %v14261_v59  ;;  %19774 = vst [vmem:[#allocation39_spill] sm:$0xff] %v14265_v0  ;;  %v1026_v46 = vmul.f32 %v14261_v59, %v14261_v59  ;;  %v1154_v21 = vadd.f32 %v1153_v26, %v1018_v20  ;;  %v1027_v41 = vmul.f32 %v14265_v0, %v14265_v0  ;;  %3051 = vmatpush1.bf16.msra.mxu1 %v12633_v1  ;;  %v12636_v38 = vld [vmem:[#allocation7 + $0x16c] ss:$16 sps:$4 sm:$0xff]   ;;  %v13255_v20 = vld [vmem:[%s13878_s7 + $0x158] sm:$0xff] }
 0x16b   : > { %v14281_v49 = vsub.f32 %v13253_v40, %v830_v39  ;;  %v14284_v52 = vsub.f32 %v13254_v28, %v830_v39  ;;  %807 = vadd.xlane.f32.xlu1 %v14029_v2  ;;  %1141 = vadd.xlane.f32.xlu0 %v14215_v35  ;;  %v1163_v26 = vadd.f32 %v1025_v24, %v1024_v10  ;;  %v12638_v28 = vld [vmem:[#allocation7 + $0x160] ss:$16 sps:$4 sm:$0xff]   ;;  %v12639_v59 = vld [vmem:[#allocation7 + $0x168] ss:$16 sps:$4 sm:$0xff]   ;;  %v14295_v1 = vmul.f32 0.001953125, %v738_v58 }
 0x16c   : > { %v14291_v23 = vsub.f32 %v13255_v20, %v830_v39  ;;  %v1020_v40 = vmul.f32 %v14276_v14, %v14276_v14  ;;  %v14297_v0 = vadd.f32 %v1154_v21, %v1019_v17  ;;  %2666 = vmatprep.subr.bf16.mxu0 %v12634_v45  ;;  %3052 = vmatprep.subr.bf16.mxu1 %v12636_v38  ;;  %v13256_v10 = vld [vmem:[%s13878_s7 + $0x1a0] sm:$0xff]  ;;  %v13257_v58 = vld [vmem:[%s13878_s7 + $0x1a8] sm:$0xff]  ;;  %v748_v21 = vpop.xlane.xlu1 %747 }
 0x16d   : > { %19775 = vst [vmem:[#allocation40_spill] sm:$0xff] %v14284_v52  ;;  %v1021_v2 = vmul.f32 %v14281_v49, %v14281_v49  ;;  %v1022_v35 = vmul.f32 %v14284_v52, %v14284_v52  ;;  %v1164_v39 = vadd.f32 %v1163_v26, %v1026_v46  ;;  %v14306_v24 = vsub.f32 %v13256_v10, %v833_v43  ;;  %v13259_v52 = vld [vmem:[%s13878_s7 + $0x1b8] sm:$0xff]  ;;  %v13260_v38 = vld [vmem:[%s13878_s7 + $0x180] sm:$0xff]  ;;  %v753_v10 = vpop.xlane.xlu0 %752 }
 0x16e   : > { %19776 = vst [vmem:[#allocation41_spill] sm:$0xff] %v14291_v23  ;;  %v1023_v5 = vmul.f32 %v14291_v23, %v14291_v23  ;;  %v14309_v17 = vsub.f32 %v13257_v58, %v833_v43  ;;  %2667 = vmatpush1.bf16.msra.mxu0 %v12638_v28  ;;  %v14312_v56 = vsub.f32 %v13258_v54, %v833_v43  ;;  %v12640_v46 = vld [vmem:[#allocation7 + $0x184] ss:$16 sps:$4 sm:$0xff]   ;;  %v12642_v26 = vld [vmem:[#allocation7 + $0x18c] ss:$16 sps:$4 sm:$0xff]  }
 0x16f   : > { %v1158_v20 = vadd.f32 %v1021_v2, %v1020_v40  ;;  %v14315_v31 = vsub.f32 %v13259_v52, %v833_v43  ;;  %v14319_v45 = vsub.f32 %v13260_v38, %v14255_v42  ;;  %3053 = vmatpush1.bf16.msra.mxu1 %v12639_v59  ;;  %1146 = vadd.xlane.f32.xlu1 %v14244_v9  ;;  %v14323_v40 = vmul.f32 0.001953125, %v743_v62  ;;  %v12644_v28 = vld [vmem:[#allocation7 + $0x180] ss:$16 sps:$4 sm:$0xff]   ;;  %v12645_v59 = vld [vmem:[#allocation7 + $0x188] ss:$16 sps:$4 sm:$0xff]  }
 0x170   : > { %19777 = vst [vmem:[#allocation42_spill] sm:$0xff] %v14312_v56  ;;  %802 = vadd.xlane.f32.xlu0 %v14031_v3  ;;  %v14325_v54 = vadd.f32 %v1164_v39, %v1027_v41  ;;  %v1032_v43 = vmul.f32 %v14306_v24, %v14306_v24  ;;  %v1033_v52 = vmul.f32 %v14309_v17, %v14309_v17  ;;  %v13261_v62 = vld [vmem:[%s13878_s7 + $0x188] sm:$0xff]  ;;  %v13262_v58 = vld [vmem:[%s13878_s7 + $0x190] sm:$0xff]  ;;  %v13263_v23 = vld [vmem:[%s13878_s7 + $0x198] sm:$0xff] }
 0x171   : > { %19778 = vst [vmem:[#allocation43_spill] sm:$0xff] %v14315_v31  ;;  %v1159_v2 = vadd.f32 %v1158_v20, %v1022_v35  ;;  %v1034_v9 = vmul.f32 %v14312_v56, %v14312_v56  ;;  %v1035_v3 = vmul.f32 %v14315_v31, %v14315_v31  ;;  %v14337_v41 = vsub.f32 %v13261_v62, %v14255_v42  ;;  %v763_v7 = vpop.xlane.xlu0 %762 }
 0x172   : > { %2668 = vmatprep.subr.bf16.mxu0 %v12640_v46  ;;  %v1173_v39 = vadd.f32 %v1033_v52, %v1032_v43  ;;  %v14341_v38 = vsub.f32 %v13262_v58, %v14255_v42  ;;  %v14345_v35 = vsub.f32 %v13263_v23, %v14255_v42  ;;  %v1028_v20 = vmul.f32 %v14319_v45, %v14319_v45  ;;  %v13264_v43 = vld [vmem:[%s13878_s7 + $0x1e0] sm:$0xff]  ;;  %v12646_v42 = vld [vmem:[#allocation7 + $0x1a4] ss:$16 sps:$4 sm:$0xff]  }
 0x173   : > { %3054 = vmatprep.subr.bf16.mxu1 %v12642_v26  ;;  %v14349_v56 = vmul.f32 0.001953125, %v748_v21  ;;  %v14351_v31 = vadd.f32 %v1159_v2, %v1023_v5  ;;  %v1029_v46 = vmul.f32 %v14337_v41, %v14337_v41  ;;  %v14357_v52 = vsub.f32 %v13264_v43, %v14295_v1  ;;  %2669 = vmatpush1.bf16.msra.mxu0 %v12644_v28  ;;  %v12648_v23 = vld [vmem:[#allocation7 + $0x1ac] ss:$16 sps:$4 sm:$0xff]   ;;  %v12650_v28 = vld [vmem:[#allocation7 + $0x1a0] ss:$16 sps:$4 sm:$0xff]   ;;  %v13265_v58 = vld [vmem:[%s13878_s7 + $0x1e8] sm:$0xff] }
 0x174   : > { %19779 = vst [vmem:[#allocation44_spill] sm:$0xff] %v14341_v38  ;;  %19780 = vst [vmem:[#allocation45_spill] sm:$0xff] %v14345_v35  ;;  %3055 = vmatpush1.bf16.msra.mxu1 %v12645_v59  ;;  %817 = vadd.xlane.f32.xlu1 %v14033_v4  ;;  %v14361_v5 = vmul.f32 0.001953125, %v753_v10  ;;  %v1174_v21 = vadd.f32 %v1173_v39, %v1034_v9  ;;  %v1030_v26 = vmul.f32 %v14341_v38, %v14341_v38  ;;  %v758_v59 = vpop.xlane.xlu1 %757  ;;  %v13266_v4 = vld [vmem:[%s13878_s7 + $0x1f0] sm:$0xff]  ;;  %v13267_v10 = vld [vmem:[%s13878_s7 + $0x1f8] sm:$0xff] }
 0x175   : > { %1151 = vadd.xlane.f32.xlu0 %v14269_v12  ;;  %v1031_v2 = vmul.f32 %v14345_v35, %v14345_v35  ;;  %v1168_v62 = vadd.f32 %v1029_v46, %v1028_v20  ;;  %v14369_v43 = vsub.f32 %v13265_v58, %v14295_v1  ;;  %v14373_v12 = vsub.f32 %v13266_v4, %v14295_v1  ;;  %v12651_v39 = vld [vmem:[#allocation7 + $0x1a8] ss:$16 sps:$4 sm:$0xff]   ;;  %v13268_v20 = vld [vmem:[%s13878_s7 + $0x1c0] sm:$0xff] }
 0x176   : > { %v14377_v9 = vsub.f32 %v13267_v10, %v14295_v1  ;;  %2670 = vmatprep.subr.bf16.mxu0 %v12646_v42  ;;  %v14379_v38 = vadd.f32 %v1174_v21, %v1035_v3  ;;  %v1040_v35 = vmul.f32 %v14357_v52, %v14357_v52  ;;  %v14385_v46 = vsub.f32 %v13268_v20, %v14288_v50  ;;  %v13269_v58 = vld [vmem:[%s13878_s7 + $0x1c8] sm:$0xff]  ;;  %v12654_v20 = vld [vmem:[#allocation7 + $0x1cc] ss:$16 sps:$4 sm:$0xff]  }
 0x177   : > { %19781 = vst [vmem:[#allocation46_spill] sm:$0xff] %v14373_v12  ;;  %v14389_v4 = vsub.f32 %v13269_v58, %v14288_v50  ;;  %3056 = vmatprep.subr.bf16.mxu1 %v12648_v23  ;;  %v1169_v1 = vadd.f32 %v1168_v62, %v1030_v26  ;;  %v1041_v42 = vmul.f32 %v14369_v43, %v14369_v43  ;;  %v12652_v10 = vld [vmem:[#allocation7 + $0x1c4] ss:$16 sps:$4 sm:$0xff]   ;;  %v14399_v58 = vmul.f32 0.001953125, %v758_v59  ;;  %v13270_v23 = vld [vmem:[%s13878_s7 + $0x1d0] sm:$0xff]  ;;  %v13272_v59 = vld [vmem:[%s13878_s7 + $0x220] sm:$0xff] }
 0x178   : > { %19782 = vst [vmem:[#allocation47_spill] sm:$0xff] %v14377_v9  ;;  %v1042_v3 = vmul.f32 %v14373_v12, %v14373_v12  ;;  %v1043_v21 = vmul.f32 %v14377_v9, %v14377_v9  ;;  %2671 = vmatpush1.bf16.msra.mxu0 %v12650_v28  ;;  %1156 = vadd.xlane.f32.xlu1 %v14297_v0  ;;  %v13271_v62 = vld [vmem:[%s13878_s7 + $0x1d8] sm:$0xff] }
 0x179   : > { %812 = vadd.xlane.f32.xlu0 %v14096_v53  ;;  %v14403_v26 = vsub.f32 %v13270_v23, %v14288_v50  ;;  %v14407_v12 = vsub.f32 %v13271_v62, %v14288_v50  ;;  %v1036_v28 = vmul.f32 %v14385_v46, %v14385_v46  ;;  %v1170_v9 = vadd.f32 %v1169_v1, %v1031_v2  ;;  %v12656_v23 = vld [vmem:[#allocation7 + $0x1c0] ss:$16 sps:$4 sm:$0xff]  }
 0x17a   : > { %v1183_v0 = vadd.f32 %v1041_v42, %v1040_v35  ;;  %v1037_v53 = vmul.f32 %v14389_v4, %v14389_v4  ;;  %v14415_v32 = vsub.f32 %v13272_v59, %v14349_v56  ;;  %3057 = vmatpush1.bf16.msra.mxu1 %v12651_v39  ;;  %v14423_v2 = vsub.f32 %v13273_v55, %v14349_v56  ;;  %v13274_v35 = vld [vmem:[%s13878_s7 + $0x230] sm:$0xff]  ;;  %v12657_v42 = vld [vmem:[#allocation7 + $0x1c8] ss:$16 sps:$4 sm:$0xff]   ;;  %v768_v59 = vpop.xlane.xlu1 %767  ;;  %v12658_v55 = vld [vmem:[#allocation7 + $0x1e4] ss:$16 sps:$4 sm:$0xff]  }
 0x17b   : > { %19783 = vst [vmem:[#allocation48_spill] sm:$0xff] %v14403_v26  ;;  %19784 = vst [vmem:[#allocation49_spill] sm:$0xff] %v14407_v12  ;;  %v1038_v50 = vmul.f32 %v14403_v26, %v14403_v26  ;;  %v1039_v62 = vmul.f32 %v14407_v12, %v14407_v12  ;;  %v14427_v1 = vsub.f32 %v13274_v35, %v14349_v56  ;;  %2672 = vmatprep.subr.bf16.mxu0 %v12652_v10 }
 0x17c   : > { %19785 = vst [vmem:[#allocation50_spill] sm:$0xff] %v14415_v32  ;;  %19786 = vst [vmem:[#allocation51_spill] sm:$0xff] %v14423_v2  ;;  %v1184_v39 = vadd.f32 %v1183_v0, %v1042_v3  ;;  %v1178_v33 = vadd.f32 %v1037_v53, %v1036_v28  ;;  %v14431_v26 = vsub.f32 %v13275_v60, %v14349_v56  ;;  %3058 = vmatprep.subr.bf16.mxu1 %v12654_v20  ;;  %v13276_v56 = vld [vmem:[%s13878_s7 + $0x200] sm:$0xff] }
 0x17d   : > { %19787 = vst [vmem:[#allocation52_spill] sm:$0xff] %v14427_v1  ;;  %v1048_v12 = vmul.f32 %v14415_v32, %v14415_v32  ;;  %1166 = vadd.xlane.f32.xlu1 %v14325_v54  ;;  %1161 = vadd.xlane.f32.xlu0 %v14351_v31  ;;  %v14437_v10 = vmul.f32 0.001953125, %v763_v7  ;;  %v1049_v3 = vmul.f32 %v14423_v2, %v14423_v2  ;;  %v13277_v31 = vld [vmem:[%s13878_s7 + $0x208] sm:$0xff]  ;;  %v12660_v53 = vld [vmem:[#allocation7 + $0x1ec] ss:$16 sps:$4 sm:$0xff]   ;;  %v13315_v2 = vld [vmem:[%s13878_s7 + $0x378] sm:$0xff] }
 0x17e   : > { %19788 = vst [vmem:[#allocation53_spill] sm:$0xff] %v14431_v26  ;;  %v1050_v60 = vmul.f32 %v14427_v1, %v14427_v1  ;;  %v14445_v28 = vsub.f32 %v13276_v56, %v14323_v40  ;;  %v1185_v20 = vadd.f32 %v1184_v39, %v1043_v21  ;;  %v1179_v0 = vadd.f32 %v1178_v33, %v1038_v50  ;;  %v13279_v56 = vld [vmem:[%s13878_s7 + $0x218] sm:$0xff]  ;;  %v12662_v50 = vld [vmem:[#allocation7 + $0x1e0] ss:$16 sps:$4 sm:$0xff]  }
 0x17f   : > { %v1051_v54 = vmul.f32 %v14431_v26, %v14431_v26  ;;  %v14451_v7 = vsub.f32 %v13277_v31, %v14323_v40  ;;  %2673 = vmatpush1.bf16.msra.mxu0 %v12656_v23  ;;  %v1193_v35 = vadd.f32 %v1049_v3, %v1048_v12  ;;  %v14455_v1 = vsub.f32 %v13278_v37, %v14323_v40  ;;  %v13280_v31 = vld [vmem:[%s13878_s7 + $0x260] sm:$0xff]  ;;  %v13281_v37 = vld [vmem:[%s13878_s7 + $0x268] sm:$0xff]  ;;  %v13282_v32 = vld [vmem:[%s13878_s7 + $0x270] sm:$0xff] }
 0x180   : > { %19789 = vst [vmem:[#allocation54_spill] sm:$0xff] %v14445_v28  ;;  %v14459_v21 = vsub.f32 %v13279_v56, %v14323_v40  ;;  %v1044_v33 = vmul.f32 %v14445_v28, %v14445_v28  ;;  %3059 = vmatpush1.bf16.msra.mxu1 %v12657_v42  ;;  %v1180_v39 = vadd.f32 %v1179_v0, %v1039_v62  ;;  %v12663_v40 = vld [vmem:[#allocation7 + $0x1e8] ss:$16 sps:$4 sm:$0xff]   ;;  %v841_v62 = vmul.f32 0.001953125, %v768_v59 }
 0x181   : > { %19790 = vst [vmem:[#allocation55_spill] sm:$0xff] %v14451_v7  ;;  %19791 = vst [vmem:[#allocation56_spill] sm:$0xff] %v14455_v1  ;;  %v1045_v23 = vmul.f32 %v14451_v7, %v14451_v7  ;;  %v14467_v12 = vsub.f32 %v13280_v31, %v14399_v58  ;;  %v14471_v3 = vsub.f32 %v13281_v37, %v14399_v58  ;;  %2674 = vmatprep.subr.bf16.mxu0 %v12658_v55  ;;  %v778_v31 = vpop.xlane.xlu1 %777  ;;  %v13283_v37 = vld [vmem:[%s13878_s7 + $0x278] sm:$0xff] }
 0x182   : > { %19792 = vst [vmem:[#allocation57_spill] sm:$0xff] %v14459_v21  ;;  %1176 = vadd.xlane.f32.xlu1 %v14379_v38  ;;  %1171 = vadd.xlane.f32.xlu0 %v1170_v9  ;;  %v1194_v42 = vadd.f32 %v1193_v35, %v1050_v60  ;;  %v1046_v0 = vmul.f32 %v14455_v1, %v14455_v1  ;;  %v13284_v35 = vld [vmem:[%s13878_s7 + $0x240] sm:$0xff] }
 0x183   : > { %19793 = vst [vmem:[#allocation58_spill] sm:$0xff] %v14467_v12  ;;  %19794 = vst [vmem:[#allocation59_spill] sm:$0xff] %v14471_v3  ;;  %v1047_v56 = vmul.f32 %v14459_v21, %v14459_v21  ;;  %v1188_v26 = vadd.f32 %v1045_v23, %v1044_v33  ;;  %v14480_v55 = vsub.f32 %v13282_v32, %v14399_v58  ;;  %3060 = vmatprep.subr.bf16.mxu1 %v12660_v53  ;;  %v13285_v23 = vld [vmem:[%s13878_s7 + $0x248] sm:$0xff]  ;;  %v13286_v53 = vld [vmem:[%s13878_s7 + $0x250] sm:$0xff] }
 0x184   : > { %v14484_v38 = vsub.f32 %v13283_v37, %v14399_v58  ;;  %v1056_v9 = vmul.f32 %v14467_v12, %v14467_v12  ;;  %v1195_v59 = vadd.f32 %v1194_v42, %v1051_v54  ;;  %v1057_v60 = vmul.f32 %v14471_v3, %v14471_v3  ;;  %2675 = vmatpush1.bf16.msra.mxu0 %v12662_v50  ;;  %v13311_v3 = vld [vmem:[%s13878_s7 + $0x318] sm:$0xff] }
 0x185   : > { %19795 = vst [vmem:[#allocation60_spill] sm:$0xff] %v14480_v55  ;;  %v14492_v33 = vsub.f32 %v13284_v35, %v14361_v5  ;;  %v14496_v32 = vsub.f32 %v13285_v23, %v14361_v5  ;;  %v1189_v58 = vadd.f32 %v1188_v26, %v1046_v0  ;;  %v1058_v37 = vmul.f32 %v14480_v55, %v14480_v55  ;;  %v13287_v26 = vld [vmem:[%s13878_s7 + $0x258] sm:$0xff] }
 0x186   : > { %19796 = vst [vmem:[#allocation61_spill] sm:$0xff] %v14484_v38  ;;  %v1059_v54 = vmul.f32 %v14484_v38, %v14484_v38  ;;  %v14504_v42 = vsub.f32 %v13286_v53, %v14361_v5  ;;  %3061 = vmatpush1.bf16.msra.mxu1 %v12663_v40  ;;  %1186 = vadd.xlane.f32.xlu1 %v1185_v20  ;;  %v843_v35 = vmul.f32 0.001953125, %v778_v31  ;;  %v13288_v40 = vld [vmem:[%s13878_s7 + $0x2a0] sm:$0xff] }
 0x187   : > { %19797 = vst [vmem:[#allocation62_spill] sm:$0xff] %v14492_v33  ;;  %19798 = vst [vmem:[#allocation63_spill] sm:$0xff] %v14496_v32  ;;  %1181 = vadd.xlane.f32.xlu0 %v1180_v39  ;;  %v1203_v23 = vadd.f32 %v1057_v60, %v1056_v9  ;;  %v14508_v50 = vsub.f32 %v13287_v26, %v14361_v5  ;;  %v1052_v0 = vmul.f32 %v14492_v33, %v14492_v33  ;;  %v13289_v5 = vld [vmem:[%s13878_s7 + $0x2a8] sm:$0xff]  ;;  %v13290_v26 = vld [vmem:[%s13878_s7 + $0x2b0] sm:$0xff] }
 0x188   : > { %19799 = vst [vmem:[#allocation64_spill] sm:$0xff] %v14504_v42  ;;  %v1190_v55 = vadd.f32 %v1189_v58, %v1047_v56  ;;  %v1053_v53 = vmul.f32 %v14496_v32, %v14496_v32  ;;  %v1054_v20 = vmul.f32 %v14504_v42, %v14504_v42  ;;  %v14517_v39 = vsub.f32 %v13288_v40, %v841_v62  ;;  %v13291_v58 = vld [vmem:[%s13878_s7 + $0x2b8] sm:$0xff] }
 0x189   : > { %19800 = vst [vmem:[#allocation65_spill] sm:$0xff] %v14508_v50  ;;  %v1204_v31 = vadd.f32 %v1203_v23, %v1058_v37  ;;  %v1055_v9 = vmul.f32 %v14508_v50, %v14508_v50  ;;  %v14522_v60 = vsub.f32 %v13289_v5, %v841_v62  ;;  %v14525_v38 = vsub.f32 %v13290_v26, %v841_v62  ;;  %v13292_v37 = vld [vmem:[%s13878_s7 + $0x280] sm:$0xff]  ;;  %v13297_v50 = vld [vmem:[%s13878_s7 + $0x2e8] sm:$0xff] }
 0x18a   : > { %19801 = vst [vmem:[#allocation66_spill] sm:$0xff] %v14517_v39  ;;  %v1198_v56 = vadd.f32 %v1053_v53, %v1052_v0  ;;  %v14528_v1 = vsub.f32 %v13291_v58, %v841_v62  ;;  %v1064_v40 = vmul.f32 %v14517_v39, %v14517_v39  ;;  %v14534_v23 = vsub.f32 %v13292_v37, %v14437_v10  ;;  %v13293_v58 = vld [vmem:[%s13878_s7 + $0x288] sm:$0xff]  ;;  %v13294_v37 = vld [vmem:[%s13878_s7 + $0x290] sm:$0xff] }
 0x18b   : > { %19802 = vst [vmem:[#allocation67_spill] sm:$0xff] %v14522_v60  ;;  %19803 = vst [vmem:[#allocation68_spill] sm:$0xff] %v14525_v38  ;;  %1196 = vadd.xlane.f32.xlu1 %v1195_v59  ;;  %1191 = vadd.xlane.f32.xlu0 %v1190_v55  ;;  %v1205_v5 = vadd.f32 %v1204_v31, %v1059_v54  ;;  %v1065_v26 = vmul.f32 %v14522_v60, %v14522_v60  ;;  %v13295_v54 = vld [vmem:[%s13878_s7 + $0x298] sm:$0xff] }
 0x18c   : > { %19804 = vst [vmem:[#allocation69_spill] sm:$0xff] %v14528_v1  ;;  %19805 = vst [vmem:[#allocation70_spill] sm:$0xff] %v14534_v23  ;;  %v1066_v0 = vmul.f32 %v14525_v38, %v14525_v38  ;;  %v1199_v62 = vadd.f32 %v1198_v56, %v1054_v20  ;;  %v1067_v53 = vmul.f32 %v14528_v1, %v14528_v1  ;;  %v13296_v56 = vld [vmem:[%s13878_s7 + $0x2e0] sm:$0xff] }
 0x18d   : > { %v14544_v42 = vsub.f32 %v13293_v58, %v14437_v10  ;;  %v14548_v55 = vsub.f32 %v13294_v37, %v14437_v10  ;;  %v1213_v59 = vadd.f32 %v1065_v26, %v1064_v40  ;;  %v14552_v31 = vsub.f32 %v13295_v54, %v14437_v10  ;;  %v13298_v10 = vld [vmem:[%s13878_s7 + $0x2f0] sm:$0xff]  ;;  %v13299_v54 = vld [vmem:[%s13878_s7 + $0x2f8] sm:$0xff] }
 0x18e   : > { %v1060_v20 = vmul.f32 %v14534_v23, %v14534_v23  ;;  %v14557_v38 = vsub.f32 %v13296_v56, %v843_v35  ;;  %v1200_v1 = vadd.f32 %v1199_v62, %v1055_v9  ;;  %v14564_v21 = vsub.f32 %v13297_v50, %v843_v35 }
 0x18f   : > { %19806 = vst [vmem:[#allocation71_spill] sm:$0xff] %v14544_v42  ;;  %19807 = vst [vmem:[#allocation72_spill] sm:$0xff] %v14548_v55  ;;  %v1061_v58 = vmul.f32 %v14544_v42, %v14544_v42  ;;  %v1062_v37 = vmul.f32 %v14548_v55, %v14548_v55  ;;  %1206 = vadd.xlane.f32.xlu1 %v1205_v5  ;;  %v1214_v40 = vadd.f32 %v1213_v59, %v1066_v0 }
 0x190   : > { %19808 = vst [vmem:[#allocation73_spill] sm:$0xff] %v14552_v31  ;;  %19809 = vst [vmem:[#allocation74_spill] sm:$0xff] %v14557_v38  ;;  %v14567_v26 = vsub.f32 %v13298_v10, %v843_v35  ;;  %v14570_v39 = vsub.f32 %v13299_v54, %v843_v35  ;;  %1201 = vadd.xlane.f32.xlu0 %v1200_v1  ;;  %v1063_v9 = vmul.f32 %v14552_v31, %v14552_v31  ;;  %v12669_v54 = vld [vmem:[#allocation7 + $0x20c] ss:$16 sps:$4 sm:$0xff]  }
 0x191   : > { %19810 = vst [vmem:[#allocation75_spill] sm:$0xff] %v14564_v21  ;;  %v1208_v62 = vadd.f32 %v1061_v58, %v1060_v20  ;;  %v1072_v56 = vmul.f32 %v14557_v38, %v14557_v38  ;;  %v1073_v50 = vmul.f32 %v14564_v21, %v14564_v21  ;;  %v1215_v55 = vadd.f32 %v1214_v40, %v1067_v53  ;;  %v12666_v58 = vld [vmem:[#allocation7 + $0x204] ss:$16 sps:$4 sm:$0xff]  }
 0x192   : > { %19811 = vst [vmem:[#allocation76_spill] sm:$0xff] %v14567_v26  ;;  %19812 = vst [vmem:[#allocation77_spill] sm:$0xff] %v14570_v39  ;;  %v1074_v5 = vmul.f32 %v14567_v26, %v14567_v26  ;;  %v1075_v35 = vmul.f32 %v14570_v39, %v14570_v39  ;;  %2837 = vmatprep.subr.bf16.mxu0 %v12666_v58  ;;  %3223 = vmatprep.subr.bf16.mxu1 %v12669_v54  ;;  %v1493_v53 = vlaneseq  ;;  %v13302_v58 = vld [vmem:[%s13878_s7 + $0x2d0] sm:$0xff] }
 0x193   : > { %v1209_v0 = vadd.f32 %v1208_v62, %v1062_v37  ;;  %v1223_v59 = vadd.f32 %v1073_v50, %v1072_v56  ;;  %1216 = vadd.xlane.f32.xlu1 %v1215_v55  ;;  %v13306_v39 = vld [vmem:[%s13878_s7 + $0x330] sm:$0xff] }
 0x194   : > { %v14582_v62 = vshrl.u32 %v1493_v53, 7  ;;  %v657_v53 = vld [vmem:[#allocation5] sm:$0xf] }
 0x195   : > { %v1210_v1 = vadd.f32 %v1209_v0, %v1063_v9  ;;  %v1224_v10 = vadd.f32 %v1223_v59, %v1074_v5  ;;  %v13300_v0 = vld [vmem:[%s13878_s7 + $0x2c0] sm:$0xff]  ;;  %v13301_v59 = vld [vmem:[%s13878_s7 + $0x2c8] sm:$0xff] }
 0x196   : > { %19813 = vst [vmem:[#allocation78_spill] sm:$0xff] %v14582_v62 }
 0x197   : > { %1211 = vadd.xlane.f32.xlu0 %v1210_v1  ;;  %v1225_v20 = vadd.f32 %v1224_v10, %v1075_v35  ;;  %v14591_v10 = vsub.s32 1, %v14582_v62 }
 0x199   : > { %1226 = vadd.xlane.f32.xlu1 %v1225_v20  ;;  %19816 = vst [vmem:[#allocation81_spill] sm:$0xff] %v14591_v10  ;;  %v14621_v21 = vrot.slane %v657_v53, %v14591_v10 }
 0x1e0   : > { %v1112_v40 = vpop.xlane.xlu0 %1111 }
 0x1e1   : > { %v1268_v26 = vmul.f32 0.001953125, %v1112_v40 }
 0x1e3   : > { %v1300_v37 = vadd.f32 1e-06, %v1268_v26 }
 0x1e4   : > { %v1117_v56 = vpop.xlane.xlu1 %1116  ;;  %v773_v55 = vpop.xlane.xlu0 %772 }
 0x1e5   : > { %13144 = vrsqrt.f32 %v1300_v37  ;;  %v1269_v9 = vmul.f32 0.001953125, %v1117_v56  ;;  %v842_v50 = vmul.f32 0.001953125, %v773_v55  ;;  %v14601_v55 = vld [vmem:[%s19307_s2] sm:$0xf] }
 0x1e7   : > { %v1301_v5 = vadd.f32 1e-06, %v1269_v9  ;;  %v14585_v35 = vsub.f32 %v13300_v0, %v842_v50  ;;  %v14588_v1 = vsub.f32 %v13301_v59, %v842_v50  ;;  %v14594_v54 = vsub.f32 %v13302_v58, %v842_v50  ;;  %v13303_v9 = vld [vmem:[%s13878_s7 + $0x2d8] sm:$0xff] }
 0x1e8   : > { %v788_v26 = vpop.xlane.xlu1 %787  ;;  %v1122_v20 = vpop.xlane.xlu0 %1121  ;;  %v14604_v0 = vsub.f32 %v13303_v9, %v842_v50  ;;  %v14609_v58 = vsub.s32 0, %v14582_v62  ;;  %v13307_v62 = vld [vmem:[%s13878_s7 + $0x338] sm:$0xff] }
 0x1e9   : > { %19814 = vst [vmem:[#allocation79_spill] sm:$0xff] %v14585_v35  ;;  %19815 = vst [vmem:[#allocation80_spill] sm:$0xff] %v14588_v1  ;;  %13146 = vrsqrt.f32 %v1301_v5  ;;  %v845_v40 = vmul.f32 0.001953125, %v788_v26  ;;  %v1270_v37 = vmul.f32 0.001953125, %v1122_v20  ;;  %v1068_v56 = vmul.f32 %v14585_v35, %v14585_v35  ;;  %v13304_v5 = vld [vmem:[%s13878_s7 + $0x320] sm:$0xff]  ;;  %v13305_v20 = vld [vmem:[%s13878_s7 + $0x328] sm:$0xff] }
 0x1ea   : > { %19817 = vst [vmem:[#allocation82_spill] sm:$0xff] %v14594_v54  ;;  %19818 = vst [vmem:[#allocation83_spill] sm:$0xff] %v14604_v0  ;;  %v1069_v59 = vmul.f32 %v14588_v1, %v14588_v1  ;;  %v1070_v1 = vmul.f32 %v14594_v54, %v14594_v54  ;;  %v1071_v12 = vmul.f32 %v14604_v0, %v14604_v0 }
 0x1eb   : > { %19819 = vst [vmem:[#allocation84_spill] sm:$0xff] %v14609_v58  ;;  %v14612_v26 = vsub.f32 %v13304_v5, %v845_v40  ;;  %v14615_v35 = vsub.f32 %v13305_v20, %v845_v40  ;;  %v14618_v38 = vsub.f32 %v13306_v39, %v845_v40  ;;  %v14626_v5 = vsub.f32 %v13307_v62, %v845_v40 }
 0x1ec   : > { %v1127_v50 = vpop.xlane.xlu1 %1126  ;;  %v783_v9 = vpop.xlane.xlu0 %782  ;;  %v1218_v31 = vadd.f32 %v1069_v59, %v1068_v56  ;;  %v14630_v20 = vrot.slane %v14601_v55, %v14591_v10  ;;  %v1302_v39 = vadd.f32 1e-06, %v1270_v37  ;;  %v13308_v37 = vld [vmem:[%s13878_s7 + $0x300] sm:$0xff] }
 0x1ed   : > { %19820 = vst [vmem:[#allocation85_spill] sm:$0xff] %v14612_v26  ;;  %19821 = vst [vmem:[#allocation86_spill] sm:$0xff] %v14615_v35  ;;  %v1271_v23 = vmul.f32 0.001953125, %v1127_v50  ;;  %v844_v60 = vmul.f32 0.001953125, %v783_v9  ;;  %v1080_v42 = vmul.f32 %v14612_v26, %v14612_v26  ;;  %v1081_v56 = vmul.f32 %v14615_v35, %v14615_v35  ;;  %v13309_v9 = vld [vmem:[%s13878_s7 + $0x308] sm:$0xff]  ;;  %v13310_v26 = vld [vmem:[%s13878_s7 + $0x310] sm:$0xff] }
 0x1ee   : > { %19822 = vst [vmem:[#allocation87_spill] sm:$0xff] %v14618_v38  ;;  %19823 = vst [vmem:[#allocation88_spill] sm:$0xff] %v14626_v5  ;;  %v1219_v54 = vadd.f32 %v1218_v31, %v1070_v1  ;;  %v1082_v62 = vmul.f32 %v14618_v38, %v14618_v38  ;;  %v1083_v35 = vmul.f32 %v14626_v5, %v14626_v5  ;;  %13148 = vrsqrt.f32 %v1302_v39 }
 0x1ef   : > { %v14640_v40 = vpop.eup %13144  ;;  %v1303_v59 = vadd.f32 1e-06, %v1271_v23  ;;  %v14643_v50 = vsub.f32 %v13308_v37, %v844_v60  ;;  %v14646_v10 = vsub.f32 %v13309_v9, %v844_v60  ;;  %v14649_v33 = vsub.f32 %v13310_v26, %v844_v60 }
 0x1f0   : > { %19824 = vst [vmem:[#allocation89_spill] sm:$0xff] %v14640_v40  ;;  %v798_v31 = vpop.xlane.xlu1 %797  ;;  %v1132_v1 = vpop.xlane.xlu0 %1131  ;;  %v1220_v0 = vadd.f32 %v1219_v54, %v1071_v12  ;;  %v1233_v38 = vadd.f32 %v1081_v56, %v1080_v42  ;;  %v1365_v23 = vmul.f32 %v14640_v40, %v14039_v8  ;;  %v14656_v9 = vsub.f32 %v13311_v3, %v844_v60  ;;  %v13312_v60 = vld [vmem:[%s13878_s7 + $0x360] sm:$0xff] }
 0x1f1   : > { %19825 = vst [vmem:[#allocation90_spill] sm:$0xff] %v14643_v50  ;;  %19826 = vst [vmem:[#allocation91_spill] sm:$0xff] %v14646_v10  ;;  %v847_v37 = vmul.f32 0.001953125, %v798_v31  ;;  %v1076_v26 = vmul.f32 %v14643_v50, %v14643_v50  ;;  %13150 = vrsqrt.f32 %v1303_v59  ;;  %v1077_v54 = vmul.f32 %v14646_v10, %v14646_v10  ;;  %v13313_v59 = vld [vmem:[%s13878_s7 + $0x368] sm:$0xff]  ;;  %v13314_v10 = vld [vmem:[%s13878_s7 + $0x370] sm:$0xff] }
 0x1f2   : > { %19827 = vst [vmem:[#allocation92_spill] sm:$0xff] %v14649_v33  ;;  %1221 = vadd.xlane.f32.xlu0 %v1220_v0  ;;  %v1234_v12 = vadd.f32 %v1233_v38, %v1082_v62  ;;  %v14663_v42 = vrot.slane %v657_v53, %v14609_v58  ;;  %v1078_v39 = vmul.f32 %v14649_v33, %v14649_v33  ;;  %v1272_v33 = vmul.f32 0.001953125, %v1132_v1 }
 0x1f3   : > { %v14665_v8 = vpop.eup %13146  ;;  %v1514_v3 = vmul.f32 %v14621_v21, %v1365_v23  ;;  %v14671_v56 = vsub.f32 %v13312_v60, %v847_v37  ;;  %v14674_v0 = vsub.f32 %v13313_v59, %v847_v37  ;;  %v1228_v50 = vadd.f32 %v1077_v54, %v1076_v26 }
 0x1f4   : > { %19828 = vst [vmem:[#allocation93_spill] sm:$0xff] %v14665_v8  ;;  %v1137_v38 = vpop.xlane.xlu1 %1136  ;;  %v793_v62 = vpop.xlane.xlu0 %792  ;;  %v1235_v31 = vadd.f32 %v1234_v12, %v1083_v35  ;;  %v1369_v53 = vmul.f32 %v14665_v8, %v14074_v36  ;;  %v14679_v5 = vsub.f32 %v13314_v10, %v847_v37  ;;  %v1079_v60 = vmul.f32 %v14656_v9, %v14656_v9 }
 0x1f5   : > { %19829 = vst [vmem:[#allocation94_spill] sm:$0xff] %v14671_v56  ;;  %v1273_v32 = vmul.f32 0.001953125, %v1137_v38  ;;  %v846_v23 = vmul.f32 0.001953125, %v793_v62  ;;  %v1229_v28 = vadd.f32 %v1228_v50, %v1078_v39  ;;  %v14685_v7 = vsub.f32 %v13315_v2, %v847_v37 }
 0x1f6   : > { %19830 = vst [vmem:[#allocation95_spill] sm:$0xff] %v14679_v5  ;;  %1236 = vadd.xlane.f32.xlu1 %v1235_v31  ;;  %v1518_v59 = vmul.f32 %v14621_v21, %v1369_v53  ;;  %v1088_v35 = vmul.f32 %v14671_v56, %v14671_v56  ;;  %v1089_v36 = vmul.f32 %v14674_v0, %v14674_v0  ;;  %v1304_v38 = vadd.f32 1e-06, %v1272_v33 }
 0x1f7   : > { %19831 = vst [vmem:[#allocation96_spill] sm:$0xff] %v14685_v7  ;;  %v1090_v10 = vmul.f32 %v14679_v5, %v14679_v5  ;;  %v1364_v1 = vmul.f32 %v14640_v40, %v14036_v6  ;;  %v14697_v50 = vrot.slane %v14601_v55, %v14609_v58  ;;  %v1230_v37 = vadd.f32 %v1229_v28, %v1079_v60 }
 0x1f8   : > { %v808_v26 = vpop.xlane.xlu1 %807  ;;  %v1142_v2 = vpop.xlane.xlu0 %1141  ;;  %v1663_v12 = vadd.f32 %v14630_v20, %v1514_v3  ;;  %v1667_v54 = vadd.f32 %v14630_v20, %v1518_v59  ;;  %v1368_v39 = vmul.f32 %v14665_v8, %v14071_v34  ;;  %v1305_v62 = vadd.f32 1e-06, %v1273_v32  ;;  %v13316_v3 = vld [vmem:[%s13878_s7 + $0x340] sm:$0xff]  ;;  %v13317_v34 = vld [vmem:[%s13878_s7 + $0x348] sm:$0xff]  ;;  %v13318_v32 = vld [vmem:[%s13878_s7 + $0x350] sm:$0xff] }
 0x1f9   : > { %v1091_v6 = vmul.f32 %v14685_v7, %v14685_v7  ;;  %v1243_v31 = vadd.f32 %v1089_v36, %v1088_v35  ;;  %1231 = vadd.xlane.f32.xlu0 %v1230_v37  ;;  %v1513_v28 = vmul.f32 %v14663_v42, %v1364_v1  ;;  %v14710_v60 = vsub.f32 %v13316_v3, %v846_v23  ;;  %v14712_v59 = vpop.eup %13148 }
 0x1fa   : > { %v14705_v55 = vpack.c.bf16 %v1667_v54, %v1663_v12  ;;  %v1517_v53 = vmul.f32 %v14663_v42, %v1368_v39  ;;  %19834 = vst [vmem:[#allocation99_spill] sm:$0xff] %v14712_v59  ;;  %v14715_v33 = vsub.f32 %v13317_v34, %v846_v23  ;;  %v14718_v40 = vsub.f32 %v13318_v32, %v846_v23  ;;  %v12664_v34 = vld [vmem:[#allocation7 + $0x200] ss:$16 sps:$4 sm:$0xff]   ;;  %v12667_v32 = vld [vmem:[#allocation7 + $0x208] ss:$16 sps:$4 sm:$0xff]  }
 0x1fb   : > { %19833 = vst [vmem:[#allocation98_spill] sm:$0xff] %v14710_v60  ;;  %v1244_v58 = vadd.f32 %v1243_v31, %v1090_v10  ;;  %v14720_v35 = vpop.eup %13150  ;;  %v849_v36 = vmul.f32 0.001953125, %v808_v26  ;;  %v1662_v12 = vadd.f32 %v14697_v50, %v1513_v28  ;;  %13152 = vrsqrt.f32 %v1304_v38  ;;  %v13319_v31 = vld [vmem:[%s13878_s7 + $0x358] sm:$0xff] }
 0x1fc   : > { %19832 = vst [vmem:[#allocation97_spill] sm:$0xff] %v14705_v55  ;;  %19835 = vst [vmem:[#allocation100_spill] sm:$0xff] %v14715_v33  ;;  %v1147_v37 = vpop.xlane.xlu1 %1146  ;;  %2676 = vmatprep.mubr.bf16.mxu0 %v14705_v55  ;;  %3062 = vmatprep.mubr.bf16.mxu1 %v14705_v55  ;;  %v1666_v10 = vadd.f32 %v14697_v50, %v1517_v53  ;;  %v1274_v54 = vmul.f32 0.001953125, %v1142_v2  ;;  %v14727_v3 = vsub.f32 %v13319_v31, %v846_v23  ;;  %v12672_v53 = vld [vmem:[#allocation7 + $0x224] ss:$16 sps:$4 sm:$0xff]  }
 0x1fd   : > { %19836 = vst [vmem:[#allocation101_spill] sm:$0xff] %v14718_v40  ;;  %19837 = vst [vmem:[#allocation102_spill] sm:$0xff] %v14720_v35  ;;  %v803_v1 = vpop.xlane.xlu0 %802  ;;  %v1245_v39 = vadd.f32 %v1244_v58, %v1091_v6  ;;  %13154 = vrsqrt.f32 %v1305_v62  ;;  %v1084_v55 = vmul.f32 %v14710_v60, %v14710_v60  ;;  %v1085_v28 = vmul.f32 %v14715_v33, %v14715_v33  ;;  %v12675_v62 = vld [vmem:[#allocation7 + $0x22c] ss:$16 sps:$4 sm:$0xff]   ;;  %v13321_v31 = vld [vmem:[%s13878_s7 + $0x3a8] sm:$0xff] }
 0x1fe   : > { %19838 = vst [vmem:[#allocation103_spill] sm:$0xff] %v14727_v3  ;;  %v14729_v26 = vpack.c.bf16 %v1666_v10, %v1662_v12  ;;  %v1275_v38 = vmul.f32 0.001953125, %v1147_v37  ;;  %v1086_v58 = vmul.f32 %v14718_v40, %v14718_v40  ;;  %v1373_v23 = vmul.f32 %v14712_v59, %v14051_v18  ;;  %v13320_v37 = vld [vmem:[%s13878_s7 + $0x3a0] sm:$0xff]  ;;  %v12673_v33 = vld [vmem:[#allocation7 + $0x228] ss:$16 sps:$4 sm:$0xff]  }
 0x1ff   : > { %1246 = vadd.xlane.f32.xlu1 %v1245_v39  ;;  %v1377_v2 = vmul.f32 %v14720_v35, %v14102_v61  ;;  %v1238_v10 = vadd.f32 %v1085_v28, %v1084_v55  ;;  %v14744_v39 = vsub.f32 %v13320_v37, %v849_v36  ;;  %v14747_v8 = vsub.f32 %v13321_v31, %v849_v36  ;;  %v12670_v18 = vld [vmem:[#allocation7 + $0x220] ss:$16 sps:$4 sm:$0xff]   ;;  %v13323_v31 = vld [vmem:[%s13878_s7 + $0x3b8] sm:$0xff] }
 0x200   : > { %19839 = vst [vmem:[#allocation104_spill] sm:$0xff] %v14729_v26  ;;  %2677 = vmatmul.mubr.bf16.vlgmr.msra.gmra.mrb[0].mxu0 %v14729_v26  ;;  %3063 = vmatmul.mubr.bf16.vlgmr.msra.gmra.mrb[0].mxu1 %v14729_v26  ;;  %v1306_v40 = vadd.f32 1e-06, %v1274_v54  ;;  %v14749_v60 = vmul.f32 0.001953125, %v803_v1  ;;  %v1087_v61 = vmul.f32 %v14727_v3, %v14727_v3  ;;  %v1522_v26 = vmul.f32 %v14621_v21, %v1373_v23  ;;  %v13322_v37 = vld [vmem:[%s13878_s7 + $0x3b0] sm:$0xff] }
 0x201   : > { %v818_v6 = vpop.xlane.xlu1 %817  ;;  %2838 = vmatpush1.bf16.msra.mxu0 %v12664_v34  ;;  %3224 = vmatpush1.bf16.msra.mxu1 %v12667_v32  ;;  %v1239_v55 = vadd.f32 %v1238_v10, %v1086_v58  ;;  %v1526_v28 = vmul.f32 %v14621_v21, %v1377_v2  ;;  %v14756_v5 = vsub.f32 %v13322_v37, %v849_v36  ;;  %v12678_v1 = vld [vmem:[#allocation7 + $0x244] ss:$16 sps:$4 sm:$0xff]   ;;  %v1307_v54 = vadd.f32 1e-06, %v1275_v38  ;;  %v12681_v32 = vld [vmem:[#allocation7 + $0x24c] ss:$16 sps:$4 sm:$0xff]  }
 0x202   : > { %v1152_v12 = vpop.xlane.xlu0 %1151  ;;  %v14759_v7 = vsub.f32 %v13323_v31, %v849_v36  ;;  %2839 = vmatprep.subr.bf16.mxu0 %v12672_v53  ;;  %v1096_v3 = vmul.f32 %v14744_v39, %v14744_v39  ;;  %v1097_v34 = vmul.f32 %v14747_v8, %v14747_v8  ;;  %3225 = vmatprep.subr.bf16.mxu1 %v12675_v62  ;;  %13156 = vrsqrt.f32 %v1306_v40  ;;  %v12676_v62 = vld [vmem:[#allocation7 + $0x240] ss:$16 sps:$4 sm:$0xff]   ;;  %v12684_v31 = vld [vmem:[#allocation7 + $0x264] ss:$16 sps:$4 sm:$0xff]  }
 0x203   : > { %19840 = vst [vmem:[#allocation105_spill] sm:$0xff] %v14756_v5  ;;  %v1276_v56 = vmul.f32 0.001953125, %v1152_v12  ;;  %v1240_v58 = vadd.f32 %v1239_v55, %v1087_v61  ;;  %v1671_v2 = vadd.f32 %v14630_v20, %v1522_v26  ;;  %v1675_v36 = vadd.f32 %v14630_v20, %v1526_v28  ;;  %v12679_v61 = vld [vmem:[#allocation7 + $0x248] ss:$16 sps:$4 sm:$0xff]   ;;  %v13324_v40 = vld [vmem:[%s13878_s7 + $0x380] sm:$0xff] }
 0x204   : > { %v1098_v53 = vmul.f32 %v14756_v5, %v14756_v5  ;;  %v1099_v38 = vmul.f32 %v14759_v7, %v14759_v7  ;;  %v1253_v12 = vadd.f32 %v1097_v34, %v1096_v3  ;;  %v1372_v55 = vmul.f32 %v14712_v59, %v14048_v16  ;;  %v13325_v34 = vld [vmem:[%s13878_s7 + $0x388] sm:$0xff]  ;;  %v12687_v16 = vld [vmem:[#allocation7 + $0x26c] ss:$16 sps:$4 sm:$0xff]  }
 0x205   : > { %v1157_v23 = vpop.xlane.xlu1 %1156  ;;  %2840 = vmatpush1.bf16.msra.mxu0 %v12670_v18  ;;  %3226 = vmatpush1.bf16.msra.mxu1 %v12673_v33  ;;  %v14773_v26 = vpack.c.bf16 %v1675_v36, %v1671_v2  ;;  %v1376_v28 = vmul.f32 %v14720_v35, %v14099_v57  ;;  %v14781_v37 = vsub.f32 %v13324_v40, %v14749_v60  ;;  %v14783_v3 = vpop.eup %13152  ;;  %v1308_v18 = vadd.f32 1e-06, %v1276_v56  ;;  %v13326_v2 = vld [vmem:[%s13878_s7 + $0x390] sm:$0xff] }
 0x206   : > { %v14767_v10 = vpop.xlane.xlu0 %812  ;;  %1241 = vadd.xlane.f32.xlu0 %v1240_v58  ;;  %v1254_v33 = vadd.f32 %v1253_v12, %v1098_v53  ;;  %v14787_v58 = vsub.f32 %v13325_v34, %v14749_v60  ;;  %v14791_v36 = vsub.f32 %v13326_v2, %v14749_v60  ;;  %2841 = vmatprep.subr.bf16.mxu0 %v12678_v1  ;;  %13158 = vrsqrt.f32 %v1307_v54  ;;  %v12685_v54 = vld [vmem:[#allocation7 + $0x268] ss:$16 sps:$4 sm:$0xff]  }
 0x207   : > { %19841 = vst [vmem:[#allocation106_spill] sm:$0xff] %v14773_v26  ;;  %19842 = vst [vmem:[#allocation107_spill] sm:$0xff] %v14781_v37  ;;  %3227 = vmatprep.subr.bf16.mxu1 %v12681_v32  ;;  %v14793_v57 = vpop.eup %13154  ;;  %v14795_v40 = vmul.f32 0.001953125, %v818_v6  ;;  %2686 = vmatprep.mubr.bf16.mxu0 %v14773_v26  ;;  %v1521_v56 = vmul.f32 %v14663_v42, %v1372_v55  ;;  %v1525_v53 = vmul.f32 %v14663_v42, %v1376_v28  ;;  %v13327_v32 = vld [vmem:[%s13878_s7 + $0x398] sm:$0xff]  ;;  %v12682_v6 = vld [vmem:[#allocation7 + $0x260] ss:$16 sps:$4 sm:$0xff]  }
 0x208   : > { %19843 = vst [vmem:[#allocation108_spill] sm:$0xff] %v14787_v58  ;;  %19844 = vst [vmem:[#allocation109_spill] sm:$0xff] %v14791_v36  ;;  %3072 = vmatprep.mubr.bf16.mxu1 %v14773_v26  ;;  %v1277_v2 = vmul.f32 0.001953125, %v1157_v23  ;;  %v1255_v59 = vadd.f32 %v1254_v33, %v1099_v38  ;;  %v14803_v35 = vsub.f32 %v13327_v32, %v14749_v60  ;;  %13160 = vrsqrt.f32 %v1308_v18 }
 0x209   : > { %2842 = vmatpush1.bf16.msra.mxu0 %v12676_v62  ;;  %3228 = vmatpush1.bf16.msra.mxu1 %v12679_v61  ;;  %v1670_v5 = vadd.f32 %v14697_v50, %v1521_v56  ;;  %v1674_v26 = vadd.f32 %v14697_v50, %v1525_v53  ;;  %v1092_v55 = vmul.f32 %v14781_v37, %v14781_v37  ;;  %v12690_v62 = vld [vmem:[#allocation7 + $0x284] ss:$16 sps:$4 sm:$0xff]   ;;  %v12693_v61 = vld [vmem:[#allocation7 + $0x28c] ss:$16 sps:$4 sm:$0xff]  }
 0x20a   : > { %v1167_v12 = vpop.xlane.xlu1 %1166  ;;  %v1162_v34 = vpop.xlane.xlu0 %1161  ;;  %19845 = vst [vmem:[#allocation110_spill] sm:$0xff] %v14803_v35  ;;  %v1093_v23 = vmul.f32 %v14787_v58, %v14787_v58  ;;  %2843 = vmatprep.subr.bf16.mxu0 %v12684_v31  ;;  %1256 = vadd.xlane.f32.xlu1 %v1255_v59  ;;  %v1094_v38 = vmul.f32 %v14791_v36, %v14791_v36  ;;  %v12688_v59 = vld [vmem:[#allocation7 + $0x280] ss:$16 sps:$4 sm:$0xff]  }
 0x20b   : > { %v1279_v1 = vmul.f32 0.001953125, %v1167_v12  ;;  %v1278_v60 = vmul.f32 0.001953125, %v1162_v34  ;;  %3229 = vmatprep.subr.bf16.mxu1 %v12687_v16  ;;  %v14813_v28 = vpack.c.bf16 %v1674_v26, %v1670_v5  ;;  %v1381_v53 = vmul.f32 %v14783_v3, %v14122_v29  ;;  %v13328_v5 = vld [vmem:[%s13878_s7 + $0x3e0] sm:$0xff]  ;;  %v12691_v29 = vld [vmem:[#allocation7 + $0x288] ss:$16 sps:$4 sm:$0xff]  }
 0x20c   : > { %v1248_v33 = vadd.f32 %v1093_v23, %v1092_v55  ;;  %v1385_v31 = vmul.f32 %v14793_v57, %v14138_v47  ;;  %v1309_v12 = vadd.f32 1e-06, %v1277_v2  ;;  %v14820_v34 = vmul.f32 0.001953125, %v14767_v10  ;;  %v12696_v55 = vld [vmem:[#allocation7 + $0x2a4] ss:$16 sps:$4 sm:$0xff]   ;;  %v14832_v23 = vpop.eup %13156 }
 0x20d   : > { %19846 = vst [vmem:[#allocation111_spill] sm:$0xff] %v14813_v28  ;;  %v1095_v16 = vmul.f32 %v14803_v35, %v14803_v35  ;;  %v14826_v26 = vsub.f32 %v13328_v5, %v14795_v40  ;;  %2844 = vmatpush1.bf16.msra.mxu0 %v12682_v6  ;;  %3230 = vmatpush1.bf16.msra.mxu1 %v12685_v54  ;;  %v1311_v47 = vadd.f32 1e-06, %v1279_v1  ;;  %v1310_v5 = vadd.f32 1e-06, %v1278_v60  ;;  %v13329_v35 = vld [vmem:[%s13878_s7 + $0x3e8] sm:$0xff] }
 0x20e   : > { %2687 = vmatmul.mubr.bf16.gmra.mrb[4].mxu0 %v14813_v28  ;;  %3073 = vmatmul.mubr.bf16.gmra.mrb[4].mxu1 %v14813_v28  ;;  %v1249_v2 = vadd.f32 %v1248_v33, %v1094_v38  ;;  %v1530_v10 = vmul.f32 %v14621_v21, %v1381_v53  ;;  %v1534_v32 = vmul.f32 %v14621_v21, %v1385_v31  ;;  %v13330_v54 = vld [vmem:[%s13878_s7 + $0x3f0] sm:$0xff]  ;;  %v13331_v31 = vld [vmem:[%s13878_s7 + $0x3f8] sm:$0xff]  ;;  %13162 = vrsqrt.f32 %v1309_v12 }
 0x20f   : > { %v1177_v56 = vpop.xlane.xlu1 %1176  ;;  %v1172_v18 = vpop.xlane.xlu0 %1171  ;;  %v14836_v6 = vsub.f32 %v13329_v35, %v14795_v40  ;;  %v14840_v37 = vsub.f32 %v13330_v54, %v14795_v40  ;;  %2845 = vmatprep.subr.bf16.mxu0 %v12690_v62  ;;  %3231 = vmatprep.subr.bf16.mxu1 %v12693_v61  ;;  %v12699_v1 = vld [vmem:[#allocation7 + $0x2ac] ss:$16 sps:$4 sm:$0xff]   ;;  %v14846_v60 = vsub.f32 %v13331_v31, %v14795_v40  ;;  %13164 = vrsqrt.f32 %v1311_v47 }
 0x210   : > { %v1281_v36 = vmul.f32 0.001953125, %v1177_v56  ;;  %v1250_v38 = vadd.f32 %v1249_v2, %v1095_v16  ;;  %v1679_v33 = vadd.f32 %v14630_v20, %v1530_v10  ;;  %v1683_v53 = vadd.f32 %v14630_v20, %v1534_v32  ;;  %v12694_v16 = vld [vmem:[#allocation7 + $0x2a0] ss:$16 sps:$4 sm:$0xff]   ;;  %v12697_v2 = vld [vmem:[#allocation7 + $0x2a8] ss:$16 sps:$4 sm:$0xff]   ;;  %v14854_v10 = vpop.eup %13158 }
 0x211   : > { %19847 = vst [vmem:[#allocation112_spill] sm:$0xff] %v14840_v37  ;;  %19848 = vst [vmem:[#allocation113_spill] sm:$0xff] %v14846_v60  ;;  %v1280_v35 = vmul.f32 0.001953125, %v1172_v18  ;;  %v1104_v58 = vmul.f32 %v14826_v26, %v14826_v26  ;;  %v1105_v62 = vmul.f32 %v14836_v6, %v14836_v6  ;;  %v1106_v61 = vmul.f32 %v14840_v37, %v14840_v37  ;;  %v12702_v32 = vld [vmem:[#allocation7 + $0x2c4] ss:$16 sps:$4 sm:$0xff]  }
 0x212   : > { %2846 = vmatpush1.bf16.msra.mxu0 %v12688_v59  ;;  %3232 = vmatpush1.bf16.msra.mxu1 %v12691_v29  ;;  %v14856_v40 = vpack.c.bf16 %v1683_v53, %v1679_v33  ;;  %v1380_v18 = vmul.f32 %v14783_v3, %v14111_v15  ;;  %v1107_v59 = vmul.f32 %v14846_v60, %v14846_v60  ;;  %v12705_v12 = vld [vmem:[#allocation7 + $0x2cc] ss:$16 sps:$4 sm:$0xff]   ;;  %v1313_v31 = vadd.f32 1e-06, %v1281_v36  ;;  %v13335_v37 = vld [vmem:[%s13878_s7 + $0x3d8] sm:$0xff] }
 0x213   : > { %v1187_v56 = vpop.xlane.xlu1 %1186  ;;  %1251 = vadd.xlane.f32.xlu0 %v1250_v38  ;;  %2847 = vmatprep.subr.bf16.mxu0 %v12696_v55  ;;  %v1263_v29 = vadd.f32 %v1105_v62, %v1104_v58  ;;  %v1384_v54 = vmul.f32 %v14793_v57, %v14135_v44  ;;  %v13332_v55 = vld [vmem:[%s13878_s7 + $0x3c0] sm:$0xff]  ;;  %v13333_v38 = vld [vmem:[%s13878_s7 + $0x3c8] sm:$0xff]  ;;  %13166 = vrsqrt.f32 %v1310_v5  ;;  %v1312_v36 = vadd.f32 1e-06, %v1280_v35 }
 0x214   : > { %v1182_v28 = vpop.xlane.xlu0 %1181  ;;  %19849 = vst [vmem:[#allocation114_spill] sm:$0xff] %v14856_v40  ;;  %3233 = vmatprep.subr.bf16.mxu1 %v12699_v1  ;;  %2696 = vmatprep.mubr.bf16.mxu0 %v14856_v40  ;;  %v1529_v15 = vmul.f32 %v14663_v42, %v1380_v18  ;;  %v14869_v47 = vsub.f32 %v13332_v55, %v14820_v34  ;;  %v14875_v1 = vpop.eup %13160  ;;  %v1283_v18 = vmul.f32 0.001953125, %v1187_v56  ;;  %v12700_v5 = vld [vmem:[#allocation7 + $0x2c0] ss:$16 sps:$4 sm:$0xff]   ;;  %v12703_v35 = vld [vmem:[#allocation7 + $0x2c8] ss:$16 sps:$4 sm:$0xff]   ;;  %13168 = vrsqrt.f32 %v1313_v31 }
 0x215   : > { %3082 = vmatprep.mubr.bf16.mxu1 %v14856_v40  ;;  %v14873_v58 = vsub.f32 %v13333_v38, %v14820_v34  ;;  %v1264_v33 = vadd.f32 %v1263_v29, %v1106_v61  ;;  %v1533_v53 = vmul.f32 %v14663_v42, %v1384_v54  ;;  %v13334_v40 = vld [vmem:[%s13878_s7 + $0x3d0] sm:$0xff]  ;;  %v14884_v38 = vsub.f32 %v13335_v37, %v14820_v34 }
 0x216   : > { %2848 = vmatpush1.bf16.msra.mxu0 %v12694_v16  ;;  %3234 = vmatpush1.bf16.msra.mxu1 %v12697_v2  ;;  %v14880_v55 = vsub.f32 %v13334_v40, %v14820_v34  ;;  %v1100_v60 = vmul.f32 %v14869_v47, %v14869_v47  ;;  %v1678_v29 = vadd.f32 %v14697_v50, %v1529_v15  ;;  %v1282_v2 = vmul.f32 0.001953125, %v1182_v28  ;;  %v12708_v40 = vld [vmem:[#allocation7 + $0x2e4] ss:$16 sps:$4 sm:$0xff]   ;;  %v12711_v54 = vld [vmem:[#allocation7 + $0x2ec] ss:$16 sps:$4 sm:$0xff]  }
 0x217   : > { %19851 = vst [vmem:[#allocation116_spill] sm:$0xff] %v14884_v38  ;;  %2849 = vmatprep.subr.bf16.mxu0 %v12702_v32  ;;  %v1265_v61 = vadd.f32 %v1264_v33, %v1107_v59  ;;  %v1682_v16 = vadd.f32 %v14697_v50, %v1533_v53  ;;  %v1101_v56 = vmul.f32 %v14873_v58, %v14873_v58  ;;  %13170 = vrsqrt.f32 %v1312_v36  ;;  %v12709_v53 = vld [vmem:[#allocation7 + $0x2e8] ss:$16 sps:$4 sm:$0xff]  }
 0x218   : > { %v1197_v44 = vpop.xlane.xlu1 %1196  ;;  %v1192_v62 = vpop.xlane.xlu0 %1191  ;;  %19850 = vst [vmem:[#allocation115_spill] sm:$0xff] %v14880_v55  ;;  %3235 = vmatprep.subr.bf16.mxu1 %v12705_v12  ;;  %v1102_v37 = vmul.f32 %v14880_v55, %v14880_v55  ;;  %v1389_v15 = vmul.f32 %v14832_v23, %v14161_v22  ;;  %v1393_v33 = vmul.f32 %v14854_v10, %v14184_v51  ;;  %v1315_v22 = vadd.f32 1e-06, %v1283_v18 }
 0x219   : > { %v1285_v34 = vmul.f32 0.001953125, %v1197_v44  ;;  %1266 = vadd.xlane.f32.xlu1 %v1265_v61  ;;  %v14894_v32 = vpack.c.bf16 %v1682_v16, %v1678_v29  ;;  %v1258_v59 = vadd.f32 %v1101_v56, %v1100_v60  ;;  %v1103_v28 = vmul.f32 %v14884_v38, %v14884_v38  ;;  %v12706_v60 = vld [vmem:[#allocation7 + $0x2e0] ss:$16 sps:$4 sm:$0xff]   ;;  %v14910_v16 = vpop.eup %13162  ;;  %v12717_v56 = vld [vmem:[#allocation7 + $0x30c] ss:$16 sps:$4 sm:$0xff]  }
 0x21a   : > { %v1388_v12 = vmul.f32 %v14832_v23, %v14156_v11  ;;  %v1392_v31 = vmul.f32 %v14854_v10, %v14181_v48  ;;  %2850 = vmatpush1.bf16.msra.mxu0 %v12700_v5  ;;  %3236 = vmatpush1.bf16.msra.mxu1 %v12703_v35  ;;  %v1538_v36 = vmul.f32 %v14621_v21, %v1389_v15  ;;  %v12714_v11 = vld [vmem:[#allocation7 + $0x304] ss:$16 sps:$4 sm:$0xff]   ;;  %v1314_v48 = vadd.f32 1e-06, %v1282_v2  ;;  %v14914_v55 = vpop.eup %13164 }
 0x21b   : > { %19852 = vst [vmem:[#allocation117_spill] sm:$0xff] %v14894_v32  ;;  %2697 = vmatmul.mubr.bf16.gmra.mrb[8].mxu0 %v14894_v32  ;;  %3083 = vmatmul.mubr.bf16.gmra.mrb[8].mxu1 %v14894_v32  ;;  %v1259_v51 = vadd.f32 %v1258_v59, %v1102_v37  ;;  %v1542_v61 = vmul.f32 %v14621_v21, %v1393_v33  ;;  %v1317_v37 = vadd.f32 1e-06, %v1285_v34  ;;  %v1284_v33 = vmul.f32 0.001953125, %v1192_v62 }
 0x21c   : > { %v1207_v44 = vpop.xlane.xlu1 %1206  ;;  %v1537_v5 = vmul.f32 %v14663_v42, %v1388_v12  ;;  %v1541_v35 = vmul.f32 %v14663_v42, %v1392_v31  ;;  %2851 = vmatprep.subr.bf16.mxu0 %v12708_v40  ;;  %3237 = vmatprep.subr.bf16.mxu1 %v12711_v54  ;;  %v1687_v59 = vadd.f32 %v14630_v20, %v1538_v36  ;;  %v12712_v12 = vld [vmem:[#allocation7 + $0x300] ss:$16 sps:$4 sm:$0xff]   ;;  %v12715_v40 = vld [vmem:[#allocation7 + $0x308] ss:$16 sps:$4 sm:$0xff]   ;;  %13172 = vrsqrt.f32 %v1315_v22 }
 0x21d   : > { %v1202_v29 = vpop.xlane.xlu0 %1201  ;;  %v1260_v18 = vadd.f32 %v1259_v51, %v1103_v28  ;;  %v1691_v15 = vadd.f32 %v14630_v20, %v1542_v61  ;;  %v1287_v38 = vmul.f32 0.001953125, %v1207_v44  ;;  %v14920_v54 = vpop.eup %13166  ;;  %v1397_v34 = vmul.f32 %v14875_v1, %v14207_v19  ;;  %v12718_v36 = vld [vmem:[#allocation7 + $0x320] ss:$16 sps:$4 sm:$0xff]  }
 0x21e   : > { %v1686_v32 = vadd.f32 %v14697_v50, %v1537_v5  ;;  %v1690_v2 = vadd.f32 %v14697_v50, %v1541_v35  ;;  %2852 = vmatpush1.bf16.msra.mxu0 %v12706_v60  ;;  %3238 = vmatpush1.bf16.msra.mxu1 %v12709_v53  ;;  %13174 = vrsqrt.f32 %v1314_v48  ;;  %v1401_v44 = vmul.f32 %v14910_v16, %v14230_v63  ;;  %v12720_v60 = vld [vmem:[#allocation7 + $0x324] ss:$16 sps:$4 sm:$0xff]   ;;  %v12723_v53 = vld [vmem:[#allocation7 + $0x32c] ss:$16 sps:$4 sm:$0xff]   ;;  %v14937_v61 = vpop.eup %13168  ;;  %v12721_v5 = vld [vmem:[#allocation7 + $0x328] ss:$16 sps:$4 sm:$0xff]  }
 0x21f   : > { %1261 = vadd.xlane.f32.xlu0 %v1260_v18  ;;  %v14922_v28 = vpack.c.bf16 %v1691_v15, %v1687_v59  ;;  %2853 = vmatprep.subr.bf16.mxu0 %v12714_v11  ;;  %v1546_v22 = vmul.f32 %v14621_v21, %v1397_v34  ;;  %v1396_v19 = vmul.f32 %v14875_v1, %v14198_v27  ;;  %13176 = vrsqrt.f32 %v1317_v37  ;;  %v12726_v18 = vld [vmem:[#allocation7 + $0x344] ss:$16 sps:$4 sm:$0xff]   ;;  %v12729_v34 = vld [vmem:[#allocation7 + $0x34c] ss:$16 sps:$4 sm:$0xff]  }
 0x220   : > { %v14926_v62 = vpack.c.bf16 %v1690_v2, %v1686_v32  ;;  %v1217_v31 = vpop.xlane.xlu1 %1216  ;;  %3239 = vmatprep.subr.bf16.mxu1 %v12717_v56  ;;  %v1400_v32 = vmul.f32 %v14910_v16, %v14220_v30  ;;  %v1316_v63 = vadd.f32 1e-06, %v1284_v33  ;;  %v1319_v11 = vadd.f32 1e-06, %v1287_v38 }
 0x221   : > { %19853 = vst [vmem:[#allocation118_spill] sm:$0xff] %v14922_v28  ;;  %2706 = vmatprep.mubr.bf16.mxu0 %v14922_v28  ;;  %3092 = vmatprep.mubr.bf16.mxu1 %v14922_v28  ;;  %v1550_v48 = vmul.f32 %v14621_v21, %v1401_v44  ;;  %v1286_v35 = vmul.f32 0.001953125, %v1202_v29  ;;  %v1289_v27 = vmul.f32 0.001953125, %v1217_v31  ;;  %v1545_v56 = vmul.f32 %v14663_v42, %v1396_v19  ;;  %v14944_v59 = vpop.eup %13170 }
 0x222   : > { %19854 = vst [vmem:[#allocation119_spill] sm:$0xff] %v14926_v62  ;;  %2854 = vmatpush1.bf16.msra.mxu0 %v12712_v12  ;;  %3240 = vmatpush1.bf16.msra.mxu1 %v12715_v40  ;;  %v1549_v30 = vmul.f32 %v14663_v42, %v1400_v32  ;;  %v1695_v38 = vadd.f32 %v14630_v20, %v1546_v22  ;;  %13178 = vrsqrt.f32 %v1316_v63 }
 0x223   : > { %2707 = vmatmul.mubr.bf16.gmra.mrb[12].mxu0 %v14926_v62  ;;  %3093 = vmatmul.mubr.bf16.gmra.mrb[12].mxu1 %v14926_v62  ;;  %v1699_v37 = vadd.f32 %v14630_v20, %v1550_v48  ;;  %v1405_v33 = vmul.f32 %v14920_v54, %v14281_v49  ;;  %v1694_v29 = vadd.f32 %v14697_v50, %v1545_v56  ;;  %13180 = vrsqrt.f32 %v1319_v11 }
 0x224   : > { %v1212_v51 = vpop.xlane.xlu0 %1211  ;;  %2855 = vmatprep.subr.bf16.mxu0 %v12720_v60  ;;  %3241 = vmatprep.subr.bf16.mxu1 %v12723_v53  ;;  %v1698_v2 = vadd.f32 %v14697_v50, %v1549_v30  ;;  %v1409_v12 = vmul.f32 %v14914_v55, %v14252_v13  ;;  %v1404_v40 = vmul.f32 %v14920_v54, %v14276_v14  ;;  %v12724_v60 = vld [vmem:[#allocation7 + $0x340] ss:$16 sps:$4 sm:$0xff]   ;;  %v1318_v53 = vadd.f32 1e-06, %v1286_v35  ;;  %v12732_v30 = vld [vmem:[#allocation7 + $0x364] ss:$16 sps:$4 sm:$0xff]  }
 0x225   : > { %v1288_v15 = vmul.f32 0.001953125, %v1212_v51  ;;  %v14956_v31 = vpack.c.bf16 %v1699_v37, %v1695_v38  ;;  %v1554_v44 = vmul.f32 %v14621_v21, %v1405_v33  ;;  %v1408_v49 = vmul.f32 %v14914_v55, %v14242_v25  ;;  %v12735_v33 = vld [vmem:[#allocation7 + $0x36c] ss:$16 sps:$4 sm:$0xff]  }
 0x226   : > { %2856 = vmatpush1.bf16.msra.mxu0 %v12718_v36  ;;  %3242 = vmatpush1.bf16.msra.mxu1 %v12721_v5  ;;  %v14961_v22 = vpack.c.bf16 %v1698_v2, %v1694_v29  ;;  %v1558_v13 = vmul.f32 %v14621_v21, %v1409_v12  ;;  %v1413_v14 = vmul.f32 %v14944_v59, %v14337_v41  ;;  %v1321_v51 = vadd.f32 1e-06, %v1289_v27  ;;  %v12727_v36 = vld [vmem:[#allocation7 + $0x348] ss:$16 sps:$4 sm:$0xff]   ;;  %v14972_v63 = vpop.eup %13172 }
 0x227   : > { %19855 = vst [vmem:[#allocation120_spill] sm:$0xff] %v14956_v31  ;;  %2857 = vmatprep.subr.bf16.mxu0 %v12726_v18  ;;  %2716 = vmatprep.mubr.bf16.mxu0 %v14956_v31  ;;  %v1703_v19 = vadd.f32 %v14630_v20, %v1554_v44  ;;  %v1553_v25 = vmul.f32 %v14663_v42, %v1404_v40  ;;  %v1320_v48 = vadd.f32 1e-06, %v1288_v15  ;;  %13182 = vrsqrt.f32 %v1318_v53  ;;  %v12730_v18 = vld [vmem:[#allocation7 + $0x360] ss:$16 sps:$4 sm:$0xff]  }
 0x228   : > { %19856 = vst [vmem:[#allocation121_spill] sm:$0xff] %v14961_v22  ;;  %3102 = vmatprep.mubr.bf16.mxu1 %v14956_v31  ;;  %v1417_v32 = vmul.f32 %v14937_v61, %v14309_v17  ;;  %v1707_v5 = vadd.f32 %v14630_v20, %v1558_v13  ;;  %v1557_v41 = vmul.f32 %v14663_v42, %v1408_v49  ;;  %v14976_v35 = vpop.eup %13174  ;;  %13184 = vrsqrt.f32 %v1321_v51  ;;  %v12733_v40 = vld [vmem:[#allocation7 + $0x368] ss:$16 sps:$4 sm:$0xff]  }
 0x229   : > { %3243 = vmatprep.subr.bf16.mxu1 %v12729_v34  ;;  %v1562_v27 = vmul.f32 %v14621_v21, %v1413_v14  ;;  %v14984_v38 = vpop.eup %13176  ;;  %v1702_v37 = vadd.f32 %v14697_v50, %v1553_v25  ;;  %v1412_v11 = vmul.f32 %v14944_v59, %v14319_v45  ;;  %v1416_v15 = vmul.f32 %v14937_v61, %v14306_v24  ;;  %v12738_v34 = vld [vmem:[#allocation7 + $0x384] ss:$16 sps:$4 sm:$0xff]   ;;  %v12736_v14 = vld [vmem:[#allocation7 + $0x380] ss:$16 sps:$4 sm:$0xff]   ;;  %v12741_v25 = vld [vmem:[#allocation7 + $0x38c] ss:$16 sps:$4 sm:$0xff]  }
 0x22a   : > { %v1566_v56 = vmul.f32 %v14621_v21, %v1417_v32  ;;  %2858 = vmatpush1.bf16.msra.mxu0 %v12724_v60  ;;  %v14982_v17 = vpack.c.bf16 %v1707_v5, %v1703_v19  ;;  %3244 = vmatpush1.bf16.msra.mxu1 %v12727_v36  ;;  %13186 = vrsqrt.f32 %v1320_v48  ;;  %v1706_v29 = vadd.f32 %v14697_v50, %v1557_v41  ;;  %v19861_v36 = vld [vmem:[#allocation51_spill] sm:$0xff] }
 0x22b   : > { %2717 = vmatmul.mubr.bf16.gmra.mrb[16].mxu0 %v14961_v22  ;;  %3103 = vmatmul.mubr.bf16.gmra.mrb[16].mxu1 %v14961_v22  ;;  %v1421_v2 = vmul.f32 %v14976_v35, %v14389_v4  ;;  %v1425_v12 = vmul.f32 %v14972_v63, %v14369_v43  ;;  %v1711_v45 = vadd.f32 %v14630_v20, %v1562_v27  ;;  %v12739_v5 = vld [vmem:[#allocation7 + $0x388] ss:$16 sps:$4 sm:$0xff]  }
 0x22c   : > { %19857 = vst [vmem:[#allocation122_spill] sm:$0xff] %v14982_v17  ;;  %2726 = vmatprep.mubr.bf16.mxu0 %v14982_v17  ;;  %3112 = vmatprep.mubr.bf16.mxu1 %v14982_v17  ;;  %v1715_v24 = vadd.f32 %v14630_v20, %v1566_v56  ;;  %v15000_v44 = vpop.eup %13178  ;;  %v1561_v49 = vmul.f32 %v14663_v42, %v1412_v11  ;;  %v19885_v17 = vld [vmem:[#allocation26_spill] sm:$0xff] }
 0x22d   : > { %2859 = vmatprep.subr.bf16.mxu0 %v12732_v30  ;;  %v1565_v60 = vmul.f32 %v14663_v42, %v1416_v15  ;;  %v1420_v4 = vmul.f32 %v14976_v35, %v14385_v46  ;;  %3245 = vmatprep.subr.bf16.mxu1 %v12735_v33  ;;  %v15006_v53 = vpack.c.bf16 %v1706_v29, %v1702_v37  ;;  %v19860_v46 = vld [vmem:[#allocation55_spill] sm:$0xff]  ;;  %v15020_v41 = vpop.eup %13180  ;;  %v12744_v30 = vld [vmem:[#allocation7 + $0x3a4] ss:$16 sps:$4 sm:$0xff]   ;;  %v12742_v15 = vld [vmem:[#allocation7 + $0x3a0] ss:$16 sps:$4 sm:$0xff]  }
 0x22e   : > { %2860 = vmatpush1.bf16.msra.mxu0 %v12730_v18  ;;  %v1570_v43 = vmul.f32 %v14621_v21, %v1421_v2  ;;  %v1574_v13 = vmul.f32 %v14621_v21, %v1425_v12  ;;  %3246 = vmatpush1.bf16.msra.mxu1 %v12733_v40  ;;  %v15010_v51 = vpack.c.bf16 %v1715_v24, %v1711_v45  ;;  %v12747_v2 = vld [vmem:[#allocation7 + $0x3ac] ss:$16 sps:$4 sm:$0xff]   ;;  %v19862_v24 = vld [vmem:[#allocation54_spill] sm:$0xff] }
 0x22f   : > { %19858 = vst [vmem:[#allocation123_spill] sm:$0xff] %v15006_v53  ;;  %v1424_v19 = vmul.f32 %v14972_v63, %v14357_v52  ;;  %2861 = vmatprep.subr.bf16.mxu0 %v12738_v34  ;;  %v1429_v32 = vmul.f32 %v15000_v44, %v19860_v46  ;;  %v1433_v48 = vmul.f32 %v14984_v38, %v19861_v36 }
 0x230   : > { %19859 = vst [vmem:[#allocation124_spill] sm:$0xff] %v15010_v51  ;;  %v1710_v52 = vadd.f32 %v14697_v50, %v1561_v49  ;;  %v1714_v27 = vadd.f32 %v14697_v50, %v1565_v60  ;;  %v1569_v56 = vmul.f32 %v14663_v42, %v1420_v4  ;;  %v1719_v37 = vadd.f32 %v14630_v20, %v1570_v43  ;;  %v19864_v4 = vld [vmem:[#allocation50_spill] sm:$0xff] }
 0x231   : > { %v15027_v18 = vpop.eup %13182  ;;  %v1723_v11 = vadd.f32 %v14630_v20, %v1574_v13  ;;  %v1573_v29 = vmul.f32 %v14663_v42, %v1424_v19  ;;  %3247 = vmatprep.subr.bf16.mxu1 %v12741_v25  ;;  %v1578_v40 = vmul.f32 %v14621_v21, %v1429_v32  ;;  %v1582_v45 = vmul.f32 %v14621_v21, %v1433_v48  ;;  %v19867_v25 = vld [vmem:[#allocation59_spill] sm:$0xff]  ;;  %v19868_v32 = vld [vmem:[#allocation62_spill] sm:$0xff] }
 0x232   : > { %2862 = vmatpush1.bf16.msra.mxu0 %v12736_v14  ;;  %v15031_v33 = vpop.eup %13184  ;;  %v1428_v34 = vmul.f32 %v15000_v44, %v19862_v24  ;;  %3248 = vmatpush1.bf16.msra.mxu1 %v12739_v5  ;;  %v15040_v49 = vpack.c.bf16 %v1714_v27, %v1710_v52  ;;  %v1718_v60 = vadd.f32 %v14697_v50, %v1569_v56  ;;  %v19866_v14 = vld [vmem:[#allocation63_spill] sm:$0xff]  ;;  %v12750_v5 = vld [vmem:[#allocation7 + $0x3c4] ss:$16 sps:$4 sm:$0xff]  }
 0x233   : > { %2727 = vmatmul.mubr.bf16.gmra.mrb[20].mxu0 %v15006_v53  ;;  %3113 = vmatmul.mubr.bf16.gmra.mrb[20].mxu1 %v15006_v53  ;;  %v1432_v43 = vmul.f32 %v14984_v38, %v19864_v4  ;;  %v15045_v13 = vpack.c.bf16 %v1723_v11, %v1719_v37  ;;  %v1437_v19 = vmul.f32 %v15027_v18, %v19866_v14  ;;  %v12745_v48 = vld [vmem:[#allocation7 + $0x3a8] ss:$16 sps:$4 sm:$0xff]   ;;  %v19869_v27 = vld [vmem:[#allocation58_spill] sm:$0xff]  ;;  %v12753_v14 = vld [vmem:[#allocation7 + $0x3cc] ss:$16 sps:$4 sm:$0xff]  }
 0x234   : > { %2736 = vmatprep.mubr.bf16.mxu0 %v15010_v51  ;;  %3122 = vmatprep.mubr.bf16.mxu1 %v15010_v51  ;;  %v15034_v12 = vpop.eup %13186  ;;  %19863 = vst [vmem:[#allocation55_spill] sm:$0xff] %v15040_v49  ;;  %v1441_v46 = vmul.f32 %v15020_v41, %v19867_v25  ;;  %v1436_v36 = vmul.f32 %v15027_v18, %v19868_v32  ;;  %v19871_v11 = vld [vmem:[#allocation67_spill] sm:$0xff]  ;;  %v12748_v4 = vld [vmem:[#allocation7 + $0x3c0] ss:$16 sps:$4 sm:$0xff]  }
 0x235   : > { %2863 = vmatprep.subr.bf16.mxu0 %v12744_v30  ;;  %19865 = vst [vmem:[#allocation51_spill] sm:$0xff] %v15045_v13  ;;  %v1722_v52 = vadd.f32 %v14697_v50, %v1573_v29  ;;  %v1440_v56 = vmul.f32 %v15020_v41, %v19869_v27  ;;  %v19870_v30 = vld [vmem:[#allocation71_spill] sm:$0xff]  ;;  %v1449_v24 = vmul.f32 %v15031_v33, %v19871_v11  ;;  %v19872_v27 = vld [vmem:[#allocation70_spill] sm:$0xff] }
 0x236   : > { %2864 = vmatpush1.bf16.msra.mxu0 %v12742_v15  ;;  %v1445_v37 = vmul.f32 %v15034_v12, %v19870_v30  ;;  %3249 = vmatprep.subr.bf16.mxu1 %v12747_v2  ;;  %v1727_v15 = vadd.f32 %v14630_v20, %v1578_v40  ;;  %v1731_v29 = vadd.f32 %v14630_v20, %v1582_v45  ;;  %v19873_v30 = vld [vmem:[#allocation66_spill] sm:$0xff] }
 0x237   : > { %v1577_v25 = vmul.f32 %v14663_v42, %v1428_v34  ;;  %v1581_v32 = vmul.f32 %v14663_v42, %v1432_v43  ;;  %v1444_v2 = vmul.f32 %v15034_v12, %v19872_v27  ;;  %v1448_v11 = vmul.f32 %v15031_v33, %v19873_v30  ;;  %3250 = vmatpush1.bf16.msra.mxu1 %v12745_v48  ;;  %v12751_v34 = vld [vmem:[#allocation7 + $0x3c8] ss:$16 sps:$4 sm:$0xff]   ;;  %v19874_v27 = vld [vmem:[#allocation78_spill] sm:$0xff] }
 0x238   : > { %v1590_v40 = vmul.f32 %v14621_v21, %v1441_v46  ;;  %v1585_v45 = vmul.f32 %v14663_v42, %v1436_v36  ;;  %2865 = vmatprep.subr.bf16.mxu0 %v12750_v5  ;;  %v1589_v51 = vmul.f32 %v14663_v42, %v1440_v56  ;;  %v1598_v43 = vmul.f32 %v14621_v21, %v1449_v24  ;;  %v12754_v30 = vld [vmem:[#allocation7 + $0x3e0] ss:$16 sps:$4 sm:$0xff]  }
 0x239   : > { %3251 = vmatprep.subr.bf16.mxu1 %v12753_v14  ;;  %v15079_v53 = vsub.s32 3, %v19874_v27  ;;  %v15084_v46 = vpack.c.bf16 %v1722_v52, %v1718_v60  ;;  %v1726_v36 = vadd.f32 %v14697_v50, %v1577_v25  ;;  %v1593_v48 = vmul.f32 %v14663_v42, %v1444_v2 }
 0x23a   : > { %2866 = vmatpush1.bf16.msra.mxu0 %v12748_v4  ;;  %v1597_v5 = vmul.f32 %v14663_v42, %v1448_v11  ;;  %v15089_v56 = vpack.c.bf16 %v1731_v29, %v1727_v15  ;;  %v1739_v4 = vadd.f32 %v14630_v20, %v1590_v40  ;;  %v1734_v14 = vadd.f32 %v14697_v50, %v1585_v45  ;;  %v13336_v15 = vld [vmem:[#allocation5] sm:$0xf]  ;;  %v12756_v11 = vld [vmem:[#allocation7 + $0x3e4] ss:$16 sps:$4 sm:$0xff]  }
 0x23b   : > { %2737 = vmatmul.mubr.bf16.gmra.mrb[24].mxu0 %v15040_v49  ;;  %3123 = vmatmul.mubr.bf16.gmra.mrb[24].mxu1 %v15040_v49  ;;  %v1586_v49 = vmul.f32 %v14621_v21, %v1437_v19  ;;  %19875 = vst [vmem:[#allocation54_spill] sm:$0xff] %v15079_v53  ;;  %v15082_v19 = vsub.s32 2, %v19874_v27  ;;  %19877 = vst [vmem:[#allocation63_spill] sm:$0xff] %v15084_v46  ;;  %v1738_v60 = vadd.f32 %v14697_v50, %v1589_v51 }
 0x23c   : > { %2746 = vmatprep.mubr.bf16.mxu0 %v15045_v13  ;;  %3132 = vmatprep.mubr.bf16.mxu1 %v15045_v13  ;;  %v1594_v13 = vmul.f32 %v14621_v21, %v1445_v37  ;;  %19878 = vst [vmem:[#allocation59_spill] sm:$0xff] %v15089_v56  ;;  %v1730_v37 = vadd.f32 %v14697_v50, %v1581_v32 }
 0x23d   : > { %19876 = vst [vmem:[#allocation50_spill] sm:$0xff] %v15082_v19  ;;  %v1735_v24 = vadd.f32 %v14630_v20, %v1586_v49  ;;  %3252 = vmatpush1.bf16.msra.mxu1 %v12751_v34  ;;  %v1747_v25 = vadd.f32 %v14630_v20, %v1598_v43  ;;  %v15101_v29 = vrot.slane %v13336_v15, %v15079_v53  ;;  %v13337_v49 = vld [vmem:[%s19307_s2] sm:$0xf]  ;;  %v19881_v43 = vld [vmem:[#allocation27_spill] sm:$0xff] }
 0x23e   : > { %v1743_v52 = vadd.f32 %v14630_v20, %v1594_v13  ;;  %v15107_v32 = vrot.slane %v13337_v49, %v15079_v53  ;;  %v15110_v51 = vrot.slane %v13336_v15, %v15082_v19  ;;  %v1742_v13 = vadd.f32 %v14697_v50, %v1593_v48  ;;  %v19882_v15 = vld [vmem:[#allocation29_spill] sm:$0xff]  ;;  %2867 = vmatprep.subr.bf16.mxu0 %v12756_v11 }
 0x23f   : > { %v1746_v2 = vadd.f32 %v14697_v50, %v1597_v5  ;;  %v15117_v40 = vrot.slane %v13337_v49, %v15082_v19  ;;  %v15119_v45 = vpack.c.bf16 %v1730_v37, %v1726_v36  ;;  %v15121_v34 = vpack.c.bf16 %v1739_v4, %v1735_v24  ;;  %v12757_v5 = vld [vmem:[#allocation7 + $0x3e8] ss:$16 sps:$4 sm:$0xff]   ;;  %v19886_v36 = vld [vmem:[#allocation28_spill] sm:$0xff]  ;;  %2868 = vmatpush1.bf16.msra.mxu0 %v12754_v30 }
 0x240   : > { %v1383_v27 = vmul.f32 %v14783_v3, %v19881_v43  ;;  %v1387_v53 = vmul.f32 %v14793_v57, %v19882_v15  ;;  %v15129_v48 = vpack.c.bf16 %v1747_v25, %v1743_v52  ;;  %v1382_v49 = vmul.f32 %v14783_v3, %v19885_v17  ;;  %v12762_v24 = vld [vmem:[#allocation8 + $0x4] ss:$16 sps:$4 sm:$0xff]   ;;  %v19887_v15 = vld [vmem:[#allocation31_spill] sm:$0xff] }
 0x241   : > { %19879 = vst [vmem:[#allocation62_spill] sm:$0xff] %v15119_v45  ;;  %19880 = vst [vmem:[#allocation58_spill] sm:$0xff] %v15121_v34  ;;  %v1386_v37 = vmul.f32 %v14793_v57, %v19886_v36  ;;  %v15141_v25 = vpack.c.bf16 %v1746_v2, %v1742_v13  ;;  %v19890_v57 = vld [vmem:[#allocation30_spill] sm:$0xff]  ;;  %4334 = vmatprep.subr.bf16.mxu0 %v12762_v24  ;;  %v19891_v2 = vld [vmem:[#allocation32_spill] sm:$0xff] }
 0x242   : > { %19884 = vst [vmem:[#allocation67_spill] sm:$0xff] %v15129_v48  ;;  %v1532_v4 = vmul.f32 %v15101_v29, %v1383_v27  ;;  %v1536_v43 = vmul.f32 %v15101_v29, %v1387_v53  ;;  %v1531_v3 = vmul.f32 %v15110_v51, %v1382_v49  ;;  %v1390_v30 = vmul.f32 %v14832_v23, %v19890_v57 }
 0x243   : > { %2747 = vmatmul.mubr.bf16.gmra.mrb[28].mxu0 %v15084_v46  ;;  %3133 = vmatmul.mubr.bf16.gmra.mrb[28].mxu1 %v15084_v46  ;;  %v12759_v46 = vld [vmem:[#allocation7 + $0x3ec] ss:$16 sps:$4 sm:$0xff]   ;;  %19889 = vst [vmem:[#allocation70_spill] sm:$0xff] %v15141_v25  ;;  %v1535_v17 = vmul.f32 %v15110_v51, %v1386_v37  ;;  %v1394_v49 = vmul.f32 %v14854_v10, %v19891_v2 }
 0x244   : > { %2756 = vmatprep.mubr.bf16.mxu0 %v15089_v56  ;;  %3142 = vmatprep.mubr.bf16.mxu1 %v15089_v56  ;;  %v15127_v56 = vpack.c.bf16 %v1738_v60, %v1734_v14  ;;  %v1391_v14 = vmul.f32 %v14832_v23, %v19887_v15  ;;  %v19888_v60 = vld [vmem:[#allocation33_spill] sm:$0xff]  ;;  %v1681_v53 = vadd.f32 %v15107_v32, %v1532_v4  ;;  %v19894_v15 = vld [vmem:[#allocation35_spill] sm:$0xff] }
 0x245   : > { %v1395_v52 = vmul.f32 %v14854_v10, %v19888_v60  ;;  %3253 = vmatprep.subr.bf16.mxu1 %v12759_v46  ;;  %v1685_v11 = vadd.f32 %v15107_v32, %v1536_v43  ;;  %v1680_v36 = vadd.f32 %v15117_v40, %v1531_v3  ;;  %v1684_v13 = vadd.f32 %v15117_v40, %v1535_v17  ;;  %v19895_v60 = vld [vmem:[#allocation37_spill] sm:$0xff]  ;;  %v19896_v3 = vld [vmem:[#allocation34_spill] sm:$0xff] }
 0x246   : > { %19883 = vst [vmem:[#allocation71_spill] sm:$0xff] %v15127_v56  ;;  %3254 = vmatpush1.bf16.msra.mxu1 %v12757_v5  ;;  %v1540_v27 = vmul.f32 %v15101_v29, %v1391_v14  ;;  %v1539_v37 = vmul.f32 %v15110_v51, %v1390_v30  ;;  %v1543_v10 = vmul.f32 %v15110_v51, %v1394_v49 }
 0x247   : > { %v1544_v46 = vmul.f32 %v15101_v29, %v1395_v52  ;;  %v15157_v23 = vpack.c.bf16 %v1685_v11, %v1681_v53  ;;  %v15163_v24 = vpack.c.bf16 %v1684_v13, %v1680_v36  ;;  %v1399_v14 = vmul.f32 %v14875_v1, %v19894_v15  ;;  %v19898_v53 = vld [vmem:[#allocation36_spill] sm:$0xff]  ;;  %v12765_v13 = vld [vmem:[#allocation8 + $0xc] ss:$16 sps:$4 sm:$0xff]  }
 0x248   : > { %v1689_v5 = vadd.f32 %v15107_v32, %v1540_v27  ;;  %v1688_v43 = vadd.f32 %v15117_v40, %v1539_v37  ;;  %v1403_v52 = vmul.f32 %v14910_v16, %v19895_v60  ;;  %v1398_v17 = vmul.f32 %v14875_v1, %v19896_v3  ;;  %v19899_v27 = vld [vmem:[#allocation41_spill] sm:$0xff]  ;;  %v19900_v37 = vld [vmem:[#allocation39_spill] sm:$0xff]  ;;  %4720 = vmatprep.subr.bf16.mxu1 %v12765_v13 }
 0x249   : > { %19892 = vst [vmem:[#allocation66_spill] sm:$0xff] %v15157_v23  ;;  %19893 = vst [vmem:[#allocation78_spill] sm:$0xff] %v15163_v24  ;;  %v1693_v4 = vadd.f32 %v15107_v32, %v1544_v46  ;;  %v1692_v30 = vadd.f32 %v15117_v40, %v1543_v10  ;;  %v1402_v11 = vmul.f32 %v14910_v16, %v19898_v53  ;;  %v19902_v16 = vld [vmem:[#allocation40_spill] sm:$0xff] }
 0x24a   : > { %v1407_v36 = vmul.f32 %v14920_v54, %v19899_v27  ;;  %v1548_v46 = vmul.f32 %v15101_v29, %v1399_v14  ;;  %v1552_v2 = vmul.f32 %v15101_v29, %v1403_v52  ;;  %v1547_v49 = vmul.f32 %v15110_v51, %v1398_v17 }
 0x24b   : > { %2757 = vmatmul.mubr.bf16.gmra.mrb[32].mxu0 %v15119_v45  ;;  %3143 = vmatmul.mubr.bf16.gmra.mrb[32].mxu1 %v15119_v45  ;;  %v15174_v57 = vpack.c.bf16 %v1693_v4, %v1689_v5  ;;  %v1411_v1 = vmul.f32 %v14914_v55, %v19900_v37  ;;  %v15186_v5 = vpack.c.bf16 %v1692_v30, %v1688_v43  ;;  %v19903_v30 = vld [vmem:[#allocation38_spill] sm:$0xff]  ;;  %v19908_v37 = vld [vmem:[#allocation43_spill] sm:$0xff] }
 0x24c   : > { %2766 = vmatprep.mubr.bf16.mxu0 %v15121_v34  ;;  %3152 = vmatprep.mubr.bf16.mxu1 %v15121_v34  ;;  %v1551_v4 = vmul.f32 %v15110_v51, %v1402_v11  ;;  %v1556_v10 = vmul.f32 %v15101_v29, %v1407_v36  ;;  %v1406_v15 = vmul.f32 %v14920_v54, %v19902_v16  ;;  %v19905_v36 = vld [vmem:[#allocation45_spill] sm:$0xff] }
 0x24d   : > { %19897 = vst [vmem:[#allocation27_spill] sm:$0xff] %v15174_v57  ;;  %19901 = vst [vmem:[#allocation29_spill] sm:$0xff] %v15186_v5  ;;  %v1697_v60 = vadd.f32 %v15107_v32, %v1548_v46  ;;  %v1701_v14 = vadd.f32 %v15107_v32, %v1552_v2  ;;  %v1696_v52 = vadd.f32 %v15117_v40, %v1547_v49 }
 0x24e   : > { %v1560_v3 = vmul.f32 %v15101_v29, %v1411_v1  ;;  %v1700_v17 = vadd.f32 %v15117_v40, %v1551_v4  ;;  %v1705_v43 = vadd.f32 %v15107_v32, %v1556_v10  ;;  %v1410_v53 = vmul.f32 %v14914_v55, %v19903_v30  ;;  %v19909_v10 = vld [vmem:[#allocation44_spill] sm:$0xff] }
 0x24f   : > { %v1555_v11 = vmul.f32 %v15110_v51, %v1406_v15  ;;  %v15203_v54 = vpack.c.bf16 %v1701_v14, %v1697_v60  ;;  %v1415_v13 = vmul.f32 %v14944_v59, %v19905_v36  ;;  %v1419_v1 = vmul.f32 %v14937_v61, %v19908_v37  ;;  %v19910_v60 = vld [vmem:[#allocation42_spill] sm:$0xff] }
 0x250   : > { %v1709_v27 = vadd.f32 %v15107_v32, %v1560_v3  ;;  %v15210_v46 = vpack.c.bf16 %v1700_v17, %v1696_v52  ;;  %v1559_v55 = vmul.f32 %v15110_v51, %v1410_v53  ;;  %v1414_v16 = vmul.f32 %v14944_v59, %v19909_v10  ;;  %v19911_v52 = vld [vmem:[#allocation49_spill] sm:$0xff]  ;;  %v19912_v17 = vld [vmem:[#allocation47_spill] sm:$0xff] }
 0x251   : > { %19904 = vst [vmem:[#allocation26_spill] sm:$0xff] %v15203_v54  ;;  %v1704_v2 = vadd.f32 %v15117_v40, %v1555_v11  ;;  %v1564_v4 = vmul.f32 %v15101_v29, %v1415_v13  ;;  %v1418_v14 = vmul.f32 %v14937_v61, %v19910_v60  ;;  %v1423_v3 = vmul.f32 %v14976_v35, %v19911_v52 }
 0x252   : > { %19906 = vst [vmem:[#allocation28_spill] sm:$0xff] %v15210_v46  ;;  %v15214_v49 = vpack.c.bf16 %v1709_v27, %v1705_v43  ;;  %v1708_v15 = vadd.f32 %v15117_v40, %v1559_v55  ;;  %v1427_v43 = vmul.f32 %v14972_v63, %v19912_v17  ;;  %v1568_v30 = vmul.f32 %v15101_v29, %v1419_v1  ;;  %v19913_v27 = vld [vmem:[#allocation48_spill] sm:$0xff]  ;;  %v19915_v1 = vld [vmem:[#allocation46_spill] sm:$0xff] }
 0x253   : > { %2767 = vmatmul.mubr.bf16.gmra.mrb[36].mxu0 %v15127_v56  ;;  %3153 = vmatmul.mubr.bf16.gmra.mrb[36].mxu1 %v15127_v56  ;;  %v1713_v53 = vadd.f32 %v15107_v32, %v1564_v4  ;;  %v1563_v11 = vmul.f32 %v15110_v51, %v1414_v16  ;;  %v1422_v59 = vmul.f32 %v14976_v35, %v19913_v27  ;;  %v19948_v56 = vld [vmem:[#allocation88_spill] sm:$0xff] }
 0x254   : > { %2776 = vmatprep.mubr.bf16.mxu0 %v15129_v48  ;;  %3162 = vmatprep.mubr.bf16.mxu1 %v15129_v48  ;;  %19907 = vst [vmem:[#allocation31_spill] sm:$0xff] %v15214_v49  ;;  %v15233_v36 = vpack.c.bf16 %v1708_v15, %v1704_v2  ;;  %v1567_v13 = vmul.f32 %v15110_v51, %v1418_v14  ;;  %v19916_v15 = vld [vmem:[#allocation57_spill] sm:$0xff] }
 0x255   : > { %v1572_v61 = vmul.f32 %v15101_v29, %v1423_v3  ;;  %v1576_v55 = vmul.f32 %v15101_v29, %v1427_v43  ;;  %v1717_v37 = vadd.f32 %v15107_v32, %v1568_v30  ;;  %v1712_v10 = vadd.f32 %v15117_v40, %v1563_v11  ;;  %v19920_v30 = vld [vmem:[#allocation53_spill] sm:$0xff] }
 0x256   : > { %19914 = vst [vmem:[#allocation33_spill] sm:$0xff] %v15233_v36  ;;  %v1426_v4 = vmul.f32 %v14972_v63, %v19915_v1  ;;  %v1571_v16 = vmul.f32 %v15110_v51, %v1422_v59  ;;  %v1716_v60 = vadd.f32 %v15117_v40, %v1567_v13  ;;  %v1431_v14 = vmul.f32 %v15000_v44, %v19916_v15  ;;  %v19921_v13 = vld [vmem:[#allocation56_spill] sm:$0xff] }
 0x257   : > { %v1721_v35 = vadd.f32 %v15107_v32, %v1572_v61  ;;  %v1725_v2 = vadd.f32 %v15107_v32, %v1576_v55  ;;  %v15250_v52 = vpack.c.bf16 %v1717_v37, %v1713_v53  ;;  %v1435_v11 = vmul.f32 %v14984_v38, %v19920_v30  ;;  %v19922_v53 = vld [vmem:[#allocation52_spill] sm:$0xff]  ;;  %v19923_v37 = vld [vmem:[#allocation65_spill] sm:$0xff] }
 0x258   : > { %v1575_v3 = vmul.f32 %v15110_v51, %v1426_v4  ;;  %v1720_v63 = vadd.f32 %v15117_v40, %v1571_v16  ;;  %v15254_v17 = vpack.c.bf16 %v1716_v60, %v1712_v10  ;;  %v1580_v27 = vmul.f32 %v15101_v29, %v1431_v14  ;;  %v19924_v16 = vld [vmem:[#allocation61_spill] sm:$0xff] }
 0x259   : > { %19917 = vst [vmem:[#allocation30_spill] sm:$0xff] %v15250_v52  ;;  %v15256_v43 = vpack.c.bf16 %v1725_v2, %v1721_v35  ;;  %v1430_v61 = vmul.f32 %v15000_v44, %v19921_v13  ;;  %v1434_v55 = vmul.f32 %v14984_v38, %v19922_v53  ;;  %v1439_v1 = vmul.f32 %v15027_v18, %v19923_v37  ;;  %v19925_v35 = vld [vmem:[#allocation64_spill] sm:$0xff] }
 0x25a   : > { %19918 = vst [vmem:[#allocation32_spill] sm:$0xff] %v15254_v17  ;;  %v1724_v59 = vadd.f32 %v15117_v40, %v1575_v3  ;;  %v1584_v10 = vmul.f32 %v15101_v29, %v1435_v11  ;;  %v1729_v4 = vadd.f32 %v15107_v32, %v1580_v27  ;;  %v1443_v60 = vmul.f32 %v15020_v41, %v19924_v16  ;;  %v19927_v11 = vld [vmem:[#allocation60_spill] sm:$0xff]  ;;  %v19931_v16 = vld [vmem:[#allocation69_spill] sm:$0xff] }
 0x25b   : > { %2777 = vmatmul.mubr.bf16.gmra.mrb[40].mxu0 %v15141_v25  ;;  %3163 = vmatmul.mubr.bf16.gmra.mrb[40].mxu1 %v15141_v25  ;;  %19919 = vst [vmem:[#allocation35_spill] sm:$0xff] %v15256_v43  ;;  %v1438_v2 = vmul.f32 %v15027_v18, %v19925_v35  ;;  %v1579_v44 = vmul.f32 %v15110_v51, %v1430_v61 }
 0x25c   : > { %v15274_v15 = vpack.c.bf16 %v1724_v59, %v1720_v63  ;;  %v1583_v14 = vmul.f32 %v15110_v51, %v1434_v55  ;;  %v1588_v38 = vmul.f32 %v15101_v29, %v1439_v1  ;;  %v1733_v3 = vadd.f32 %v15107_v32, %v1584_v10  ;;  %v19928_v59 = vld [vmem:[#allocation73_spill] sm:$0xff] }
 0x25d   : > { %v1592_v30 = vmul.f32 %v15101_v29, %v1443_v60  ;;  %v1442_v27 = vmul.f32 %v15020_v41, %v19927_v11  ;;  %v1587_v13 = vmul.f32 %v15110_v51, %v1438_v2  ;;  %v1728_v53 = vadd.f32 %v15117_v40, %v1579_v44  ;;  %v19932_v2 = vld [vmem:[#allocation72_spill] sm:$0xff] }
 0x25e   : > { %19926 = vst [vmem:[#allocation37_spill] sm:$0xff] %v15274_v15  ;;  %v1732_v18 = vadd.f32 %v15117_v40, %v1583_v14  ;;  %v1737_v63 = vadd.f32 %v15107_v32, %v1588_v38  ;;  %v1447_v61 = vmul.f32 %v15034_v12, %v19928_v59  ;;  %v15289_v55 = vpack.c.bf16 %v1733_v3, %v1729_v4  ;;  %v19934_v38 = vld [vmem:[#allocation68_spill] sm:$0xff] }
 0x25f   : > { %v1741_v37 = vadd.f32 %v15107_v32, %v1592_v30  ;;  %v1591_v1 = vmul.f32 %v15110_v51, %v1442_v27  ;;  %v1736_v10 = vadd.f32 %v15117_v40, %v1587_v13  ;;  %v1451_v60 = vmul.f32 %v15031_v33, %v19931_v16 }
 0x260   : > { %19929 = vst [vmem:[#allocation34_spill] sm:$0xff] %v15289_v55  ;;  %v15294_v41 = vpack.c.bf16 %v1732_v18, %v1728_v53  ;;  %v1596_v35 = vmul.f32 %v15101_v29, %v1447_v61  ;;  %v1446_v44 = vmul.f32 %v15034_v12, %v19932_v2  ;;  %v1450_v3 = vmul.f32 %v15031_v33, %v19934_v38  ;;  %v1227_v33 = vpop.xlane.xlu1 %1226 }
 0x261   : > { %v15301_v14 = vpack.c.bf16 %v1741_v37, %v1737_v63  ;;  %v1740_v4 = vadd.f32 %v15117_v40, %v1591_v1  ;;  %v1600_v30 = vmul.f32 %v15101_v29, %v1451_v60  ;;  %v1291_v37 = vmul.f32 0.001953125, %v1227_v33  ;;  %v19941_v33 = vld [vmem:[#allocation76_spill] sm:$0xff] }
 0x262   : > { %19930 = vst [vmem:[#allocation36_spill] sm:$0xff] %v15294_v41  ;;  %v1745_v11 = vadd.f32 %v15107_v32, %v1596_v35  ;;  %v1595_v27 = vmul.f32 %v15110_v51, %v1446_v44  ;;  %v1599_v53 = vmul.f32 %v15110_v51, %v1450_v3 }
 0x263   : > { %19933 = vst [vmem:[#allocation41_spill] sm:$0xff] %v15301_v14  ;;  %v15309_v13 = vpack.c.bf16 %v1740_v4, %v1736_v10  ;;  %v1749_v18 = vadd.f32 %v15107_v32, %v1600_v30  ;;  %v1323_v1 = vadd.f32 1e-06, %v1291_v37  ;;  %v19938_v30 = vld [vmem:[#allocation75_spill] sm:$0xff] }
 0x264   : > { %v1744_v12 = vadd.f32 %v15117_v40, %v1595_v27  ;;  %v1748_v63 = vadd.f32 %v15117_v40, %v1599_v53  ;;  %v19939_v53 = vld [vmem:[#allocation74_spill] sm:$0xff] }
 0x265   : > { %19935 = vst [vmem:[#allocation39_spill] sm:$0xff] %v15309_v13  ;;  %v15315_v59 = vpack.c.bf16 %v1749_v18, %v1745_v11  ;;  %13188 = vrsqrt.f32 %v1323_v1 }
 0x266   : > { %v15317_v61 = vpack.c.bf16 %v1748_v63, %v1744_v12  ;;  %v19940_v12 = vld [vmem:[#allocation77_spill] sm:$0xff] }
 0x267   : > { %19936 = vst [vmem:[#allocation40_spill] sm:$0xff] %v15315_v59 }
 0x268   : > { %19937 = vst [vmem:[#allocation38_spill] sm:$0xff] %v15317_v61 }
 0x26f   : > { %v13189_v44 = vpop.eup %13188 }
 0x270   : > { %v1457_v11 = vmul.f32 %v13189_v44, %v19938_v30  ;;  %v1456_v18 = vmul.f32 %v13189_v44, %v19939_v53  ;;  %v1459_v63 = vmul.f32 %v13189_v44, %v19940_v12  ;;  %v1458_v37 = vmul.f32 %v13189_v44, %v19941_v33  ;;  %v19943_v53 = vld [vmem:[#allocation79_spill] sm:$0xff] }
 0x271   : > { %v19944_v12 = vld [vmem:[#allocation83_spill] sm:$0xff] }
 0x27f   : > { %v1222_v16 = vpop.xlane.xlu0 %1221 }
 0x280   : > { %v1290_v60 = vmul.f32 0.001953125, %v1222_v16  ;;  %v1606_v16 = vmul.f32 %v14621_v21, %v1457_v11 }
 0x282   : > { %v1322_v10 = vadd.f32 1e-06, %v1290_v60  ;;  %v1755_v44 = vadd.f32 %v14630_v20, %v1606_v16 }
 0x283   : > { %v1237_v35 = vpop.xlane.xlu1 %1236 }
 0x284   : > { %13190 = vrsqrt.f32 %v1322_v10  ;;  %v1293_v2 = vmul.f32 0.001953125, %v1237_v35  ;;  %v1605_v35 = vmul.f32 %v14663_v42, %v1456_v18 }
 0x286   : > { %v1325_v4 = vadd.f32 1e-06, %v1293_v2  ;;  %v1232_v38 = vpop.xlane.xlu0 %1231  ;;  %v1608_v2 = vmul.f32 %v15101_v29, %v1459_v63 }
 0x287   : > { %v1292_v3 = vmul.f32 0.001953125, %v1232_v38 }
 0x288   : > { %13192 = vrsqrt.f32 %v1325_v4  ;;  %v1607_v4 = vmul.f32 %v15110_v51, %v1458_v37  ;;  %v1754_v37 = vadd.f32 %v14697_v50, %v1605_v35 }
 0x289   : > { %v1324_v27 = vadd.f32 1e-06, %v1292_v3  ;;  %v19942_v3 = vld [vmem:[#allocation80_spill] sm:$0xff] }
 0x28b   : > { %13194 = vrsqrt.f32 %v1324_v27  ;;  %v19945_v27 = vld [vmem:[#allocation82_spill] sm:$0xff] }
 0x28c   : > { %v1247_v1 = vpop.xlane.xlu1 %1246 }
 0x28d   : > { %v1295_v60 = vmul.f32 0.001953125, %v1247_v1 }
 0x28e   : > { %v13191_v10 = vpop.eup %13190 }
 0x28f   : > { %v1327_v38 = vadd.f32 1e-06, %v1295_v60  ;;  %v1453_v30 = vmul.f32 %v13191_v10, %v19942_v3  ;;  %v1452_v19 = vmul.f32 %v13191_v10, %v19943_v53  ;;  %v1455_v25 = vmul.f32 %v13191_v10, %v19944_v12 }
 0x290   : > { %v1454_v33 = vmul.f32 %v13191_v10, %v19945_v27  ;;  %v1757_v60 = vadd.f32 %v15107_v32, %v1608_v2  ;;  %v1756_v53 = vadd.f32 %v15117_v40, %v1607_v4  ;;  %v19947_v27 = vld [vmem:[#allocation85_spill] sm:$0xff] }
 0x291   : > { %13196 = vrsqrt.f32 %v1327_v38  ;;  %v1602_v11 = vmul.f32 %v14621_v21, %v1453_v30  ;;  %v1601_v18 = vmul.f32 %v14663_v42, %v1452_v19  ;;  %v1604_v63 = vmul.f32 %v15101_v29, %v1455_v25  ;;  %v19946_v38 = vld [vmem:[#allocation86_spill] sm:$0xff] }
 0x292   : > { %v13193_v1 = vpop.eup %13192  ;;  %v1603_v3 = vmul.f32 %v15110_v51, %v1454_v33 }
 0x293   : > { %v1242_v12 = vpop.xlane.xlu0 %1241  ;;  %v1751_v16 = vadd.f32 %v14630_v20, %v1602_v11  ;;  %v1750_v10 = vadd.f32 %v14697_v50, %v1601_v18  ;;  %v1465_v30 = vmul.f32 %v13193_v1, %v19946_v38  ;;  %v1464_v19 = vmul.f32 %v13193_v1, %v19947_v27 }
 0x294   : > { %v1294_v48 = vmul.f32 0.001953125, %v1242_v12  ;;  %v1753_v25 = vadd.f32 %v15107_v32, %v1604_v63  ;;  %v1752_v35 = vadd.f32 %v15117_v40, %v1603_v3  ;;  %v1467_v2 = vmul.f32 %v13193_v1, %v19948_v56  ;;  %v19953_v63 = vld [vmem:[#allocation91_spill] sm:$0xff] }
 0x295   : > { %v15346_v34 = vpack.c.bf16 %v1755_v44, %v1751_v16  ;;  %v15348_v33 = vpack.c.bf16 %v1754_v37, %v1750_v10  ;;  %v1614_v4 = vmul.f32 %v14621_v21, %v1465_v30  ;;  %v13195_v11 = vpop.eup %13194  ;;  %v1613_v18 = vmul.f32 %v14663_v42, %v1464_v19  ;;  %v19954_v44 = vld [vmem:[#allocation90_spill] sm:$0xff]  ;;  %v19955_v10 = vld [vmem:[#allocation92_spill] sm:$0xff] }
 0x296   : > { %v1326_v45 = vadd.f32 1e-06, %v1294_v48  ;;  %v15352_v38 = vpack.c.bf16 %v1757_v60, %v1753_v25  ;;  %v15354_v27 = vpack.c.bf16 %v1756_v53, %v1752_v35  ;;  %v1461_v56 = vmul.f32 %v13195_v11, %v19953_v63  ;;  %v19956_v35 = vld [vmem:[#allocation87_spill] sm:$0xff] }
 0x297   : > { %19949 = vst [vmem:[#allocation45_spill] sm:$0xff] %v15346_v34  ;;  %19950 = vst [vmem:[#allocation43_spill] sm:$0xff] %v15348_v33  ;;  %2786 = vmatprep.mubr.bf16.mxu0 %v15346_v34  ;;  %3172 = vmatprep.mubr.bf16.mxu1 %v15346_v34  ;;  %v1460_v3 = vmul.f32 %v13195_v11, %v19954_v44  ;;  %v1257_v37 = vpop.xlane.xlu1 %1256  ;;  %v1463_v48 = vmul.f32 %v13195_v11, %v14656_v9 }
 0x298   : > { %19951 = vst [vmem:[#allocation44_spill] sm:$0xff] %v15352_v38  ;;  %19952 = vst [vmem:[#allocation42_spill] sm:$0xff] %v15354_v27  ;;  %13198 = vrsqrt.f32 %v1326_v45  ;;  %2787 = vmatmul.mubr.bf16.gmra.mrb[44].mxu0 %v15348_v33  ;;  %3173 = vmatmul.mubr.bf16.gmra.mrb[44].mxu1 %v15348_v33  ;;  %v1616_v60 = vmul.f32 %v15101_v29, %v1467_v2  ;;  %v1297_v53 = vmul.f32 0.001953125, %v1257_v37 }
 0x299   : > { %v1610_v12 = vmul.f32 %v14621_v21, %v1461_v56  ;;  %v1609_v16 = vmul.f32 %v14663_v42, %v1460_v3  ;;  %v1462_v30 = vmul.f32 %v13195_v11, %v19955_v10  ;;  %v1763_v19 = vadd.f32 %v14630_v20, %v1614_v4 }
 0x29a   : > { %v1762_v45 = vadd.f32 %v14697_v50, %v1613_v18  ;;  %v1612_v25 = vmul.f32 %v15101_v29, %v1463_v48  ;;  %v1466_v63 = vmul.f32 %v13193_v1, %v19956_v35  ;;  %v1329_v33 = vadd.f32 1e-06, %v1297_v53  ;;  %v19959_v53 = vld [vmem:[#allocation94_spill] sm:$0xff] }
 0x29b   : > { %v13197_v44 = vpop.eup %13196  ;;  %v1759_v9 = vadd.f32 %v14630_v20, %v1610_v12  ;;  %v1758_v2 = vadd.f32 %v14697_v50, %v1609_v16  ;;  %v1611_v56 = vmul.f32 %v15110_v51, %v1462_v30  ;;  %v1765_v11 = vadd.f32 %v15107_v32, %v1616_v60 }
 0x29c   : > { %v1761_v3 = vadd.f32 %v15107_v32, %v1612_v25  ;;  %v1615_v4 = vmul.f32 %v15110_v51, %v1466_v63  ;;  %13200 = vrsqrt.f32 %v1329_v33  ;;  %v1473_v48 = vmul.f32 %v13197_v44, %v14674_v0  ;;  %v19961_v33 = vld [vmem:[#allocation96_spill] sm:$0xff]  ;;  %v19963_v0 = vld [vmem:[#allocation95_spill] sm:$0xff] }
 0x29d   : > { %v15377_v18 = vpack.c.bf16 %v1763_v19, %v1759_v9  ;;  %v15379_v37 = vpack.c.bf16 %v1762_v45, %v1758_v2  ;;  %v1760_v1 = vadd.f32 %v15117_v40, %v1611_v56  ;;  %v1472_v12 = vmul.f32 %v13197_v44, %v19959_v53 }
 0x29e   : > { %v15384_v16 = vpack.c.bf16 %v1765_v11, %v1761_v3  ;;  %v1764_v10 = vadd.f32 %v15117_v40, %v1615_v4  ;;  %v1475_v60 = vmul.f32 %v13197_v44, %v19961_v33  ;;  %v1474_v25 = vmul.f32 %v13197_v44, %v19963_v0  ;;  %v19964_v3 = vld [vmem:[#allocation100_spill] sm:$0xff]  ;;  %v19965_v4 = vld [vmem:[#allocation98_spill] sm:$0xff] }
 0x29f   : > { %19957 = vst [vmem:[#allocation49_spill] sm:$0xff] %v15377_v18  ;;  %19958 = vst [vmem:[#allocation47_spill] sm:$0xff] %v15379_v37  ;;  %2796 = vmatprep.mubr.bf16.mxu0 %v15377_v18  ;;  %3182 = vmatprep.mubr.bf16.mxu1 %v15377_v18  ;;  %v1622_v9 = vmul.f32 %v14621_v21, %v1473_v48  ;;  %v1621_v2 = vmul.f32 %v14663_v42, %v1472_v12  ;;  %v19991_v18 = vld [vmem:[#allocation102_spill] sm:$0xff] }
 0x2a0   : > { %19960 = vst [vmem:[#allocation48_spill] sm:$0xff] %v15384_v16  ;;  %v1252_v30 = vpop.xlane.xlu0 %1251  ;;  %2797 = vmatmul.mubr.bf16.gmra.mrb[48].mxu0 %v15379_v37  ;;  %3183 = vmatmul.mubr.bf16.gmra.mrb[48].mxu1 %v15379_v37  ;;  %v15392_v45 = vpack.c.bf16 %v1764_v10, %v1760_v1  ;;  %v1624_v56 = vmul.f32 %v15101_v29, %v1475_v60  ;;  %v19967_v37 = vld [vmem:[#allocation101_spill] sm:$0xff] }
 0x2a1   : > { %v1296_v19 = vmul.f32 0.001953125, %v1252_v30  ;;  %v19966_v30 = vld [vmem:[#allocation103_spill] sm:$0xff]  ;;  %v1623_v10 = vmul.f32 %v15110_v51, %v1474_v25  ;;  %v1771_v60 = vadd.f32 %v14630_v20, %v1622_v9  ;;  %v1770_v0 = vadd.f32 %v14697_v50, %v1621_v2 }
 0x2a2   : > { %19962 = vst [vmem:[#allocation46_spill] sm:$0xff] %v15392_v45  ;;  %v13199_v35 = vpop.eup %13198 }
 0x2a3   : > { %v1328_v63 = vadd.f32 1e-06, %v1296_v19  ;;  %v1469_v11 = vmul.f32 %v13199_v35, %v19964_v3  ;;  %v1468_v53 = vmul.f32 %v13199_v35, %v19965_v4  ;;  %v1471_v33 = vmul.f32 %v13199_v35, %v19966_v30 }
 0x2a4   : > { %v1470_v1 = vmul.f32 %v13199_v35, %v19967_v37  ;;  %v1773_v3 = vadd.f32 %v15107_v32, %v1624_v56 }
 0x2a5   : > { %13202 = vrsqrt.f32 %v1328_v63  ;;  %v1618_v44 = vmul.f32 %v14621_v21, %v1469_v11  ;;  %v1617_v19 = vmul.f32 %v14663_v42, %v1468_v53  ;;  %v1620_v48 = vmul.f32 %v15101_v29, %v1471_v33 }
 0x2a6   : > { %v1267_v12 = vpop.xlane.xlu1 %1266  ;;  %v1619_v4 = vmul.f32 %v15110_v51, %v1470_v1  ;;  %v13201_v63 = vpop.eup %13200  ;;  %v1772_v53 = vadd.f32 %v15117_v40, %v1623_v10 }
 0x2a7   : > { %v1299_v30 = vmul.f32 0.001953125, %v1267_v12  ;;  %v1767_v37 = vadd.f32 %v14630_v20, %v1618_v44  ;;  %v1766_v25 = vadd.f32 %v14697_v50, %v1617_v19  ;;  %v1769_v35 = vadd.f32 %v15107_v32, %v1620_v48  ;;  %v19972_v48 = vld [vmem:[#allocation105_spill] sm:$0xff] }
 0x2a8   : > { %v1768_v11 = vadd.f32 %v15117_v40, %v1619_v4  ;;  %v1481_v1 = vmul.f32 %v13201_v63, %v14747_v8  ;;  %v1480_v12 = vmul.f32 %v13201_v63, %v14744_v39  ;;  %v1483_v19 = vmul.f32 %v13201_v63, %v14759_v7 }
 0x2a9   : > { %v1331_v33 = vadd.f32 1e-06, %v1299_v30  ;;  %v15415_v9 = vpack.c.bf16 %v1771_v60, %v1767_v37  ;;  %v15417_v2 = vpack.c.bf16 %v1770_v0, %v1766_v25  ;;  %v15419_v56 = vpack.c.bf16 %v1773_v3, %v1769_v35  ;;  %v19973_v30 = vld [vmem:[#allocation108_spill] sm:$0xff]  ;;  %v19974_v25 = vld [vmem:[#allocation107_spill] sm:$0xff] }
 0x2aa   : > { %v15423_v44 = vpack.c.bf16 %v1772_v53, %v1768_v11  ;;  %v1482_v60 = vmul.f32 %v13201_v63, %v19972_v48  ;;  %v1630_v39 = vmul.f32 %v14621_v21, %v1481_v1  ;;  %v1629_v3 = vmul.f32 %v14663_v42, %v1480_v12  ;;  %v19975_v11 = vld [vmem:[#allocation110_spill] sm:$0xff] }
 0x2ab   : > { %19968 = vst [vmem:[#allocation57_spill] sm:$0xff] %v15415_v9  ;;  %19969 = vst [vmem:[#allocation53_spill] sm:$0xff] %v15417_v2  ;;  %13204 = vrsqrt.f32 %v1331_v33  ;;  %2806 = vmatprep.mubr.bf16.mxu0 %v15415_v9  ;;  %3192 = vmatprep.mubr.bf16.mxu1 %v15415_v9  ;;  %v1632_v7 = vmul.f32 %v15101_v29, %v1483_v19  ;;  %v19976_v33 = vld [vmem:[#allocation109_spill] sm:$0xff] }
 0x2ac   : > { %19970 = vst [vmem:[#allocation56_spill] sm:$0xff] %v15419_v56  ;;  %19971 = vst [vmem:[#allocation52_spill] sm:$0xff] %v15423_v44  ;;  %v1262_v10 = vpop.xlane.xlu0 %1261  ;;  %2807 = vmatmul.mubr.bf16.gmra.mrb[52].mxu0 %v15417_v2  ;;  %3193 = vmatmul.mubr.bf16.gmra.mrb[52].mxu1 %v15417_v2  ;;  %v1631_v2 = vmul.f32 %v15110_v51, %v1482_v60  ;;  %v1779_v19 = vadd.f32 %v14630_v20, %v1630_v39 }
 0x2ad   : > { %v1298_v0 = vmul.f32 0.001953125, %v1262_v10  ;;  %v1778_v10 = vadd.f32 %v14697_v50, %v1629_v3  ;;  %v1781_v60 = vadd.f32 %v15107_v32, %v1632_v7  ;;  %v19979_v3 = vld [vmem:[#allocation23_spill] sm:$0xff]  ;;  %v19983_v7 = vld [vmem:[#allocation113_spill] sm:$0xff] }
 0x2af   : > { %v13203_v8 = vpop.eup %13202  ;;  %v1330_v4 = vadd.f32 1e-06, %v1298_v0 }
 0x2b0   : > { %v1477_v37 = vmul.f32 %v13203_v8, %v19973_v30  ;;  %v1476_v35 = vmul.f32 %v13203_v8, %v19974_v25  ;;  %v1479_v53 = vmul.f32 %v13203_v8, %v19975_v11  ;;  %v1478_v9 = vmul.f32 %v13203_v8, %v19976_v33  ;;  %v19980_v11 = vld [vmem:[#allocation93_spill] sm:$0xff] }
 0x2b1   : > { %13206 = vrsqrt.f32 %v1330_v4 }
 0x2b2   : > { %v1626_v63 = vmul.f32 %v14621_v21, %v1477_v37  ;;  %v1625_v1 = vmul.f32 %v14663_v42, %v1476_v35  ;;  %v1628_v12 = vmul.f32 %v15101_v29, %v1479_v53  ;;  %v1627_v48 = vmul.f32 %v15110_v51, %v1478_v9 }
 0x2b3   : > { %v1780_v37 = vadd.f32 %v15117_v40, %v1631_v2  ;;  %v1371_v9 = vmul.f32 %v19980_v11, %v19979_v3  ;;  %v19987_v3 = vld [vmem:[#allocation116_spill] sm:$0xff] }
 0x2b4   : > { %v1775_v0 = vadd.f32 %v14630_v20, %v1626_v63  ;;  %v1774_v30 = vadd.f32 %v14697_v50, %v1625_v1  ;;  %v1777_v8 = vadd.f32 %v15107_v32, %v1628_v12  ;;  %v1776_v4 = vadd.f32 %v15117_v40, %v1627_v48  ;;  %v19984_v12 = vld [vmem:[#allocation112_spill] sm:$0xff]  ;;  %v19986_v48 = vld [vmem:[#allocation89_spill] sm:$0xff] }
 0x2b5   : > { %v13205_v25 = vpop.eup %13204 }
 0x2b6   : > { %v15451_v35 = vpack.c.bf16 %v1779_v19, %v1775_v0  ;;  %v15453_v39 = vpack.c.bf16 %v1778_v10, %v1774_v30  ;;  %v15457_v53 = vpack.c.bf16 %v1781_v60, %v1777_v8  ;;  %v1489_v33 = vmul.f32 %v13205_v25, %v14836_v6  ;;  %v19985_v10 = vld [vmem:[#allocation19_spill] sm:$0xff] }
 0x2b7   : > { %v15460_v63 = vpack.c.bf16 %v1780_v37, %v1776_v4  ;;  %v1488_v2 = vmul.f32 %v13205_v25, %v14826_v26  ;;  %v1491_v1 = vmul.f32 %v13205_v25, %v19983_v7  ;;  %v1490_v19 = vmul.f32 %v13205_v25, %v19984_v12  ;;  %v19988_v12 = vld [vmem:[#allocation115_spill] sm:$0xff] }
 0x2b8   : > { %19977 = vst [vmem:[#allocation65_spill] sm:$0xff] %v15451_v35  ;;  %19978 = vst [vmem:[#allocation61_spill] sm:$0xff] %v15453_v39  ;;  %2816 = vmatprep.mubr.bf16.mxu0 %v15451_v35  ;;  %3202 = vmatprep.mubr.bf16.mxu1 %v15451_v35  ;;  %v1367_v0 = vmul.f32 %v19986_v48, %v19985_v10  ;;  %v1520_v6 = vmul.f32 %v15101_v29, %v1371_v9  ;;  %v19989_v35 = vld [vmem:[#allocation22_spill] sm:$0xff] }
 0x2b9   : > { %19981 = vst [vmem:[#allocation64_spill] sm:$0xff] %v15457_v53  ;;  %19982 = vst [vmem:[#allocation60_spill] sm:$0xff] %v15460_v63  ;;  %2817 = vmatmul.mubr.bf16.gmra.mrb[56].mxu0 %v15453_v39  ;;  %3203 = vmatmul.mubr.bf16.gmra.mrb[56].mxu1 %v15453_v39  ;;  %v1638_v8 = vmul.f32 %v14621_v21, %v1489_v33  ;;  %v1637_v60 = vmul.f32 %v14663_v42, %v1488_v2  ;;  %v19990_v2 = vld [vmem:[#allocation25_spill] sm:$0xff] }
 0x2ba   : > { %v1640_v26 = vmul.f32 %v15101_v29, %v1491_v1  ;;  %v1639_v4 = vmul.f32 %v15110_v51, %v1490_v19  ;;  %v1516_v10 = vmul.f32 %v15101_v29, %v1367_v0  ;;  %v1669_v9 = vadd.f32 %v15107_v32, %v1520_v6 }
 0x2bb   : > { %v13207_v30 = vpop.eup %13206  ;;  %v1370_v33 = vmul.f32 %v19980_v11, %v19989_v35  ;;  %v1379_v1 = vmul.f32 %v19991_v18, %v19990_v2  ;;  %v1786_v0 = vadd.f32 %v14697_v50, %v1637_v60 }
 0x2bc   : > { %v1485_v37 = vmul.f32 %v13207_v30, %v14873_v58  ;;  %v1484_v25 = vmul.f32 %v13207_v30, %v14869_v47  ;;  %v1487_v7 = vmul.f32 %v13207_v30, %v19987_v3  ;;  %v1486_v39 = vmul.f32 %v13207_v30, %v19988_v12 }
 0x2bd   : > { %v1787_v30 = vadd.f32 %v14630_v20, %v1638_v8  ;;  %v1789_v6 = vadd.f32 %v15107_v32, %v1640_v26  ;;  %v1788_v12 = vadd.f32 %v15117_v40, %v1639_v4  ;;  %v19993_v8 = vld [vmem:[#allocation21_spill] sm:$0xff] }
 0x2be   : > { %v1634_v19 = vmul.f32 %v14621_v21, %v1485_v37  ;;  %v1633_v58 = vmul.f32 %v14663_v42, %v1484_v25  ;;  %v1636_v47 = vmul.f32 %v15101_v29, %v1487_v7  ;;  %v1635_v3 = vmul.f32 %v15110_v51, %v1486_v39  ;;  %v19992_v25 = vld [vmem:[#allocation18_spill] sm:$0xff]  ;;  %v19994_v7 = vld [vmem:[#allocation99_spill] sm:$0xff] }
 0x2bf   : > { %v1665_v37 = vadd.f32 %v15107_v32, %v1516_v10  ;;  %v1366_v39 = vmul.f32 %v19986_v48, %v19992_v25  ;;  %v1375_v60 = vmul.f32 %v19994_v7, %v19993_v8  ;;  %v1528_v48 = vmul.f32 %v15101_v29, %v1379_v1  ;;  %v12766_v25 = vld [vmem:[#allocation8 + $0x20] ss:$16 sps:$4 sm:$0xff]   ;;  %v12774_v8 = vld [vmem:[#allocation8 + $0x44] ss:$16 sps:$4 sm:$0xff]  }
 0x2c0   : > { %v1783_v35 = vadd.f32 %v14630_v20, %v1634_v19  ;;  %v1782_v11 = vadd.f32 %v14697_v50, %v1633_v58  ;;  %v1785_v21 = vadd.f32 %v15107_v32, %v1636_v47  ;;  %v1784_v42 = vadd.f32 %v15117_v40, %v1635_v3  ;;  %v20000_v47 = vld [vmem:[#allocation24_spill] sm:$0xff] }
 0x2c1   : > { %v1519_v50 = vmul.f32 %v15110_v51, %v1370_v33  ;;  %v15514_v10 = vpack.c.bf16 %v1669_v9, %v1665_v37  ;;  %v1515_v19 = vmul.f32 %v15110_v51, %v1366_v39  ;;  %v1524_v33 = vmul.f32 %v15101_v29, %v1375_v60  ;;  %v12771_v37 = vld [vmem:[#allocation8 + $0x2c] ss:$16 sps:$4 sm:$0xff]   ;;  %v12769_v39 = vld [vmem:[#allocation8 + $0x28] ss:$16 sps:$4 sm:$0xff]  }
 0x2c2   : > { %v15503_v2 = vpack.c.bf16 %v1787_v30, %v1783_v35  ;;  %v15505_v26 = vpack.c.bf16 %v1786_v0, %v1782_v11  ;;  %v15507_v4 = vpack.c.bf16 %v1789_v6, %v1785_v21  ;;  %v15509_v20 = vpack.c.bf16 %v1788_v12, %v1784_v42  ;;  %v20001_v30 = vld [vmem:[#allocation20_spill] sm:$0xff]  ;;  %v12763_v11 = vld [vmem:[#allocation8 + $0x8] ss:$16 sps:$4 sm:$0xff]  }
 0x2c3   : > { %19999 = vst [vmem:[#allocation75_spill] sm:$0xff] %v15514_v10  ;;  %v1668_v58 = vadd.f32 %v15117_v40, %v1519_v50  ;;  %v1378_v9 = vmul.f32 %v19991_v18, %v20000_v47  ;;  %v1677_v3 = vadd.f32 %v15107_v32, %v1528_v48  ;;  %v1664_v1 = vadd.f32 %v15117_v40, %v1515_v19  ;;  %v12760_v6 = vld [vmem:[#allocation8] ss:$16 sps:$4 sm:$0xff]   ;;  %v12768_v42 = vld [vmem:[#allocation8 + $0x24] ss:$16 sps:$4 sm:$0xff]  }
 0x2c4   : > { %19995 = vst [vmem:[#allocation73_spill] sm:$0xff] %v15503_v2  ;;  %19996 = vst [vmem:[#allocation69_spill] sm:$0xff] %v15505_v26  ;;  %2826 = vmatprep.mubr.bf16.mxu0 %v15503_v2  ;;  %3212 = vmatprep.mubr.bf16.mxu1 %v15503_v2  ;;  %v1374_v0 = vmul.f32 %v19994_v7, %v20001_v30  ;;  %v1673_v12 = vadd.f32 %v15107_v32, %v1524_v33  ;;  %v12777_v7 = vld [vmem:[#allocation8 + $0x4c] ss:$16 sps:$4 sm:$0xff]   ;;  %v12775_v48 = vld [vmem:[#allocation8 + $0x48] ss:$16 sps:$4 sm:$0xff]  }
 0x2c5   : > { %19997 = vst [vmem:[#allocation72_spill] sm:$0xff] %v15507_v4  ;;  %19998 = vst [vmem:[#allocation68_spill] sm:$0xff] %v15509_v20  ;;  %2827 = vmatmul.mubr.bf16.gmra.mrb[60].mxu0 %v15505_v26  ;;  %3213 = vmatmul.mubr.bf16.gmra.mrb[60].mxu1 %v15505_v26  ;;  %v15531_v35 = vpack.c.bf16 %v1668_v58, %v1664_v1  ;;  %v1527_v29 = vmul.f32 %v15110_v51, %v1378_v9  ;;  %v12780_v19 = vld [vmem:[#allocation8 + $0x64] ss:$16 sps:$4 sm:$0xff]   ;;  %v12783_v33 = vld [vmem:[#allocation8 + $0x6c] ss:$16 sps:$4 sm:$0xff]  }
 0x2c6   : > { %2869 = vmatprep.mubr.bf16.mxu0 %v15514_v10  ;;  %3255 = vmatprep.mubr.bf16.mxu1 %v15514_v10  ;;  %v15534_v21 = vpack.c.bf16 %v1677_v3, %v1673_v12  ;;  %v1523_v18 = vmul.f32 %v15110_v51, %v1374_v0  ;;  %v12772_v51 = vld [vmem:[#allocation8 + $0x40] ss:$16 sps:$4 sm:$0xff]   ;;  %v12781_v58 = vld [vmem:[#allocation8 + $0x68] ss:$16 sps:$4 sm:$0xff]   ;;  %v12786_v47 = vld [vmem:[#allocation8 + $0x84] ss:$16 sps:$4 sm:$0xff]  }
 0x2c7   : > { %20002 = vst [vmem:[#allocation74_spill] sm:$0xff] %v15531_v35  ;;  %v1676_v32 = vadd.f32 %v15117_v40, %v1527_v29  ;;  %v12789_v9 = vld [vmem:[#allocation8 + $0x8c] ss:$16 sps:$4 sm:$0xff]   ;;  %v12784_v3 = vld [vmem:[#allocation8 + $0x80] ss:$16 sps:$4 sm:$0xff]  }
 0x2c8   : > { %20003 = vst [vmem:[#allocation77_spill] sm:$0xff] %v15534_v21  ;;  %v1672_v60 = vadd.f32 %v15117_v40, %v1523_v18  ;;  %v12778_v40 = vld [vmem:[#allocation8 + $0x60] ss:$16 sps:$4 sm:$0xff]   ;;  %v12787_v1 = vld [vmem:[#allocation8 + $0x88] ss:$16 sps:$4 sm:$0xff]  }
 0x2c9   : > { %v12792_v30 = vld [vmem:[#allocation8 + $0xa4] ss:$16 sps:$4 sm:$0xff]   ;;  %v12795_v0 = vld [vmem:[#allocation8 + $0xac] ss:$16 sps:$4 sm:$0xff]   ;;  %v12793_v12 = vld [vmem:[#allocation8 + $0xa8] ss:$16 sps:$4 sm:$0xff]  }
 0x2ca   : > { %v15543_v50 = vpack.c.bf16 %v1676_v32, %v1672_v60  ;;  %v12801_v29 = vld [vmem:[#allocation8 + $0xcc] ss:$16 sps:$4 sm:$0xff]   ;;  %v12804_v18 = vld [vmem:[#allocation8 + $0xe4] ss:$16 sps:$4 sm:$0xff]   ;;  %v12802_v32 = vld [vmem:[#allocation8 + $0xe0] ss:$16 sps:$4 sm:$0xff]  }
 0x2cb   : > { %v12808_v60 = vld [vmem:[#allocation8 + $0x100] ss:$16 sps:$4 sm:$0xff]  }
 0x2cc   : > { %20004 = vst [vmem:[#allocation76_spill] sm:$0xff] %v15543_v50 }
 0x2cd   : > { %2870 = vmatmul.mubr.bf16.vlgmr.msra.gmra.mrb[0].mxu0 %v15531_v35  ;;  %3256 = vmatmul.mubr.bf16.vlgmr.msra.gmra.mrb[0].mxu1 %v15531_v35 }
 0x2ce   : > { %4335 = vmatpush1.bf16.msra.mxu0 %v12760_v6  ;;  %2879 = vmatprep.mubr.bf16.mxu0 %v15534_v21  ;;  %v12790_v6 = vld [vmem:[#allocation8 + $0xa0] ss:$16 sps:$4 sm:$0xff]  }
 0x2cf   : > { %3265 = vmatprep.mubr.bf16.mxu1 %v15534_v21  ;;  %4721 = vmatpush1.bf16.msra.mxu1 %v12763_v11  ;;  %v12798_v11 = vld [vmem:[#allocation8 + $0xc4] ss:$16 sps:$4 sm:$0xff]  }
 0x2d0   : > { %4336 = vmatprep.subr.bf16.mxu0 %v12768_v42  ;;  %4722 = vmatprep.subr.bf16.mxu1 %v12771_v37  ;;  %v12796_v42 = vld [vmem:[#allocation8 + $0xc0] ss:$16 sps:$4 sm:$0xff]   ;;  %v12799_v37 = vld [vmem:[#allocation8 + $0xc8] ss:$16 sps:$4 sm:$0xff]  }
 0x2d2   : > { %4337 = vmatpush1.bf16.msra.mxu0 %v12766_v25  ;;  %v12807_v25 = vld [vmem:[#allocation8 + $0xec] ss:$16 sps:$4 sm:$0xff]  }
 0x2d3   : > { %4723 = vmatpush1.bf16.msra.mxu1 %v12769_v39  ;;  %4338 = vmatprep.subr.bf16.mxu0 %v12774_v8  ;;  %v12805_v39 = vld [vmem:[#allocation8 + $0xe8] ss:$16 sps:$4 sm:$0xff]   ;;  %v12810_v8 = vld [vmem:[#allocation8 + $0x104] ss:$16 sps:$4 sm:$0xff]  }
 0x2d4   : > { %4724 = vmatprep.subr.bf16.mxu1 %v12777_v7  ;;  %v12813_v7 = vld [vmem:[#allocation8 + $0x10c] ss:$16 sps:$4 sm:$0xff]  }
 0x2d5   : > { %2880 = vmatmul.mubr.bf16.gmra.mrb[4].mxu0 %v15543_v50  ;;  %3266 = vmatmul.mubr.bf16.gmra.mrb[4].mxu1 %v15543_v50 }
 0x2d6   : > { %2889 = vmatprep.mubr.bf16.mxu0 %v15157_v23  ;;  %3275 = vmatprep.mubr.bf16.mxu1 %v15157_v23 }
 0x2d7   : > { %4339 = vmatpush1.bf16.msra.mxu0 %v12772_v51  ;;  %4725 = vmatpush1.bf16.msra.mxu1 %v12775_v48  ;;  %v12811_v51 = vld [vmem:[#allocation8 + $0x108] ss:$16 sps:$4 sm:$0xff]   ;;  %v12816_v48 = vld [vmem:[#allocation8 + $0x124] ss:$16 sps:$4 sm:$0xff]  }
 0x2d8   : > { %4340 = vmatprep.subr.bf16.mxu0 %v12780_v19  ;;  %4726 = vmatprep.subr.bf16.mxu1 %v12783_v33  ;;  %v12819_v19 = vld [vmem:[#allocation8 + $0x12c] ss:$16 sps:$4 sm:$0xff]   ;;  %v12814_v33 = vld [vmem:[#allocation8 + $0x120] ss:$16 sps:$4 sm:$0xff]  }
 0x2db   : > { %4341 = vmatpush1.bf16.msra.mxu0 %v12778_v40  ;;  %4727 = vmatpush1.bf16.msra.mxu1 %v12781_v58  ;;  %v12817_v40 = vld [vmem:[#allocation8 + $0x128] ss:$16 sps:$4 sm:$0xff]   ;;  %v12822_v58 = vld [vmem:[#allocation8 + $0x144] ss:$16 sps:$4 sm:$0xff]  }
 0x2dc   : > { %4342 = vmatprep.subr.bf16.mxu0 %v12786_v47  ;;  %4728 = vmatprep.subr.bf16.mxu1 %v12789_v9  ;;  %v12825_v47 = vld [vmem:[#allocation8 + $0x14c] ss:$16 sps:$4 sm:$0xff]   ;;  %v12820_v9 = vld [vmem:[#allocation8 + $0x140] ss:$16 sps:$4 sm:$0xff]  }
 0x2dd   : > { %2890 = vmatmul.mubr.bf16.gmra.mrb[8].mxu0 %v15163_v24  ;;  %3276 = vmatmul.mubr.bf16.gmra.mrb[8].mxu1 %v15163_v24 }
 0x2de   : > { %2899 = vmatprep.mubr.bf16.mxu0 %v15174_v57  ;;  %3285 = vmatprep.mubr.bf16.mxu1 %v15174_v57 }
 0x2df   : > { %4343 = vmatpush1.bf16.msra.mxu0 %v12784_v3  ;;  %4729 = vmatpush1.bf16.msra.mxu1 %v12787_v1  ;;  %v12823_v3 = vld [vmem:[#allocation8 + $0x148] ss:$16 sps:$4 sm:$0xff]   ;;  %v12828_v1 = vld [vmem:[#allocation8 + $0x164] ss:$16 sps:$4 sm:$0xff]  }
 0x2e0   : > { %4344 = vmatprep.subr.bf16.mxu0 %v12792_v30  ;;  %4730 = vmatprep.subr.bf16.mxu1 %v12795_v0  ;;  %v12831_v30 = vld [vmem:[#allocation8 + $0x16c] ss:$16 sps:$4 sm:$0xff]   ;;  %v12826_v0 = vld [vmem:[#allocation8 + $0x160] ss:$16 sps:$4 sm:$0xff]  }
 0x2e3   : > { %4345 = vmatpush1.bf16.msra.mxu0 %v12790_v6  ;;  %4731 = vmatpush1.bf16.msra.mxu1 %v12793_v12  ;;  %v12829_v6 = vld [vmem:[#allocation8 + $0x168] ss:$16 sps:$4 sm:$0xff]   ;;  %v12834_v12 = vld [vmem:[#allocation8 + $0x184] ss:$16 sps:$4 sm:$0xff]  }
 0x2e4   : > { %4346 = vmatprep.subr.bf16.mxu0 %v12798_v11  ;;  %4732 = vmatprep.subr.bf16.mxu1 %v12801_v29  ;;  %v12837_v11 = vld [vmem:[#allocation8 + $0x18c] ss:$16 sps:$4 sm:$0xff]   ;;  %v12832_v29 = vld [vmem:[#allocation8 + $0x180] ss:$16 sps:$4 sm:$0xff]  }
 0x2e5   : > { %2900 = vmatmul.mubr.bf16.gmra.mrb[12].mxu0 %v15186_v5  ;;  %3286 = vmatmul.mubr.bf16.gmra.mrb[12].mxu1 %v15186_v5 }
 0x2e6   : > { %2909 = vmatprep.mubr.bf16.mxu0 %v15203_v54  ;;  %3295 = vmatprep.mubr.bf16.mxu1 %v15203_v54 }
 0x2e7   : > { %4347 = vmatpush1.bf16.msra.mxu0 %v12796_v42  ;;  %4733 = vmatpush1.bf16.msra.mxu1 %v12799_v37  ;;  %v12835_v42 = vld [vmem:[#allocation8 + $0x188] ss:$16 sps:$4 sm:$0xff]   ;;  %v12840_v37 = vld [vmem:[#allocation8 + $0x1a4] ss:$16 sps:$4 sm:$0xff]  }
 0x2e8   : > { %4348 = vmatprep.subr.bf16.mxu0 %v12804_v18  ;;  %4734 = vmatprep.subr.bf16.mxu1 %v12807_v25  ;;  %v12843_v18 = vld [vmem:[#allocation8 + $0x1ac] ss:$16 sps:$4 sm:$0xff]   ;;  %v12838_v25 = vld [vmem:[#allocation8 + $0x1a0] ss:$16 sps:$4 sm:$0xff]  }
 0x2eb   : > { %4349 = vmatpush1.bf16.msra.mxu0 %v12802_v32  ;;  %4735 = vmatpush1.bf16.msra.mxu1 %v12805_v39  ;;  %v12841_v32 = vld [vmem:[#allocation8 + $0x1a8] ss:$16 sps:$4 sm:$0xff]   ;;  %v12846_v39 = vld [vmem:[#allocation8 + $0x1c4] ss:$16 sps:$4 sm:$0xff]  }
 0x2ec   : > { %4350 = vmatprep.subr.bf16.mxu0 %v12810_v8  ;;  %4736 = vmatprep.subr.bf16.mxu1 %v12813_v7  ;;  %v12849_v8 = vld [vmem:[#allocation8 + $0x1cc] ss:$16 sps:$4 sm:$0xff]   ;;  %v12844_v7 = vld [vmem:[#allocation8 + $0x1c0] ss:$16 sps:$4 sm:$0xff]  }
 0x2ed   : > { %2910 = vmatmul.mubr.bf16.gmra.mrb[16].mxu0 %v15210_v46  ;;  %3296 = vmatmul.mubr.bf16.gmra.mrb[16].mxu1 %v15210_v46 }
 0x2ee   : > { %2919 = vmatprep.mubr.bf16.mxu0 %v15214_v49  ;;  %3305 = vmatprep.mubr.bf16.mxu1 %v15214_v49 }
 0x2ef   : > { %4351 = vmatpush1.bf16.msra.mxu0 %v12808_v60  ;;  %4737 = vmatpush1.bf16.msra.mxu1 %v12811_v51  ;;  %v12847_v60 = vld [vmem:[#allocation8 + $0x1c8] ss:$16 sps:$4 sm:$0xff]   ;;  %v12852_v51 = vld [vmem:[#allocation8 + $0x1e4] ss:$16 sps:$4 sm:$0xff]  }
 0x2f0   : > { %4352 = vmatprep.subr.bf16.mxu0 %v12816_v48  ;;  %4738 = vmatprep.subr.bf16.mxu1 %v12819_v19  ;;  %v12855_v48 = vld [vmem:[#allocation8 + $0x1ec] ss:$16 sps:$4 sm:$0xff]   ;;  %v12850_v19 = vld [vmem:[#allocation8 + $0x1e0] ss:$16 sps:$4 sm:$0xff]  }
 0x2f3   : > { %4353 = vmatpush1.bf16.msra.mxu0 %v12814_v33  ;;  %4739 = vmatpush1.bf16.msra.mxu1 %v12817_v40  ;;  %v12853_v33 = vld [vmem:[#allocation8 + $0x1e8] ss:$16 sps:$4 sm:$0xff]   ;;  %v12858_v40 = vld [vmem:[#allocation8 + $0x204] ss:$16 sps:$4 sm:$0xff]  }
 0x2f4   : > { %4354 = vmatprep.subr.bf16.mxu0 %v12822_v58  ;;  %4740 = vmatprep.subr.bf16.mxu1 %v12825_v47  ;;  %v12861_v58 = vld [vmem:[#allocation8 + $0x20c] ss:$16 sps:$4 sm:$0xff]  }
 0x2f5   : > { %2920 = vmatmul.mubr.bf16.gmra.mrb[20].mxu0 %v15233_v36  ;;  %3306 = vmatmul.mubr.bf16.gmra.mrb[20].mxu1 %v15233_v36  ;;  %v20005_v47 = vld [vmem:[#allocation97_spill] sm:$0xff] }
 0x2f6   : > { %2929 = vmatprep.mubr.bf16.mxu0 %v15250_v52  ;;  %3315 = vmatprep.mubr.bf16.mxu1 %v15250_v52 }
 0x2f7   : > { %4355 = vmatpush1.bf16.msra.mxu0 %v12820_v9  ;;  %4741 = vmatpush1.bf16.msra.mxu1 %v12823_v3  ;;  %v12856_v9 = vld [vmem:[#allocation8 + $0x200] ss:$16 sps:$4 sm:$0xff]   ;;  %v12859_v3 = vld [vmem:[#allocation8 + $0x208] ss:$16 sps:$4 sm:$0xff]  }
 0x2f8   : > { %4356 = vmatprep.subr.bf16.mxu0 %v12828_v1  ;;  %4742 = vmatprep.subr.bf16.mxu1 %v12831_v30  ;;  %v12864_v1 = vld [vmem:[#allocation8 + $0x224] ss:$16 sps:$4 sm:$0xff]   ;;  %v12867_v30 = vld [vmem:[#allocation8 + $0x22c] ss:$16 sps:$4 sm:$0xff]  }
 0x2fb   : > { %4357 = vmatpush1.bf16.msra.mxu0 %v12826_v0  ;;  %4743 = vmatpush1.bf16.msra.mxu1 %v12829_v6  ;;  %v20006_v0 = vld [vmem:[#allocation104_spill] sm:$0xff]  ;;  %v20007_v6 = vld [vmem:[#allocation106_spill] sm:$0xff] }
 0x2fc   : > { %4358 = vmatprep.subr.bf16.mxu0 %v12834_v12  ;;  %4744 = vmatprep.subr.bf16.mxu1 %v12837_v11  ;;  %v12862_v12 = vld [vmem:[#allocation8 + $0x220] ss:$16 sps:$4 sm:$0xff]   ;;  %v12865_v11 = vld [vmem:[#allocation8 + $0x228] ss:$16 sps:$4 sm:$0xff]  }
 0x2fd   : > { %2930 = vmatmul.mubr.bf16.gmra.mrb[24].mxu0 %v15254_v17  ;;  %3316 = vmatmul.mubr.bf16.gmra.mrb[24].mxu1 %v15254_v17 }
 0x2fe   : > { %2939 = vmatprep.mubr.bf16.mxu0 %v15256_v43  ;;  %3325 = vmatprep.mubr.bf16.mxu1 %v15256_v43 }
 0x2ff   : > { %4359 = vmatpush1.bf16.msra.mxu0 %v12832_v29  ;;  %4745 = vmatpush1.bf16.msra.mxu1 %v12835_v42  ;;  %v12870_v29 = vld [vmem:[#allocation8 + $0x244] ss:$16 sps:$4 sm:$0xff]   ;;  %v12873_v42 = vld [vmem:[#allocation8 + $0x24c] ss:$16 sps:$4 sm:$0xff]  }
 0x300   : > { %4360 = vmatprep.subr.bf16.mxu0 %v12840_v37  ;;  %4746 = vmatprep.subr.bf16.mxu1 %v12843_v18  ;;  %v12868_v37 = vld [vmem:[#allocation8 + $0x240] ss:$16 sps:$4 sm:$0xff]   ;;  %v12871_v18 = vld [vmem:[#allocation8 + $0x248] ss:$16 sps:$4 sm:$0xff]  }
 0x303   : > { %4361 = vmatpush1.bf16.msra.mxu0 %v12838_v25  ;;  %4747 = vmatpush1.bf16.msra.mxu1 %v12841_v32  ;;  %v12876_v25 = vld [vmem:[#allocation8 + $0x264] ss:$16 sps:$4 sm:$0xff]   ;;  %v12879_v32 = vld [vmem:[#allocation8 + $0x26c] ss:$16 sps:$4 sm:$0xff]  }
 0x304   : > { %4362 = vmatprep.subr.bf16.mxu0 %v12846_v39  ;;  %4748 = vmatprep.subr.bf16.mxu1 %v12849_v8  ;;  %v20008_v39 = vld [vmem:[#allocation111_spill] sm:$0xff]  ;;  %v20009_v8 = vld [vmem:[#allocation114_spill] sm:$0xff] }
 0x305   : > { %2940 = vmatmul.mubr.bf16.gmra.mrb[28].mxu0 %v15274_v15  ;;  %3326 = vmatmul.mubr.bf16.gmra.mrb[28].mxu1 %v15274_v15 }
 0x306   : > { %2949 = vmatprep.mubr.bf16.mxu0 %v15289_v55  ;;  %3335 = vmatprep.mubr.bf16.mxu1 %v15289_v55 }
 0x307   : > { %4363 = vmatpush1.bf16.msra.mxu0 %v12844_v7  ;;  %4749 = vmatpush1.bf16.msra.mxu1 %v12847_v60  ;;  %v12874_v7 = vld [vmem:[#allocation8 + $0x260] ss:$16 sps:$4 sm:$0xff]   ;;  %v12877_v60 = vld [vmem:[#allocation8 + $0x268] ss:$16 sps:$4 sm:$0xff]  }
 0x308   : > { %4364 = vmatprep.subr.bf16.mxu0 %v12852_v51  ;;  %4750 = vmatprep.subr.bf16.mxu1 %v12855_v48  ;;  %v12882_v51 = vld [vmem:[#allocation8 + $0x284] ss:$16 sps:$4 sm:$0xff]   ;;  %v12885_v48 = vld [vmem:[#allocation8 + $0x28c] ss:$16 sps:$4 sm:$0xff]  }
 0x30b   : > { %4365 = vmatpush1.bf16.msra.mxu0 %v12850_v19  ;;  %4751 = vmatpush1.bf16.msra.mxu1 %v12853_v33  ;;  %v12880_v19 = vld [vmem:[#allocation8 + $0x280] ss:$16 sps:$4 sm:$0xff]   ;;  %v12883_v33 = vld [vmem:[#allocation8 + $0x288] ss:$16 sps:$4 sm:$0xff]  }
 0x30c   : > { %4527 = vmatprep.subr.bf16.mxu0 %v12858_v40  ;;  %4913 = vmatprep.subr.bf16.mxu1 %v12861_v58  ;;  %v12888_v40 = vld [vmem:[#allocation8 + $0x2a4] ss:$16 sps:$4 sm:$0xff]   ;;  %v12891_v58 = vld [vmem:[#allocation8 + $0x2ac] ss:$16 sps:$4 sm:$0xff]  }
 0x30d   : > { %2950 = vmatmul.mubr.bf16.gmra.mrb[32].mxu0 %v15294_v41  ;;  %3336 = vmatmul.mubr.bf16.gmra.mrb[32].mxu1 %v15294_v41 }
 0x30e   : > { %2959 = vmatprep.mubr.bf16.mxu0 %v15301_v14  ;;  %3345 = vmatprep.mubr.bf16.mxu1 %v15301_v14 }
 0x315   : > { %2960 = vmatmul.mubr.bf16.gmra.mrb[36].mxu0 %v15309_v13  ;;  %3346 = vmatmul.mubr.bf16.gmra.mrb[36].mxu1 %v15309_v13 }
 0x316   : > { %2969 = vmatprep.mubr.bf16.mxu0 %v15315_v59  ;;  %3355 = vmatprep.mubr.bf16.mxu1 %v15315_v59 }
 0x31d   : > { %2970 = vmatmul.mubr.bf16.gmra.mrb[40].mxu0 %v15317_v61  ;;  %3356 = vmatmul.mubr.bf16.gmra.mrb[40].mxu1 %v15317_v61  ;;  %v12955_v61 = vld [vmem:[#allocation10 + $0x8] ss:$16 sps:$4 sm:$0xff]  }
 0x31e   : > { %2979 = vmatprep.mubr.bf16.mxu0 %v15352_v38  ;;  %3365 = vmatprep.mubr.bf16.mxu1 %v15352_v38 }
 0x325   : > { %2980 = vmatmul.mubr.bf16.gmra.mrb[44].mxu0 %v15354_v27  ;;  %3366 = vmatmul.mubr.bf16.gmra.mrb[44].mxu1 %v15354_v27 }
 0x326   : > { %2989 = vmatprep.mubr.bf16.mxu0 %v15384_v16  ;;  %3375 = vmatprep.mubr.bf16.mxu1 %v15384_v16 }
 0x32d   : > { %2990 = vmatmul.mubr.bf16.gmra.mrb[48].mxu0 %v15392_v45  ;;  %3376 = vmatmul.mubr.bf16.gmra.mrb[48].mxu1 %v15392_v45 }
 0x32e   : > { %2999 = vmatprep.mubr.bf16.mxu0 %v15419_v56  ;;  %3385 = vmatprep.mubr.bf16.mxu1 %v15419_v56 }
 0x335   : > { %3000 = vmatmul.mubr.bf16.gmra.mrb[52].mxu0 %v15423_v44  ;;  %3386 = vmatmul.mubr.bf16.gmra.mrb[52].mxu1 %v15423_v44 }
 0x336   : > { %3009 = vmatprep.mubr.bf16.mxu0 %v15457_v53  ;;  %3395 = vmatprep.mubr.bf16.mxu1 %v15457_v53 }
 0x33d   : > { %3010 = vmatmul.mubr.bf16.gmra.mrb[56].mxu0 %v15460_v63  ;;  %3396 = vmatmul.mubr.bf16.gmra.mrb[56].mxu1 %v15460_v63 }
 0x33e   : > { %3019 = vmatprep.mubr.bf16.mxu0 %v15507_v4  ;;  %3405 = vmatprep.mubr.bf16.mxu1 %v15507_v4 }
 0x345   : > { %3020 = vmatmul.mubr.bf16.gmra.mrb[60].mxu0 %v15509_v20  ;;  %3406 = vmatmul.mubr.bf16.gmra.mrb[60].mxu1 %v15509_v20 }
 0x346   : > { %4366 = vmatprep.mubr.bf16.mxu0 %v20005_v47  ;;  %4752 = vmatprep.mubr.bf16.mxu1 %v20005_v47 }
 0x34d   : > { %4367 = vmatmul.mubr.bf16.vlgmr.msra.gmra.mrb[64].mxu0 %v20006_v0  ;;  %4753 = vmatmul.mubr.bf16.vlgmr.msra.gmra.mrb[64].mxu1 %v20006_v0 }
 0x34e   : > { %4528 = vmatpush1.bf16.msra.mxu0 %v12856_v9  ;;  %4376 = vmatprep.mubr.bf16.mxu0 %v20007_v6  ;;  %v20010_v9 = vld [vmem:[#allocation117_spill] sm:$0xff] }
 0x34f   : > { %4762 = vmatprep.mubr.bf16.mxu1 %v20007_v6  ;;  %4914 = vmatpush1.bf16.msra.mxu1 %v12859_v3  ;;  %v12886_v3 = vld [vmem:[#allocation8 + $0x2a0] ss:$16 sps:$4 sm:$0xff]  }
 0x350   : > { %4529 = vmatprep.subr.bf16.mxu0 %v12864_v1  ;;  %4915 = vmatprep.subr.bf16.mxu1 %v12867_v30  ;;  %v12889_v1 = vld [vmem:[#allocation8 + $0x2a8] ss:$16 sps:$4 sm:$0xff]   ;;  %v12894_v30 = vld [vmem:[#allocation8 + $0x2c4] ss:$16 sps:$4 sm:$0xff]  }
 0x352   : > { %4530 = vmatpush1.bf16.msra.mxu0 %v12862_v12  ;;  %v12897_v12 = vld [vmem:[#allocation8 + $0x2cc] ss:$16 sps:$4 sm:$0xff]  }
 0x353   : > { %4916 = vmatpush1.bf16.msra.mxu1 %v12865_v11  ;;  %4531 = vmatprep.subr.bf16.mxu0 %v12870_v29  ;;  %v12892_v11 = vld [vmem:[#allocation8 + $0x2c0] ss:$16 sps:$4 sm:$0xff]   ;;  %v12895_v29 = vld [vmem:[#allocation8 + $0x2c8] ss:$16 sps:$4 sm:$0xff]  }
 0x354   : > { %4917 = vmatprep.subr.bf16.mxu1 %v12873_v42  ;;  %v12900_v42 = vld [vmem:[#allocation8 + $0x2e4] ss:$16 sps:$4 sm:$0xff]  }
 0x355   : > { %4377 = vmatmul.mubr.bf16.gmra.mrb[68].mxu0 %v20008_v39  ;;  %4763 = vmatmul.mubr.bf16.gmra.mrb[68].mxu1 %v20008_v39 }
 0x356   : > { %4386 = vmatprep.mubr.bf16.mxu0 %v20009_v8  ;;  %4772 = vmatprep.mubr.bf16.mxu1 %v20009_v8 }
 0x357   : > { %4532 = vmatpush1.bf16.msra.mxu0 %v12868_v37  ;;  %4918 = vmatpush1.bf16.msra.mxu1 %v12871_v18  ;;  %v12903_v37 = vld [vmem:[#allocation8 + $0x2ec] ss:$16 sps:$4 sm:$0xff]   ;;  %v12898_v18 = vld [vmem:[#allocation8 + $0x2e0] ss:$16 sps:$4 sm:$0xff]  }
 0x358   : > { %4533 = vmatprep.subr.bf16.mxu0 %v12876_v25  ;;  %4919 = vmatprep.subr.bf16.mxu1 %v12879_v32  ;;  %v12901_v25 = vld [vmem:[#allocation8 + $0x2e8] ss:$16 sps:$4 sm:$0xff]   ;;  %v12906_v32 = vld [vmem:[#allocation8 + $0x304] ss:$16 sps:$4 sm:$0xff]  }
 0x35b   : > { %4534 = vmatpush1.bf16.msra.mxu0 %v12874_v7  ;;  %4920 = vmatpush1.bf16.msra.mxu1 %v12877_v60  ;;  %v12909_v7 = vld [vmem:[#allocation8 + $0x30c] ss:$16 sps:$4 sm:$0xff]   ;;  %v12904_v60 = vld [vmem:[#allocation8 + $0x300] ss:$16 sps:$4 sm:$0xff]  }
 0x35c   : > { %4535 = vmatprep.subr.bf16.mxu0 %v12882_v51  ;;  %4921 = vmatprep.subr.bf16.mxu1 %v12885_v48  ;;  %v12907_v51 = vld [vmem:[#allocation8 + $0x308] ss:$16 sps:$4 sm:$0xff]   ;;  %v12912_v48 = vld [vmem:[#allocation8 + $0x324] ss:$16 sps:$4 sm:$0xff]  }
 0x35d   : > { %4387 = vmatmul.mubr.bf16.gmra.mrb[72].mxu0 %v20010_v9  ;;  %4773 = vmatmul.mubr.bf16.gmra.mrb[72].mxu1 %v20010_v9 }
 0x35e   : > { %4396 = vmatprep.mubr.bf16.mxu0 %v14922_v28  ;;  %4782 = vmatprep.mubr.bf16.mxu1 %v14922_v28  ;;  %v20028_v28 = vld [vmem:[#allocation49_spill] sm:$0xff] }
 0x35f   : > { %4536 = vmatpush1.bf16.msra.mxu0 %v12880_v19  ;;  %4922 = vmatpush1.bf16.msra.mxu1 %v12883_v33  ;;  %v12915_v19 = vld [vmem:[#allocation8 + $0x32c] ss:$16 sps:$4 sm:$0xff]   ;;  %v20011_v33 = vld [vmem:[#allocation122_spill] sm:$0xff] }
 0x360   : > { %4537 = vmatprep.subr.bf16.mxu0 %v12888_v40  ;;  %4923 = vmatprep.subr.bf16.mxu1 %v12891_v58  ;;  %v12910_v40 = vld [vmem:[#allocation8 + $0x320] ss:$16 sps:$4 sm:$0xff]   ;;  %v12913_v58 = vld [vmem:[#allocation8 + $0x328] ss:$16 sps:$4 sm:$0xff]  }
 0x363   : > { %4538 = vmatpush1.bf16.msra.mxu0 %v12886_v3  ;;  %4924 = vmatpush1.bf16.msra.mxu1 %v12889_v1  ;;  %v12918_v3 = vld [vmem:[#allocation8 + $0x344] ss:$16 sps:$4 sm:$0xff]   ;;  %v12921_v1 = vld [vmem:[#allocation8 + $0x34c] ss:$16 sps:$4 sm:$0xff]  }
 0x364   : > { %4539 = vmatprep.subr.bf16.mxu0 %v12894_v30  ;;  %4925 = vmatprep.subr.bf16.mxu1 %v12897_v12  ;;  %v12916_v30 = vld [vmem:[#allocation8 + $0x340] ss:$16 sps:$4 sm:$0xff]   ;;  %v12919_v12 = vld [vmem:[#allocation8 + $0x348] ss:$16 sps:$4 sm:$0xff]  }
 0x365   : > { %4397 = vmatmul.mubr.bf16.gmra.mrb[76].mxu0 %v14926_v62  ;;  %4783 = vmatmul.mubr.bf16.gmra.mrb[76].mxu1 %v14926_v62 }
 0x366   : > { %4406 = vmatprep.mubr.bf16.mxu0 %v14956_v31  ;;  %4792 = vmatprep.mubr.bf16.mxu1 %v14956_v31 }
 0x367   : > { %4540 = vmatpush1.bf16.msra.mxu0 %v12892_v11  ;;  %4926 = vmatpush1.bf16.msra.mxu1 %v12895_v29  ;;  %v12924_v11 = vld [vmem:[#allocation8 + $0x364] ss:$16 sps:$4 sm:$0xff]   ;;  %v12927_v29 = vld [vmem:[#allocation8 + $0x36c] ss:$16 sps:$4 sm:$0xff]  }
 0x368   : > { %4541 = vmatprep.subr.bf16.mxu0 %v12900_v42  ;;  %4927 = vmatprep.subr.bf16.mxu1 %v12903_v37  ;;  %v20012_v42 = vld [vmem:[#allocation123_spill] sm:$0xff]  ;;  %v20013_v37 = vld [vmem:[#allocation124_spill] sm:$0xff] }
 0x36b   : > { %4542 = vmatpush1.bf16.msra.mxu0 %v12898_v18  ;;  %4928 = vmatpush1.bf16.msra.mxu1 %v12901_v25  ;;  %v12922_v18 = vld [vmem:[#allocation8 + $0x360] ss:$16 sps:$4 sm:$0xff]   ;;  %v12925_v25 = vld [vmem:[#allocation8 + $0x368] ss:$16 sps:$4 sm:$0xff]  }
 0x36c   : > { %4543 = vmatprep.subr.bf16.mxu0 %v12906_v32  ;;  %4929 = vmatprep.subr.bf16.mxu1 %v12909_v7  ;;  %v12930_v32 = vld [vmem:[#allocation8 + $0x384] ss:$16 sps:$4 sm:$0xff]   ;;  %v12933_v7 = vld [vmem:[#allocation8 + $0x38c] ss:$16 sps:$4 sm:$0xff]  }
 0x36d   : > { %4407 = vmatmul.mubr.bf16.gmra.mrb[80].mxu0 %v14961_v22  ;;  %4793 = vmatmul.mubr.bf16.gmra.mrb[80].mxu1 %v14961_v22  ;;  %v20027_v22 = vld [vmem:[#allocation43_spill] sm:$0xff] }
 0x36e   : > { %4416 = vmatprep.mubr.bf16.mxu0 %v20011_v33  ;;  %4802 = vmatprep.mubr.bf16.mxu1 %v20011_v33 }
 0x36f   : > { %4544 = vmatpush1.bf16.msra.mxu0 %v12904_v60  ;;  %4930 = vmatpush1.bf16.msra.mxu1 %v12907_v51  ;;  %v12928_v60 = vld [vmem:[#allocation8 + $0x380] ss:$16 sps:$4 sm:$0xff]   ;;  %v12931_v51 = vld [vmem:[#allocation8 + $0x388] ss:$16 sps:$4 sm:$0xff]  }
 0x370   : > { %4545 = vmatprep.subr.bf16.mxu0 %v12912_v48  ;;  %4931 = vmatprep.subr.bf16.mxu1 %v12915_v19  ;;  %v12936_v48 = vld [vmem:[#allocation8 + $0x3a4] ss:$16 sps:$4 sm:$0xff]   ;;  %v12939_v19 = vld [vmem:[#allocation8 + $0x3ac] ss:$16 sps:$4 sm:$0xff]  }
 0x373   : > { %4546 = vmatpush1.bf16.msra.mxu0 %v12910_v40  ;;  %4932 = vmatpush1.bf16.msra.mxu1 %v12913_v58  ;;  %v20014_v40 = vld [vmem:[#allocation55_spill] sm:$0xff] }
 0x374   : > { %4547 = vmatprep.subr.bf16.mxu0 %v12918_v3  ;;  %4933 = vmatprep.subr.bf16.mxu1 %v12921_v1  ;;  %v20015_v58 = vld [vmem:[#allocation51_spill] sm:$0xff]  ;;  %v12934_v3 = vld [vmem:[#allocation8 + $0x3a0] ss:$16 sps:$4 sm:$0xff]  }
 0x375   : > { %4417 = vmatmul.mubr.bf16.gmra.mrb[84].mxu0 %v20012_v42  ;;  %4803 = vmatmul.mubr.bf16.gmra.mrb[84].mxu1 %v20012_v42  ;;  %v12937_v1 = vld [vmem:[#allocation8 + $0x3a8] ss:$16 sps:$4 sm:$0xff]  }
 0x376   : > { %4426 = vmatprep.mubr.bf16.mxu0 %v20013_v37  ;;  %4812 = vmatprep.mubr.bf16.mxu1 %v20013_v37 }
 0x377   : > { %4548 = vmatpush1.bf16.msra.mxu0 %v12916_v30  ;;  %4934 = vmatpush1.bf16.msra.mxu1 %v12919_v12  ;;  %v12942_v30 = vld [vmem:[#allocation8 + $0x3c4] ss:$16 sps:$4 sm:$0xff]   ;;  %v12945_v12 = vld [vmem:[#allocation8 + $0x3cc] ss:$16 sps:$4 sm:$0xff]  }
 0x378   : > { %4549 = vmatprep.subr.bf16.mxu0 %v12924_v11  ;;  %4935 = vmatprep.subr.bf16.mxu1 %v12927_v29  ;;  %v12940_v11 = vld [vmem:[#allocation8 + $0x3c0] ss:$16 sps:$4 sm:$0xff]   ;;  %v12943_v29 = vld [vmem:[#allocation8 + $0x3c8] ss:$16 sps:$4 sm:$0xff]  }
 0x37b   : > { %4550 = vmatpush1.bf16.msra.mxu0 %v12922_v18  ;;  %4936 = vmatpush1.bf16.msra.mxu1 %v12925_v25  ;;  %v12948_v18 = vld [vmem:[#allocation8 + $0x3e4] ss:$16 sps:$4 sm:$0xff]   ;;  %v12951_v25 = vld [vmem:[#allocation8 + $0x3ec] ss:$16 sps:$4 sm:$0xff]  }
 0x37c   : > { %4551 = vmatprep.subr.bf16.mxu0 %v12930_v32  ;;  %4937 = vmatprep.subr.bf16.mxu1 %v12933_v7  ;;  %v20016_v32 = vld [vmem:[#allocation63_spill] sm:$0xff] }
 0x37d   : > { %4427 = vmatmul.mubr.bf16.gmra.mrb[88].mxu0 %v20014_v40  ;;  %4813 = vmatmul.mubr.bf16.gmra.mrb[88].mxu1 %v20014_v40  ;;  %v20017_v7 = vld [vmem:[#allocation59_spill] sm:$0xff] }
 0x37e   : > { %4436 = vmatprep.mubr.bf16.mxu0 %v20015_v58  ;;  %4822 = vmatprep.mubr.bf16.mxu1 %v20015_v58 }
 0x37f   : > { %4552 = vmatpush1.bf16.msra.mxu0 %v12928_v60  ;;  %4938 = vmatpush1.bf16.msra.mxu1 %v12931_v51  ;;  %v12946_v60 = vld [vmem:[#allocation8 + $0x3e0] ss:$16 sps:$4 sm:$0xff]   ;;  %v12949_v51 = vld [vmem:[#allocation8 + $0x3e8] ss:$16 sps:$4 sm:$0xff]  }
 0x380   : > { %4553 = vmatprep.subr.bf16.mxu0 %v12936_v48  ;;  %4939 = vmatprep.subr.bf16.mxu1 %v12939_v19  ;;  %v20018_v48 = vld [vmem:[#allocation62_spill] sm:$0xff] }
 0x381   : > { %v20019_v19 = vld [vmem:[#allocation58_spill] sm:$0xff] }
 0x383   : > { %4554 = vmatpush1.bf16.msra.mxu0 %v12934_v3  ;;  %4940 = vmatpush1.bf16.msra.mxu1 %v12937_v1  ;;  %v12954_v3 = vld [vmem:[#allocation10 + $0x4] ss:$16 sps:$4 sm:$0xff]   ;;  %v12957_v1 = vld [vmem:[#allocation10 + $0xc] ss:$16 sps:$4 sm:$0xff]  }
 0x384   : > { %4555 = vmatprep.subr.bf16.mxu0 %v12942_v30  ;;  %4941 = vmatprep.subr.bf16.mxu1 %v12945_v12  ;;  %v20020_v30 = vld [vmem:[#allocation71_spill] sm:$0xff] }
 0x385   : > { %4437 = vmatmul.mubr.bf16.gmra.mrb[92].mxu0 %v20016_v32  ;;  %4823 = vmatmul.mubr.bf16.gmra.mrb[92].mxu1 %v20016_v32  ;;  %v20021_v12 = vld [vmem:[#allocation67_spill] sm:$0xff] }
 0x386   : > { %4446 = vmatprep.mubr.bf16.mxu0 %v20017_v7  ;;  %4832 = vmatprep.mubr.bf16.mxu1 %v20017_v7 }
 0x387   : > { %4556 = vmatpush1.bf16.msra.mxu0 %v12940_v11  ;;  %4942 = vmatpush1.bf16.msra.mxu1 %v12943_v29  ;;  %v1982_v11 = vld [vmem:[%s19311_s6] sm:$0xf]  ;;  %v20022_v29 = vld [vmem:[#allocation70_spill] sm:$0xff] }
 0x388   : > { %4557 = vmatprep.subr.bf16.mxu0 %v12948_v18  ;;  %4943 = vmatprep.subr.bf16.mxu1 %v12951_v25  ;;  %v20023_v18 = vld [vmem:[#allocation84_spill] sm:$0xff] }
 0x389   : > { %v15655_v25 = vrot.slane %v1982_v11, %v20023_v18 }
 0x38b   : > { %4558 = vmatpush1.bf16.msra.mxu0 %v12946_v60  ;;  %4944 = vmatpush1.bf16.msra.mxu1 %v12949_v51  ;;  %v20024_v60 = vld [vmem:[#allocation50_spill] sm:$0xff] }
 0x38c   : > { %5896 = vmatprep.subr.bf16.mxu0 %v12954_v3  ;;  %6282 = vmatprep.subr.bf16.mxu1 %v12957_v1  ;;  %v15658_v51 = vrot.slane %v1982_v11, %v20024_v60  ;;  %v20025_v3 = vld [vmem:[#allocation81_spill] sm:$0xff] }
 0x38d   : > { %4447 = vmatmul.mubr.bf16.gmra.mrb[96].mxu0 %v20018_v48  ;;  %4833 = vmatmul.mubr.bf16.gmra.mrb[96].mxu1 %v20018_v48  ;;  %v15663_v1 = vrot.slane %v1982_v11, %v20025_v3 }
 0x38e   : > { %4456 = vmatprep.mubr.bf16.mxu0 %v20019_v19  ;;  %4842 = vmatprep.mubr.bf16.mxu1 %v20019_v19 }
 0x395   : > { %4457 = vmatmul.mubr.bf16.gmra.mrb[100].mxu0 %v20020_v30  ;;  %4843 = vmatmul.mubr.bf16.gmra.mrb[100].mxu1 %v20020_v30 }
 0x396   : > { %4466 = vmatprep.mubr.bf16.mxu0 %v20021_v12  ;;  %4852 = vmatprep.mubr.bf16.mxu1 %v20021_v12  ;;  %v20026_v12 = vld [vmem:[#allocation54_spill] sm:$0xff] }
 0x397   : > { %v15666_v30 = vrot.slane %v1982_v11, %v20026_v12 }
 0x39d   : > { %4467 = vmatmul.mubr.bf16.gmra.mrb[104].mxu0 %v20022_v29  ;;  %4853 = vmatmul.mubr.bf16.gmra.mrb[104].mxu1 %v20022_v29 }
 0x39e   : > { %4476 = vmatprep.mubr.bf16.mxu0 %v15346_v34  ;;  %4862 = vmatprep.mubr.bf16.mxu1 %v15346_v34 }
 0x3a0   : > { %v2871_v29 = vpop.f32.mrb[0].mxu0  ;;  %v3257_v19 = vpop.f32.mrb[0].mxu1 }
 0x3a1   : > { %v11690_v18 = vadd.f32 %v2871_v29, %v15655_v25  ;;  %v11754_v48 = vadd.f32 %v3257_v19, %v15658_v51  ;;  %v2873_v60 = vpop.f32.mrb[1].mxu0  ;;  %v3259_v7 = vpop.f32.mrb[1].mxu1 }
 0x3a2   : > { %v11691_v32 = vadd.f32 %v2873_v60, %v15663_v1  ;;  %v11755_v34 = vadd.f32 %v3259_v7, %v15666_v30  ;;  %v2875_v3 = vpop.f32.mrb[2].mxu0  ;;  %v3261_v58 = vpop.f32.mrb[2].mxu1 }
 0x3a3   : > { %v3416_v40 = vmul.f32 0.125, %v11690_v18  ;;  %v3418_v11 = vmul.f32 0.125, %v11754_v48  ;;  %v11692_v12 = vadd.f32 %v2875_v3, %v15655_v25  ;;  %v11756_v37 = vadd.f32 %v3261_v58, %v15658_v51  ;;  %v2877_v42 = vpop.f32.mrb[3].mxu0  ;;  %v3263_v33 = vpop.f32.mrb[3].mxu1 }
 0x3a4   : > { %v3417_v19 = vmul.f32 0.125, %v11691_v32  ;;  %v3419_v29 = vmul.f32 0.125, %v11755_v34  ;;  %v11693_v7 = vadd.f32 %v2877_v42, %v15663_v1  ;;  %v11757_v48 = vadd.f32 %v3263_v33, %v15666_v30 }
 0x3a5   : > { %v11433_v18 = vpack.c.bf16 %v3416_v40, %v3416_v40  ;;  %v11561_v60 = vpack.c.bf16 %v3418_v11, %v3418_v11  ;;  %v3420_v3 = vmul.f32 0.125, %v11692_v12  ;;  %v3422_v58 = vmul.f32 0.125, %v11756_v37  ;;  %4477 = vmatmul.mubr.bf16.gmra.mrb[108].mxu0 %v20027_v22  ;;  %4863 = vmatmul.mubr.bf16.gmra.mrb[108].mxu1 %v20027_v22 }
 0x3a6   : > { %v11497_v31 = vpack.c.bf16 %v3417_v19, %v3417_v19  ;;  %v15686_v62 = vpack.c.bf16 %v3419_v29, %v3419_v29  ;;  %v3421_v32 = vmul.f32 0.125, %v11693_v7  ;;  %v3423_v34 = vmul.f32 0.125, %v11757_v48  ;;  %4486 = vmatprep.mubr.bf16.mxu0 %v20028_v28  ;;  %4872 = vmatprep.mubr.bf16.mxu1 %v20028_v28 }
 0x3a7   : > { %6973 = vst.msk [vmem:[%s15680_s26] sm:$0xf] %vm6972_vm0, %v11433_v18  ;;  %11009 = vst.msk [vmem:[%s15680_s26 + $0x200] sm:$0xf] %vm6972_vm0, %v11561_v60  ;;  %v11434_v33 = vpack.c.bf16 %v3420_v3, %v3420_v3  ;;  %v11562_v42 = vpack.c.bf16 %v3422_v58, %v3422_v58  ;;  %7229 = vrot.lane.b32.xlu0 %v11433_v18, %s13581_s4 }
 0x3a8   : > { %10785 = vst.msk [vmem:[%s15680_s26 + $0x100] sm:$0xf] %vm6972_vm0, %v11497_v31  ;;  %11233 = vst.msk [vmem:[%s15680_s26 + $0x300] sm:$0xf] %vm6972_vm0, %v15686_v62  ;;  %v11498_v37 = vpack.c.bf16 %v3421_v32, %v3421_v32  ;;  %v15700_v40 = vpack.c.bf16 %v3423_v34, %v3423_v34  ;;  %v2881_v12 = vpop.f32.mrb[4].mxu0  ;;  %v3267_v11 = vpop.f32.mrb[4].mxu1 }
 0x3a9   : > { %6974 = vst.msk [vmem:[%s15680_s26 + $0x4] sm:$0xf] %vm6972_vm0, %v11434_v33  ;;  %11010 = vst.msk [vmem:[%s15680_s26 + $0x204] sm:$0xf] %vm6972_vm0, %v11562_v42  ;;  %v11694_v19 = vadd.f32 %v2881_v12, %v15655_v25  ;;  %v11758_v29 = vadd.f32 %v3267_v11, %v15658_v51  ;;  %v2883_v7 = vpop.f32.mrb[5].mxu0  ;;  %v3269_v48 = vpop.f32.mrb[5].mxu1  ;;  %7231 = vrot.lane.b32.xlu1 %v11434_v33, %s13581_s4 }
 0x3aa   : > { %10786 = vst.msk [vmem:[%s15680_s26 + $0x104] sm:$0xf] %vm6972_vm0, %v11498_v37  ;;  %11234 = vst.msk [vmem:[%s15680_s26 + $0x304] sm:$0xf] %vm6972_vm0, %v15700_v40  ;;  %v11695_v18 = vadd.f32 %v2883_v7, %v15663_v1  ;;  %v11759_v3 = vadd.f32 %v3269_v48, %v15666_v30  ;;  %v2885_v58 = vpop.f32.mrb[6].mxu0  ;;  %v3271_v32 = vpop.f32.mrb[6].mxu1 }
 0x3ab   : > { %v3424_v34 = vmul.f32 0.125, %v11694_v19  ;;  %v3426_v28 = vmul.f32 0.125, %v11758_v29  ;;  %v11696_v12 = vadd.f32 %v2885_v58, %v15655_v25  ;;  %v11760_v11 = vadd.f32 %v3271_v32, %v15658_v51  ;;  %v2887_v22 = vpop.f32.mrb[7].mxu0  ;;  %v3273_v9 = vpop.f32.mrb[7].mxu1  ;;  %8777 = vrot.lane.b32.xlu0 %v11561_v60, %s13581_s4  ;;  %v20029_v32 = vld [vmem:[#allocation47_spill] sm:$0xff] }
 0x3ac   : > { %v3425_v33 = vmul.f32 0.125, %v11695_v18  ;;  %v3427_v8 = vmul.f32 0.125, %v11759_v3  ;;  %v11697_v7 = vadd.f32 %v2887_v22, %v15663_v1  ;;  %v11761_v48 = vadd.f32 %v3273_v9, %v15666_v30 }
 0x3ad   : > { %v15721_v39 = vpack.c.bf16 %v3424_v34, %v3424_v34  ;;  %v15723_v19 = vpack.c.bf16 %v3426_v28, %v3426_v28  ;;  %v3428_v29 = vmul.f32 0.125, %v11696_v12  ;;  %v3430_v58 = vmul.f32 0.125, %v11760_v11  ;;  %4487 = vmatmul.mubr.bf16.gmra.mrb[112].mxu0 %v20029_v32  ;;  %4873 = vmatmul.mubr.bf16.gmra.mrb[112].mxu1 %v20029_v32  ;;  %v20030_v28 = vld [vmem:[#allocation57_spill] sm:$0xff] }
 0x3ae   : > { %v15727_v60 = vpack.c.bf16 %v3425_v33, %v3425_v33  ;;  %v15729_v18 = vpack.c.bf16 %v3427_v8, %v3427_v8  ;;  %v3429_v3 = vmul.f32 0.125, %v11697_v7  ;;  %v3431_v22 = vmul.f32 0.125, %v11761_v48  ;;  %8779 = vrot.lane.b32.xlu1 %v11562_v42, %s13581_s4  ;;  %4496 = vmatprep.mubr.bf16.mxu0 %v20030_v28 }
 0x3af   : > { %6975 = vst.msk [vmem:[%s15680_s26 + $0x8] sm:$0xf] %vm6972_vm0, %v15721_v39  ;;  %11011 = vst.msk [vmem:[%s15680_s26 + $0x208] sm:$0xf] %vm6972_vm0, %v15723_v19  ;;  %v15739_v9 = vpack.c.bf16 %v3428_v29, %v3428_v29  ;;  %v15741_v34 = vpack.c.bf16 %v3430_v58, %v3430_v58  ;;  %4882 = vmatprep.mubr.bf16.mxu1 %v20030_v28  ;;  %8003 = vrot.lane.b32.xlu0 %v11497_v31, %s13581_s4 }
 0x3b0   : > { %10787 = vst.msk [vmem:[%s15680_s26 + $0x108] sm:$0xf] %vm6972_vm0, %v15727_v60  ;;  %11235 = vst.msk [vmem:[%s15680_s26 + $0x308] sm:$0xf] %vm6972_vm0, %v15729_v18  ;;  %v15751_v8 = vpack.c.bf16 %v3429_v3, %v3429_v3  ;;  %v15753_v42 = vpack.c.bf16 %v3431_v22, %v3431_v22  ;;  %v2891_v12 = vpop.f32.mrb[8].mxu0  ;;  %v3277_v11 = vpop.f32.mrb[8].mxu1 }
 0x3b1   : > { %6976 = vst.msk [vmem:[%s15680_s26 + $0xc] sm:$0xf] %vm6972_vm0, %v15739_v9  ;;  %11012 = vst.msk [vmem:[%s15680_s26 + $0x20c] sm:$0xf] %vm6972_vm0, %v15741_v34  ;;  %v11698_v31 = vadd.f32 %v2891_v12, %v15655_v25  ;;  %v11762_v33 = vadd.f32 %v3277_v11, %v15658_v51  ;;  %v2893_v7 = vpop.f32.mrb[9].mxu0  ;;  %v3279_v48 = vpop.f32.mrb[9].mxu1 }
 0x3b2   : > { %10788 = vst.msk [vmem:[%s15680_s26 + $0x10c] sm:$0xf] %vm6972_vm0, %v15751_v8  ;;  %11236 = vst.msk [vmem:[%s15680_s26 + $0x30c] sm:$0xf] %vm6972_vm0, %v15753_v42  ;;  %v11699_v29 = vadd.f32 %v2893_v7, %v15663_v1  ;;  %v11763_v58 = vadd.f32 %v3279_v48, %v15666_v30  ;;  %8005 = vrot.lane.b32.xlu1 %v11498_v37, %s13581_s4  ;;  %v2895_v3 = vpop.f32.mrb[10].mxu0  ;;  %v3281_v22 = vpop.f32.mrb[10].mxu1 }
 0x3b3   : > { %v3432_v28 = vmul.f32 0.125, %v11698_v31  ;;  %v3434_v12 = vmul.f32 0.125, %v11762_v33  ;;  %v11700_v11 = vadd.f32 %v2895_v3, %v15655_v25  ;;  %v11764_v32 = vadd.f32 %v3281_v22, %v15658_v51  ;;  %v2897_v6 = vpop.f32.mrb[11].mxu0  ;;  %v3283_v0 = vpop.f32.mrb[11].mxu1  ;;  %9551 = vrot.lane.b32.xlu0 %v15686_v62, %s13581_s4  ;;  %v20031_v22 = vld [vmem:[#allocation53_spill] sm:$0xff] }
 0x3b4   : > { %v3433_v47 = vmul.f32 0.125, %v11699_v29  ;;  %v3435_v7 = vmul.f32 0.125, %v11763_v58  ;;  %v11701_v48 = vadd.f32 %v2897_v6, %v15663_v1  ;;  %v11765_v37 = vadd.f32 %v3283_v0, %v15666_v30  ;;  %v20032_v0 = vld [vmem:[#allocation65_spill] sm:$0xff] }
 0x3b5   : > { %v15778_v20 = vpack.c.bf16 %v3432_v28, %v3432_v28  ;;  %v15780_v31 = vpack.c.bf16 %v3434_v12, %v3434_v12  ;;  %v3436_v33 = vmul.f32 0.125, %v11700_v11  ;;  %v3438_v3 = vmul.f32 0.125, %v11764_v32  ;;  %4497 = vmatmul.mubr.bf16.gmra.mrb[116].mxu0 %v20031_v22  ;;  %4883 = vmatmul.mubr.bf16.gmra.mrb[116].mxu1 %v20031_v22 }
 0x3b6   : > { %v15784_v62 = vpack.c.bf16 %v3433_v47, %v3433_v47  ;;  %v15786_v29 = vpack.c.bf16 %v3435_v7, %v3435_v7  ;;  %v3437_v58 = vmul.f32 0.125, %v11701_v48  ;;  %v3439_v6 = vmul.f32 0.125, %v11765_v37  ;;  %9553 = vrot.lane.b32.xlu1 %v15700_v40, %s13581_s4  ;;  %4506 = vmatprep.mubr.bf16.mxu0 %v20032_v0 }
 0x3b7   : > { %6977 = vst.msk [vmem:[%s15680_s26 + $0x10] sm:$0xf] %vm6972_vm0, %v15778_v20  ;;  %11013 = vst.msk [vmem:[%s15680_s26 + $0x210] sm:$0xf] %vm6972_vm0, %v15780_v31  ;;  %v15797_v32 = vpack.c.bf16 %v3436_v33, %v3436_v33  ;;  %v15799_v47 = vpack.c.bf16 %v3438_v3, %v3438_v3  ;;  %4892 = vmatprep.mubr.bf16.mxu1 %v20032_v0  ;;  %8781 = vrot.lane.b32.xlu0 %v15723_v19, %s13581_s4 }
 0x3b8   : > { %10789 = vst.msk [vmem:[%s15680_s26 + $0x110] sm:$0xf] %vm6972_vm0, %v15784_v62  ;;  %11237 = vst.msk [vmem:[%s15680_s26 + $0x310] sm:$0xf] %vm6972_vm0, %v15786_v29  ;;  %v15810_v40 = vpack.c.bf16 %v3437_v58, %v3437_v58  ;;  %v15812_v28 = vpack.c.bf16 %v3439_v6, %v3439_v6  ;;  %v2901_v12 = vpop.f32.mrb[12].mxu0  ;;  %v3287_v11 = vpop.f32.mrb[12].mxu1 }
 0x3b9   : > { %6978 = vst.msk [vmem:[%s15680_s26 + $0x14] sm:$0xf] %vm6972_vm0, %v15797_v32  ;;  %11014 = vst.msk [vmem:[%s15680_s26 + $0x214] sm:$0xf] %vm6972_vm0, %v15799_v47  ;;  %v11702_v19 = vadd.f32 %v2901_v12, %v15655_v25  ;;  %v11766_v7 = vadd.f32 %v3287_v11, %v15658_v51  ;;  %v2903_v48 = vpop.f32.mrb[13].mxu0  ;;  %v3289_v37 = vpop.f32.mrb[13].mxu1 }
 0x3ba   : > { %10790 = vst.msk [vmem:[%s15680_s26 + $0x114] sm:$0xf] %vm6972_vm0, %v15810_v40  ;;  %11238 = vst.msk [vmem:[%s15680_s26 + $0x314] sm:$0xf] %vm6972_vm0, %v15812_v28  ;;  %v11703_v33 = vadd.f32 %v2903_v48, %v15663_v1  ;;  %v11767_v3 = vadd.f32 %v3289_v37, %v15666_v30  ;;  %7233 = vrot.lane.b32.xlu1 %v15721_v39, %s13581_s4  ;;  %v2905_v58 = vpop.f32.mrb[14].mxu0  ;;  %v3291_v6 = vpop.f32.mrb[14].mxu1 }
 0x3bb   : > { %v3440_v12 = vmul.f32 0.125, %v11702_v19  ;;  %v3442_v0 = vmul.f32 0.125, %v11766_v7  ;;  %v11704_v11 = vadd.f32 %v2905_v58, %v15655_v25  ;;  %v11768_v22 = vadd.f32 %v3291_v6, %v15658_v51  ;;  %v2907_v4 = vpop.f32.mrb[15].mxu0  ;;  %v3293_v63 = vpop.f32.mrb[15].mxu1  ;;  %8007 = vrot.lane.b32.xlu0 %v15727_v60, %s13581_s4  ;;  %v20033_v6 = vld [vmem:[#allocation61_spill] sm:$0xff] }
 0x3bc   : > { %v3441_v53 = vmul.f32 0.125, %v11703_v33  ;;  %v3443_v48 = vmul.f32 0.125, %v11767_v3  ;;  %v11705_v37 = vadd.f32 %v2907_v4, %v15663_v1  ;;  %v11769_v39 = vadd.f32 %v3293_v63, %v15666_v30 }
 0x3bd   : > { %v15838_v44 = vpack.c.bf16 %v3440_v12, %v3440_v12  ;;  %v15840_v19 = vpack.c.bf16 %v3442_v0, %v3442_v0  ;;  %v3444_v7 = vmul.f32 0.125, %v11704_v11  ;;  %v3446_v58 = vmul.f32 0.125, %v11768_v22  ;;  %4507 = vmatmul.mubr.bf16.gmra.mrb[120].mxu0 %v20033_v6  ;;  %4893 = vmatmul.mubr.bf16.gmra.mrb[120].mxu1 %v20033_v6 }
 0x3be   : > { %v15844_v60 = vpack.c.bf16 %v3441_v53, %v3441_v53  ;;  %v15846_v33 = vpack.c.bf16 %v3443_v48, %v3443_v48  ;;  %v3445_v3 = vmul.f32 0.125, %v11705_v37  ;;  %v3447_v4 = vmul.f32 0.125, %v11769_v39  ;;  %7235 = vrot.lane.b32.xlu1 %v15739_v9, %s13581_s4  ;;  %4516 = vmatprep.mubr.bf16.mxu0 %v15503_v2 }
 0x3bf   : > { %6979 = vst.msk [vmem:[%s15680_s26 + $0x18] sm:$0xf] %vm6972_vm0, %v15838_v44  ;;  %11015 = vst.msk [vmem:[%s15680_s26 + $0x218] sm:$0xf] %vm6972_vm0, %v15840_v19  ;;  %v15857_v63 = vpack.c.bf16 %v3444_v7, %v3444_v7  ;;  %v15859_v53 = vpack.c.bf16 %v3446_v58, %v3446_v58  ;;  %4902 = vmatprep.mubr.bf16.mxu1 %v15503_v2  ;;  %9555 = vrot.lane.b32.xlu0 %v15729_v18, %s13581_s4 }
 0x3c0   : > { %10791 = vst.msk [vmem:[%s15680_s26 + $0x118] sm:$0xf] %vm6972_vm0, %v15844_v60  ;;  %11239 = vst.msk [vmem:[%s15680_s26 + $0x318] sm:$0xf] %vm6972_vm0, %v15846_v33  ;;  %v15870_v9 = vpack.c.bf16 %v3445_v3, %v3445_v3  ;;  %v15872_v22 = vpack.c.bf16 %v3447_v4, %v3447_v4  ;;  %v2911_v0 = vpop.f32.mrb[16].mxu0  ;;  %v3297_v12 = vpop.f32.mrb[16].mxu1 }
 0x3c1   : > { %6980 = vst.msk [vmem:[%s15680_s26 + $0x1c] sm:$0xf] %vm6972_vm0, %v15857_v63  ;;  %11016 = vst.msk [vmem:[%s15680_s26 + $0x21c] sm:$0xf] %vm6972_vm0, %v15859_v53  ;;  %v11706_v18 = vadd.f32 %v2911_v0, %v15655_v25  ;;  %v11770_v11 = vadd.f32 %v3297_v12, %v15658_v51  ;;  %v2913_v48 = vpop.f32.mrb[17].mxu0  ;;  %v3299_v37 = vpop.f32.mrb[17].mxu1 }
 0x3c2   : > { %10792 = vst.msk [vmem:[%s15680_s26 + $0x11c] sm:$0xf] %vm6972_vm0, %v15870_v9  ;;  %11240 = vst.msk [vmem:[%s15680_s26 + $0x31c] sm:$0xf] %vm6972_vm0, %v15872_v22  ;;  %v11707_v39 = vadd.f32 %v2913_v48, %v15663_v1  ;;  %v11771_v7 = vadd.f32 %v3299_v37, %v15666_v30  ;;  %8783 = vrot.lane.b32.xlu1 %v15741_v34, %s13581_s4  ;;  %v2915_v58 = vpop.f32.mrb[18].mxu0  ;;  %v3301_v3 = vpop.f32.mrb[18].mxu1 }
 0x3c3   : > { %v3448_v4 = vmul.f32 0.125, %v11706_v18  ;;  %v3450_v0 = vmul.f32 0.125, %v11770_v11  ;;  %v11708_v12 = vadd.f32 %v2915_v58, %v15655_v25  ;;  %v11772_v2 = vadd.f32 %v3301_v3, %v15658_v51  ;;  %v2917_v6 = vpop.f32.mrb[19].mxu0  ;;  %v3303_v56 = vpop.f32.mrb[19].mxu1  ;;  %7237 = vrot.lane.b32.xlu0 %v15778_v20, %s13581_s4 }
 0x3c4   : > { %v3449_v45 = vmul.f32 0.125, %v11707_v39  ;;  %v3451_v48 = vmul.f32 0.125, %v11771_v7  ;;  %v11709_v37 = vadd.f32 %v2917_v6, %v15663_v1  ;;  %v11773_v34 = vadd.f32 %v3303_v56, %v15666_v30 }
 0x3c5   : > { %v15898_v16 = vpack.c.bf16 %v3448_v4, %v3448_v4  ;;  %v15900_v18 = vpack.c.bf16 %v3450_v0, %v3450_v0  ;;  %v3452_v11 = vmul.f32 0.125, %v11708_v12  ;;  %v3454_v58 = vmul.f32 0.125, %v11772_v2  ;;  %4517 = vmatmul.mubr.bf16.gmra.mrb[124].mxu0 %v15505_v26  ;;  %4903 = vmatmul.mubr.bf16.gmra.mrb[124].mxu1 %v15505_v26 }
 0x3c6   : > { %v15904_v20 = vpack.c.bf16 %v3449_v45, %v3449_v45  ;;  %v15906_v39 = vpack.c.bf16 %v3451_v48, %v3451_v48  ;;  %v3453_v7 = vmul.f32 0.125, %v11709_v37  ;;  %v3455_v6 = vmul.f32 0.125, %v11773_v34  ;;  %8009 = vrot.lane.b32.xlu1 %v15751_v8, %s13581_s4  ;;  %4559 = vmatprep.mubr.bf16.mxu0 %v15514_v10 }
 0x3c7   : > { %6981 = vst.msk [vmem:[%s15680_s26 + $0x20] sm:$0xf] %vm6972_vm0, %v15898_v16  ;;  %11017 = vst.msk [vmem:[%s15680_s26 + $0x220] sm:$0xf] %vm6972_vm0, %v15900_v18  ;;  %v15917_v56 = vpack.c.bf16 %v3452_v11, %v3452_v11  ;;  %v15919_v45 = vpack.c.bf16 %v3454_v58, %v3454_v58  ;;  %4945 = vmatprep.mubr.bf16.mxu1 %v15514_v10  ;;  %8785 = vrot.lane.b32.xlu0 %v15780_v31, %s13581_s4 }
 0x3c8   : > { %10793 = vst.msk [vmem:[%s15680_s26 + $0x120] sm:$0xf] %vm6972_vm0, %v15904_v20  ;;  %11241 = vst.msk [vmem:[%s15680_s26 + $0x320] sm:$0xf] %vm6972_vm0, %v15906_v39  ;;  %v15930_v2 = vpack.c.bf16 %v3453_v7, %v3453_v7  ;;  %v15932_v8 = vpack.c.bf16 %v3455_v6, %v3455_v6  ;;  %v2921_v3 = vpop.f32.mrb[20].mxu0  ;;  %v3307_v4 = vpop.f32.mrb[20].mxu1 }
 0x3c9   : > { %6982 = vst.msk [vmem:[%s15680_s26 + $0x24] sm:$0xf] %vm6972_vm0, %v15917_v56  ;;  %11018 = vst.msk [vmem:[%s15680_s26 + $0x224] sm:$0xf] %vm6972_vm0, %v15919_v45  ;;  %v11710_v31 = vadd.f32 %v2921_v3, %v15655_v25  ;;  %v11774_v0 = vadd.f32 %v3307_v4, %v15658_v51  ;;  %v2923_v12 = vpop.f32.mrb[21].mxu0  ;;  %v3309_v48 = vpop.f32.mrb[21].mxu1 }
 0x3ca   : > { %10794 = vst.msk [vmem:[%s15680_s26 + $0x124] sm:$0xf] %vm6972_vm0, %v15930_v2  ;;  %11242 = vst.msk [vmem:[%s15680_s26 + $0x324] sm:$0xf] %vm6972_vm0, %v15932_v8  ;;  %v11711_v37 = vadd.f32 %v2923_v12, %v15663_v1  ;;  %v11775_v34 = vadd.f32 %v3309_v48, %v15666_v30  ;;  %9557 = vrot.lane.b32.xlu1 %v15753_v42, %s13581_s4  ;;  %v2925_v11 = vpop.f32.mrb[22].mxu0  ;;  %v3311_v58 = vpop.f32.mrb[22].mxu1 }
 0x3cb   : > { %v3456_v7 = vmul.f32 0.125, %v11710_v31  ;;  %v3458_v6 = vmul.f32 0.125, %v11774_v0  ;;  %v11712_v3 = vadd.f32 %v2925_v11, %v15655_v25  ;;  %v11776_v4 = vadd.f32 %v3311_v58, %v15658_v51  ;;  %v2927_v10 = vpop.f32.mrb[23].mxu0  ;;  %v3313_v26 = vpop.f32.mrb[23].mxu1  ;;  %8011 = vrot.lane.b32.xlu0 %v15784_v62, %s13581_s4  ;;  %v12952_v42 = vld [vmem:[#allocation10] ss:$16 sps:$4 sm:$0xff]  }
 0x3cc   : > { %v3457_v27 = vmul.f32 0.125, %v11711_v37  ;;  %v3459_v12 = vmul.f32 0.125, %v11775_v34  ;;  %v11713_v48 = vadd.f32 %v2927_v10, %v15663_v1  ;;  %v11777_v38 = vadd.f32 %v3313_v26, %v15666_v30  ;;  %v12960_v62 = vld [vmem:[#allocation10 + $0x24] ss:$16 sps:$4 sm:$0xff]   ;;  %v12963_v10 = vld [vmem:[#allocation10 + $0x2c] ss:$16 sps:$4 sm:$0xff]  }
 0x3cd   : > { %v15958_v31 = vpack.c.bf16 %v3456_v7, %v3456_v7  ;;  %v15960_v0 = vpack.c.bf16 %v3458_v6, %v3458_v6  ;;  %v3460_v11 = vmul.f32 0.125, %v11712_v3  ;;  %v3462_v58 = vmul.f32 0.125, %v11776_v4  ;;  %4560 = vmatmul.mubr.bf16.vlgmr.msra.gmra.mrb[64].mxu0 %v15531_v35  ;;  %4946 = vmatmul.mubr.bf16.vlgmr.msra.gmra.mrb[64].mxu1 %v15531_v35  ;;  %v12958_v4 = vld [vmem:[#allocation10 + $0x20] ss:$16 sps:$4 sm:$0xff]  }
 0x3ce   : > { %v15964_v37 = vpack.c.bf16 %v3457_v27, %v3457_v27  ;;  %v15966_v26 = vpack.c.bf16 %v3459_v12, %v3459_v12  ;;  %v3461_v34 = vmul.f32 0.125, %v11713_v48  ;;  %v3463_v59 = vmul.f32 0.125, %v11777_v38  ;;  %7239 = vrot.lane.b32.xlu1 %v15797_v32, %s13581_s4  ;;  %4569 = vmatprep.mubr.bf16.mxu0 %v15534_v21  ;;  %v12961_v12 = vld [vmem:[#allocation10 + $0x28] ss:$16 sps:$4 sm:$0xff]  }
 0x3cf   : > { %6983 = vst.msk [vmem:[%s15680_s26 + $0x28] sm:$0xf] %vm6972_vm0, %v15958_v31  ;;  %11019 = vst.msk [vmem:[%s15680_s26 + $0x228] sm:$0xf] %vm6972_vm0, %v15960_v0  ;;  %v15977_v7 = vpack.c.bf16 %v3460_v11, %v3460_v11  ;;  %v15979_v27 = vpack.c.bf16 %v3462_v58, %v3462_v58  ;;  %4955 = vmatprep.mubr.bf16.mxu1 %v15534_v21  ;;  %9559 = vrot.lane.b32.xlu0 %v15786_v29, %s13581_s4 }
 0x3d0   : > { %10795 = vst.msk [vmem:[%s15680_s26 + $0x128] sm:$0xf] %vm6972_vm0, %v15964_v37  ;;  %11243 = vst.msk [vmem:[%s15680_s26 + $0x328] sm:$0xf] %vm6972_vm0, %v15966_v26  ;;  %v15990_v38 = vpack.c.bf16 %v3461_v34, %v3461_v34  ;;  %v15992_v32 = vpack.c.bf16 %v3463_v59, %v3463_v59  ;;  %v2931_v6 = vpop.f32.mrb[24].mxu0  ;;  %v3317_v3 = vpop.f32.mrb[24].mxu1  ;;  %5897 = vmatpush1.bf16.msra.mxu0 %v12952_v42  ;;  %6283 = vmatpush1.bf16.msra.mxu1 %v12955_v61 }
 0x3d1   : > { %6984 = vst.msk [vmem:[%s15680_s26 + $0x2c] sm:$0xf] %vm6972_vm0, %v15977_v7  ;;  %11020 = vst.msk [vmem:[%s15680_s26 + $0x22c] sm:$0xf] %vm6972_vm0, %v15979_v27  ;;  %v11714_v29 = vadd.f32 %v2931_v6, %v15655_v25  ;;  %v11778_v48 = vadd.f32 %v3317_v3, %v15658_v51  ;;  %v2933_v11 = vpop.f32.mrb[25].mxu0  ;;  %v3319_v59 = vpop.f32.mrb[25].mxu1  ;;  %5898 = vmatprep.subr.bf16.mxu0 %v12960_v62  ;;  %6284 = vmatprep.subr.bf16.mxu1 %v12963_v10 }
 0x3d2   : > { %10796 = vst.msk [vmem:[%s15680_s26 + $0x12c] sm:$0xf] %vm6972_vm0, %v15990_v38  ;;  %11244 = vst.msk [vmem:[%s15680_s26 + $0x32c] sm:$0xf] %vm6972_vm0, %v15992_v32  ;;  %v11715_v61 = vadd.f32 %v2933_v11, %v15663_v1  ;;  %v11779_v42 = vadd.f32 %v3319_v59, %v15666_v30  ;;  %8787 = vrot.lane.b32.xlu1 %v15799_v47, %s13581_s4  ;;  %v2935_v58 = vpop.f32.mrb[26].mxu0  ;;  %v3321_v34 = vpop.f32.mrb[26].mxu1 }
 0x3d3   : > { %v3464_v6 = vmul.f32 0.125, %v11714_v29  ;;  %v3466_v3 = vmul.f32 0.125, %v11778_v48  ;;  %v11716_v62 = vadd.f32 %v2935_v58, %v15655_v25  ;;  %v11780_v10 = vadd.f32 %v3321_v34, %v15658_v51  ;;  %v2937_v21 = vpop.f32.mrb[27].mxu0  ;;  %v3323_v35 = vpop.f32.mrb[27].mxu1  ;;  %7241 = vrot.lane.b32.xlu0 %v15838_v44, %s13581_s4  ;;  %v12966_v47 = vld [vmem:[#allocation10 + $0x44] ss:$16 sps:$4 sm:$0xff]  }
 0x3d4   : > { %v3465_v13 = vmul.f32 0.125, %v11715_v61  ;;  %v3467_v11 = vmul.f32 0.125, %v11779_v42  ;;  %v11717_v59 = vadd.f32 %v2937_v21, %v15663_v1  ;;  %v11781_v14 = vadd.f32 %v3323_v35, %v15666_v30  ;;  %5899 = vmatpush1.bf16.msra.mxu0 %v12958_v4  ;;  %6285 = vmatpush1.bf16.msra.mxu1 %v12961_v12  ;;  %v12969_v29 = vld [vmem:[#allocation10 + $0x4c] ss:$16 sps:$4 sm:$0xff]   ;;  %v12964_v44 = vld [vmem:[#allocation10 + $0x40] ss:$16 sps:$4 sm:$0xff]  }
 0x3d5   : > { %v16018_v48 = vpack.c.bf16 %v3464_v6, %v3464_v6  ;;  %v16020_v58 = vpack.c.bf16 %v3466_v3, %v3466_v3  ;;  %v3468_v34 = vmul.f32 0.125, %v11716_v62  ;;  %v3470_v41 = vmul.f32 0.125, %v11780_v10  ;;  %4570 = vmatmul.mubr.bf16.gmra.mrb[68].mxu0 %v15543_v50  ;;  %4956 = vmatmul.mubr.bf16.gmra.mrb[68].mxu1 %v15543_v50  ;;  %v12967_v21 = vld [vmem:[#allocation10 + $0x48] ss:$16 sps:$4 sm:$0xff]   ;;  %v12972_v42 = vld [vmem:[#allocation10 + $0x64] ss:$16 sps:$4 sm:$0xff]  }
 0x3d6   : > { %v16024_v35 = vpack.c.bf16 %v3465_v13, %v3465_v13  ;;  %v16026_v4 = vpack.c.bf16 %v3467_v11, %v3467_v11  ;;  %v3469_v12 = vmul.f32 0.125, %v11717_v59  ;;  %v3471_v61 = vmul.f32 0.125, %v11781_v14  ;;  %8013 = vrot.lane.b32.xlu1 %v15810_v40, %s13581_s4  ;;  %4579 = vmatprep.mubr.bf16.mxu0 %v15157_v23  ;;  %v12975_v14 = vld [vmem:[#allocation10 + $0x6c] ss:$16 sps:$4 sm:$0xff]  }
 0x3d7   : > { %6985 = vst.msk [vmem:[%s15680_s26 + $0x30] sm:$0xf] %vm6972_vm0, %v16018_v48  ;;  %11021 = vst.msk [vmem:[%s15680_s26 + $0x230] sm:$0xf] %vm6972_vm0, %v16020_v58  ;;  %v16037_v13 = vpack.c.bf16 %v3468_v34, %v3468_v34  ;;  %v16039_v6 = vpack.c.bf16 %v3470_v41, %v3470_v41  ;;  %4965 = vmatprep.mubr.bf16.mxu1 %v15157_v23  ;;  %8789 = vrot.lane.b32.xlu0 %v15840_v19, %s13581_s4 }
 0x3d8   : > { %10797 = vst.msk [vmem:[%s15680_s26 + $0x130] sm:$0xf] %vm6972_vm0, %v16024_v35  ;;  %11245 = vst.msk [vmem:[%s15680_s26 + $0x330] sm:$0xf] %vm6972_vm0, %v16026_v4  ;;  %v16050_v40 = vpack.c.bf16 %v3469_v12, %v3469_v12  ;;  %v16052_v3 = vpack.c.bf16 %v3471_v61, %v3471_v61  ;;  %v2941_v41 = vpop.f32.mrb[28].mxu0  ;;  %v3327_v62 = vpop.f32.mrb[28].mxu1  ;;  %5900 = vmatprep.subr.bf16.mxu0 %v12966_v47  ;;  %6286 = vmatprep.subr.bf16.mxu1 %v12969_v29 }
 0x3d9   : > { %6986 = vst.msk [vmem:[%s15680_s26 + $0x34] sm:$0xf] %vm6972_vm0, %v16037_v13  ;;  %11022 = vst.msk [vmem:[%s15680_s26 + $0x234] sm:$0xf] %vm6972_vm0, %v16039_v6  ;;  %v11718_v19 = vadd.f32 %v2941_v41, %v15655_v25  ;;  %v11782_v10 = vadd.f32 %v3327_v62, %v15658_v51  ;;  %v2943_v11 = vpop.f32.mrb[29].mxu0  ;;  %v3329_v59 = vpop.f32.mrb[29].mxu1  ;;  %5901 = vmatpush1.bf16.msra.mxu0 %v12964_v44  ;;  %6287 = vmatpush1.bf16.msra.mxu1 %v12967_v21 }
 0x3da   : > { %20034 = vst [vmem:[#allocation80_spill] sm:$0xff] %v16052_v3  ;;  %10798 = vst.msk [vmem:[%s15680_s26 + $0x134] sm:$0xf] %vm6972_vm0, %v16050_v40  ;;  %v11719_v47 = vadd.f32 %v2943_v11, %v15663_v1  ;;  %v11783_v29 = vadd.f32 %v3329_v59, %v15666_v30  ;;  %9561 = vrot.lane.b32.xlu1 %v15812_v28, %s13581_s4  ;;  %v2945_v34 = vpop.f32.mrb[30].mxu0  ;;  %v3331_v12 = vpop.f32.mrb[30].mxu1  ;;  %5902 = vmatprep.subr.bf16.mxu0 %v12972_v42 }
 0x3db   : > { %11246 = vst.msk [vmem:[%s15680_s26 + $0x334] sm:$0xf] %vm6972_vm0, %v16052_v3  ;;  %v3472_v61 = vmul.f32 0.125, %v11718_v19  ;;  %v3474_v41 = vmul.f32 0.125, %v11782_v10  ;;  %v11720_v44 = vadd.f32 %v2945_v34, %v15655_v25  ;;  %v11784_v21 = vadd.f32 %v3331_v12, %v15658_v51  ;;  %v2947_v62 = vpop.f32.mrb[31].mxu0  ;;  %v3333_v23 = vpop.f32.mrb[31].mxu1  ;;  %8015 = vrot.lane.b32.xlu0 %v15844_v60, %s13581_s4  ;;  %6288 = vmatprep.subr.bf16.mxu1 %v12975_v14 }
 0x3dc   : > { %v3473_v11 = vmul.f32 0.125, %v11719_v47  ;;  %v3475_v59 = vmul.f32 0.125, %v11783_v29  ;;  %v11721_v50 = vadd.f32 %v2947_v62, %v15663_v1  ;;  %v11785_v28 = vadd.f32 %v3333_v23, %v15666_v30  ;;  %v12970_v3 = vld [vmem:[#allocation10 + $0x60] ss:$16 sps:$4 sm:$0xff]   ;;  %v12973_v42 = vld [vmem:[#allocation10 + $0x68] ss:$16 sps:$4 sm:$0xff]  }
 0x3dd   : > { %v16078_v19 = vpack.c.bf16 %v3472_v61, %v3472_v61  ;;  %v16080_v10 = vpack.c.bf16 %v3474_v41, %v3474_v41  ;;  %v3476_v34 = vmul.f32 0.125, %v11720_v44  ;;  %v3478_v12 = vmul.f32 0.125, %v11784_v21  ;;  %4580 = vmatmul.mubr.bf16.gmra.mrb[72].mxu0 %v15163_v24  ;;  %4966 = vmatmul.mubr.bf16.gmra.mrb[72].mxu1 %v15163_v24  ;;  %v12978_v60 = vld [vmem:[#allocation10 + $0x84] ss:$16 sps:$4 sm:$0xff]   ;;  %v12981_v14 = vld [vmem:[#allocation10 + $0x8c] ss:$16 sps:$4 sm:$0xff]  }
 0x3de   : > { %v16084_v47 = vpack.c.bf16 %v3473_v11, %v3473_v11  ;;  %v16086_v23 = vpack.c.bf16 %v3475_v59, %v3475_v59  ;;  %v3477_v29 = vmul.f32 0.125, %v11721_v50  ;;  %v3479_v62 = vmul.f32 0.125, %v11785_v28  ;;  %7243 = vrot.lane.b32.xlu1 %v15857_v63, %s13581_s4  ;;  %4589 = vmatprep.mubr.bf16.mxu0 %v15174_v57  ;;  %v12976_v11 = vld [vmem:[#allocation10 + $0x80] ss:$16 sps:$4 sm:$0xff]   ;;  %v12979_v59 = vld [vmem:[#allocation10 + $0x88] ss:$16 sps:$4 sm:$0xff]  }
 0x3df   : > { %6987 = vst.msk [vmem:[%s15680_s26 + $0x38] sm:$0xf] %vm6972_vm0, %v16078_v19  ;;  %11023 = vst.msk [vmem:[%s15680_s26 + $0x238] sm:$0xf] %vm6972_vm0, %v16080_v10  ;;  %v16097_v61 = vpack.c.bf16 %v3476_v34, %v3476_v34  ;;  %v16099_v41 = vpack.c.bf16 %v3478_v12, %v3478_v12  ;;  %4975 = vmatprep.mubr.bf16.mxu1 %v15174_v57  ;;  %9563 = vrot.lane.b32.xlu0 %v15846_v33, %s13581_s4 }
 0x3e0   : > { %10799 = vst.msk [vmem:[%s15680_s26 + $0x138] sm:$0xf] %vm6972_vm0, %v16084_v47  ;;  %11247 = vst.msk [vmem:[%s15680_s26 + $0x338] sm:$0xf] %vm6972_vm0, %v16086_v23  ;;  %v16110_v50 = vpack.c.bf16 %v3477_v29, %v3477_v29  ;;  %v16112_v63 = vpack.c.bf16 %v3479_v62, %v3479_v62  ;;  %v2951_v44 = vpop.f32.mrb[32].mxu0  ;;  %v3337_v21 = vpop.f32.mrb[32].mxu1  ;;  %5903 = vmatpush1.bf16.msra.mxu0 %v12970_v3  ;;  %6289 = vmatpush1.bf16.msra.mxu1 %v12973_v42 }
 0x3e1   : > { %20035 = vst [vmem:[#allocation79_spill] sm:$0xff] %v16099_v41  ;;  %6988 = vst.msk [vmem:[%s15680_s26 + $0x3c] sm:$0xf] %vm6972_vm0, %v16097_v61  ;;  %v11722_v33 = vadd.f32 %v2951_v44, %v15655_v25  ;;  %v11786_v28 = vadd.f32 %v3337_v21, %v15658_v51  ;;  %v2953_v34 = vpop.f32.mrb[33].mxu0  ;;  %v3339_v12 = vpop.f32.mrb[33].mxu1  ;;  %5904 = vmatprep.subr.bf16.mxu0 %v12978_v60  ;;  %6290 = vmatprep.subr.bf16.mxu1 %v12981_v14 }
 0x3e2   : > { %20036 = vst [vmem:[#allocation83_spill] sm:$0xff] %v16110_v50  ;;  %20037 = vst [vmem:[#allocation82_spill] sm:$0xff] %v16112_v63  ;;  %v11723_v3 = vadd.f32 %v2953_v34, %v15663_v1  ;;  %v11787_v42 = vadd.f32 %v3339_v12, %v15666_v30  ;;  %8791 = vrot.lane.b32.xlu1 %v15859_v53, %s13581_s4  ;;  %v2955_v29 = vpop.f32.mrb[34].mxu0  ;;  %v3341_v62 = vpop.f32.mrb[34].mxu1  ;;  %v12984_v53 = vld [vmem:[#allocation10 + $0xa4] ss:$16 sps:$4 sm:$0xff]  }
 0x3e3   : > { %11024 = vst.msk [vmem:[%s15680_s26 + $0x23c] sm:$0xf] %vm6972_vm0, %v16099_v41  ;;  %10800 = vst.msk [vmem:[%s15680_s26 + $0x13c] sm:$0xf] %vm6972_vm0, %v16110_v50  ;;  %v3480_v44 = vmul.f32 0.125, %v11722_v33  ;;  %v3482_v21 = vmul.f32 0.125, %v11786_v28  ;;  %v11724_v60 = vadd.f32 %v2955_v29, %v15655_v25  ;;  %v11788_v14 = vadd.f32 %v3341_v62, %v15658_v51  ;;  %7245 = vrot.lane.b32.xlu0 %v15898_v16, %s13581_s4 }
 0x3e4   : > { %11248 = vst.msk [vmem:[%s15680_s26 + $0x33c] sm:$0xf] %vm6972_vm0, %v16112_v63  ;;  %v2957_v57 = vpop.f32.mrb[35].mxu0  ;;  %v3343_v24 = vpop.f32.mrb[35].mxu1  ;;  %v3481_v63 = vmul.f32 0.125, %v11723_v3  ;;  %v3483_v34 = vmul.f32 0.125, %v11787_v42  ;;  %5905 = vmatpush1.bf16.msra.mxu0 %v12976_v11  ;;  %6291 = vmatpush1.bf16.msra.mxu1 %v12979_v59 }
 0x3e5   : > { %v11725_v12 = vadd.f32 %v2957_v57, %v15663_v1  ;;  %v11789_v50 = vadd.f32 %v3343_v24, %v15666_v30  ;;  %v12987_v33 = vld [vmem:[#allocation10 + $0xac] ss:$16 sps:$4 sm:$0xff]   ;;  %v16138_v28 = vpack.c.bf16 %v3480_v44, %v3480_v44  ;;  %v16140_v29 = vpack.c.bf16 %v3482_v21, %v3482_v21  ;;  %4590 = vmatmul.mubr.bf16.gmra.mrb[76].mxu0 %v15186_v5  ;;  %v12982_v16 = vld [vmem:[#allocation10 + $0xa0] ss:$16 sps:$4 sm:$0xff]   ;;  %v12985_v57 = vld [vmem:[#allocation10 + $0xa8] ss:$16 sps:$4 sm:$0xff]  }
 0x3e6   : > { %v3484_v62 = vmul.f32 0.125, %v11724_v60  ;;  %v3486_v41 = vmul.f32 0.125, %v11788_v14  ;;  %4976 = vmatmul.mubr.bf16.gmra.mrb[76].mxu1 %v15186_v5  ;;  %v16144_v24 = vpack.c.bf16 %v3481_v63, %v3481_v63  ;;  %v16146_v11 = vpack.c.bf16 %v3483_v34, %v3483_v34  ;;  %8017 = vrot.lane.b32.xlu1 %v15870_v9, %s13581_s4  ;;  %v12990_v42 = vld [vmem:[#allocation10 + $0xc4] ss:$16 sps:$4 sm:$0xff]   ;;  %v12993_v9 = vld [vmem:[#allocation10 + $0xcc] ss:$16 sps:$4 sm:$0xff]  }
 0x3e7   : > { %v3485_v59 = vmul.f32 0.125, %v11725_v12  ;;  %v3487_v3 = vmul.f32 0.125, %v11789_v50  ;;  %4599 = vmatprep.mubr.bf16.mxu0 %v15203_v54  ;;  %6989 = vst.msk [vmem:[%s15680_s26 + $0x40] sm:$0xf] %vm6972_vm0, %v16138_v28  ;;  %11025 = vst.msk [vmem:[%s15680_s26 + $0x240] sm:$0xf] %vm6972_vm0, %v16140_v29  ;;  %4985 = vmatprep.mubr.bf16.mxu1 %v15203_v54 }
 0x3e8   : > { %v16157_v63 = vpack.c.bf16 %v3484_v62, %v3484_v62  ;;  %v16159_v44 = vpack.c.bf16 %v3486_v41, %v3486_v41  ;;  %8793 = vrot.lane.b32.xlu0 %v15900_v18, %s13581_s4  ;;  %10801 = vst.msk [vmem:[%s15680_s26 + $0x140] sm:$0xf] %vm6972_vm0, %v16144_v24  ;;  %11249 = vst.msk [vmem:[%s15680_s26 + $0x340] sm:$0xf] %vm6972_vm0, %v16146_v11  ;;  %v2961_v41 = vpop.f32.mrb[36].mxu0  ;;  %v3347_v60 = vpop.f32.mrb[36].mxu1  ;;  %5906 = vmatprep.subr.bf16.mxu0 %v12984_v53 }
 0x3e9   : > { %v16170_v50 = vpack.c.bf16 %v3485_v59, %v3485_v59  ;;  %v16172_v21 = vpack.c.bf16 %v3487_v3, %v3487_v3  ;;  %6292 = vmatprep.subr.bf16.mxu1 %v12987_v33  ;;  %v11726_v18 = vadd.f32 %v2961_v41, %v15655_v25  ;;  %v11790_v14 = vadd.f32 %v3347_v60, %v15658_v51  ;;  %v2963_v34 = vpop.f32.mrb[37].mxu0  ;;  %v3349_v12 = vpop.f32.mrb[37].mxu1 }
 0x3ea   : > { %6990 = vst.msk [vmem:[%s15680_s26 + $0x44] sm:$0xf] %vm6972_vm0, %v16157_v63  ;;  %11026 = vst.msk [vmem:[%s15680_s26 + $0x244] sm:$0xf] %vm6972_vm0, %v16159_v44  ;;  %5907 = vmatpush1.bf16.msra.mxu0 %v12982_v16  ;;  %6293 = vmatpush1.bf16.msra.mxu1 %v12985_v57  ;;  %v11727_v53 = vadd.f32 %v2963_v34, %v15663_v1  ;;  %v11791_v33 = vadd.f32 %v3349_v12, %v15666_v30  ;;  %v2965_v62 = vpop.f32.mrb[38].mxu0  ;;  %v3351_v59 = vpop.f32.mrb[38].mxu1 }
 0x3eb   : > { %20038 = vst [vmem:[#allocation86_spill] sm:$0xff] %v16172_v21  ;;  %10802 = vst.msk [vmem:[%s15680_s26 + $0x144] sm:$0xf] %vm6972_vm0, %v16170_v50  ;;  %9565 = vrot.lane.b32.xlu1 %v15872_v22, %s13581_s4  ;;  %5908 = vmatprep.subr.bf16.mxu0 %v12990_v42  ;;  %v3488_v3 = vmul.f32 0.125, %v11726_v18  ;;  %v3490_v41 = vmul.f32 0.125, %v11790_v14  ;;  %v11728_v16 = vadd.f32 %v2965_v62, %v15655_v25  ;;  %v2967_v60 = vpop.f32.mrb[39].mxu0 }
 0x3ec   : > { %11250 = vst.msk [vmem:[%s15680_s26 + $0x344] sm:$0xf] %vm6972_vm0, %v16172_v21  ;;  %v11792_v57 = vadd.f32 %v3351_v59, %v15658_v51  ;;  %v3353_v54 = vpop.f32.mrb[39].mxu1  ;;  %8019 = vrot.lane.b32.xlu0 %v15904_v20, %s13581_s4  ;;  %6294 = vmatprep.subr.bf16.mxu1 %v12993_v9  ;;  %v3489_v34 = vmul.f32 0.125, %v11727_v53  ;;  %v3491_v12 = vmul.f32 0.125, %v11791_v33  ;;  %v11729_v5 = vadd.f32 %v2967_v60, %v15663_v1 }
 0x3ed   : > { %v11793_v22 = vadd.f32 %v3353_v54, %v15666_v30  ;;  %v12988_v21 = vld [vmem:[#allocation10 + $0xc0] ss:$16 sps:$4 sm:$0xff]   ;;  %v12991_v42 = vld [vmem:[#allocation10 + $0xc8] ss:$16 sps:$4 sm:$0xff]   ;;  %v16198_v18 = vpack.c.bf16 %v3488_v3, %v3488_v3  ;;  %v16200_v14 = vpack.c.bf16 %v3490_v41, %v3490_v41  ;;  %v3492_v62 = vmul.f32 0.125, %v11728_v16  ;;  %4600 = vmatmul.mubr.bf16.gmra.mrb[80].mxu0 %v15210_v46 }
 0x3ee   : > { %v3494_v59 = vmul.f32 0.125, %v11792_v57  ;;  %4986 = vmatmul.mubr.bf16.gmra.mrb[80].mxu1 %v15210_v46  ;;  %v12996_v20 = vld [vmem:[#allocation10 + $0xe4] ss:$16 sps:$4 sm:$0xff]   ;;  %v12999_v9 = vld [vmem:[#allocation10 + $0xec] ss:$16 sps:$4 sm:$0xff]   ;;  %v16204_v53 = vpack.c.bf16 %v3489_v34, %v3489_v34  ;;  %v16206_v54 = vpack.c.bf16 %v3491_v12, %v3491_v12  ;;  %v3493_v33 = vmul.f32 0.125, %v11729_v5  ;;  %4609 = vmatprep.mubr.bf16.mxu0 %v15214_v49 }
 0x3ef   : > { %v3495_v60 = vmul.f32 0.125, %v11793_v22  ;;  %7247 = vrot.lane.b32.xlu1 %v15917_v56, %s13581_s4  ;;  %6991 = vst.msk [vmem:[%s15680_s26 + $0x48] sm:$0xf] %vm6972_vm0, %v16198_v18  ;;  %11027 = vst.msk [vmem:[%s15680_s26 + $0x248] sm:$0xf] %vm6972_vm0, %v16200_v14  ;;  %v16217_v3 = vpack.c.bf16 %v3492_v62, %v3492_v62  ;;  %4995 = vmatprep.mubr.bf16.mxu1 %v15214_v49 }
 0x3f0   : > { %v16219_v41 = vpack.c.bf16 %v3494_v59, %v3494_v59  ;;  %9567 = vrot.lane.b32.xlu0 %v15906_v39, %s13581_s4  ;;  %10803 = vst.msk [vmem:[%s15680_s26 + $0x148] sm:$0xf] %vm6972_vm0, %v16204_v53  ;;  %11251 = vst.msk [vmem:[%s15680_s26 + $0x348] sm:$0xf] %vm6972_vm0, %v16206_v54  ;;  %v16230_v5 = vpack.c.bf16 %v3493_v33, %v3493_v33  ;;  %v2971_v16 = vpop.f32.mrb[40].mxu0  ;;  %v3357_v57 = vpop.f32.mrb[40].mxu1  ;;  %5909 = vmatpush1.bf16.msra.mxu0 %v12988_v21 }
 0x3f1   : > { %v16232_v56 = vpack.c.bf16 %v3495_v60, %v3495_v60  ;;  %6295 = vmatpush1.bf16.msra.mxu1 %v12991_v42  ;;  %v12994_v34 = vld [vmem:[#allocation10 + $0xe0] ss:$16 sps:$4 sm:$0xff]   ;;  %v12997_v12 = vld [vmem:[#allocation10 + $0xe8] ss:$16 sps:$4 sm:$0xff]   ;;  %6992 = vst.msk [vmem:[%s15680_s26 + $0x4c] sm:$0xf] %vm6972_vm0, %v16217_v3  ;;  %v11730_v39 = vadd.f32 %v2971_v16, %v15655_v25  ;;  %v11794_v22 = vadd.f32 %v3357_v57, %v15658_v51 }
 0x3f2   : > { %20039 = vst [vmem:[#allocation85_spill] sm:$0xff] %v16219_v41  ;;  %20040 = vst [vmem:[#allocation88_spill] sm:$0xff] %v16230_v5  ;;  %v2973_v62 = vpop.f32.mrb[41].mxu0  ;;  %v3359_v59 = vpop.f32.mrb[41].mxu1  ;;  %5910 = vmatprep.subr.bf16.mxu0 %v12996_v20  ;;  %6296 = vmatprep.subr.bf16.mxu1 %v12999_v9 }
 0x3f3   : > { %20041 = vst [vmem:[#allocation91_spill] sm:$0xff] %v16232_v56  ;;  %11028 = vst.msk [vmem:[%s15680_s26 + $0x24c] sm:$0xf] %vm6972_vm0, %v16219_v41  ;;  %v11731_v21 = vadd.f32 %v2973_v62, %v15663_v1  ;;  %v11795_v42 = vadd.f32 %v3359_v59, %v15666_v30  ;;  %8795 = vrot.lane.b32.xlu1 %v15919_v45, %s13581_s4  ;;  %v2975_v33 = vpop.f32.mrb[42].mxu0  ;;  %v3361_v60 = vpop.f32.mrb[42].mxu1  ;;  %v3496_v16 = vmul.f32 0.125, %v11730_v39 }
 0x3f4   : > { %10804 = vst.msk [vmem:[%s15680_s26 + $0x14c] sm:$0xf] %vm6972_vm0, %v16230_v5  ;;  %11252 = vst.msk [vmem:[%s15680_s26 + $0x34c] sm:$0xf] %vm6972_vm0, %v16232_v56  ;;  %v3498_v57 = vmul.f32 0.125, %v11794_v22  ;;  %v11732_v20 = vadd.f32 %v2975_v33, %v15655_v25  ;;  %v11796_v9 = vadd.f32 %v3361_v60, %v15658_v51  ;;  %v2977_v49 = vpop.f32.mrb[43].mxu0  ;;  %7249 = vrot.lane.b32.xlu0 %v15958_v31, %s13581_s4  ;;  %5911 = vmatpush1.bf16.msra.mxu0 %v12994_v34 }
 0x3f5   : > { %v3363_v46 = vpop.f32.mrb[43].mxu1  ;;  %v3497_v56 = vmul.f32 0.125, %v11731_v21  ;;  %v3499_v62 = vmul.f32 0.125, %v11795_v42  ;;  %v11733_v59 = vadd.f32 %v2977_v49, %v15663_v1  ;;  %6297 = vmatpush1.bf16.msra.mxu1 %v12997_v12  ;;  %v13002_v45 = vld [vmem:[#allocation10 + $0x104] ss:$16 sps:$4 sm:$0xff]   ;;  %v16258_v22 = vpack.c.bf16 %v3496_v16, %v3496_v16  ;;  %4610 = vmatmul.mubr.bf16.gmra.mrb[84].mxu0 %v15233_v36 }
 0x3f6   : > { %v11797_v5 = vadd.f32 %v3363_v46, %v15666_v30  ;;  %v13005_v39 = vld [vmem:[#allocation10 + $0x10c] ss:$16 sps:$4 sm:$0xff]   ;;  %v16260_v33 = vpack.c.bf16 %v3498_v57, %v3498_v57  ;;  %v3500_v60 = vmul.f32 0.125, %v11732_v20  ;;  %v3502_v41 = vmul.f32 0.125, %v11796_v9  ;;  %4996 = vmatmul.mubr.bf16.gmra.mrb[84].mxu1 %v15233_v36  ;;  %v13000_v31 = vld [vmem:[#allocation10 + $0x100] ss:$16 sps:$4 sm:$0xff]   ;;  %4619 = vmatprep.mubr.bf16.mxu0 %v15250_v52 }
 0x3f7   : > { %v13003_v49 = vld [vmem:[#allocation10 + $0x108] ss:$16 sps:$4 sm:$0xff]   ;;  %v16264_v46 = vpack.c.bf16 %v3497_v56, %v3497_v56  ;;  %v16266_v34 = vpack.c.bf16 %v3499_v62, %v3499_v62  ;;  %v3501_v12 = vmul.f32 0.125, %v11733_v59  ;;  %8021 = vrot.lane.b32.xlu1 %v15930_v2, %s13581_s4  ;;  %v13008_v42 = vld [vmem:[#allocation10 + $0x124] ss:$16 sps:$4 sm:$0xff]   ;;  %5005 = vmatprep.mubr.bf16.mxu1 %v15250_v52 }
 0x3f8   : > { %v3503_v21 = vmul.f32 0.125, %v11797_v5  ;;  %6993 = vst.msk [vmem:[%s15680_s26 + $0x50] sm:$0xf] %vm6972_vm0, %v16258_v22  ;;  %11029 = vst.msk [vmem:[%s15680_s26 + $0x250] sm:$0xf] %vm6972_vm0, %v16260_v33  ;;  %v16277_v56 = vpack.c.bf16 %v3500_v60, %v3500_v60  ;;  %v16279_v16 = vpack.c.bf16 %v3502_v41, %v3502_v41  ;;  %8797 = vrot.lane.b32.xlu0 %v15960_v0, %s13581_s4  ;;  %v2981_v41 = vpop.f32.mrb[44].mxu0  ;;  %5912 = vmatprep.subr.bf16.mxu0 %v13002_v45 }
 0x3f9   : > { %v13011_v2 = vld [vmem:[#allocation10 + $0x12c] ss:$16 sps:$4 sm:$0xff]   ;;  %10805 = vst.msk [vmem:[%s15680_s26 + $0x150] sm:$0xf] %vm6972_vm0, %v16264_v46  ;;  %11253 = vst.msk [vmem:[%s15680_s26 + $0x350] sm:$0xf] %vm6972_vm0, %v16266_v34  ;;  %v16290_v5 = vpack.c.bf16 %v3501_v12, %v3501_v12  ;;  %6298 = vmatprep.subr.bf16.mxu1 %v13005_v39  ;;  %v11734_v0 = vadd.f32 %v2981_v41, %v15655_v25  ;;  %5913 = vmatpush1.bf16.msra.mxu0 %v13000_v31 }
 0x3fa   : > { %v16292_v57 = vpack.c.bf16 %v3503_v21, %v3503_v21  ;;  %v3367_v20 = vpop.f32.mrb[44].mxu1  ;;  %6994 = vst.msk [vmem:[%s15680_s26 + $0x54] sm:$0xf] %vm6972_vm0, %v16277_v56  ;;  %11030 = vst.msk [vmem:[%s15680_s26 + $0x254] sm:$0xf] %vm6972_vm0, %v16279_v16  ;;  %v2983_v62 = vpop.f32.mrb[45].mxu0  ;;  %6299 = vmatpush1.bf16.msra.mxu1 %v13003_v49  ;;  %5914 = vmatprep.subr.bf16.mxu0 %v13008_v42 }
 0x3fb   : > { %v11798_v9 = vadd.f32 %v3367_v20, %v15658_v51  ;;  %v3369_v59 = vpop.f32.mrb[45].mxu1  ;;  %10806 = vst.msk [vmem:[%s15680_s26 + $0x154] sm:$0xf] %vm6972_vm0, %v16290_v5  ;;  %v11735_v45 = vadd.f32 %v2983_v62, %v15663_v1  ;;  %9569 = vrot.lane.b32.xlu1 %v15932_v8, %s13581_s4  ;;  %v2985_v60 = vpop.f32.mrb[46].mxu0  ;;  %v3504_v21 = vmul.f32 0.125, %v11734_v0  ;;  %6300 = vmatprep.subr.bf16.mxu1 %v13011_v2 }
 0x3fc   : > { %20042 = vst [vmem:[#allocation90_spill] sm:$0xff] %v16292_v57  ;;  %11254 = vst.msk [vmem:[%s15680_s26 + $0x354] sm:$0xf] %vm6972_vm0, %v16292_v57  ;;  %v11799_v39 = vadd.f32 %v3369_v59, %v15666_v30  ;;  %v3371_v12 = vpop.f32.mrb[46].mxu1  ;;  %v11736_v31 = vadd.f32 %v2985_v60, %v15655_v25  ;;  %v2987_v20 = vpop.f32.mrb[47].mxu0  ;;  %8023 = vrot.lane.b32.xlu0 %v15964_v37, %s13581_s4 }
 0x3fd   : > { %v3506_v41 = vmul.f32 0.125, %v11798_v9  ;;  %v11800_v49 = vadd.f32 %v3371_v12, %v15658_v51  ;;  %v3373_v52 = vpop.f32.mrb[47].mxu1  ;;  %v3505_v62 = vmul.f32 0.125, %v11735_v45  ;;  %v11737_v36 = vadd.f32 %v2987_v20, %v15663_v1  ;;  %v13006_v57 = vld [vmem:[#allocation10 + $0x120] ss:$16 sps:$4 sm:$0xff]   ;;  %4620 = vmatmul.mubr.bf16.gmra.mrb[88].mxu0 %v15254_v17 }
 0x3fe   : > { %v3507_v59 = vmul.f32 0.125, %v11799_v39  ;;  %v11801_v8 = vadd.f32 %v3373_v52, %v15666_v30  ;;  %v13009_v42 = vld [vmem:[#allocation10 + $0x128] ss:$16 sps:$4 sm:$0xff]   ;;  %v16318_v0 = vpack.c.bf16 %v3504_v21, %v3504_v21  ;;  %v3508_v60 = vmul.f32 0.125, %v11736_v31  ;;  %5006 = vmatmul.mubr.bf16.gmra.mrb[88].mxu1 %v15254_v17  ;;  %v13014_v37 = vld [vmem:[#allocation10 + $0x144] ss:$16 sps:$4 sm:$0xff]   ;;  %4629 = vmatprep.mubr.bf16.mxu0 %v15256_v43 }
 0x3ff   : > { %v16320_v9 = vpack.c.bf16 %v3506_v41, %v3506_v41  ;;  %v3510_v12 = vmul.f32 0.125, %v11800_v49  ;;  %v13017_v2 = vld [vmem:[#allocation10 + $0x14c] ss:$16 sps:$4 sm:$0xff]   ;;  %v16324_v45 = vpack.c.bf16 %v3505_v62, %v3505_v62  ;;  %v3509_v39 = vmul.f32 0.125, %v11737_v36  ;;  %7251 = vrot.lane.b32.xlu1 %v15977_v7, %s13581_s4  ;;  %5015 = vmatprep.mubr.bf16.mxu1 %v15256_v43  ;;  %v13012_v62 = vld [vmem:[#allocation10 + $0x140] ss:$16 sps:$4 sm:$0xff]  }
 0x400   : > { %v16326_v52 = vpack.c.bf16 %v3507_v59, %v3507_v59  ;;  %v3511_v20 = vmul.f32 0.125, %v11801_v8  ;;  %6995 = vst.msk [vmem:[%s15680_s26 + $0x58] sm:$0xf] %vm6972_vm0, %v16318_v0  ;;  %v16337_v21 = vpack.c.bf16 %v3508_v60, %v3508_v60  ;;  %9571 = vrot.lane.b32.xlu0 %v15966_v26, %s13581_s4  ;;  %v2991_v31 = vpop.f32.mrb[48].mxu0  ;;  %v3377_v49 = vpop.f32.mrb[48].mxu1  ;;  %5915 = vmatpush1.bf16.msra.mxu0 %v13006_v57 }
 0x401   : > { %11031 = vst.msk [vmem:[%s15680_s26 + $0x258] sm:$0xf] %vm6972_vm0, %v16320_v9  ;;  %v16339_v41 = vpack.c.bf16 %v3510_v12, %v3510_v12  ;;  %10807 = vst.msk [vmem:[%s15680_s26 + $0x158] sm:$0xf] %vm6972_vm0, %v16324_v45  ;;  %v16350_v36 = vpack.c.bf16 %v3509_v39, %v3509_v39  ;;  %6301 = vmatpush1.bf16.msra.mxu1 %v13009_v42  ;;  %v13015_v59 = vld [vmem:[#allocation10 + $0x148] ss:$16 sps:$4 sm:$0xff]   ;;  %v11738_v26 = vadd.f32 %v2991_v31, %v15655_v25 }
 0x402   : > { %11255 = vst.msk [vmem:[%s15680_s26 + $0x358] sm:$0xf] %vm6972_vm0, %v16326_v52  ;;  %v16352_v7 = vpack.c.bf16 %v3511_v20, %v3511_v20  ;;  %6996 = vst.msk [vmem:[%s15680_s26 + $0x5c] sm:$0xf] %vm6972_vm0, %v16337_v21  ;;  %v11802_v8 = vadd.f32 %v3377_v49, %v15658_v51  ;;  %v2993_v60 = vpop.f32.mrb[49].mxu0  ;;  %v3379_v12 = vpop.f32.mrb[49].mxu1  ;;  %5916 = vmatprep.subr.bf16.mxu0 %v13014_v37  ;;  %6302 = vmatprep.subr.bf16.mxu1 %v13017_v2 }
 0x403   : > { %20043 = vst [vmem:[#allocation92_spill] sm:$0xff] %v16339_v41  ;;  %20044 = vst [vmem:[#allocation87_spill] sm:$0xff] %v16350_v36  ;;  %v11739_v57 = vadd.f32 %v2993_v60, %v15663_v1  ;;  %v11803_v42 = vadd.f32 %v3379_v12, %v15666_v30  ;;  %8799 = vrot.lane.b32.xlu1 %v15979_v27, %s13581_s4  ;;  %v2995_v39 = vpop.f32.mrb[50].mxu0  ;;  %v3381_v20 = vpop.f32.mrb[50].mxu1  ;;  %v3512_v31 = vmul.f32 0.125, %v11738_v26 }
 0x404   : > { %20045 = vst [vmem:[#allocation94_spill] sm:$0xff] %v16352_v7  ;;  %11032 = vst.msk [vmem:[%s15680_s26 + $0x25c] sm:$0xf] %vm6972_vm0, %v16339_v41  ;;  %v3514_v49 = vmul.f32 0.125, %v11802_v8  ;;  %v11740_v37 = vadd.f32 %v2995_v39, %v15655_v25  ;;  %v11804_v2 = vadd.f32 %v3381_v20, %v15658_v51  ;;  %v2997_v43 = vpop.f32.mrb[51].mxu0  ;;  %v3383_v17 = vpop.f32.mrb[51].mxu1  ;;  %7253 = vrot.lane.b32.xlu0 %v16018_v48, %s13581_s4  ;;  %5917 = vmatpush1.bf16.msra.mxu0 %v13012_v62 }
 0x405   : > { %10808 = vst.msk [vmem:[%s15680_s26 + $0x15c] sm:$0xf] %vm6972_vm0, %v16350_v36  ;;  %11256 = vst.msk [vmem:[%s15680_s26 + $0x35c] sm:$0xf] %vm6972_vm0, %v16352_v7  ;;  %v3513_v7 = vmul.f32 0.125, %v11739_v57  ;;  %v3515_v60 = vmul.f32 0.125, %v11803_v42  ;;  %v11741_v12 = vadd.f32 %v2997_v43, %v15663_v1  ;;  %v11805_v36 = vadd.f32 %v3383_v17, %v15666_v30  ;;  %6303 = vmatpush1.bf16.msra.mxu1 %v13015_v59 }
 0x406   : > { %v13020_v27 = vld [vmem:[#allocation10 + $0x164] ss:$16 sps:$4 sm:$0xff]   ;;  %v13023_v26 = vld [vmem:[#allocation10 + $0x16c] ss:$16 sps:$4 sm:$0xff]   ;;  %v16378_v8 = vpack.c.bf16 %v3512_v31, %v3512_v31  ;;  %v16380_v39 = vpack.c.bf16 %v3514_v49, %v3514_v49  ;;  %v3516_v20 = vmul.f32 0.125, %v11740_v37  ;;  %v3518_v41 = vmul.f32 0.125, %v11804_v2  ;;  %4630 = vmatmul.mubr.bf16.gmra.mrb[92].mxu0 %v15274_v15  ;;  %5016 = vmatmul.mubr.bf16.gmra.mrb[92].mxu1 %v15274_v15 }
 0x407   : > { %v13018_v48 = vld [vmem:[#allocation10 + $0x160] ss:$16 sps:$4 sm:$0xff]   ;;  %v13021_v43 = vld [vmem:[#allocation10 + $0x168] ss:$16 sps:$4 sm:$0xff]   ;;  %v16384_v17 = vpack.c.bf16 %v3513_v7, %v3513_v7  ;;  %v16386_v62 = vpack.c.bf16 %v3515_v60, %v3515_v60  ;;  %v3517_v59 = vmul.f32 0.125, %v11741_v12  ;;  %v3519_v57 = vmul.f32 0.125, %v11805_v36  ;;  %8025 = vrot.lane.b32.xlu1 %v15990_v38, %s13581_s4  ;;  %4639 = vmatprep.mubr.bf16.mxu0 %v15289_v55 }
 0x408   : > { %v13026_v42 = vld [vmem:[#allocation10 + $0x184] ss:$16 sps:$4 sm:$0xff]   ;;  %6997 = vst.msk [vmem:[%s15680_s26 + $0x60] sm:$0xf] %vm6972_vm0, %v16378_v8  ;;  %11033 = vst.msk [vmem:[%s15680_s26 + $0x260] sm:$0xf] %vm6972_vm0, %v16380_v39  ;;  %v16397_v7 = vpack.c.bf16 %v3516_v20, %v3516_v20  ;;  %v16399_v31 = vpack.c.bf16 %v3518_v41, %v3518_v41  ;;  %5025 = vmatprep.mubr.bf16.mxu1 %v15289_v55  ;;  %8801 = vrot.lane.b32.xlu0 %v16020_v58, %s13581_s4 }
 0x409   : > { %v13029_v38 = vld [vmem:[#allocation10 + $0x18c] ss:$16 sps:$4 sm:$0xff]   ;;  %10809 = vst.msk [vmem:[%s15680_s26 + $0x160] sm:$0xf] %vm6972_vm0, %v16384_v17  ;;  %11257 = vst.msk [vmem:[%s15680_s26 + $0x360] sm:$0xf] %vm6972_vm0, %v16386_v62  ;;  %v16410_v36 = vpack.c.bf16 %v3517_v59, %v3517_v59  ;;  %v16412_v49 = vpack.c.bf16 %v3519_v57, %v3519_v57  ;;  %5918 = vmatprep.subr.bf16.mxu0 %v13020_v27  ;;  %6304 = vmatprep.subr.bf16.mxu1 %v13023_v26 }
 0x40a   : > { %v3001_v41 = vpop.f32.mrb[52].mxu0  ;;  %v3387_v37 = vpop.f32.mrb[52].mxu1  ;;  %6998 = vst.msk [vmem:[%s15680_s26 + $0x64] sm:$0xf] %vm6972_vm0, %v16397_v7  ;;  %11034 = vst.msk [vmem:[%s15680_s26 + $0x264] sm:$0xf] %vm6972_vm0, %v16399_v31  ;;  %5919 = vmatpush1.bf16.msra.mxu0 %v13018_v48  ;;  %6305 = vmatpush1.bf16.msra.mxu1 %v13021_v43 }
 0x40b   : > { %20046 = vst [vmem:[#allocation96_spill] sm:$0xff] %v16410_v36  ;;  %20047 = vst [vmem:[#allocation95_spill] sm:$0xff] %v16412_v49  ;;  %v11742_v58 = vadd.f32 %v3001_v41, %v15655_v25  ;;  %v11806_v2 = vadd.f32 %v3387_v37, %v15658_v51  ;;  %v3003_v60 = vpop.f32.mrb[53].mxu0  ;;  %v3389_v12 = vpop.f32.mrb[53].mxu1  ;;  %9573 = vrot.lane.b32.xlu1 %v15992_v32, %s13581_s4  ;;  %5920 = vmatprep.subr.bf16.mxu0 %v13026_v42  ;;  %v13027_v42 = vld [vmem:[#allocation10 + $0x188] ss:$16 sps:$4 sm:$0xff]  }
 0x40c   : > { %10810 = vst.msk [vmem:[%s15680_s26 + $0x164] sm:$0xf] %vm6972_vm0, %v16410_v36  ;;  %11258 = vst.msk [vmem:[%s15680_s26 + $0x364] sm:$0xf] %vm6972_vm0, %v16412_v49  ;;  %v11743_v27 = vadd.f32 %v3003_v60, %v15663_v1  ;;  %v11807_v26 = vadd.f32 %v3389_v12, %v15666_v30  ;;  %v3005_v20 = vpop.f32.mrb[54].mxu0  ;;  %v3391_v59 = vpop.f32.mrb[54].mxu1  ;;  %8027 = vrot.lane.b32.xlu0 %v16024_v35, %s13581_s4  ;;  %6306 = vmatprep.subr.bf16.mxu1 %v13029_v38 }
 0x40d   : > { %v3520_v57 = vmul.f32 0.125, %v11742_v58  ;;  %v3522_v41 = vmul.f32 0.125, %v11806_v2  ;;  %v11744_v48 = vadd.f32 %v3005_v20, %v15655_v25  ;;  %v11808_v43 = vadd.f32 %v3391_v59, %v15658_v51  ;;  %v3007_v37 = vpop.f32.mrb[55].mxu0  ;;  %v3393_v55 = vpop.f32.mrb[55].mxu1  ;;  %v13024_v49 = vld [vmem:[#allocation10 + $0x180] ss:$16 sps:$4 sm:$0xff]  }
 0x40e   : > { %v3521_v60 = vmul.f32 0.125, %v11743_v27  ;;  %v3523_v12 = vmul.f32 0.125, %v11807_v26  ;;  %v11745_v15 = vadd.f32 %v3007_v37, %v15663_v1  ;;  %v11809_v32 = vadd.f32 %v3393_v55, %v15666_v30  ;;  %v20048_v36 = vld [vmem:[#allocation36_spill] sm:$0xff]  ;;  %v13035_v38 = vld [vmem:[#allocation10 + $0x1ac] ss:$16 sps:$4 sm:$0xff]   ;;  %5921 = vmatpush1.bf16.msra.mxu0 %v13024_v49  ;;  %6307 = vmatpush1.bf16.msra.mxu1 %v13027_v42 }
 0x40f   : > { %v16438_v58 = vpack.c.bf16 %v3520_v57, %v3520_v57  ;;  %v16440_v2 = vpack.c.bf16 %v3522_v41, %v3522_v41  ;;  %v3524_v20 = vmul.f32 0.125, %v11744_v48  ;;  %v3526_v59 = vmul.f32 0.125, %v11808_v43  ;;  %4640 = vmatmul.mubr.bf16.gmra.mrb[96].mxu0 %v20048_v36  ;;  %5026 = vmatmul.mubr.bf16.gmra.mrb[96].mxu1 %v20048_v36  ;;  %v13032_v35 = vld [vmem:[#allocation10 + $0x1a4] ss:$16 sps:$4 sm:$0xff]   ;;  %v20050_v57 = vld [vmem:[#allocation41_spill] sm:$0xff] }
 0x410   : > { %v16444_v27 = vpack.c.bf16 %v3521_v60, %v3521_v60  ;;  %v16446_v55 = vpack.c.bf16 %v3523_v12, %v3523_v12  ;;  %v3525_v26 = vmul.f32 0.125, %v11745_v15  ;;  %v3527_v37 = vmul.f32 0.125, %v11809_v32  ;;  %7255 = vrot.lane.b32.xlu1 %v16037_v13, %s13581_s4  ;;  %4649 = vmatprep.mubr.bf16.mxu0 %v20050_v57  ;;  %v3011_v43 = vpop.f32.mrb[56].mxu0  ;;  %v3397_v60 = vpop.f32.mrb[56].mxu1  ;;  %v13030_v12 = vld [vmem:[#allocation10 + $0x1a0] ss:$16 sps:$4 sm:$0xff]  }
 0x411   : > { %6999 = vst.msk [vmem:[%s15680_s26 + $0x68] sm:$0xf] %vm6972_vm0, %v16438_v58  ;;  %11035 = vst.msk [vmem:[%s15680_s26 + $0x268] sm:$0xf] %vm6972_vm0, %v16440_v2  ;;  %v16457_v41 = vpack.c.bf16 %v3524_v20, %v3524_v20  ;;  %v16459_v48 = vpack.c.bf16 %v3526_v59, %v3526_v59  ;;  %5035 = vmatprep.mubr.bf16.mxu1 %v20050_v57  ;;  %9575 = vrot.lane.b32.xlu0 %v16026_v4, %s13581_s4  ;;  %v13033_v32 = vld [vmem:[#allocation10 + $0x1a8] ss:$16 sps:$4 sm:$0xff]  }
 0x412   : > { %20049 = vst [vmem:[#allocation100_spill] sm:$0xff] %v16446_v55  ;;  %10811 = vst.msk [vmem:[%s15680_s26 + $0x168] sm:$0xf] %vm6972_vm0, %v16444_v27  ;;  %v16470_v15 = vpack.c.bf16 %v3525_v26, %v3525_v26  ;;  %v16472_v13 = vpack.c.bf16 %v3527_v37, %v3527_v37  ;;  %v11746_v4 = vadd.f32 %v3011_v43, %v15655_v25  ;;  %v3013_v59 = vpop.f32.mrb[57].mxu0  ;;  %v3399_v26 = vpop.f32.mrb[57].mxu1  ;;  %5922 = vmatprep.subr.bf16.mxu0 %v13032_v35 }
 0x413   : > { %20051 = vst [vmem:[#allocation98_spill] sm:$0xff] %v16457_v41  ;;  %20052 = vst [vmem:[#allocation103_spill] sm:$0xff] %v16459_v48  ;;  %v11810_v20 = vadd.f32 %v3397_v60, %v15658_v51  ;;  %6308 = vmatprep.subr.bf16.mxu1 %v13035_v38  ;;  %v11747_v49 = vadd.f32 %v3013_v59, %v15663_v1  ;;  %v11811_v42 = vadd.f32 %v3399_v26, %v15666_v30  ;;  %v3015_v37 = vpop.f32.mrb[58].mxu0  ;;  %v3401_v43 = vpop.f32.mrb[58].mxu1 }
 0x414   : > { %11259 = vst.msk [vmem:[%s15680_s26 + $0x368] sm:$0xf] %vm6972_vm0, %v16446_v55  ;;  %20053 = vst [vmem:[#allocation101_spill] sm:$0xff] %v16470_v15  ;;  %8803 = vrot.lane.b32.xlu1 %v16039_v6, %s13581_s4  ;;  %v3528_v60 = vmul.f32 0.125, %v11746_v4  ;;  %v11748_v35 = vadd.f32 %v3015_v37, %v15655_v25  ;;  %v11812_v38 = vadd.f32 %v3401_v43, %v15658_v51  ;;  %v3017_v36 = vpop.f32.mrb[59].mxu0  ;;  %5923 = vmatpush1.bf16.msra.mxu0 %v13030_v12 }
 0x415   : > { %20054 = vst [vmem:[#allocation105_spill] sm:$0xff] %v16472_v13  ;;  %7000 = vst.msk [vmem:[%s15680_s26 + $0x6c] sm:$0xf] %vm6972_vm0, %v16457_v41  ;;  %v3530_v57 = vmul.f32 0.125, %v11810_v20  ;;  %7257 = vrot.lane.b32.xlu0 %v16078_v19, %s13581_s4  ;;  %v3531_v59 = vmul.f32 0.125, %v11811_v42  ;;  %v11749_v26 = vadd.f32 %v3017_v36, %v15663_v1  ;;  %6309 = vmatpush1.bf16.msra.mxu1 %v13033_v32  ;;  %v20055_v41 = vld [vmem:[#allocation39_spill] sm:$0xff] }
 0x416   : > { %11036 = vst.msk [vmem:[%s15680_s26 + $0x26c] sm:$0xf] %vm6972_vm0, %v16459_v48  ;;  %10812 = vst.msk [vmem:[%s15680_s26 + $0x16c] sm:$0xf] %vm6972_vm0, %v16470_v15  ;;  %v3403_v15 = vpop.f32.mrb[59].mxu1  ;;  %v16498_v20 = vpack.c.bf16 %v3528_v60, %v3528_v60  ;;  %v3532_v43 = vmul.f32 0.125, %v11748_v35 }
 0x417   : > { %11260 = vst.msk [vmem:[%s15680_s26 + $0x36c] sm:$0xf] %vm6972_vm0, %v16472_v13  ;;  %v3529_v13 = vmul.f32 0.125, %v11747_v49  ;;  %v11813_v48 = vadd.f32 %v3403_v15, %v15666_v30  ;;  %v13038_v6 = vld [vmem:[#allocation10 + $0x1c4] ss:$16 sps:$4 sm:$0xff]   ;;  %v16500_v37 = vpack.c.bf16 %v3530_v57, %v3530_v57  ;;  %v3534_v55 = vmul.f32 0.125, %v11812_v38  ;;  %4650 = vmatmul.mubr.bf16.gmra.mrb[100].mxu0 %v20055_v41  ;;  %5036 = vmatmul.mubr.bf16.gmra.mrb[100].mxu1 %v20055_v41 }
 0x418   : > { %v13041_v4 = vld [vmem:[#allocation10 + $0x1cc] ss:$16 sps:$4 sm:$0xff]   ;;  %v13036_v19 = vld [vmem:[#allocation10 + $0x1c0] ss:$16 sps:$4 sm:$0xff]   ;;  %v13039_v36 = vld [vmem:[#allocation10 + $0x1c8] ss:$16 sps:$4 sm:$0xff]   ;;  %v16506_v12 = vpack.c.bf16 %v3531_v59, %v3531_v59  ;;  %8029 = vrot.lane.b32.xlu1 %v16050_v40, %s13581_s4  ;;  %5924 = vmatprep.subr.bf16.mxu0 %v13038_v6 }
 0x419   : > { %v16504_v15 = vpack.c.bf16 %v3529_v13, %v3529_v13  ;;  %v3533_v32 = vmul.f32 0.125, %v11749_v26  ;;  %v3535_v49 = vmul.f32 0.125, %v11813_v48  ;;  %v20056_v57 = vld [vmem:[#allocation40_spill] sm:$0xff]  ;;  %7001 = vst.msk [vmem:[%s15680_s26 + $0x70] sm:$0xf] %vm6972_vm0, %v16498_v20  ;;  %v16517_v13 = vpack.c.bf16 %v3532_v43, %v3532_v43  ;;  %8805 = vrot.lane.b32.xlu0 %v16080_v10, %s13581_s4  ;;  %v3407_v38 = vpop.f32.mrb[60].mxu1  ;;  %6310 = vmatprep.subr.bf16.mxu1 %v13041_v4 }
 0x41a   : > { %4659 = vmatprep.mubr.bf16.mxu0 %v20056_v57  ;;  %v13044_v42 = vld [vmem:[#allocation10 + $0x1e4] ss:$16 sps:$4 sm:$0xff]   ;;  %11037 = vst.msk [vmem:[%s15680_s26 + $0x270] sm:$0xf] %vm6972_vm0, %v16500_v37  ;;  %v16519_v60 = vpack.c.bf16 %v3534_v55, %v3534_v55  ;;  %5045 = vmatprep.mubr.bf16.mxu1 %v20056_v57  ;;  %v13047_v40 = vld [vmem:[#allocation10 + $0x1ec] ss:$16 sps:$4 sm:$0xff]   ;;  %v11814_v59 = vadd.f32 %v3407_v38, %v15658_v51 }
 0x41b   : > { %10813 = vst.msk [vmem:[%s15680_s26 + $0x170] sm:$0xf] %vm6972_vm0, %v16504_v15  ;;  %11261 = vst.msk [vmem:[%s15680_s26 + $0x370] sm:$0xf] %vm6972_vm0, %v16506_v12  ;;  %v16530_v48 = vpack.c.bf16 %v3533_v32, %v3533_v32  ;;  %v16532_v35 = vpack.c.bf16 %v3535_v49, %v3535_v49  ;;  %v3021_v55 = vpop.f32.mrb[60].mxu0  ;;  %v3409_v43 = vpop.f32.mrb[61].mxu1  ;;  %5925 = vmatpush1.bf16.msra.mxu0 %v13036_v19  ;;  %6311 = vmatpush1.bf16.msra.mxu1 %v13039_v36 }
 0x41c   : > { %7002 = vst.msk [vmem:[%s15680_s26 + $0x74] sm:$0xf] %vm6972_vm0, %v16517_v13  ;;  %11038 = vst.msk [vmem:[%s15680_s26 + $0x274] sm:$0xf] %vm6972_vm0, %v16519_v60  ;;  %v11750_v10 = vadd.f32 %v3021_v55, %v15655_v25  ;;  %v3023_v26 = vpop.f32.mrb[61].mxu0  ;;  %v11815_v4 = vadd.f32 %v3409_v43, %v15666_v30  ;;  %v20059_v32 = vld [vmem:[#allocation80_spill] sm:$0xff]  ;;  %v7230_v49 = vpop.permute.xlu0 %7229  ;;  %5926 = vmatprep.subr.bf16.mxu0 %v13044_v42  ;;  %6312 = vmatprep.subr.bf16.mxu1 %v13047_v40 }
 0x41d   : > { %20057 = vst [vmem:[#allocation108_spill] sm:$0xff] %v16530_v48  ;;  %20058 = vst [vmem:[#allocation107_spill] sm:$0xff] %v16532_v35  ;;  %v11751_v6 = vadd.f32 %v3023_v26, %v15663_v1  ;;  %9577 = vrot.lane.b32.xlu1 %v20059_v32, %s13581_s4  ;;  %v3025_v55 = vpop.f32.mrb[62].mxu0  ;;  %v3538_v57 = vmul.f32 0.125, %v11814_v59  ;;  %v3411_v36 = vpop.f32.mrb[62].mxu1  ;;  %8031 = vrot.lane.b32.xlu0 %v16084_v47, %s13581_s4  ;;  %v20060_v40 = vld [vmem:[#allocation38_spill] sm:$0xff] }
 0x41e   : > { %10814 = vst.msk [vmem:[%s15680_s26 + $0x174] sm:$0xf] %vm6972_vm0, %v16530_v48  ;;  %11262 = vst.msk [vmem:[%s15680_s26 + $0x374] sm:$0xf] %vm6972_vm0, %v16532_v35  ;;  %v3536_v38 = vmul.f32 0.125, %v11750_v10  ;;  %v11752_v19 = vadd.f32 %v3025_v55, %v15655_v25  ;;  %v3027_v41 = vpop.f32.mrb[63].mxu0  ;;  %v11816_v32 = vadd.f32 %v3411_v36, %v15658_v51  ;;  %v7232_v59 = vpop.permute.xlu1 %7231 }
 0x41f   : > { %10673 = vst.msk [vmem:[%s15680_s26 + $0x80] sm:$0xf] %vm6972_vm0, %v7230_v49  ;;  %v13042_v26 = vld [vmem:[#allocation10 + $0x1e0] ss:$16 sps:$4 sm:$0xff]   ;;  %v3537_v43 = vmul.f32 0.125, %v11751_v6  ;;  %v3539_v35 = vmul.f32 0.125, %v11815_v4  ;;  %v11753_v42 = vadd.f32 %v3027_v41, %v15663_v1  ;;  %v16561_v25 = vpack.c.bf16 %v3538_v57, %v3538_v57  ;;  %4660 = vmatmul.mubr.bf16.gmra.mrb[104].mxu0 %v20060_v40  ;;  %5046 = vmatmul.mubr.bf16.gmra.mrb[104].mxu1 %v20060_v40 }
 0x420   : > { %v3413_v10 = vpop.f32.mrb[63].mxu1  ;;  %v13045_v48 = vld [vmem:[#allocation10 + $0x1e8] ss:$16 sps:$4 sm:$0xff]   ;;  %v16559_v49 = vpack.c.bf16 %v3536_v38, %v3536_v38  ;;  %v3540_v55 = vmul.f32 0.125, %v11752_v19  ;;  %10674 = vst.msk [vmem:[%s15680_s26 + $0x84] sm:$0xf] %vm6972_vm0, %v7232_v59  ;;  %5927 = vmatpush1.bf16.msra.mxu0 %v13042_v26 }
 0x421   : > { %v11817_v47 = vadd.f32 %v3413_v10, %v15666_v30  ;;  %v13050_v51 = vld [vmem:[#allocation10 + $0x204] ss:$16 sps:$4 sm:$0xff]   ;;  %v13053_v1 = vld [vmem:[#allocation10 + $0x20c] ss:$16 sps:$4 sm:$0xff]   ;;  %v16568_v41 = vpack.c.bf16 %v3537_v43, %v3537_v43  ;;  %v16570_v6 = vpack.c.bf16 %v3539_v35, %v3539_v35  ;;  %v3542_v57 = vmul.f32 0.125, %v11816_v32  ;;  %7259 = vrot.lane.b32.xlu1 %v16097_v61, %s13581_s4  ;;  %v8778_v30 = vpop.permute.xlu0 %8777  ;;  %9579 = vrot.lane.b32.xlu0 %v16086_v23, %s13581_s4 }
 0x422   : > { %v3541_v4 = vmul.f32 0.125, %v11753_v42  ;;  %v20061_v38 = vld [vmem:[#allocation44_spill] sm:$0xff]  ;;  %7003 = vst.msk [vmem:[%s15680_s26 + $0x78] sm:$0xf] %vm6972_vm0, %v16559_v49  ;;  %11039 = vst.msk [vmem:[%s15680_s26 + $0x278] sm:$0xf] %vm6972_vm0, %v16561_v25  ;;  %v16581_v19 = vpack.c.bf16 %v3540_v55, %v3540_v55  ;;  %v8780_v43 = vpop.permute.xlu1 %8779  ;;  %6313 = vmatpush1.bf16.msra.mxu1 %v13045_v48  ;;  %6089 = vmatprep.subr.bf16.mxu0 %v13050_v51 }
 0x423   : > { %4669 = vmatprep.mubr.bf16.mxu0 %v20061_v38  ;;  %v3543_v35 = vmul.f32 0.125, %v11817_v47  ;;  %11121 = vst.msk [vmem:[%s15680_s26 + $0x280] sm:$0xf] %vm6972_vm0, %v8778_v30  ;;  %5055 = vmatprep.mubr.bf16.mxu1 %v20061_v38  ;;  %10815 = vst.msk [vmem:[%s15680_s26 + $0x178] sm:$0xf] %vm6972_vm0, %v16568_v41  ;;  %v16594_v61 = vpack.c.bf16 %v3542_v57, %v3542_v57  ;;  %v20062_v32 = vld [vmem:[#allocation79_spill] sm:$0xff] }
 0x424   : > { %11263 = vst.msk [vmem:[%s15680_s26 + $0x378] sm:$0xf] %vm6972_vm0, %v16570_v6  ;;  %v16596_v36 = vpack.c.bf16 %v3541_v4, %v3541_v4  ;;  %7004 = vst.msk [vmem:[%s15680_s26 + $0x7c] sm:$0xf] %vm6972_vm0, %v16581_v19  ;;  %6475 = vmatprep.subr.bf16.mxu1 %v13053_v1  ;;  %v20063_v42 = vld [vmem:[#allocation42_spill] sm:$0xff]  ;;  %v20064_v10 = vld [vmem:[#allocation83_spill] sm:$0xff] }
 0x425   : > { %v16601_v23 = vpack.c.bf16 %v3543_v35, %v3543_v35  ;;  %11122 = vst.msk [vmem:[%s15680_s26 + $0x284] sm:$0xf] %vm6972_vm0, %v8780_v43  ;;  %11040 = vst.msk [vmem:[%s15680_s26 + $0x27c] sm:$0xf] %vm6972_vm0, %v16594_v61  ;;  %8807 = vrot.lane.b32.xlu1 %v20062_v32, %s13581_s4  ;;  %v8004_v48 = vpop.permute.xlu0 %8003  ;;  %7261 = vrot.lane.b32.xlu0 %v16138_v28, %s13581_s4  ;;  %v20065_v55 = vld [vmem:[#allocation48_spill] sm:$0xff]  ;;  %v20066_v47 = vld [vmem:[#allocation82_spill] sm:$0xff] }
 0x426   : > { %10816 = vst.msk [vmem:[%s15680_s26 + $0x17c] sm:$0xf] %vm6972_vm0, %v16596_v36  ;;  %10897 = vst.msk [vmem:[%s15680_s26 + $0x180] sm:$0xf] %vm6972_vm0, %v8004_v48  ;;  %v8006_v26 = vpop.permute.xlu1 %8005  ;;  %v20067_v57 = vld [vmem:[#allocation46_spill] sm:$0xff]  ;;  %v20068_v4 = vld [vmem:[#allocation56_spill] sm:$0xff] }
 0x427   : > { %11264 = vst.msk [vmem:[%s15680_s26 + $0x37c] sm:$0xf] %vm6972_vm0, %v16601_v23  ;;  %10898 = vst.msk [vmem:[%s15680_s26 + $0x184] sm:$0xf] %vm6972_vm0, %v8006_v26  ;;  %4670 = vmatmul.mubr.bf16.gmra.mrb[108].mxu0 %v20063_v42  ;;  %5056 = vmatmul.mubr.bf16.gmra.mrb[108].mxu1 %v20063_v42  ;;  %v20069_v35 = vld [vmem:[#allocation52_spill] sm:$0xff]  ;;  %v20071_v43 = vld [vmem:[#allocation86_spill] sm:$0xff] }
 0x428   : > { %4679 = vmatprep.mubr.bf16.mxu0 %v20065_v55  ;;  %5065 = vmatprep.mubr.bf16.mxu1 %v20065_v55  ;;  %v20072_v48 = vld [vmem:[#allocation60_spill] sm:$0xff] }
 0x429   : > { %8033 = vrot.lane.b32.xlu1 %v20064_v10, %s13581_s4  ;;  %v9552_v59 = vpop.permute.xlu0 %9551  ;;  %8809 = vrot.lane.b32.xlu0 %v16140_v29, %s13581_s4  ;;  %v20073_v26 = vld [vmem:[#allocation72_spill] sm:$0xff]  ;;  %v20074_v10 = vld [vmem:[#allocation85_spill] sm:$0xff] }
 0x42a   : > { %11345 = vst.msk [vmem:[%s15680_s26 + $0x380] sm:$0xf] %vm6972_vm0, %v9552_v59  ;;  %v9554_v28 = vpop.permute.xlu1 %9553 }
 0x42b   : > { %11346 = vst.msk [vmem:[%s15680_s26 + $0x384] sm:$0xf] %vm6972_vm0, %v9554_v28  ;;  %v20075_v28 = vld [vmem:[#allocation68_spill] sm:$0xff] }
 0x42d   : > { %9581 = vrot.lane.b32.xlu1 %v20066_v47, %s13581_s4  ;;  %v8782_v51 = vpop.permute.xlu0 %8781  ;;  %8035 = vrot.lane.b32.xlu0 %v16144_v24, %s13581_s4 }
 0x42e   : > { %11123 = vst.msk [vmem:[%s15680_s26 + $0x288] sm:$0xf] %vm6972_vm0, %v8782_v51  ;;  %v7234_v1 = vpop.permute.xlu1 %7233  ;;  %v20077_v51 = vld [vmem:[#allocation97_spill] sm:$0xff] }
 0x42f   : > { %10675 = vst.msk [vmem:[%s15680_s26 + $0x88] sm:$0xf] %vm6972_vm0, %v7234_v1  ;;  %4680 = vmatmul.mubr.bf16.gmra.mrb[112].mxu0 %v20067_v57  ;;  %5066 = vmatmul.mubr.bf16.gmra.mrb[112].mxu1 %v20067_v57  ;;  %v20078_v1 = vld [vmem:[#allocation91_spill] sm:$0xff] }
 0x430   : > { %4689 = vmatprep.mubr.bf16.mxu0 %v20068_v4  ;;  %5075 = vmatprep.mubr.bf16.mxu1 %v20068_v4 }
 0x431   : > { %7263 = vrot.lane.b32.xlu1 %v16157_v63, %s13581_s4  ;;  %v8008_v29 = vpop.permute.xlu0 %8007  ;;  %9583 = vrot.lane.b32.xlu0 %v16146_v11, %s13581_s4 }
 0x432   : > { %10899 = vst.msk [vmem:[%s15680_s26 + $0x188] sm:$0xf] %vm6972_vm0, %v8008_v29  ;;  %v7236_v24 = vpop.permute.xlu1 %7235 }
 0x433   : > { %10676 = vst.msk [vmem:[%s15680_s26 + $0x8c] sm:$0xf] %vm6972_vm0, %v7236_v24 }
 0x435   : > { %8811 = vrot.lane.b32.xlu1 %v16159_v44, %s13581_s4  ;;  %v9556_v30 = vpop.permute.xlu0 %9555  ;;  %7265 = vrot.lane.b32.xlu0 %v16198_v18, %s13581_s4  ;;  %v20070_v44 = vld [vmem:[#allocation64_spill] sm:$0xff] }
 0x436   : > { %11347 = vst.msk [vmem:[%s15680_s26 + $0x388] sm:$0xf] %vm6972_vm0, %v9556_v30  ;;  %v8784_v63 = vpop.permute.xlu1 %8783  ;;  %v13048_v30 = vld [vmem:[#allocation10 + $0x200] ss:$16 sps:$4 sm:$0xff]  }
 0x437   : > { %11124 = vst.msk [vmem:[%s15680_s26 + $0x28c] sm:$0xf] %vm6972_vm0, %v8784_v63  ;;  %4690 = vmatmul.mubr.bf16.gmra.mrb[116].mxu0 %v20069_v35  ;;  %5076 = vmatmul.mubr.bf16.gmra.mrb[116].mxu1 %v20069_v35  ;;  %v13051_v63 = vld [vmem:[#allocation10 + $0x208] ss:$16 sps:$4 sm:$0xff]  }
 0x438   : > { %4699 = vmatprep.mubr.bf16.mxu0 %v20070_v44  ;;  %5085 = vmatprep.mubr.bf16.mxu1 %v20070_v44 }
 0x439   : > { %8037 = vrot.lane.b32.xlu1 %v16170_v50, %s13581_s4  ;;  %v7238_v11 = vpop.permute.xlu0 %7237  ;;  %8813 = vrot.lane.b32.xlu0 %v16200_v14, %s13581_s4 }
 0x43a   : > { %10677 = vst.msk [vmem:[%s15680_s26 + $0x90] sm:$0xf] %vm6972_vm0, %v7238_v11  ;;  %v8010_v18 = vpop.permute.xlu1 %8009  ;;  %v20079_v11 = vld [vmem:[#allocation104_spill] sm:$0xff] }
 0x43b   : > { %10900 = vst.msk [vmem:[%s15680_s26 + $0x18c] sm:$0xf] %vm6972_vm0, %v8010_v18  ;;  %v13059_v18 = vld [vmem:[#allocation10 + $0x22c] ss:$16 sps:$4 sm:$0xff]  }
 0x43d   : > { %9585 = vrot.lane.b32.xlu1 %v20071_v43, %s13581_s4  ;;  %v8786_v32 = vpop.permute.xlu0 %8785  ;;  %8039 = vrot.lane.b32.xlu0 %v16204_v53, %s13581_s4 }
 0x43e   : > { %11125 = vst.msk [vmem:[%s15680_s26 + $0x290] sm:$0xf] %vm6972_vm0, %v8786_v32  ;;  %v9558_v50 = vpop.permute.xlu1 %9557  ;;  %v20080_v32 = vld [vmem:[#allocation106_spill] sm:$0xff] }
 0x43f   : > { %11348 = vst.msk [vmem:[%s15680_s26 + $0x38c] sm:$0xf] %vm6972_vm0, %v9558_v50  ;;  %4700 = vmatmul.mubr.bf16.gmra.mrb[120].mxu0 %v20072_v48  ;;  %5086 = vmatmul.mubr.bf16.gmra.mrb[120].mxu1 %v20072_v48  ;;  %v13054_v50 = vld [vmem:[#allocation10 + $0x220] ss:$16 sps:$4 sm:$0xff]  }
 0x440   : > { %4709 = vmatprep.mubr.bf16.mxu0 %v20073_v26  ;;  %5095 = vmatprep.mubr.bf16.mxu1 %v20073_v26 }
 0x441   : > { %7267 = vrot.lane.b32.xlu1 %v16217_v3, %s13581_s4  ;;  %v8012_v14 = vpop.permute.xlu0 %8011  ;;  %9587 = vrot.lane.b32.xlu0 %v16206_v54, %s13581_s4  ;;  %v20076_v54 = vld [vmem:[#allocation88_spill] sm:$0xff] }
 0x442   : > { %10901 = vst.msk [vmem:[%s15680_s26 + $0x190] sm:$0xf] %vm6972_vm0, %v8012_v14  ;;  %v7240_v53 = vpop.permute.xlu1 %7239  ;;  %v13057_v14 = vld [vmem:[#allocation10 + $0x228] ss:$16 sps:$4 sm:$0xff]  }
 0x443   : > { %10678 = vst.msk [vmem:[%s15680_s26 + $0x94] sm:$0xf] %vm6972_vm0, %v7240_v53  ;;  %v13062_v53 = vld [vmem:[#allocation10 + $0x244] ss:$16 sps:$4 sm:$0xff]  }
 0x445   : > { %8815 = vrot.lane.b32.xlu1 %v20074_v10, %s13581_s4  ;;  %v9560_v59 = vpop.permute.xlu0 %9559  ;;  %7269 = vrot.lane.b32.xlu0 %v16258_v22, %s13581_s4  ;;  %v13065_v10 = vld [vmem:[#allocation10 + $0x24c] ss:$16 sps:$4 sm:$0xff]  }
 0x446   : > { %11349 = vst.msk [vmem:[%s15680_s26 + $0x390] sm:$0xf] %vm6972_vm0, %v9560_v59  ;;  %v8788_v3 = vpop.permute.xlu1 %8787  ;;  %v20081_v59 = vld [vmem:[#allocation111_spill] sm:$0xff] }
 0x447   : > { %11126 = vst.msk [vmem:[%s15680_s26 + $0x294] sm:$0xf] %vm6972_vm0, %v8788_v3  ;;  %4710 = vmatmul.mubr.bf16.gmra.mrb[124].mxu0 %v20075_v28  ;;  %5096 = vmatmul.mubr.bf16.gmra.mrb[124].mxu1 %v20075_v28  ;;  %v13063_v3 = vld [vmem:[#allocation10 + $0x248] ss:$16 sps:$4 sm:$0xff]  }
 0x448   : > { %5928 = vmatprep.mubr.bf16.mxu0 %v20077_v51  ;;  %6314 = vmatprep.mubr.bf16.mxu1 %v20077_v51  ;;  %v13071_v51 = vld [vmem:[#allocation10 + $0x26c] ss:$16 sps:$4 sm:$0xff]  }
 0x449   : > { %8041 = vrot.lane.b32.xlu1 %v20076_v54, %s13581_s4  ;;  %v7242_v47 = vpop.permute.xlu0 %7241  ;;  %8817 = vrot.lane.b32.xlu0 %v16260_v33, %s13581_s4  ;;  %v13056_v33 = vld [vmem:[#allocation10 + $0x224] ss:$16 sps:$4 sm:$0xff]  }
 0x44a   : > { %10679 = vst.msk [vmem:[%s15680_s26 + $0x98] sm:$0xf] %vm6972_vm0, %v7242_v47  ;;  %v8014_v22 = vpop.permute.xlu1 %8013  ;;  %v20082_v47 = vld [vmem:[#allocation114_spill] sm:$0xff] }
 0x44b   : > { %10902 = vst.msk [vmem:[%s15680_s26 + $0x194] sm:$0xf] %vm6972_vm0, %v8014_v22 }
 0x44d   : > { %9589 = vrot.lane.b32.xlu1 %v20078_v1, %s13581_s4  ;;  %v8790_v29 = vpop.permute.xlu0 %8789  ;;  %8043 = vrot.lane.b32.xlu0 %v16264_v46, %s13581_s4 }
 0x44e   : > { %11127 = vst.msk [vmem:[%s15680_s26 + $0x298] sm:$0xf] %vm6972_vm0, %v8790_v29  ;;  %v9562_v24 = vpop.permute.xlu1 %9561  ;;  %v13066_v29 = vld [vmem:[#allocation10 + $0x260] ss:$16 sps:$4 sm:$0xff]  }
 0x44f   : > { %11350 = vst.msk [vmem:[%s15680_s26 + $0x394] sm:$0xf] %vm6972_vm0, %v9562_v24  ;;  %5929 = vmatmul.mubr.bf16.vlgmr.msra.gmra.mrb[128].mxu0 %v20079_v11  ;;  %6315 = vmatmul.mubr.bf16.vlgmr.msra.gmra.mrb[128].mxu1 %v20079_v11  ;;  %v13069_v24 = vld [vmem:[#allocation10 + $0x268] ss:$16 sps:$4 sm:$0xff]   ;;  %v13077_v11 = vld [vmem:[#allocation10 + $0x28c] ss:$16 sps:$4 sm:$0xff]  }
 0x450   : > { %5938 = vmatprep.mubr.bf16.mxu0 %v20080_v32  ;;  %6324 = vmatprep.mubr.bf16.mxu1 %v20080_v32  ;;  %v13075_v32 = vld [vmem:[#allocation10 + $0x288] ss:$16 sps:$4 sm:$0xff]  }
 0x451   : > { %7271 = vrot.lane.b32.xlu1 %v16277_v56, %s13581_s4  ;;  %v8016_v43 = vpop.permute.xlu0 %8015  ;;  %9591 = vrot.lane.b32.xlu0 %v16266_v34, %s13581_s4 }
 0x452   : > { %10903 = vst.msk [vmem:[%s15680_s26 + $0x198] sm:$0xf] %vm6972_vm0, %v8016_v43  ;;  %v7244_v46 = vpop.permute.xlu1 %7243  ;;  %6090 = vmatpush1.bf16.msra.mxu0 %v13048_v30  ;;  %6476 = vmatpush1.bf16.msra.mxu1 %v13051_v63  ;;  %v20084_v30 = vld [vmem:[#allocation117_spill] sm:$0xff]  ;;  %v13074_v63 = vld [vmem:[#allocation10 + $0x284] ss:$16 sps:$4 sm:$0xff]  }
 0x453   : > { %10680 = vst.msk [vmem:[%s15680_s26 + $0x9c] sm:$0xf] %vm6972_vm0, %v7244_v46  ;;  %6091 = vmatprep.subr.bf16.mxu0 %v13056_v33  ;;  %6477 = vmatprep.subr.bf16.mxu1 %v13059_v18  ;;  %v20085_v18 = vld [vmem:[#allocation118_spill] sm:$0xff] }
 0x454   : > { %v13072_v43 = vld [vmem:[#allocation10 + $0x280] ss:$16 sps:$4 sm:$0xff]  }
 0x455   : > { %8819 = vrot.lane.b32.xlu1 %v16279_v16, %s13581_s4  ;;  %v9564_v56 = vpop.permute.xlu0 %9563  ;;  %7273 = vrot.lane.b32.xlu0 %v16318_v0, %s13581_s4  ;;  %v13060_v16 = vld [vmem:[#allocation10 + $0x240] ss:$16 sps:$4 sm:$0xff]   ;;  %v13068_v0 = vld [vmem:[#allocation10 + $0x264] ss:$16 sps:$4 sm:$0xff]  }
 0x456   : > { %11351 = vst.msk [vmem:[%s15680_s26 + $0x398] sm:$0xf] %vm6972_vm0, %v9564_v56  ;;  %v8792_v34 = vpop.permute.xlu1 %8791  ;;  %6092 = vmatpush1.bf16.msra.mxu0 %v13054_v50  ;;  %6478 = vmatpush1.bf16.msra.mxu1 %v13057_v14  ;;  %v13080_v50 = vld [vmem:[#allocation10 + $0x2a4] ss:$16 sps:$4 sm:$0xff]   ;;  %v13083_v14 = vld [vmem:[#allocation10 + $0x2ac] ss:$16 sps:$4 sm:$0xff]  }
 0x457   : > { %11128 = vst.msk [vmem:[%s15680_s26 + $0x29c] sm:$0xf] %vm6972_vm0, %v8792_v34  ;;  %5939 = vmatmul.mubr.bf16.gmra.mrb[132].mxu0 %v20081_v59  ;;  %6325 = vmatmul.mubr.bf16.gmra.mrb[132].mxu1 %v20081_v59  ;;  %v20087_v56 = vld [vmem:[#allocation119_spill] sm:$0xff]  ;;  %v13078_v34 = vld [vmem:[#allocation10 + $0x2a0] ss:$16 sps:$4 sm:$0xff]  }
 0x458   : > { %5948 = vmatprep.mubr.bf16.mxu0 %v20082_v47  ;;  %6334 = vmatprep.mubr.bf16.mxu1 %v20082_v47  ;;  %v20090_v47 = vld [vmem:[#allocation94_spill] sm:$0xff] }
 0x459   : > { %8045 = vrot.lane.b32.xlu1 %v16290_v5, %s13581_s4  ;;  %v7246_v54 = vpop.permute.xlu0 %7245  ;;  %8821 = vrot.lane.b32.xlu0 %v16320_v9, %s13581_s4  ;;  %v20083_v5 = vld [vmem:[#allocation90_spill] sm:$0xff] }
 0x45a   : > { %10681 = vst.msk [vmem:[%s15680_s26 + $0xa0] sm:$0xf] %vm6972_vm0, %v7246_v54  ;;  %v8018_v22 = vpop.permute.xlu1 %8017  ;;  %6093 = vmatprep.subr.bf16.mxu0 %v13062_v53  ;;  %6479 = vmatprep.subr.bf16.mxu1 %v13065_v10  ;;  %v13081_v53 = vld [vmem:[#allocation10 + $0x2a8] ss:$16 sps:$4 sm:$0xff]  }
 0x45b   : > { %10904 = vst.msk [vmem:[%s15680_s26 + $0x19c] sm:$0xf] %vm6972_vm0, %v8018_v22  ;;  %6094 = vmatpush1.bf16.msra.mxu0 %v13060_v16  ;;  %6480 = vmatpush1.bf16.msra.mxu1 %v13063_v3  ;;  %v20088_v10 = vld [vmem:[#allocation87_spill] sm:$0xff]  ;;  %v20089_v16 = vld [vmem:[#allocation120_spill] sm:$0xff] }
 0x45c   : > { %6095 = vmatprep.subr.bf16.mxu0 %v13068_v0  ;;  %6481 = vmatprep.subr.bf16.mxu1 %v13071_v51  ;;  %v13089_v3 = vld [vmem:[#allocation10 + $0x2cc] ss:$16 sps:$4 sm:$0xff]   ;;  %v13084_v51 = vld [vmem:[#allocation10 + $0x2c0] ss:$16 sps:$4 sm:$0xff]   ;;  %v13087_v22 = vld [vmem:[#allocation10 + $0x2c8] ss:$16 sps:$4 sm:$0xff]  }
 0x45d   : > { %9593 = vrot.lane.b32.xlu1 %v20083_v5, %s13581_s4  ;;  %v8794_v1 = vpop.permute.xlu0 %8793  ;;  %8047 = vrot.lane.b32.xlu0 %v16324_v45, %s13581_s4  ;;  %v20091_v5 = vld [vmem:[#allocation121_spill] sm:$0xff] }
 0x45e   : > { %11129 = vst.msk [vmem:[%s15680_s26 + $0x2a0] sm:$0xf] %vm6972_vm0, %v8794_v1  ;;  %v9566_v9 = vpop.permute.xlu1 %9565  ;;  %v13092_v1 = vld [vmem:[#allocation10 + $0x2e4] ss:$16 sps:$4 sm:$0xff]  }
 0x45f   : > { %11352 = vst.msk [vmem:[%s15680_s26 + $0x39c] sm:$0xf] %vm6972_vm0, %v9566_v9  ;;  %5949 = vmatmul.mubr.bf16.gmra.mrb[136].mxu0 %v20084_v30  ;;  %6335 = vmatmul.mubr.bf16.gmra.mrb[136].mxu1 %v20084_v30  ;;  %v13095_v9 = vld [vmem:[#allocation10 + $0x2ec] ss:$16 sps:$4 sm:$0xff]   ;;  %v13090_v30 = vld [vmem:[#allocation10 + $0x2e0] ss:$16 sps:$4 sm:$0xff]  }
 0x460   : > { %5958 = vmatprep.mubr.bf16.mxu0 %v20085_v18  ;;  %6344 = vmatprep.mubr.bf16.mxu1 %v20085_v18  ;;  %v20093_v18 = vld [vmem:[#allocation123_spill] sm:$0xff] }
 0x461   : > { %7275 = vrot.lane.b32.xlu1 %v16337_v21, %s13581_s4  ;;  %v8020_v33 = vpop.permute.xlu0 %8019  ;;  %9595 = vrot.lane.b32.xlu0 %v16326_v52, %s13581_s4  ;;  %v20086_v21 = vld [vmem:[#allocation92_spill] sm:$0xff] }
 0x462   : > { %10905 = vst.msk [vmem:[%s15680_s26 + $0x1a0] sm:$0xf] %vm6972_vm0, %v8020_v33  ;;  %v7248_v45 = vpop.permute.xlu1 %7247  ;;  %6096 = vmatpush1.bf16.msra.mxu0 %v13066_v29  ;;  %6482 = vmatpush1.bf16.msra.mxu1 %v13069_v24  ;;  %v20092_v24 = vld [vmem:[#allocation122_spill] sm:$0xff]  ;;  %v13101_v33 = vld [vmem:[#allocation10 + $0x30c] ss:$16 sps:$4 sm:$0xff]  }
 0x463   : > { %10682 = vst.msk [vmem:[%s15680_s26 + $0xa4] sm:$0xf] %vm6972_vm0, %v7248_v45  ;;  %6097 = vmatprep.subr.bf16.mxu0 %v13074_v63  ;;  %6483 = vmatprep.subr.bf16.mxu1 %v13077_v11  ;;  %v13093_v63 = vld [vmem:[#allocation10 + $0x2e8] ss:$16 sps:$4 sm:$0xff]   ;;  %v13098_v11 = vld [vmem:[#allocation10 + $0x304] ss:$16 sps:$4 sm:$0xff]  }
 0x464   : > { %v13099_v45 = vld [vmem:[#allocation10 + $0x308] ss:$16 sps:$4 sm:$0xff]  }
 0x465   : > { %8823 = vrot.lane.b32.xlu1 %v20086_v21, %s13581_s4  ;;  %v9568_v46 = vpop.permute.xlu0 %9567  ;;  %7277 = vrot.lane.b32.xlu0 %v16378_v8, %s13581_s4  ;;  %v13086_v8 = vld [vmem:[#allocation10 + $0x2c4] ss:$16 sps:$4 sm:$0xff]  }
 0x466   : > { %11353 = vst.msk [vmem:[%s15680_s26 + $0x3a0] sm:$0xf] %vm6972_vm0, %v9568_v46  ;;  %v8796_v52 = vpop.permute.xlu1 %8795  ;;  %6098 = vmatpush1.bf16.msra.mxu0 %v13072_v43  ;;  %6484 = vmatpush1.bf16.msra.mxu1 %v13075_v32  ;;  %v20094_v43 = vld [vmem:[#allocation96_spill] sm:$0xff]  ;;  %v13107_v46 = vld [vmem:[#allocation10 + $0x32c] ss:$16 sps:$4 sm:$0xff]  }
 0x467   : > { %11130 = vst.msk [vmem:[%s15680_s26 + $0x2a4] sm:$0xf] %vm6972_vm0, %v8796_v52  ;;  %5959 = vmatmul.mubr.bf16.gmra.mrb[140].mxu0 %v20087_v56  ;;  %6345 = vmatmul.mubr.bf16.gmra.mrb[140].mxu1 %v20087_v56  ;;  %v20095_v21 = vld [vmem:[#allocation124_spill] sm:$0xff] }
 0x468   : > { %5968 = vmatprep.mubr.bf16.mxu0 %v20089_v16  ;;  %6354 = vmatprep.mubr.bf16.mxu1 %v20089_v16  ;;  %v13102_v56 = vld [vmem:[#allocation10 + $0x320] ss:$16 sps:$4 sm:$0xff]  }
 0x469   : > { %8049 = vrot.lane.b32.xlu1 %v20088_v10, %s13581_s4  ;;  %v7250_v59 = vpop.permute.xlu0 %7249  ;;  %8825 = vrot.lane.b32.xlu0 %v16380_v39, %s13581_s4  ;;  %v13110_v10 = vld [vmem:[#allocation10 + $0x344] ss:$16 sps:$4 sm:$0xff]  }
 0x46a   : > { %10683 = vst.msk [vmem:[%s15680_s26 + $0xa8] sm:$0xf] %vm6972_vm0, %v7250_v59  ;;  %v8022_v54 = vpop.permute.xlu1 %8021  ;;  %6099 = vmatprep.subr.bf16.mxu0 %v13080_v50  ;;  %6485 = vmatprep.subr.bf16.mxu1 %v13083_v14  ;;  %v20096_v50 = vld [vmem:[#allocation95_spill] sm:$0xff]  ;;  %v20098_v16 = vld [vmem:[#allocation98_spill] sm:$0xff] }
 0x46b   : > { %10906 = vst.msk [vmem:[%s15680_s26 + $0x1a4] sm:$0xf] %vm6972_vm0, %v8022_v54  ;;  %6100 = vmatpush1.bf16.msra.mxu0 %v13078_v34  ;;  %6486 = vmatpush1.bf16.msra.mxu1 %v13081_v53  ;;  %v13105_v34 = vld [vmem:[#allocation10 + $0x328] ss:$16 sps:$4 sm:$0xff]   ;;  %v13113_v59 = vld [vmem:[#allocation10 + $0x34c] ss:$16 sps:$4 sm:$0xff]  }
 0x46c   : > { %6101 = vmatprep.subr.bf16.mxu0 %v13086_v8  ;;  %6487 = vmatprep.subr.bf16.mxu1 %v13089_v3  ;;  %v20097_v53 = vld [vmem:[#allocation55_spill] sm:$0xff] }
 0x46d   : > { %9597 = vrot.lane.b32.xlu1 %v20090_v47, %s13581_s4  ;;  %v8798_v0 = vpop.permute.xlu0 %8797  ;;  %8051 = vrot.lane.b32.xlu0 %v16384_v17, %s13581_s4  ;;  %v20099_v3 = vld [vmem:[#allocation51_spill] sm:$0xff]  ;;  %v13108_v47 = vld [vmem:[#allocation10 + $0x340] ss:$16 sps:$4 sm:$0xff]  }
 0x46e   : > { %11131 = vst.msk [vmem:[%s15680_s26 + $0x2a8] sm:$0xf] %vm6972_vm0, %v8798_v0  ;;  %v9570_v39 = vpop.permute.xlu1 %9569  ;;  %v13111_v0 = vld [vmem:[#allocation10 + $0x348] ss:$16 sps:$4 sm:$0xff]  }
 0x46f   : > { %11354 = vst.msk [vmem:[%s15680_s26 + $0x3a4] sm:$0xf] %vm6972_vm0, %v9570_v39  ;;  %5969 = vmatmul.mubr.bf16.gmra.mrb[144].mxu0 %v20091_v5  ;;  %6355 = vmatmul.mubr.bf16.gmra.mrb[144].mxu1 %v20091_v5  ;;  %v20101_v39 = vld [vmem:[#allocation103_spill] sm:$0xff]  ;;  %v13116_v5 = vld [vmem:[#allocation10 + $0x364] ss:$16 sps:$4 sm:$0xff]  }
 0x470   : > { %5978 = vmatprep.mubr.bf16.mxu0 %v20092_v24  ;;  %6364 = vmatprep.mubr.bf16.mxu1 %v20092_v24  ;;  %v13117_v24 = vld [vmem:[#allocation10 + $0x368] ss:$16 sps:$4 sm:$0xff]  }
 0x471   : > { %7279 = vrot.lane.b32.xlu1 %v16397_v7, %s13581_s4  ;;  %v8024_v29 = vpop.permute.xlu0 %8023  ;;  %9599 = vrot.lane.b32.xlu0 %v16386_v62, %s13581_s4 }
 0x472   : > { %10907 = vst.msk [vmem:[%s15680_s26 + $0x1a8] sm:$0xf] %vm6972_vm0, %v8024_v29  ;;  %v7252_v17 = vpop.permute.xlu1 %7251  ;;  %6102 = vmatpush1.bf16.msra.mxu0 %v13084_v51  ;;  %6488 = vmatpush1.bf16.msra.mxu1 %v13087_v22  ;;  %v13114_v29 = vld [vmem:[#allocation10 + $0x360] ss:$16 sps:$4 sm:$0xff]  }
 0x473   : > { %10684 = vst.msk [vmem:[%s15680_s26 + $0xac] sm:$0xf] %vm6972_vm0, %v7252_v17  ;;  %6103 = vmatprep.subr.bf16.mxu0 %v13092_v1  ;;  %6489 = vmatprep.subr.bf16.mxu1 %v13095_v9  ;;  %v13119_v1 = vld [vmem:[#allocation10 + $0x36c] ss:$16 sps:$4 sm:$0xff]  }
 0x474   : > { %v20102_v9 = vld [vmem:[#allocation63_spill] sm:$0xff]  ;;  %v20103_v17 = vld [vmem:[#allocation101_spill] sm:$0xff] }
 0x475   : > { %8827 = vrot.lane.b32.xlu1 %v16399_v31, %s13581_s4  ;;  %v9572_v7 = vpop.permute.xlu0 %9571  ;;  %7281 = vrot.lane.b32.xlu0 %v16438_v58, %s13581_s4  ;;  %v13096_v31 = vld [vmem:[#allocation10 + $0x300] ss:$16 sps:$4 sm:$0xff]   ;;  %v13104_v58 = vld [vmem:[#allocation10 + $0x324] ss:$16 sps:$4 sm:$0xff]  }
 0x476   : > { %11355 = vst.msk [vmem:[%s15680_s26 + $0x3a8] sm:$0xf] %vm6972_vm0, %v9572_v7  ;;  %v8800_v62 = vpop.permute.xlu1 %8799  ;;  %6104 = vmatpush1.bf16.msra.mxu0 %v13090_v30  ;;  %6490 = vmatpush1.bf16.msra.mxu1 %v13093_v63  ;;  %v20104_v63 = vld [vmem:[#allocation59_spill] sm:$0xff] }
 0x477   : > { %11132 = vst.msk [vmem:[%s15680_s26 + $0x2ac] sm:$0xf] %vm6972_vm0, %v8800_v62  ;;  %5979 = vmatmul.mubr.bf16.gmra.mrb[148].mxu0 %v20093_v18  ;;  %6365 = vmatmul.mubr.bf16.gmra.mrb[148].mxu1 %v20093_v18  ;;  %v13125_v7 = vld [vmem:[#allocation10 + $0x38c] ss:$16 sps:$4 sm:$0xff]   ;;  %v13120_v18 = vld [vmem:[#allocation10 + $0x380] ss:$16 sps:$4 sm:$0xff]  }
 0x478   : > { %5988 = vmatprep.mubr.bf16.mxu0 %v20095_v21  ;;  %6374 = vmatprep.mubr.bf16.mxu1 %v20095_v21 }
 0x479   : > { %8053 = vrot.lane.b32.xlu1 %v20094_v43, %s13581_s4  ;;  %v7254_v32 = vpop.permute.xlu0 %7253  ;;  %8829 = vrot.lane.b32.xlu0 %v16440_v2, %s13581_s4  ;;  %v13128_v43 = vld [vmem:[#allocation10 + $0x3a4] ss:$16 sps:$4 sm:$0xff]  }
 0x47a   : > { %10685 = vst.msk [vmem:[%s15680_s26 + $0xb0] sm:$0xf] %vm6972_vm0, %v7254_v32  ;;  %v8026_v52 = vpop.permute.xlu1 %8025  ;;  %6105 = vmatprep.subr.bf16.mxu0 %v13098_v11  ;;  %6491 = vmatprep.subr.bf16.mxu1 %v13101_v33  ;;  %v20105_v11 = vld [vmem:[#allocation105_spill] sm:$0xff] }
 0x47b   : > { %10908 = vst.msk [vmem:[%s15680_s26 + $0x1ac] sm:$0xf] %vm6972_vm0, %v8026_v52  ;;  %6106 = vmatpush1.bf16.msra.mxu0 %v13096_v31  ;;  %6492 = vmatpush1.bf16.msra.mxu1 %v13099_v45  ;;  %v13123_v31 = vld [vmem:[#allocation10 + $0x388] ss:$16 sps:$4 sm:$0xff]   ;;  %v20106_v45 = vld [vmem:[#allocation62_spill] sm:$0xff] }
 0x47c   : > { %6107 = vmatprep.subr.bf16.mxu0 %v13104_v58  ;;  %6493 = vmatprep.subr.bf16.mxu1 %v13107_v46  ;;  %v13131_v32 = vld [vmem:[#allocation10 + $0x3ac] ss:$16 sps:$4 sm:$0xff]   ;;  %v20107_v58 = vld [vmem:[#allocation58_spill] sm:$0xff]  ;;  %v13129_v52 = vld [vmem:[#allocation10 + $0x3a8] ss:$16 sps:$4 sm:$0xff]  }
 0x47d   : > { %9601 = vrot.lane.b32.xlu1 %v20096_v50, %s13581_s4  ;;  %v8802_v14 = vpop.permute.xlu0 %8801  ;;  %8055 = vrot.lane.b32.xlu0 %v16444_v27, %s13581_s4  ;;  %v20100_v27 = vld [vmem:[#allocation100_spill] sm:$0xff] }
 0x47e   : > { %11133 = vst.msk [vmem:[%s15680_s26 + $0x2b0] sm:$0xf] %vm6972_vm0, %v8802_v14  ;;  %v9574_v2 = vpop.permute.xlu1 %9573  ;;  %v13126_v46 = vld [vmem:[#allocation10 + $0x3a0] ss:$16 sps:$4 sm:$0xff]   ;;  %v13134_v50 = vld [vmem:[#allocation10 + $0x3c4] ss:$16 sps:$4 sm:$0xff]  }
 0x47f   : > { %11356 = vst.msk [vmem:[%s15680_s26 + $0x3ac] sm:$0xf] %vm6972_vm0, %v9574_v2  ;;  %5989 = vmatmul.mubr.bf16.gmra.mrb[152].mxu0 %v20097_v53  ;;  %6375 = vmatmul.mubr.bf16.gmra.mrb[152].mxu1 %v20097_v53  ;;  %v13137_v14 = vld [vmem:[#allocation10 + $0x3cc] ss:$16 sps:$4 sm:$0xff]  }
 0x480   : > { %5998 = vmatprep.mubr.bf16.mxu0 %v20099_v3  ;;  %6384 = vmatprep.mubr.bf16.mxu1 %v20099_v3  ;;  %v20108_v2 = vld [vmem:[#allocation71_spill] sm:$0xff] }
 0x481   : > { %7283 = vrot.lane.b32.xlu1 %v20098_v16, %s13581_s4  ;;  %v8028_v8 = vpop.permute.xlu0 %8027  ;;  %9603 = vrot.lane.b32.xlu0 %v20100_v27, %s13581_s4  ;;  %v3672_v27 = vld [vmem:[%s20112_s8] sm:$0xf]  ;;  %s9992_s8 = sshll.u32 %s17736_s23, 4  ;;  %s19172_s8 = int_to_ptr.vmem [resolvable:$true] %s9992_s8 }
 0x482   : > { %10909 = vst.msk [vmem:[%s15680_s26 + $0x1b0] sm:$0xf] %vm6972_vm0, %v8028_v8  ;;  %v7256_v54 = vpop.permute.xlu1 %7255  ;;  %6108 = vmatpush1.bf16.msra.mxu0 %v13102_v56  ;;  %6494 = vmatpush1.bf16.msra.mxu1 %v13105_v34  ;;  %v13135_v56 = vld [vmem:[#allocation10 + $0x3c8] ss:$16 sps:$4 sm:$0xff]   ;;  %v20109_v34 = vld [vmem:[#allocation108_spill] sm:$0xff]  ;;  %s13480_s7 = scalar_lea.vmem %s19172_s8, 8192 }
 0x483   : > { %10686 = vst.msk [vmem:[%s15680_s26 + $0xb4] sm:$0xf] %vm6972_vm0, %v7256_v54  ;;  %6109 = vmatprep.subr.bf16.mxu0 %v13110_v10  ;;  %6495 = vmatprep.subr.bf16.mxu1 %v13113_v59  ;;  %v20110_v10 = vld [vmem:[#allocation67_spill] sm:$0xff]  ;;  %v13138_v54 = vld [vmem:[#allocation10 + $0x3e0] ss:$16 sps:$4 sm:$0xff]   ;;  %p13481_p1 = scmp.ne.s32.totalorder %s19172_s8, %s13480_s7 }
 0x484   : > { %v13143_v59 = vld [vmem:[#allocation10 + $0x3ec] ss:$16 sps:$4 sm:$0xff]  }
 0x485   : > { %8831 = vrot.lane.b32.xlu1 %v20101_v39, %s13581_s4  ;;  %v9576_v51 = vpop.permute.xlu0 %9575  ;;  %7285 = vrot.lane.b32.xlu0 %v16498_v20, %s13581_s4  ;;  %v13122_v20 = vld [vmem:[#allocation10 + $0x384] ss:$16 sps:$4 sm:$0xff]   ;;  %v20111_v8 = vld [vmem:[#allocation107_spill] sm:$0xff]  ;;  %p13482_p2 = pnand %p13481_p1, %p13819_p6 }
 0x486   : > { %11357 = vst.msk [vmem:[%s15680_s26 + $0x3b0] sm:$0xf] %vm6972_vm0, %v9576_v51  ;;  %v8804_v22 = vpop.permute.xlu1 %8803  ;;  %6110 = vmatpush1.bf16.msra.mxu0 %v13108_v47  ;;  %6496 = vmatpush1.bf16.msra.mxu1 %v13111_v0  ;;  %v13141_v47 = vld [vmem:[#allocation10 + $0x3e8] ss:$16 sps:$4 sm:$0xff]   ;;  %v20113_v0 = vld [vmem:[#allocation70_spill] sm:$0xff]  ;;  %v20115_v51 = vld [vmem:[#allocation84_spill] sm:$0xff] }
 0x487   : > { %11134 = vst.msk [vmem:[%s15680_s26 + $0x2b4] sm:$0xf] %vm6972_vm0, %v8804_v22  ;;  %5999 = vmatmul.mubr.bf16.gmra.mrb[156].mxu0 %v20102_v9  ;;  %6385 = vmatmul.mubr.bf16.gmra.mrb[156].mxu1 %v20102_v9  ;;  %v16936_v22 = vrot.slane %v3672_v27, %v20115_v51  ;;  %v20116_v9 = vld [vmem:[#allocation50_spill] sm:$0xff]  ;;  %p13483_p4 = pneg %p13482_p2 }
 0x488   : > { %6008 = vmatprep.mubr.bf16.mxu0 %v20104_v63  ;;  %6394 = vmatprep.mubr.bf16.mxu1 %v20104_v63  ;;  %v20118_v63 = vld [vmem:[#allocation54_spill] sm:$0xff] }
 0x489   : > { %8057 = vrot.lane.b32.xlu1 %v20103_v17, %s13581_s4  ;;  %v7258_v30 = vpop.permute.xlu0 %7257  ;;  %8833 = vrot.lane.b32.xlu0 %v16500_v37, %s13581_s4  ;;  %v20142_v51 = vld [vmem:[#allocation26_spill] sm:$0xff] }
 0x48a   : > { %10687 = vst.msk [vmem:[%s15680_s26 + $0xb8] sm:$0xf] %vm6972_vm0, %v7258_v30  ;;  %v8030_v62 = vpop.permute.xlu1 %8029  ;;  %6111 = vmatprep.subr.bf16.mxu0 %v13116_v5  ;;  %6497 = vmatprep.subr.bf16.mxu1 %v13119_v1 }
 0x48b   : > { %10910 = vst.msk [vmem:[%s15680_s26 + $0x1b4] sm:$0xf] %vm6972_vm0, %v8030_v62  ;;  %6112 = vmatpush1.bf16.msra.mxu0 %v13114_v29  ;;  %6498 = vmatpush1.bf16.msra.mxu1 %v13117_v24  ;;  %v16939_v29 = vrot.slane %v3672_v27, %v20116_v9 }
 0x48c   : > { %6113 = vmatprep.subr.bf16.mxu0 %v13122_v20  ;;  %6499 = vmatprep.subr.bf16.mxu1 %v13125_v7 }
 0x48d   : > { %9605 = vrot.lane.b32.xlu1 %v20105_v11, %s13581_s4  ;;  %v8806_v33 = vpop.permute.xlu0 %8805  ;;  %8059 = vrot.lane.b32.xlu0 %v16504_v15, %s13581_s4 }
 0x48e   : > { %11135 = vst.msk [vmem:[%s15680_s26 + $0x2b8] sm:$0xf] %vm6972_vm0, %v8806_v33 }
 0x48f   : > { %v9578_v37 = vpop.permute.xlu1 %9577  ;;  %6009 = vmatmul.mubr.bf16.gmra.mrb[160].mxu0 %v20106_v45  ;;  %6395 = vmatmul.mubr.bf16.gmra.mrb[160].mxu1 %v20106_v45 }
 0x490   : > { %11358 = vst.msk [vmem:[%s15680_s26 + $0x3b4] sm:$0xf] %vm6972_vm0, %v9578_v37  ;;  %6018 = vmatprep.mubr.bf16.mxu0 %v20107_v58  ;;  %6404 = vmatprep.mubr.bf16.mxu1 %v20107_v58 }
 0x491   : > { %7287 = vrot.lane.b32.xlu1 %v16517_v13, %s13581_s4  ;;  %v8032_v21 = vpop.permute.xlu0 %8031  ;;  %9607 = vrot.lane.b32.xlu0 %v16506_v12, %s13581_s4 }
 0x492   : > { %10911 = vst.msk [vmem:[%s15680_s26 + $0x1b8] sm:$0xf] %vm6972_vm0, %v8032_v21  ;;  %6114 = vmatpush1.bf16.msra.mxu0 %v13120_v18  ;;  %6500 = vmatpush1.bf16.msra.mxu1 %v13123_v31 }
 0x493   : > { %v7260_v15 = vpop.permute.xlu1 %7259  ;;  %6115 = vmatprep.subr.bf16.mxu0 %v13128_v43  ;;  %6501 = vmatprep.subr.bf16.mxu1 %v13131_v32 }
 0x494   : > { %10688 = vst.msk [vmem:[%s15680_s26 + $0xbc] sm:$0xf] %vm6972_vm0, %v7260_v15 }
 0x495   : > { %8835 = vrot.lane.b32.xlu1 %v16519_v60, %s13581_s4  ;;  %v9580_v13 = vpop.permute.xlu0 %9579  ;;  %7289 = vrot.lane.b32.xlu0 %v16559_v49, %s13581_s4  ;;  %v13132_v60 = vld [vmem:[#allocation10 + $0x3c0] ss:$16 sps:$4 sm:$0xff]   ;;  %v13140_v49 = vld [vmem:[#allocation10 + $0x3e4] ss:$16 sps:$4 sm:$0xff]  }
 0x496   : > { %11359 = vst.msk [vmem:[%s15680_s26 + $0x3b8] sm:$0xf] %vm6972_vm0, %v9580_v13  ;;  %6116 = vmatpush1.bf16.msra.mxu0 %v13126_v46  ;;  %6502 = vmatpush1.bf16.msra.mxu1 %v13129_v52  ;;  %v20119_v46 = vld [vmem:[#allocation43_spill] sm:$0xff] }
 0x497   : > { %v8808_v12 = vpop.permute.xlu1 %8807  ;;  %6019 = vmatmul.mubr.bf16.gmra.mrb[164].mxu0 %v20108_v2  ;;  %6405 = vmatmul.mubr.bf16.gmra.mrb[164].mxu1 %v20108_v2 }
 0x498   : > { %11136 = vst.msk [vmem:[%s15680_s26 + $0x2bc] sm:$0xf] %vm6972_vm0, %v8808_v12  ;;  %6028 = vmatprep.mubr.bf16.mxu0 %v20110_v10  ;;  %6414 = vmatprep.mubr.bf16.mxu1 %v20110_v10 }
 0x499   : > { %8061 = vrot.lane.b32.xlu1 %v20109_v34, %s13581_s4  ;;  %v7262_v53 = vpop.permute.xlu0 %7261  ;;  %8837 = vrot.lane.b32.xlu0 %v16561_v25, %s13581_s4 }
 0x49a   : > { %10689 = vst.msk [vmem:[%s15680_s26 + $0xc0] sm:$0xf] %vm6972_vm0, %v7262_v53  ;;  %6117 = vmatprep.subr.bf16.mxu0 %v13134_v50  ;;  %6503 = vmatprep.subr.bf16.mxu1 %v13137_v14  ;;  %v20120_v50 = vld [vmem:[#allocation49_spill] sm:$0xff] }
 0x49b   : > { %v8034_v16 = vpop.permute.xlu1 %8033  ;;  %6118 = vmatpush1.bf16.msra.mxu0 %v13132_v60  ;;  %6504 = vmatpush1.bf16.msra.mxu1 %v13135_v56 }
 0x49c   : > { %10912 = vst.msk [vmem:[%s15680_s26 + $0x1bc] sm:$0xf] %vm6972_vm0, %v8034_v16  ;;  %6119 = vmatprep.subr.bf16.mxu0 %v13140_v49  ;;  %6505 = vmatprep.subr.bf16.mxu1 %v13143_v59 }
 0x49d   : > { %9609 = vrot.lane.b32.xlu1 %v20111_v8, %s13581_s4  ;;  %v8810_v3 = vpop.permute.xlu0 %8809  ;;  %8063 = vrot.lane.b32.xlu0 %v16568_v41, %s13581_s4  ;;  %v20114_v41 = vld [vmem:[#allocation45_spill] sm:$0xff] }
 0x49e   : > { %11137 = vst.msk [vmem:[%s15680_s26 + $0x2c0] sm:$0xf] %vm6972_vm0, %v8810_v3 }
 0x49f   : > { %v9582_v25 = vpop.permute.xlu1 %9581  ;;  %6029 = vmatmul.mubr.bf16.gmra.mrb[168].mxu0 %v20113_v0  ;;  %6415 = vmatmul.mubr.bf16.gmra.mrb[168].mxu1 %v20113_v0 }
 0x4a0   : > { %11360 = vst.msk [vmem:[%s15680_s26 + $0x3bc] sm:$0xf] %vm6972_vm0, %v9582_v25  ;;  %6038 = vmatprep.mubr.bf16.mxu0 %v20114_v41  ;;  %6424 = vmatprep.mubr.bf16.mxu1 %v20114_v41  ;;  %v4561_v1 = vpop.f32.mrb[64].mxu0  ;;  %v4947_v17 = vpop.f32.mrb[64].mxu1 }
 0x4a1   : > { %7291 = vrot.lane.b32.xlu1 %v16581_v19, %s13581_s4  ;;  %v8036_v39 = vpop.permute.xlu0 %8035  ;;  %9611 = vrot.lane.b32.xlu0 %v16570_v6, %s13581_s4  ;;  %v20117_v19 = vld [vmem:[#allocation81_spill] sm:$0xff]  ;;  %v4563_v30 = vpop.f32.mrb[65].mxu0  ;;  %v16947_v6 = vrot.slane %v3672_v27, %v20118_v63  ;;  %v11818_v62 = vadd.f32 %v4561_v1, %v16936_v22  ;;  %v11882_v37 = vadd.f32 %v4947_v17, %v16939_v29 }
 0x4a2   : > { %10913 = vst.msk [vmem:[%s15680_s26 + $0x1c0] sm:$0xf] %vm6972_vm0, %v8036_v39  ;;  %v16942_v24 = vrot.slane %v3672_v27, %v20117_v19  ;;  %6120 = vmatpush1.bf16.msra.mxu0 %v13138_v54  ;;  %6506 = vmatpush1.bf16.msra.mxu1 %v13141_v47  ;;  %v4949_v20 = vpop.f32.mrb[65].mxu1  ;;  %v4565_v11 = vpop.f32.mrb[66].mxu0 }
 0x4a3   : > { %v7264_v5 = vpop.permute.xlu1 %7263  ;;  %v4951_v33 = vpop.f32.mrb[66].mxu1  ;;  %v11820_v31 = vadd.f32 %v4565_v11, %v16936_v22 }
 0x4a4   : > { %10690 = vst.msk [vmem:[%s15680_s26 + $0xc4] sm:$0xf] %vm6972_vm0, %v7264_v5  ;;  %v11819_v18 = vadd.f32 %v4563_v30, %v16942_v24  ;;  %v11884_v45 = vadd.f32 %v4951_v33, %v16939_v29  ;;  %v4567_v43 = vpop.f32.mrb[67].mxu0  ;;  %v4953_v32 = vpop.f32.mrb[67].mxu1  ;;  %v20121_v5 = vld [vmem:[#allocation47_spill] sm:$0xff] }
 0x4a5   : > { %8839 = vrot.lane.b32.xlu1 %v16594_v61, %s13581_s4  ;;  %v9584_v7 = vpop.permute.xlu0 %9583  ;;  %v11883_v61 = vadd.f32 %v4949_v20, %v16947_v6  ;;  %v11821_v21 = vadd.f32 %v4567_v43, %v16942_v24  ;;  %v11885_v58 = vadd.f32 %v4953_v32, %v16947_v6  ;;  %v16963_v52 = vpack.c.bf16 %v11820_v31, %v11818_v62  ;;  %v20122_v20 = vld [vmem:[#allocation57_spill] sm:$0xff] }
 0x4a6   : > { %11361 = vst.msk [vmem:[%s15680_s26 + $0x3c0] sm:$0xf] %vm6972_vm0, %v9584_v7  ;;  %v16965_v13 = vpack.c.bf16 %v11884_v45, %v11882_v37 }
 0x4a7   : > { %v8812_v15 = vpop.permute.xlu1 %8811  ;;  %6039 = vmatmul.mubr.bf16.gmra.mrb[172].mxu0 %v20119_v46  ;;  %6425 = vmatmul.mubr.bf16.gmra.mrb[172].mxu1 %v20119_v46  ;;  %v16972_v14 = vpack.c.bf16 %v11821_v21, %v11819_v18  ;;  %v16974_v2 = vpack.c.bf16 %v11885_v58, %v11883_v61 }
 0x4a8   : > { %11138 = vst.msk [vmem:[%s15680_s26 + $0x2c4] sm:$0xf] %vm6972_vm0, %v8812_v15  ;;  %6048 = vmatprep.mubr.bf16.mxu0 %v20120_v50  ;;  %6434 = vmatprep.mubr.bf16.mxu1 %v20120_v50  ;;  %v4571_v60 = vpop.f32.mrb[68].mxu0  ;;  %v4957_v56 = vpop.f32.mrb[68].mxu1 }
 0x4a9   : > { %8065 = vrot.lane.b32.xlu1 %v16596_v36, %s13581_s4  ;;  %v7266_v12 = vpop.permute.xlu0 %7265  ;;  %7374 = vrot.lane.b32.xlu0 %v16963_v52, %s13581_s4  ;;  %v4573_v53 = vpop.f32.mrb[69].mxu0  ;;  %v11822_v49 = vadd.f32 %v4571_v60, %v16936_v22  ;;  %v11886_v8 = vadd.f32 %v4957_v56, %v16939_v29 }
 0x4aa   : > { %10691 = vst.msk [vmem:[%s15680_s26 + $0xc8] sm:$0xf] %vm6972_vm0, %v7266_v12  ;;  %v4959_v36 = vpop.f32.mrb[69].mxu1  ;;  %v4575_v59 = vpop.f32.mrb[70].mxu0  ;;  %v11823_v3 = vadd.f32 %v4573_v53, %v16942_v24 }
 0x4ab   : > { %v8038_v34 = vpop.permute.xlu1 %8037  ;;  %v4961_v16 = vpop.f32.mrb[70].mxu1  ;;  %v11824_v25 = vadd.f32 %v4575_v59, %v16936_v22 }
 0x4ac   : > { %10914 = vst.msk [vmem:[%s15680_s26 + $0x1c4] sm:$0xf] %vm6972_vm0, %v8038_v34  ;;  %v11888_v27 = vadd.f32 %v4961_v16, %v16939_v29  ;;  %v4577_v54 = vpop.f32.mrb[71].mxu0  ;;  %v4963_v47 = vpop.f32.mrb[71].mxu1  ;;  %v20124_v16 = vld [vmem:[#allocation65_spill] sm:$0xff] }
 0x4ad   : > { %9613 = vrot.lane.b32.xlu1 %v16601_v23, %s13581_s4  ;;  %v8814_v10 = vpop.permute.xlu0 %8813  ;;  %8922 = vrot.lane.b32.xlu0 %v16965_v13, %s13581_s4  ;;  %v11887_v23 = vadd.f32 %v4959_v36, %v16947_v6  ;;  %v11825_v0 = vadd.f32 %v4577_v54, %v16942_v24  ;;  %v11889_v39 = vadd.f32 %v4963_v47, %v16947_v6  ;;  %v20123_v36 = vld [vmem:[#allocation53_spill] sm:$0xff] }
 0x4ae   : > { %11139 = vst.msk [vmem:[%s15680_s26 + $0x2c8] sm:$0xf] %vm6972_vm0, %v8814_v10  ;;  %v16999_v1 = vpack.c.bf16 %v11824_v25, %v11822_v49  ;;  %v17001_v17 = vpack.c.bf16 %v11888_v27, %v11886_v8 }
 0x4af   : > { %v9586_v41 = vpop.permute.xlu1 %9585  ;;  %6049 = vmatmul.mubr.bf16.gmra.mrb[176].mxu0 %v20121_v5  ;;  %6435 = vmatmul.mubr.bf16.gmra.mrb[176].mxu1 %v20121_v5  ;;  %v17007_v7 = vpack.c.bf16 %v11825_v0, %v11823_v3  ;;  %v17009_v62 = vpack.c.bf16 %v11889_v39, %v11887_v23 }
 0x4b0   : > { %11362 = vst.msk [vmem:[%s15680_s26 + $0x3c4] sm:$0xf] %vm6972_vm0, %v9586_v41  ;;  %6058 = vmatprep.mubr.bf16.mxu0 %v20122_v20  ;;  %6444 = vmatprep.mubr.bf16.mxu1 %v20122_v20  ;;  %v4581_v11 = vpop.f32.mrb[72].mxu0  ;;  %v4967_v33 = vpop.f32.mrb[72].mxu1 }
 0x4b1   : > { %v8040_v30 = vpop.permute.xlu0 %8039  ;;  %7376 = vrot.lane.b32.xlu1 %v16999_v1, %s13581_s4  ;;  %8148 = vrot.lane.b32.xlu0 %v16972_v14, %s13581_s4  ;;  %v4583_v18 = vpop.f32.mrb[73].mxu0  ;;  %v11826_v43 = vadd.f32 %v4581_v11, %v16936_v22  ;;  %v11890_v32 = vadd.f32 %v4967_v33, %v16939_v29 }
 0x4b2   : > { %10915 = vst.msk [vmem:[%s15680_s26 + $0x1c8] sm:$0xf] %vm6972_vm0, %v8040_v30  ;;  %v4969_v31 = vpop.f32.mrb[73].mxu1  ;;  %v4585_v61 = vpop.f32.mrb[74].mxu0  ;;  %v11827_v58 = vadd.f32 %v4583_v18, %v16942_v24 }
 0x4b3   : > { %v7268_v37 = vpop.permute.xlu1 %7267  ;;  %v4971_v21 = vpop.f32.mrb[74].mxu1  ;;  %v11828_v15 = vadd.f32 %v4585_v61, %v16936_v22  ;;  %v11891_v60 = vadd.f32 %v4969_v31, %v16947_v6  ;;  %v20125_v61 = vld [vmem:[#allocation61_spill] sm:$0xff] }
 0x4b4   : > { %10692 = vst.msk [vmem:[%s15680_s26 + $0xcc] sm:$0xf] %vm6972_vm0, %v7268_v37  ;;  %v11892_v46 = vadd.f32 %v4971_v21, %v16939_v29  ;;  %v4587_v12 = vpop.f32.mrb[75].mxu0  ;;  %v4973_v50 = vpop.f32.mrb[75].mxu1 }
 0x4b5   : > { %v9588_v45 = vpop.permute.xlu0 %9587  ;;  %8924 = vrot.lane.b32.xlu1 %v17001_v17, %s13581_s4  ;;  %9696 = vrot.lane.b32.xlu0 %v16974_v2, %s13581_s4  ;;  %v11829_v56 = vadd.f32 %v4587_v12, %v16942_v24  ;;  %v11893_v34 = vadd.f32 %v4973_v50, %v16947_v6  ;;  %v17035_v10 = vpack.c.bf16 %v11828_v15, %v11826_v43 }
 0x4b6   : > { %11363 = vst.msk [vmem:[%s15680_s26 + $0x3c8] sm:$0xf] %vm6972_vm0, %v9588_v45  ;;  %v17037_v49 = vpack.c.bf16 %v11892_v46, %v11890_v32  ;;  %v20126_v46 = vld [vmem:[#allocation73_spill] sm:$0xff] }
 0x4b7   : > { %v8816_v53 = vpop.permute.xlu1 %8815  ;;  %6059 = vmatmul.mubr.bf16.gmra.mrb[180].mxu0 %v20123_v36  ;;  %6445 = vmatmul.mubr.bf16.gmra.mrb[180].mxu1 %v20123_v36  ;;  %v17043_v8 = vpack.c.bf16 %v11829_v56, %v11827_v58  ;;  %v17045_v3 = vpack.c.bf16 %v11893_v34, %v11891_v60 }
 0x4b8   : > { %11140 = vst.msk [vmem:[%s15680_s26 + $0x2cc] sm:$0xf] %vm6972_vm0, %v8816_v53  ;;  %6068 = vmatprep.mubr.bf16.mxu0 %v20124_v16  ;;  %6454 = vmatprep.mubr.bf16.mxu1 %v20124_v16  ;;  %v4591_v25 = vpop.f32.mrb[76].mxu0 }
 0x4b9   : > { %v7270_v59 = vpop.permute.xlu0 %7269  ;;  %8150 = vrot.lane.b32.xlu1 %v17007_v7, %s13581_s4  ;;  %7378 = vrot.lane.b32.xlu0 %v17035_v10, %s13581_s4  ;;  %v4977_v27 = vpop.f32.mrb[76].mxu1  ;;  %v11830_v39 = vadd.f32 %v4591_v25, %v16936_v22 }
 0x4ba   : > { %10693 = vst.msk [vmem:[%s15680_s26 + $0xd0] sm:$0xf] %vm6972_vm0, %v7270_v59  ;;  %v4593_v47 = vpop.f32.mrb[77].mxu0  ;;  %v4979_v23 = vpop.f32.mrb[77].mxu1  ;;  %v11894_v41 = vadd.f32 %v4977_v27, %v16939_v29 }
 0x4bb   : > { %v8042_v54 = vpop.permute.xlu1 %8041  ;;  %v4595_v5 = vpop.f32.mrb[78].mxu0  ;;  %v11831_v20 = vadd.f32 %v4593_v47, %v16942_v24  ;;  %v11895_v31 = vadd.f32 %v4979_v23, %v16947_v6 }
 0x4bc   : > { %10916 = vst.msk [vmem:[%s15680_s26 + $0x1cc] sm:$0xf] %vm6972_vm0, %v8042_v54  ;;  %v4981_v30 = vpop.f32.mrb[78].mxu1  ;;  %v11832_v11 = vadd.f32 %v4595_v5, %v16936_v22  ;;  %v4597_v37 = vpop.f32.mrb[79].mxu0 }
 0x4bd   : > { %v8818_v0 = vpop.permute.xlu0 %8817  ;;  %v11896_v33 = vadd.f32 %v4981_v30, %v16939_v29  ;;  %v4983_v18 = vpop.f32.mrb[79].mxu1  ;;  %9698 = vrot.lane.b32.xlu1 %v17009_v62, %s13581_s4  ;;  %8926 = vrot.lane.b32.xlu0 %v17037_v49, %s13581_s4  ;;  %v11833_v45 = vadd.f32 %v4597_v37, %v16942_v24 }
 0x4be   : > { %11141 = vst.msk [vmem:[%s15680_s26 + $0x2d0] sm:$0xf] %vm6972_vm0, %v8818_v0  ;;  %v11897_v43 = vadd.f32 %v4983_v18, %v16947_v6  ;;  %v17071_v21 = vpack.c.bf16 %v11832_v11, %v11830_v39 }
 0x4bf   : > { %v9590_v32 = vpop.permute.xlu1 %9589  ;;  %6069 = vmatmul.mubr.bf16.gmra.mrb[184].mxu0 %v20125_v61  ;;  %6455 = vmatmul.mubr.bf16.gmra.mrb[184].mxu1 %v20125_v61  ;;  %v17073_v58 = vpack.c.bf16 %v11896_v33, %v11894_v41  ;;  %v17079_v12 = vpack.c.bf16 %v11833_v45, %v11831_v20  ;;  %v20128_v33 = vld [vmem:[#allocation69_spill] sm:$0xff]  ;;  %v20129_v45 = vld [vmem:[#allocation75_spill] sm:$0xff] }
 0x4c0   : > { %11364 = vst.msk [vmem:[%s15680_s26 + $0x3cc] sm:$0xf] %vm6972_vm0, %v9590_v32  ;;  %6078 = vmatprep.mubr.bf16.mxu0 %v20126_v46  ;;  %6464 = vmatprep.mubr.bf16.mxu1 %v20126_v46  ;;  %v17081_v50 = vpack.c.bf16 %v11897_v43, %v11895_v31  ;;  %v4601_v60 = vpop.f32.mrb[80].mxu0 }
 0x4c1   : > { %v8044_v15 = vpop.permute.xlu0 %8043  ;;  %7380 = vrot.lane.b32.xlu1 %v17071_v21, %s13581_s4  ;;  %8152 = vrot.lane.b32.xlu0 %v17043_v8, %s13581_s4  ;;  %v4987_v56 = vpop.f32.mrb[80].mxu1  ;;  %v11834_v16 = vadd.f32 %v4601_v60, %v16936_v22 }
 0x4c2   : > { %20127 = vst [vmem:[#allocation110_spill] sm:$0xff] %v17081_v50  ;;  %10917 = vst.msk [vmem:[%s15680_s26 + $0x1d0] sm:$0xf] %vm6972_vm0, %v8044_v15  ;;  %v4603_v53 = vpop.f32.mrb[81].mxu0  ;;  %v4989_v36 = vpop.f32.mrb[81].mxu1  ;;  %v11898_v25 = vadd.f32 %v4987_v56, %v16939_v29 }
 0x4c3   : > { %v7272_v34 = vpop.permute.xlu1 %7271  ;;  %v4605_v27 = vpop.f32.mrb[82].mxu0  ;;  %v11835_v47 = vadd.f32 %v4603_v53, %v16942_v24  ;;  %v11899_v5 = vadd.f32 %v4989_v36, %v16947_v6 }
 0x4c4   : > { %10694 = vst.msk [vmem:[%s15680_s26 + $0xd4] sm:$0xf] %vm6972_vm0, %v7272_v34  ;;  %v4991_v54 = vpop.f32.mrb[82].mxu1  ;;  %v11836_v23 = vadd.f32 %v4605_v27, %v16936_v22  ;;  %v4607_v39 = vpop.f32.mrb[83].mxu0 }
 0x4c5   : > { %v9592_v59 = vpop.permute.xlu0 %9591  ;;  %v11900_v0 = vadd.f32 %v4991_v54, %v16939_v29  ;;  %v4993_v41 = vpop.f32.mrb[83].mxu1  ;;  %8928 = vrot.lane.b32.xlu1 %v17073_v58, %s13581_s4  ;;  %9700 = vrot.lane.b32.xlu0 %v17045_v3, %s13581_s4  ;;  %v11837_v30 = vadd.f32 %v4607_v39, %v16942_v24 }
 0x4c6   : > { %11365 = vst.msk [vmem:[%s15680_s26 + $0x3d0] sm:$0xf] %vm6972_vm0, %v9592_v59  ;;  %v11901_v20 = vadd.f32 %v4993_v41, %v16947_v6  ;;  %v17107_v37 = vpack.c.bf16 %v11836_v23, %v11834_v16 }
 0x4c7   : > { %v8820_v11 = vpop.permute.xlu1 %8819  ;;  %6079 = vmatmul.mubr.bf16.gmra.mrb[188].mxu0 %v20128_v33  ;;  %6465 = vmatmul.mubr.bf16.gmra.mrb[188].mxu1 %v20128_v33  ;;  %v17109_v18 = vpack.c.bf16 %v11900_v0, %v11898_v25  ;;  %v17115_v43 = vpack.c.bf16 %v11837_v30, %v11835_v47  ;;  %v20131_v30 = vld [vmem:[#allocation74_spill] sm:$0xff] }
 0x4c8   : > { %11142 = vst.msk [vmem:[%s15680_s26 + $0x2d4] sm:$0xf] %vm6972_vm0, %v8820_v11  ;;  %6121 = vmatprep.mubr.bf16.mxu0 %v20129_v45  ;;  %6507 = vmatprep.mubr.bf16.mxu1 %v20129_v45  ;;  %v17117_v32 = vpack.c.bf16 %v11901_v20, %v11899_v5  ;;  %v4611_v61 = vpop.f32.mrb[84].mxu0 }
 0x4c9   : > { %v7274_v31 = vpop.permute.xlu0 %7273  ;;  %8154 = vrot.lane.b32.xlu1 %v17079_v12, %s13581_s4  ;;  %7382 = vrot.lane.b32.xlu0 %v17107_v37, %s13581_s4  ;;  %v4997_v15 = vpop.f32.mrb[84].mxu1  ;;  %v11838_v53 = vadd.f32 %v4611_v61, %v16936_v22 }
 0x4ca   : > { %20130 = vst [vmem:[#allocation109_spill] sm:$0xff] %v17117_v32  ;;  %10695 = vst.msk [vmem:[%s15680_s26 + $0xd8] sm:$0xf] %vm6972_vm0, %v7274_v31  ;;  %v4613_v60 = vpop.f32.mrb[85].mxu0  ;;  %v4999_v56 = vpop.f32.mrb[85].mxu1  ;;  %v11902_v36 = vadd.f32 %v4997_v15, %v16939_v29  ;;  %v20132_v31 = vld [vmem:[#allocation77_spill] sm:$0xff] }
 0x4cb   : > { %v8046_v46 = vpop.permute.xlu1 %8045  ;;  %v4615_v59 = vpop.f32.mrb[86].mxu0  ;;  %v11839_v25 = vadd.f32 %v4613_v60, %v16942_v24  ;;  %v11903_v0 = vadd.f32 %v4999_v56, %v16947_v6 }
 0x4cc   : > { %10918 = vst.msk [vmem:[%s15680_s26 + $0x1d4] sm:$0xf] %vm6972_vm0, %v8046_v46  ;;  %v5001_v16 = vpop.f32.mrb[86].mxu1  ;;  %v11840_v27 = vadd.f32 %v4615_v59, %v16936_v22  ;;  %v4617_v47 = vpop.f32.mrb[87].mxu0 }
 0x4cd   : > { %v8822_v34 = vpop.permute.xlu0 %8821  ;;  %v11904_v54 = vadd.f32 %v5001_v16, %v16939_v29  ;;  %v5003_v23 = vpop.f32.mrb[87].mxu1  ;;  %9702 = vrot.lane.b32.xlu1 %v17081_v50, %s13581_s4  ;;  %8930 = vrot.lane.b32.xlu0 %v17109_v18, %s13581_s4  ;;  %v11841_v39 = vadd.f32 %v4617_v47, %v16942_v24 }
 0x4ce   : > { %11143 = vst.msk [vmem:[%s15680_s26 + $0x2d8] sm:$0xf] %vm6972_vm0, %v8822_v34  ;;  %v11905_v41 = vadd.f32 %v5003_v23, %v16947_v6  ;;  %v17143_v20 = vpack.c.bf16 %v11840_v27, %v11838_v53 }
 0x4cf   : > { %v9594_v5 = vpop.permute.xlu1 %9593  ;;  %6122 = vmatmul.mubr.bf16.vlgmr.msra.gmra.mrb[128].mxu0 %v20131_v30  ;;  %6508 = vmatmul.mubr.bf16.vlgmr.msra.gmra.mrb[128].mxu1 %v20131_v30  ;;  %v17145_v11 = vpack.c.bf16 %v11904_v54, %v11902_v36  ;;  %v17151_v45 = vpack.c.bf16 %v11841_v39, %v11839_v25 }
 0x4d0   : > { %11366 = vst.msk [vmem:[%s15680_s26 + $0x3d4] sm:$0xf] %vm6972_vm0, %v9594_v5  ;;  %6131 = vmatprep.mubr.bf16.mxu0 %v20132_v31  ;;  %6517 = vmatprep.mubr.bf16.mxu1 %v20132_v31  ;;  %v17153_v61 = vpack.c.bf16 %v11905_v41, %v11903_v0  ;;  %v4621_v15 = vpop.f32.mrb[88].mxu0 }
 0x4d1   : > { %v8048_v33 = vpop.permute.xlu0 %8047  ;;  %7384 = vrot.lane.b32.xlu1 %v17143_v20, %s13581_s4  ;;  %8156 = vrot.lane.b32.xlu0 %v17115_v43, %s13581_s4  ;;  %v5007_v46 = vpop.f32.mrb[88].mxu1  ;;  %v11842_v36 = vadd.f32 %v4621_v15, %v16936_v22 }
 0x4d2   : > { %20133 = vst [vmem:[#allocation23_spill] sm:$0xff] %v17153_v61  ;;  %10919 = vst.msk [vmem:[%s15680_s26 + $0x1d8] sm:$0xf] %vm6972_vm0, %v8048_v33  ;;  %v4623_v56 = vpop.f32.mrb[89].mxu0  ;;  %v5009_v34 = vpop.f32.mrb[89].mxu1  ;;  %v11906_v59 = vadd.f32 %v5007_v46, %v16939_v29  ;;  %v20134_v33 = vld [vmem:[#allocation76_spill] sm:$0xff] }
 0x4d3   : > { %v7276_v60 = vpop.permute.xlu1 %7275  ;;  %v4625_v16 = vpop.f32.mrb[90].mxu0  ;;  %v11843_v27 = vadd.f32 %v4623_v56, %v16942_v24  ;;  %v11907_v39 = vadd.f32 %v5009_v34, %v16947_v6 }
 0x4d4   : > { %10696 = vst.msk [vmem:[%s15680_s26 + $0xdc] sm:$0xf] %vm6972_vm0, %v7276_v60  ;;  %v5011_v25 = vpop.f32.mrb[90].mxu1  ;;  %v11844_v54 = vadd.f32 %v4625_v16, %v16936_v22  ;;  %v4627_v23 = vpop.f32.mrb[91].mxu0  ;;  %v20135_v60 = vld [vmem:[#allocation66_spill] sm:$0xff] }
 0x4d5   : > { %v9596_v53 = vpop.permute.xlu0 %9595  ;;  %v11908_v47 = vadd.f32 %v5011_v25, %v16939_v29  ;;  %v5013_v0 = vpop.f32.mrb[91].mxu1  ;;  %8932 = vrot.lane.b32.xlu1 %v17145_v11, %s13581_s4  ;;  %9704 = vrot.lane.b32.xlu0 %v17117_v32, %s13581_s4  ;;  %v11845_v41 = vadd.f32 %v4627_v23, %v16942_v24 }
 0x4d6   : > { %11367 = vst.msk [vmem:[%s15680_s26 + $0x3d8] sm:$0xf] %vm6972_vm0, %v9596_v53  ;;  %v11909_v5 = vadd.f32 %v5013_v0, %v16947_v6  ;;  %v17179_v31 = vpack.c.bf16 %v11844_v54, %v11842_v36 }
 0x4d7   : > { %v8824_v30 = vpop.permute.xlu1 %8823  ;;  %6132 = vmatmul.mubr.bf16.gmra.mrb[132].mxu0 %v20134_v33  ;;  %6518 = vmatmul.mubr.bf16.gmra.mrb[132].mxu1 %v20134_v33  ;;  %v17181_v15 = vpack.c.bf16 %v11908_v47, %v11906_v59  ;;  %v17187_v56 = vpack.c.bf16 %v11845_v41, %v11843_v27 }
 0x4d8   : > { %11144 = vst.msk [vmem:[%s15680_s26 + $0x2dc] sm:$0xf] %vm6972_vm0, %v8824_v30  ;;  %6141 = vmatprep.mubr.bf16.mxu0 %v20135_v60  ;;  %6527 = vmatprep.mubr.bf16.mxu1 %v20135_v60  ;;  %v17189_v34 = vpack.c.bf16 %v11909_v5, %v11907_v39 }
 0x4d9   : > { %v7278_v46 = vpop.permute.xlu0 %7277  ;;  %8158 = vrot.lane.b32.xlu1 %v17151_v45, %s13581_s4  ;;  %7386 = vrot.lane.b32.xlu0 %v17179_v31, %s13581_s4  ;;  %v4631_v53 = vpop.f32.mrb[92].mxu0 }
 0x4da   : > { %20136 = vst [vmem:[#allocation93_spill] sm:$0xff] %v17189_v34  ;;  %10697 = vst.msk [vmem:[%s15680_s26 + $0xe0] sm:$0xf] %vm6972_vm0, %v7278_v46  ;;  %v5017_v36 = vpop.f32.mrb[92].mxu1  ;;  %v4633_v16 = vpop.f32.mrb[93].mxu0  ;;  %v11846_v27 = vadd.f32 %v4631_v53, %v16936_v22 }
 0x4db   : > { %v8050_v59 = vpop.permute.xlu1 %8049  ;;  %v5019_v25 = vpop.f32.mrb[93].mxu1  ;;  %v11910_v47 = vadd.f32 %v5017_v36, %v16939_v29  ;;  %v11847_v39 = vadd.f32 %v4633_v16, %v16942_v24 }
 0x4dc   : > { %10920 = vst.msk [vmem:[%s15680_s26 + $0x1dc] sm:$0xf] %vm6972_vm0, %v8050_v59  ;;  %v4635_v23 = vpop.f32.mrb[94].mxu0  ;;  %v5021_v0 = vpop.f32.mrb[94].mxu1  ;;  %v11911_v46 = vadd.f32 %v5019_v25, %v16947_v6  ;;  %v20137_v59 = vld [vmem:[#allocation78_spill] sm:$0xff] }
 0x4dd   : > { %v8826_v54 = vpop.permute.xlu0 %8825  ;;  %v11848_v41 = vadd.f32 %v4635_v23, %v16936_v22  ;;  %v11912_v5 = vadd.f32 %v5021_v0, %v16939_v29  ;;  %v4637_v30 = vpop.f32.mrb[95].mxu0  ;;  %9706 = vrot.lane.b32.xlu1 %v17153_v61, %s13581_s4  ;;  %8934 = vrot.lane.b32.xlu0 %v17181_v15, %s13581_s4  ;;  %v20138_v0 = vld [vmem:[#allocation27_spill] sm:$0xff] }
 0x4de   : > { %11145 = vst.msk [vmem:[%s15680_s26 + $0x2e0] sm:$0xf] %vm6972_vm0, %v8826_v54  ;;  %v5023_v33 = vpop.f32.mrb[95].mxu1  ;;  %v11849_v60 = vadd.f32 %v4637_v30, %v16942_v24 }
 0x4df   : > { %v11913_v53 = vadd.f32 %v5023_v33, %v16947_v6  ;;  %v9598_v36 = vpop.permute.xlu1 %9597  ;;  %6142 = vmatmul.mubr.bf16.gmra.mrb[136].mxu0 %v20137_v59  ;;  %6528 = vmatmul.mubr.bf16.gmra.mrb[136].mxu1 %v20137_v59  ;;  %v17215_v16 = vpack.c.bf16 %v11848_v41, %v11846_v27  ;;  %v17217_v54 = vpack.c.bf16 %v11912_v5, %v11910_v47 }
 0x4e0   : > { %11368 = vst.msk [vmem:[%s15680_s26 + $0x3dc] sm:$0xf] %vm6972_vm0, %v9598_v36  ;;  %6151 = vmatprep.mubr.bf16.mxu0 %v20138_v0  ;;  %6537 = vmatprep.mubr.bf16.mxu1 %v20138_v0  ;;  %v17223_v25 = vpack.c.bf16 %v11849_v60, %v11847_v39 }
 0x4e1   : > { %v8052_v23 = vpop.permute.xlu0 %8051  ;;  %v17225_v30 = vpack.c.bf16 %v11913_v53, %v11911_v46  ;;  %7388 = vrot.lane.b32.xlu1 %v17215_v16, %s13581_s4  ;;  %8160 = vrot.lane.b32.xlu0 %v17187_v56, %s13581_s4 }
 0x4e2   : > { %10921 = vst.msk [vmem:[%s15680_s26 + $0x1e0] sm:$0xf] %vm6972_vm0, %v8052_v23  ;;  %v4641_v27 = vpop.f32.mrb[96].mxu0  ;;  %v5027_v47 = vpop.f32.mrb[96].mxu1 }
 0x4e3   : > { %20139 = vst [vmem:[#allocation113_spill] sm:$0xff] %v17225_v30  ;;  %v7280_v41 = vpop.permute.xlu1 %7279  ;;  %v4643_v5 = vpop.f32.mrb[97].mxu0  ;;  %v11850_v39 = vadd.f32 %v4641_v27, %v16936_v22  ;;  %v11914_v46 = vadd.f32 %v5027_v47, %v16939_v29 }
 0x4e4   : > { %10698 = vst.msk [vmem:[%s15680_s26 + $0xe4] sm:$0xf] %vm6972_vm0, %v7280_v41  ;;  %v5029_v33 = vpop.f32.mrb[97].mxu1  ;;  %v4645_v60 = vpop.f32.mrb[98].mxu0  ;;  %v11851_v59 = vadd.f32 %v4643_v5, %v16942_v24 }
 0x4e5   : > { %v9600_v36 = vpop.permute.xlu0 %9599  ;;  %v5031_v53 = vpop.f32.mrb[98].mxu1  ;;  %v11852_v23 = vadd.f32 %v4645_v60, %v16936_v22  ;;  %8936 = vrot.lane.b32.xlu1 %v17217_v54, %s13581_s4  ;;  %9708 = vrot.lane.b32.xlu0 %v17189_v34, %s13581_s4  ;;  %v11915_v27 = vadd.f32 %v5029_v33, %v16947_v6 }
 0x4e6   : > { %11369 = vst.msk [vmem:[%s15680_s26 + $0x3e0] sm:$0xf] %vm6972_vm0, %v9600_v36  ;;  %v11916_v0 = vadd.f32 %v5031_v53, %v16939_v29  ;;  %v4647_v63 = vpop.f32.mrb[99].mxu0  ;;  %v5033_v19 = vpop.f32.mrb[99].mxu1  ;;  %v20140_v36 = vld [vmem:[#allocation29_spill] sm:$0xff] }
 0x4e7   : > { %v11853_v47 = vadd.f32 %v4647_v63, %v16942_v24  ;;  %v11917_v41 = vadd.f32 %v5033_v19, %v16947_v6  ;;  %v8828_v5 = vpop.permute.xlu1 %8827  ;;  %6152 = vmatmul.mubr.bf16.gmra.mrb[140].mxu0 %v20140_v36  ;;  %6538 = vmatmul.mubr.bf16.gmra.mrb[140].mxu1 %v20140_v36  ;;  %v17251_v60 = vpack.c.bf16 %v11852_v23, %v11850_v39 }
 0x4e8   : > { %v17253_v53 = vpack.c.bf16 %v11916_v0, %v11914_v46  ;;  %11146 = vst.msk [vmem:[%s15680_s26 + $0x2e4] sm:$0xf] %vm6972_vm0, %v8828_v5  ;;  %6161 = vmatprep.mubr.bf16.mxu0 %v20142_v51  ;;  %6547 = vmatprep.mubr.bf16.mxu1 %v20142_v51 }
 0x4e9   : > { %v7282_v9 = vpop.permute.xlu0 %7281  ;;  %v17259_v63 = vpack.c.bf16 %v11853_v47, %v11851_v59  ;;  %v17261_v19 = vpack.c.bf16 %v11917_v41, %v11915_v27  ;;  %8162 = vrot.lane.b32.xlu1 %v17223_v25, %s13581_s4 }
 0x4ea   : > { %20141 = vst [vmem:[#allocation112_spill] sm:$0xff] %v17253_v53  ;;  %10699 = vst.msk [vmem:[%s15680_s26 + $0xe8] sm:$0xf] %vm6972_vm0, %v7282_v9  ;;  %v4651_v33 = vpop.f32.mrb[100].mxu0  ;;  %v5037_v39 = vpop.f32.mrb[100].mxu1 }
 0x4eb   : > { %20143 = vst [vmem:[#allocation19_spill] sm:$0xff] %v17259_v63  ;;  %20144 = vst [vmem:[#allocation89_spill] sm:$0xff] %v17261_v19  ;;  %v8054_v46 = vpop.permute.xlu1 %8053  ;;  %v4653_v23 = vpop.f32.mrb[101].mxu0  ;;  %v11854_v36 = vadd.f32 %v4651_v33, %v16936_v22  ;;  %v11918_v9 = vadd.f32 %v5037_v39, %v16939_v29  ;;  %v20145_v39 = vld [vmem:[#allocation28_spill] sm:$0xff] }
 0x4ec   : > { %10922 = vst.msk [vmem:[%s15680_s26 + $0x1e4] sm:$0xf] %vm6972_vm0, %v8054_v46  ;;  %v5039_v0 = vpop.f32.mrb[101].mxu1  ;;  %v4655_v51 = vpop.f32.mrb[102].mxu0  ;;  %v11855_v27 = vadd.f32 %v4653_v23, %v16942_v24 }
 0x4ed   : > { %v8830_v5 = vpop.permute.xlu0 %8829  ;;  %v5041_v59 = vpop.f32.mrb[102].mxu1  ;;  %v11856_v47 = vadd.f32 %v4655_v51, %v16936_v22  ;;  %9710 = vrot.lane.b32.xlu1 %v17225_v30, %s13581_s4  ;;  %v11919_v33 = vadd.f32 %v5039_v0, %v16947_v6  ;;  %v20147_v30 = vld [vmem:[#allocation31_spill] sm:$0xff] }
 0x4ee   : > { %11147 = vst.msk [vmem:[%s15680_s26 + $0x2e8] sm:$0xf] %vm6972_vm0, %v8830_v5  ;;  %v11920_v41 = vadd.f32 %v5041_v59, %v16939_v29  ;;  %v4657_v19 = vpop.f32.mrb[103].mxu0  ;;  %v5043_v63 = vpop.f32.mrb[103].mxu1 }
 0x4ef   : > { %v11857_v46 = vadd.f32 %v4657_v19, %v16942_v24  ;;  %v11921_v5 = vadd.f32 %v5043_v63, %v16947_v6  ;;  %v9602_v53 = vpop.permute.xlu1 %9601  ;;  %6162 = vmatmul.mubr.bf16.gmra.mrb[144].mxu0 %v20145_v39  ;;  %6548 = vmatmul.mubr.bf16.gmra.mrb[144].mxu1 %v20145_v39  ;;  %v17283_v23 = vpack.c.bf16 %v11856_v47, %v11854_v36 }
 0x4f0   : > { %v17285_v51 = vpack.c.bf16 %v11920_v41, %v11918_v9  ;;  %11370 = vst.msk [vmem:[%s15680_s26 + $0x3e4] sm:$0xf] %vm6972_vm0, %v9602_v53  ;;  %6171 = vmatprep.mubr.bf16.mxu0 %v20147_v30  ;;  %6557 = vmatprep.mubr.bf16.mxu1 %v20147_v30 }
 0x4f1   : > { %v8056_v59 = vpop.permute.xlu0 %8055  ;;  %v17291_v19 = vpack.c.bf16 %v11857_v46, %v11855_v27  ;;  %v17293_v63 = vpack.c.bf16 %v11921_v5, %v11919_v33  ;;  %7392 = vrot.lane.b32.xlu1 %v17283_v23, %s13581_s4 }
 0x4f2   : > { %20146 = vst [vmem:[#allocation116_spill] sm:$0xff] %v17285_v51  ;;  %10923 = vst.msk [vmem:[%s15680_s26 + $0x1e8] sm:$0xf] %vm6972_vm0, %v8056_v59  ;;  %v4661_v0 = vpop.f32.mrb[104].mxu0  ;;  %v5047_v36 = vpop.f32.mrb[104].mxu1 }
 0x4f3   : > { %20148 = vst [vmem:[#allocation115_spill] sm:$0xff] %v17291_v19  ;;  %20149 = vst [vmem:[#allocation22_spill] sm:$0xff] %v17293_v63  ;;  %v7284_v9 = vpop.permute.xlu1 %7283  ;;  %v4663_v47 = vpop.f32.mrb[105].mxu0  ;;  %v11858_v39 = vadd.f32 %v4661_v0, %v16936_v22  ;;  %v11922_v33 = vadd.f32 %v5047_v36, %v16939_v29  ;;  %v20150_v36 = vld [vmem:[#allocation33_spill] sm:$0xff] }
 0x4f4   : > { %10700 = vst.msk [vmem:[%s15680_s26 + $0xec] sm:$0xf] %vm6972_vm0, %v7284_v9  ;;  %v5049_v53 = vpop.f32.mrb[105].mxu1  ;;  %v4665_v30 = vpop.f32.mrb[106].mxu0  ;;  %v11859_v46 = vadd.f32 %v4663_v47, %v16942_v24 }
 0x4f5   : > { %v9604_v41 = vpop.permute.xlu0 %9603  ;;  %v5051_v27 = vpop.f32.mrb[106].mxu1  ;;  %v11860_v5 = vadd.f32 %v4665_v30, %v16936_v22  ;;  %8940 = vrot.lane.b32.xlu1 %v17285_v51, %s13581_s4  ;;  %v11923_v0 = vadd.f32 %v5049_v53, %v16947_v6  ;;  %v20152_v51 = vld [vmem:[#allocation30_spill] sm:$0xff] }
 0x4f6   : > { %11371 = vst.msk [vmem:[%s15680_s26 + $0x3e8] sm:$0xf] %vm6972_vm0, %v9604_v41  ;;  %v11924_v59 = vadd.f32 %v5051_v27, %v16939_v29  ;;  %v4667_v34 = vpop.f32.mrb[107].mxu0  ;;  %v5053_v61 = vpop.f32.mrb[107].mxu1 }
 0x4f7   : > { %v11861_v9 = vadd.f32 %v4667_v34, %v16942_v24  ;;  %v11925_v41 = vadd.f32 %v5053_v61, %v16947_v6  ;;  %v8832_v32 = vpop.permute.xlu1 %8831  ;;  %6172 = vmatmul.mubr.bf16.gmra.mrb[148].mxu0 %v20150_v36  ;;  %6558 = vmatmul.mubr.bf16.gmra.mrb[148].mxu1 %v20150_v36  ;;  %v17315_v47 = vpack.c.bf16 %v11860_v5, %v11858_v39 }
 0x4f8   : > { %v17317_v30 = vpack.c.bf16 %v11924_v59, %v11922_v33  ;;  %11148 = vst.msk [vmem:[%s15680_s26 + $0x2ec] sm:$0xf] %vm6972_vm0, %v8832_v32  ;;  %6181 = vmatprep.mubr.bf16.mxu0 %v20152_v51  ;;  %6567 = vmatprep.mubr.bf16.mxu1 %v20152_v51 }
 0x4f9   : > { %v7286_v27 = vpop.permute.xlu0 %7285  ;;  %v17323_v34 = vpack.c.bf16 %v11861_v9, %v11859_v46  ;;  %v17325_v61 = vpack.c.bf16 %v11925_v41, %v11923_v0  ;;  %8166 = vrot.lane.b32.xlu1 %v17291_v19, %s13581_s4 }
 0x4fa   : > { %20151 = vst [vmem:[#allocation25_spill] sm:$0xff] %v17317_v30  ;;  %10701 = vst.msk [vmem:[%s15680_s26 + $0xf0] sm:$0xf] %vm6972_vm0, %v7286_v27  ;;  %v4671_v53 = vpop.f32.mrb[108].mxu0  ;;  %v5057_v39 = vpop.f32.mrb[108].mxu1 }
 0x4fb   : > { %20153 = vst [vmem:[#allocation102_spill] sm:$0xff] %v17323_v34  ;;  %20154 = vst [vmem:[#allocation18_spill] sm:$0xff] %v17325_v61  ;;  %v8058_v33 = vpop.permute.xlu1 %8057  ;;  %v4673_v5 = vpop.f32.mrb[109].mxu0  ;;  %v11862_v36 = vadd.f32 %v4671_v53, %v16936_v22  ;;  %v11926_v0 = vadd.f32 %v5057_v39, %v16939_v29  ;;  %v20155_v39 = vld [vmem:[#allocation32_spill] sm:$0xff] }
 0x4fc   : > { %10924 = vst.msk [vmem:[%s15680_s26 + $0x1ec] sm:$0xf] %vm6972_vm0, %v8058_v33  ;;  %v5059_v32 = vpop.f32.mrb[109].mxu1  ;;  %v4675_v51 = vpop.f32.mrb[110].mxu0  ;;  %v11863_v9 = vadd.f32 %v4673_v5, %v16942_v24 }
 0x4fd   : > { %v8834_v59 = vpop.permute.xlu0 %8833  ;;  %v5061_v46 = vpop.f32.mrb[110].mxu1  ;;  %v11864_v41 = vadd.f32 %v4675_v51, %v16936_v22  ;;  %9714 = vrot.lane.b32.xlu1 %v17293_v63, %s13581_s4  ;;  %v11927_v53 = vadd.f32 %v5059_v32, %v16947_v6  ;;  %v20156_v63 = vld [vmem:[#allocation35_spill] sm:$0xff] }
 0x4fe   : > { %11149 = vst.msk [vmem:[%s15680_s26 + $0x2f0] sm:$0xf] %vm6972_vm0, %v8834_v59  ;;  %v11928_v27 = vadd.f32 %v5061_v46, %v16939_v29  ;;  %v4677_v19 = vpop.f32.mrb[111].mxu0  ;;  %v5063_v61 = vpop.f32.mrb[111].mxu1 }
 0x4ff   : > { %v11865_v33 = vadd.f32 %v4677_v19, %v16942_v24  ;;  %v11929_v59 = vadd.f32 %v5063_v61, %v16947_v6  ;;  %v9606_v34 = vpop.permute.xlu1 %9605  ;;  %6182 = vmatmul.mubr.bf16.gmra.mrb[152].mxu0 %v20155_v39  ;;  %6568 = vmatmul.mubr.bf16.gmra.mrb[152].mxu1 %v20155_v39  ;;  %v17347_v5 = vpack.c.bf16 %v11864_v41, %v11862_v36 }
 0x500   : > { %v17349_v51 = vpack.c.bf16 %v11928_v27, %v11926_v0  ;;  %11372 = vst.msk [vmem:[%s15680_s26 + $0x3ec] sm:$0xf] %vm6972_vm0, %v9606_v34  ;;  %6191 = vmatprep.mubr.bf16.mxu0 %v20156_v63  ;;  %6577 = vmatprep.mubr.bf16.mxu1 %v20156_v63 }
 0x501   : > { %v8060_v46 = vpop.permute.xlu0 %8059  ;;  %v17355_v19 = vpack.c.bf16 %v11865_v33, %v11863_v9  ;;  %v17357_v61 = vpack.c.bf16 %v11929_v59, %v11927_v53  ;;  %7396 = vrot.lane.b32.xlu1 %v17347_v5, %s13581_s4 }
 0x502   : > { %10925 = vst.msk [vmem:[%s15680_s26 + $0x1f0] sm:$0xf] %vm6972_vm0, %v8060_v46  ;;  %v4681_v32 = vpop.f32.mrb[112].mxu0  ;;  %v5067_v36 = vpop.f32.mrb[112].mxu1 }
 0x503   : > { %20157 = vst [vmem:[#allocation21_spill] sm:$0xff] %v17355_v19  ;;  %20158 = vst [vmem:[#allocation99_spill] sm:$0xff] %v17357_v61  ;;  %v7288_v0 = vpop.permute.xlu1 %7287  ;;  %v4683_v41 = vpop.f32.mrb[113].mxu0  ;;  %7005 = vxpose.xlu0.c.b16.start [1/8] (narrow) %v16963_v52, 64  ;;  %v11866_v63 = vadd.f32 %v4681_v32, %v16936_v22  ;;  %v11930_v33 = vadd.f32 %v5067_v36, %v16939_v29  ;;  %v20159_v36 = vld [vmem:[#allocation37_spill] sm:$0xff] }
 0x504   : > { %10702 = vst.msk [vmem:[%s15680_s26 + $0xf4] sm:$0xf] %vm6972_vm0, %v7288_v0  ;;  %v5069_v34 = vpop.f32.mrb[113].mxu1  ;;  %v4685_v9 = vpop.f32.mrb[114].mxu0  ;;  %v11867_v59 = vadd.f32 %v4683_v41, %v16942_v24 }
 0x505   : > { %v9608_v27 = vpop.permute.xlu0 %9607  ;;  %v5071_v53 = vpop.f32.mrb[114].mxu1  ;;  %v11868_v39 = vadd.f32 %v4685_v9, %v16936_v22  ;;  %8944 = vrot.lane.b32.xlu1 %v17349_v51, %s13581_s4  ;;  %v11931_v52 = vadd.f32 %v5069_v34, %v16947_v6  ;;  %v20161_v34 = vld [vmem:[#allocation34_spill] sm:$0xff] }
 0x506   : > { %11373 = vst.msk [vmem:[%s15680_s26 + $0x3f0] sm:$0xf] %vm6972_vm0, %v9608_v27  ;;  %v11932_v46 = vadd.f32 %v5071_v53, %v16939_v29  ;;  %v4687_v0 = vpop.f32.mrb[115].mxu0  ;;  %v5073_v30 = vpop.f32.mrb[115].mxu1 }
 0x507   : > { %v11869_v32 = vadd.f32 %v4687_v0, %v16942_v24  ;;  %v11933_v27 = vadd.f32 %v5073_v30, %v16947_v6  ;;  %v8836_v50 = vpop.permute.xlu1 %8835  ;;  %6192 = vmatmul.mubr.bf16.gmra.mrb[156].mxu0 %v20159_v36  ;;  %6578 = vmatmul.mubr.bf16.gmra.mrb[156].mxu1 %v20159_v36  ;;  %v17380_v41 = vpack.c.bf16 %v11868_v39, %v11866_v63 }
 0x508   : > { %v17382_v9 = vpack.c.bf16 %v11932_v46, %v11930_v33  ;;  %11150 = vst.msk [vmem:[%s15680_s26 + $0x2f4] sm:$0xf] %vm6972_vm0, %v8836_v50  ;;  %7006 = vxpose.xlu0.c.b16.cont [2/8] (narrow) %v16999_v1, 64  ;;  %6201 = vmatprep.mubr.bf16.mxu0 %v20161_v34 }
 0x509   : > { %v7290_v53 = vpop.permute.xlu0 %7289  ;;  %v17388_v0 = vpack.c.bf16 %v11869_v32, %v11867_v59  ;;  %v17390_v30 = vpack.c.bf16 %v11933_v27, %v11931_v52  ;;  %6587 = vmatprep.mubr.bf16.mxu1 %v20161_v34  ;;  %8170 = vrot.lane.b32.xlu1 %v17355_v19, %s13581_s4 }
 0x50a   : > { %20160 = vst [vmem:[#allocation24_spill] sm:$0xff] %v17382_v9  ;;  %10703 = vst.msk [vmem:[%s15680_s26 + $0xf8] sm:$0xf] %vm6972_vm0, %v7290_v53  ;;  %v4691_v63 = vpop.f32.mrb[116].mxu0  ;;  %v5077_v33 = vpop.f32.mrb[116].mxu1  ;;  %v20167_v9 = vld [vmem:[#allocation39_spill] sm:$0xff] }
 0x50b   : > { %20162 = vst [vmem:[#allocation20_spill] sm:$0xff] %v17388_v0  ;;  %20163 = vst [vmem:[#allocation80_spill] sm:$0xff] %v17390_v30  ;;  %v8062_v50 = vpop.permute.xlu1 %8061  ;;  %v4693_v39 = vpop.f32.mrb[117].mxu0  ;;  %v11870_v46 = vadd.f32 %v4691_v63, %v16936_v22  ;;  %v11934_v27 = vadd.f32 %v5077_v33, %v16939_v29  ;;  %v20164_v33 = vld [vmem:[#allocation36_spill] sm:$0xff] }
 0x50c   : > { %10926 = vst.msk [vmem:[%s15680_s26 + $0x1f4] sm:$0xf] %vm6972_vm0, %v8062_v50  ;;  %v5079_v1 = vpop.f32.mrb[117].mxu1  ;;  %7007 = vxpose.xlu0.c.b16.cont [3/8] (narrow) %v17035_v10, 64  ;;  %v4695_v52 = vpop.f32.mrb[118].mxu0  ;;  %v11871_v36 = vadd.f32 %v4693_v39, %v16942_v24 }
 0x50d   : > { %v8838_v59 = vpop.permute.xlu0 %8837  ;;  %v5081_v32 = vpop.f32.mrb[118].mxu1  ;;  %v11872_v53 = vadd.f32 %v4695_v52, %v16936_v22  ;;  %9718 = vrot.lane.b32.xlu1 %v17357_v61, %s13581_s4  ;;  %v11935_v10 = vadd.f32 %v5079_v1, %v16947_v6  ;;  %v20165_v1 = vld [vmem:[#allocation41_spill] sm:$0xff] }
 0x50e   : > { %11151 = vst.msk [vmem:[%s15680_s26 + $0x2f8] sm:$0xf] %vm6972_vm0, %v8838_v59  ;;  %v11936_v34 = vadd.f32 %v5081_v32, %v16939_v29  ;;  %v4697_v50 = vpop.f32.mrb[119].mxu0  ;;  %v5083_v19 = vpop.f32.mrb[119].mxu1 }
 0x50f   : > { %v11873_v63 = vadd.f32 %v4697_v50, %v16942_v24  ;;  %v11937_v59 = vadd.f32 %v5083_v19, %v16947_v6  ;;  %v9610_v30 = vpop.permute.xlu1 %9609  ;;  %6202 = vmatmul.mubr.bf16.gmra.mrb[160].mxu0 %v20164_v33  ;;  %6588 = vmatmul.mubr.bf16.gmra.mrb[160].mxu1 %v20164_v33  ;;  %v17414_v39 = vpack.c.bf16 %v11872_v53, %v11870_v46 }
 0x510   : > { %v17416_v52 = vpack.c.bf16 %v11936_v34, %v11934_v27  ;;  %11374 = vst.msk [vmem:[%s15680_s26 + $0x3f4] sm:$0xf] %vm6972_vm0, %v9610_v30  ;;  %7008 = vxpose.xlu0.c.b16.cont [4/8] (narrow) %v17071_v21, 64  ;;  %6211 = vmatprep.mubr.bf16.mxu0 %v20165_v1 }
 0x511   : > { %v8064_v32 = vpop.permute.xlu0 %8063  ;;  %v17422_v50 = vpack.c.bf16 %v11873_v63, %v11871_v36  ;;  %v17424_v19 = vpack.c.bf16 %v11937_v59, %v11935_v10  ;;  %6597 = vmatprep.mubr.bf16.mxu1 %v20165_v1  ;;  %7400 = vrot.lane.b32.xlu1 %v17414_v39, %s13581_s4 }
 0x512   : > { %10927 = vst.msk [vmem:[%s15680_s26 + $0x1f8] sm:$0xf] %vm6972_vm0, %v8064_v32  ;;  %v4701_v46 = vpop.f32.mrb[120].mxu0  ;;  %v5087_v27 = vpop.f32.mrb[120].mxu1 }
 0x513   : > { %20166 = vst [vmem:[#allocation38_spill] sm:$0xff] %v17422_v50  ;;  %v7292_v30 = vpop.permute.xlu1 %7291  ;;  %v4703_v53 = vpop.f32.mrb[121].mxu0  ;;  %v11874_v34 = vadd.f32 %v4701_v46, %v16936_v22  ;;  %v11938_v59 = vadd.f32 %v5087_v27, %v16939_v29 }
 0x514   : > { %10704 = vst.msk [vmem:[%s15680_s26 + $0xfc] sm:$0xf] %vm6972_vm0, %v7292_v30  ;;  %v5089_v21 = vpop.f32.mrb[121].mxu1  ;;  %7009 = vxpose.xlu0.c.b16.cont [5/8] (narrow) %v17107_v37, 64  ;;  %v4705_v10 = vpop.f32.mrb[122].mxu0  ;;  %v11875_v33 = vadd.f32 %v4703_v53, %v16942_v24 }
 0x515   : > { %v9612_v36 = vpop.permute.xlu0 %9611  ;;  %v5091_v63 = vpop.f32.mrb[122].mxu1  ;;  %v11876_v32 = vadd.f32 %v4705_v10, %v16936_v22  ;;  %8948 = vrot.lane.b32.xlu1 %v17416_v52, %s13581_s4  ;;  %v11939_v37 = vadd.f32 %v5089_v21, %v16947_v6  ;;  %v20168_v10 = vld [vmem:[#allocation40_spill] sm:$0xff] }
 0x516   : > { %11375 = vst.msk [vmem:[%s15680_s26 + $0x3f8] sm:$0xf] %vm6972_vm0, %v9612_v36  ;;  %v11940_v1 = vadd.f32 %v5091_v63, %v16939_v29  ;;  %v4707_v30 = vpop.f32.mrb[123].mxu0  ;;  %v5093_v61 = vpop.f32.mrb[123].mxu1 }
 0x517   : > { %v11877_v46 = vadd.f32 %v4707_v30, %v16942_v24  ;;  %v11941_v36 = vadd.f32 %v5093_v61, %v16947_v6  ;;  %v8840_v0 = vpop.permute.xlu1 %8839  ;;  %6212 = vmatmul.mubr.bf16.gmra.mrb[164].mxu0 %v20167_v9  ;;  %6598 = vmatmul.mubr.bf16.gmra.mrb[164].mxu1 %v20167_v9  ;;  %v17448_v27 = vpack.c.bf16 %v11876_v32, %v11874_v34 }
 0x518   : > { %v17450_v53 = vpack.c.bf16 %v11940_v1, %v11938_v59  ;;  %11152 = vst.msk [vmem:[%s15680_s26 + $0x2fc] sm:$0xf] %vm6972_vm0, %v8840_v0  ;;  %7010 = vxpose.xlu0.c.b16.cont [6/8] (narrow) %v17143_v20, 64  ;;  %6221 = vmatprep.mubr.bf16.mxu0 %v20168_v10 }
 0x519   : > { %v17456_v21 = vpack.c.bf16 %v11877_v46, %v11875_v33  ;;  %v17458_v63 = vpack.c.bf16 %v11941_v36, %v11939_v37  ;;  %6607 = vmatprep.mubr.bf16.mxu1 %v20168_v10  ;;  %8174 = vrot.lane.b32.xlu1 %v17422_v50, %s13581_s4 }
 0x51a   : > { %v4711_v61 = vpop.f32.mrb[124].mxu0  ;;  %v5097_v9 = vpop.f32.mrb[124].mxu1 }
 0x51b   : > { %v8066_v34 = vpop.permute.xlu1 %8065  ;;  %v4713_v59 = vpop.f32.mrb[125].mxu0  ;;  %v11878_v20 = vadd.f32 %v4711_v61, %v16936_v22  ;;  %v11942_v1 = vadd.f32 %v5097_v9, %v16939_v29 }
 0x51c   : > { %10928 = vst.msk [vmem:[%s15680_s26 + $0x1fc] sm:$0xf] %vm6972_vm0, %v8066_v34  ;;  %v5099_v0 = vpop.f32.mrb[125].mxu1  ;;  %7011 = vxpose.xlu0.c.b16.cont [7/8] (narrow) %v17179_v31, 64  ;;  %v4715_v33 = vpop.f32.mrb[126].mxu0  ;;  %v11879_v30 = vadd.f32 %v4713_v59, %v16942_v24 }
 0x51d   : > { %v5101_v32 = vpop.f32.mrb[126].mxu1  ;;  %v11880_v37 = vadd.f32 %v4715_v33, %v16936_v22  ;;  %v4717_v36 = vpop.f32.mrb[127].mxu0  ;;  %9722 = vrot.lane.b32.xlu1 %v17424_v19, %s13581_s4  ;;  %v11943_v31 = vadd.f32 %v5099_v0, %v16947_v6 }
 0x51e   : > { %v11944_v46 = vadd.f32 %v5101_v32, %v16939_v29  ;;  %v5103_v10 = vpop.f32.mrb[127].mxu1  ;;  %v11881_v61 = vadd.f32 %v4717_v36, %v16942_v24  ;;  %v20181_v32 = vld [vmem:[#allocation112_spill] sm:$0xff]  ;;  %v20184_v36 = vld [vmem:[#allocation25_spill] sm:$0xff] }
 0x51f   : > { %v11945_v34 = vadd.f32 %v5103_v10, %v16947_v6  ;;  %v9614_v50 = vpop.permute.xlu1 %9613  ;;  %6222 = vmatmul.mubr.bf16.gmra.mrb[168].mxu0 %v20060_v40  ;;  %6608 = vmatmul.mubr.bf16.gmra.mrb[168].mxu1 %v20060_v40  ;;  %v17478_v9 = vpack.c.bf16 %v11880_v37, %v11878_v20  ;;  %v20179_v20 = vld [vmem:[#allocation113_spill] sm:$0xff] }
 0x520   : > { %v17480_v22 = vpack.c.bf16 %v11944_v46, %v11942_v1  ;;  %11376 = vst.msk [vmem:[%s15680_s26 + $0x3fc] sm:$0xf] %vm6972_vm0, %v9614_v50  ;;  %7012 = vxpose.xlu0.c.b16.end [8/8] (narrow) %v17215_v16, 64  ;;  %6231 = vmatprep.mubr.bf16.mxu0 %v20061_v38  ;;  %v17486_v29 = vpack.c.bf16 %v11881_v61, %v11879_v30  ;;  %v20176_v50 = vld [vmem:[#allocation23_spill] sm:$0xff]  ;;  %v20182_v30 = vld [vmem:[#allocation116_spill] sm:$0xff] }
 0x521   : > { %v17488_v24 = vpack.c.bf16 %v11945_v34, %v11943_v31  ;;  %6617 = vmatprep.mubr.bf16.mxu1 %v20061_v38  ;;  %v20186_v61 = vld [vmem:[#allocation19_spill] sm:$0xff]  ;;  %v20187_v34 = vld [vmem:[#allocation24_spill] sm:$0xff] }
 0x523   : > { %v17491_v6 = vpop.permute.xlu1 %7376 }
 0x524   : > { %8551 = vxpose.xlu0.c.b16.start [1/8] (narrow) %v16965_v13, 64 }
 0x527   : > { %6232 = vmatmul.mubr.bf16.gmra.mrb[172].mxu0 %v20063_v42  ;;  %6618 = vmatmul.mubr.bf16.gmra.mrb[172].mxu1 %v20063_v42  ;;  %v17496_v40 = vpop.permute.xlu1 %8924 }
 0x528   : > { %8552 = vxpose.xlu0.c.b16.cont [2/8] (narrow) %v17001_v17, 64  ;;  %6241 = vmatprep.mubr.bf16.mxu0 %v20065_v55 }
 0x529   : > { %6627 = vmatprep.mubr.bf16.mxu1 %v20065_v55 }
 0x52b   : > { %v17501_v16 = vpop.permute.xlu1 %8150 }
 0x52c   : > { %8553 = vxpose.xlu0.c.b16.cont [3/8] (narrow) %v17037_v49, 64 }
 0x52f   : > { %6242 = vmatmul.mubr.bf16.gmra.mrb[176].mxu0 %v20067_v57  ;;  %6628 = vmatmul.mubr.bf16.gmra.mrb[176].mxu1 %v20067_v57  ;;  %v17506_v38 = vpop.permute.xlu1 %9698 }
 0x530   : > { %8554 = vxpose.xlu0.c.b16.cont [4/8] (narrow) %v17073_v58, 64  ;;  %6251 = vmatprep.mubr.bf16.mxu0 %v20068_v4 }
 0x531   : > { %6637 = vmatprep.mubr.bf16.mxu1 %v20068_v4  ;;  %v17524_v4 = vpop.permute.xlu0 %7374 }
 0x533   : > { %v17511_v42 = vpop.permute.xlu1 %7380 }
 0x534   : > { %8555 = vxpose.xlu0.c.b16.cont [5/8] (narrow) %v17109_v18, 64 }
 0x537   : > { %6252 = vmatmul.mubr.bf16.gmra.mrb[180].mxu0 %v20069_v35  ;;  %6638 = vmatmul.mubr.bf16.gmra.mrb[180].mxu1 %v20069_v35  ;;  %v17516_v55 = vpop.permute.xlu1 %8928  ;;  %v17534_v35 = vpop.permute.xlu0 %8922 }
 0x538   : > { %8556 = vxpose.xlu0.c.b16.cont [6/8] (narrow) %v17145_v11, 64  ;;  %6261 = vmatprep.mubr.bf16.mxu0 %v20070_v44 }
 0x539   : > { %6647 = vmatprep.mubr.bf16.mxu1 %v20070_v44 }
 0x53b   : > { %v17521_v57 = vpop.permute.xlu1 %8154  ;;  %v17545_v17 = vpop.permute.xlu0 %8148 }
 0x53c   : > { %8557 = vxpose.xlu0.c.b16.cont [7/8] (narrow) %v17181_v15, 64 }
 0x53f   : > { %6262 = vmatmul.mubr.bf16.gmra.mrb[184].mxu0 %v20072_v48  ;;  %6648 = vmatmul.mubr.bf16.gmra.mrb[184].mxu1 %v20072_v48  ;;  %v17528_v13 = vpop.permute.xlu1 %9702 }
 0x540   : > { %8558 = vxpose.xlu0.c.b16.end [8/8] (narrow) %v17217_v54, 64  ;;  %6271 = vmatprep.mubr.bf16.mxu0 %v20073_v26 }
 0x541   : > { %6657 = vmatprep.mubr.bf16.mxu1 %v20073_v26  ;;  %7021 = vxpose.xlu1.c.b16.start [1/8] (narrow) %v17251_v60, 64 }
 0x543   : > { %v17536_v44 = vpop.permute.xlu1 %7384 }
 0x544   : > { %7777 = vxpose.xlu0.c.b16.start [1/8] (narrow) %v16972_v14, 64  ;;  %v17552_v14 = vpop.permute.xlu0 %9696 }
 0x545   : > { %7022 = vxpose.xlu1.c.b16.cont [2/8] (narrow) %v17283_v23, 64 }
 0x547   : > { %6272 = vmatmul.mubr.bf16.gmra.mrb[188].mxu0 %v20075_v28  ;;  %6658 = vmatmul.mubr.bf16.gmra.mrb[188].mxu1 %v20075_v28  ;;  %v17542_v48 = vpop.permute.xlu1 %8932 }
 0x548   : > { %7778 = vxpose.xlu0.c.b16.cont [2/8] (narrow) %v17007_v7, 64  ;;  %v17561_v7 = vpop.permute.xlu0 %7378 }
 0x549   : > { %7023 = vxpose.xlu1.c.b16.cont [3/8] (narrow) %v17315_v47, 64 }
 0x54b   : > { %v17548_v26 = vpop.permute.xlu1 %8158 }
 0x54c   : > { %7779 = vxpose.xlu0.c.b16.cont [3/8] (narrow) %v17043_v8, 64  ;;  %v17568_v8 = vpop.permute.xlu0 %8926 }
 0x54d   : > { %7024 = vxpose.xlu1.c.b16.cont [4/8] (narrow) %v17347_v5, 64 }
 0x54f   : > { %v17554_v49 = vpop.permute.xlu1 %9706 }
 0x550   : > { %7780 = vxpose.xlu0.c.b16.cont [4/8] (narrow) %v17079_v12, 64 }
 0x551   : > { %7025 = vxpose.xlu1.c.b16.cont [5/8] (narrow) %v17380_v41, 64 }
 0x553   : > { %v17558_v28 = vpop.permute.xlu1 %7388 }
 0x554   : > { %7781 = vxpose.xlu0.c.b16.cont [5/8] (narrow) %v17115_v43, 64  ;;  %v17577_v43 = vpop.permute.xlu0 %8152 }
 0x555   : > { %7026 = vxpose.xlu1.c.b16.cont [6/8] (narrow) %v17414_v39, 64  ;;  %v20174_v39 = vld [vmem:[#allocation109_spill] sm:$0xff] }
 0x557   : > { %v17564_v58 = vpop.permute.xlu1 %8936 }
 0x558   : > { %7782 = vxpose.xlu0.c.b16.cont [6/8] (narrow) %v17151_v45, 64  ;;  %v17584_v45 = vpop.permute.xlu0 %9700 }
 0x559   : > { %7027 = vxpose.xlu1.c.b16.cont [7/8] (narrow) %v17448_v27, 64 }
 0x55b   : > { %v17570_v18 = vpop.permute.xlu1 %8162 }
 0x55c   : > { %7783 = vxpose.xlu0.c.b16.cont [7/8] (narrow) %v17187_v56, 64  ;;  %v17592_v54 = vpop.permute.xlu0 %7382 }
 0x55d   : > { %7028 = vxpose.xlu1.c.b16.end [8/8] (narrow) %v17478_v9, 64 }
 0x55f   : > { %v17574_v12 = vpop.permute.xlu1 %9710 }
 0x560   : > { %20169 = vst [vmem:[#allocation44_spill] sm:$0xff] %v17574_v12  ;;  %7784 = vxpose.xlu0.c.b16.end [8/8] (narrow) %v17223_v25, 64  ;;  %v20172_v25 = vld [vmem:[#allocation110_spill] sm:$0xff]  ;;  %v17597_v5 = vpop.permute.xlu0 %8930 }
 0x561   : > { %7404 = vrot.lane.b32.xlu1 %v17478_v9, %s13581_s4 }
 0x563   : > { %v17581_v11 = vpop.permute.xlu1 %7392 }
 0x564   : > { %9325 = vxpose.xlu0.c.b16.start [1/8] (narrow) %v16974_v2, 64  ;;  %v17603_v59 = vpop.permute.xlu0 %8156 }
 0x567   : > { %v17586_v15 = vpop.permute.xlu1 %8940 }
 0x568   : > { %20170 = vst [vmem:[#allocation79_spill] sm:$0xff] %v17586_v15  ;;  %9326 = vxpose.xlu0.c.b16.cont [2/8] (narrow) %v17009_v62, 64  ;;  %v20177_v62 = vld [vmem:[#allocation93_spill] sm:$0xff] }
 0x56b   : > { %v17589_v56 = vpop.permute.xlu1 %8166 }
 0x56c   : > { %20171 = vst [vmem:[#allocation42_spill] sm:$0xff] %v17589_v56  ;;  %9327 = vxpose.xlu0.c.b16.cont [3/8] (narrow) %v17045_v3, 64  ;;  %v17608_v3 = vpop.permute.xlu0 %9704 }
 0x56f   : > { %v17595_v23 = vpop.permute.xlu1 %9714 }
 0x570   : > { %9328 = vxpose.xlu0.c.b16.cont [4/8] (narrow) %v20172_v25, 64  ;;  %20173 = vst [vmem:[#allocation83_spill] sm:$0xff] %v17595_v23  ;;  %v17614_v1 = vpop.permute.xlu0 %7386 }
 0x573   : > { %v17600_v2 = vpop.permute.xlu1 %7396 }
 0x574   : > { %9329 = vxpose.xlu0.c.b16.cont [5/8] (narrow) %v20174_v39, 64  ;;  %20175 = vst [vmem:[#allocation48_spill] sm:$0xff] %v17600_v2  ;;  %v17621_v46 = vpop.permute.xlu0 %8934 }
 0x577   : > { %v17606_v0 = vpop.permute.xlu1 %8944 }
 0x578   : > { %9330 = vxpose.xlu0.c.b16.cont [6/8] (narrow) %v20176_v50, 64  ;;  %20178 = vst [vmem:[#allocation82_spill] sm:$0xff] %v17606_v0  ;;  %v17629_v31 = vpop.permute.xlu0 %8160  ;;  %v5234_v50 = vld [vmem:[%s20192_s27] sm:$0xf]  ;;  %s13484_s27 = sshll.u32 %s13582_s25, 4  ;;  %s13485_s27 = int_to_ptr.vmem [resolvable:$false] %s13484_s27 }
 0x579   : > { %s13486_s29 = scalar_lea.vmem %s13485_s27, 16384  ;;  %p13487_p8 = scmp.lt.s32.totalorder %s19172_s8, %s13485_s27 }
 0x57a   : > { %p13488_p0 = scmp.lt.s32.totalorder %s13486_s29, %s13480_s7 }
 0x57b   : > { %v17611_v33 = vpop.permute.xlu1 %8170 }
 0x57c   : > { %9331 = vxpose.xlu0.c.b16.cont [7/8] (narrow) %v20177_v62, 64  ;;  %20180 = vst [vmem:[#allocation46_spill] sm:$0xff] %v17611_v33  ;;  %v17638_v25 = vpop.permute.xlu0 %9708  ;;  %v20193_v62 = vld [vmem:[#allocation84_spill] sm:$0xff]  ;;  %v20198_v33 = vld [vmem:[#allocation102_spill] sm:$0xff]  ;;  %p13489_p5 = por %p13488_p0, %p13487_p8 }
 0x57d   : > { %20190 = vst [vmem:[#allocation86_spill] sm:$0xff] %v17638_v25 }
 0x57e   : > { %p13490_p10 = pnand %p13489_p5, %p13483_p4 }
 0x57f   : > { %v17617_v37 = vpop.permute.xlu1 %9718 }
 0x580   : > { %9332 = vxpose.xlu0.c.b16.end [8/8] (narrow) %v20179_v20, 64  ;;  %20183 = vst [vmem:[#allocation56_spill] sm:$0xff] %v17617_v37  ;;  %v7013_v39 = vpop.trf.xlu0  ;;  %v17652_v20 = vrot.slane %v5234_v50, %v20193_v62  ;;  %v20196_v37 = vld [vmem:[#allocation54_spill] sm:$0xff] }
 0x581   : > { %v17662_v23 = vrot.slane %v5234_v50, %v20196_v37 }
 0x583   : > { %v17626_v10 = vpop.permute.xlu1 %7400 }
 0x584   : > { %8567 = vxpose.xlu1.c.b16.start [1/8] (narrow) %v20181_v32, 64  ;;  %20185 = vst [vmem:[#allocation52_spill] sm:$0xff] %v17626_v10 }
 0x587   : > { %v17634_v9 = vpop.permute.xlu1 %8948 }
 0x588   : > { %8568 = vxpose.xlu1.c.b16.cont [2/8] (narrow) %v20182_v30, 64  ;;  %20188 = vst [vmem:[#allocation64_spill] sm:$0xff] %v17634_v9 }
 0x589   : > { %7390 = vrot.lane.b32.xlu0 %v17251_v60, %s13581_s4  ;;  %v20189_v60 = vld [vmem:[#allocation89_spill] sm:$0xff] }
 0x58c   : > { %8569 = vxpose.xlu1.c.b16.cont [3/8] (narrow) %v20184_v36, 64 }
 0x58d   : > { %8938 = vrot.lane.b32.xlu0 %v20181_v32, %s13581_s4 }
 0x590   : > { %8570 = vxpose.xlu1.c.b16.cont [4/8] (narrow) %v17349_v51, 64  ;;  %v17643_v51 = vpop.permute.xlu1 %8174 }
 0x591   : > { %8164 = vrot.lane.b32.xlu0 %v20186_v61, %s13581_s4  ;;  %20191 = vst [vmem:[#allocation60_spill] sm:$0xff] %v17643_v51 }
 0x594   : > { %8571 = vxpose.xlu1.c.b16.cont [5/8] (narrow) %v20187_v34, 64  ;;  %v17664_v51 = vpop.permute.xlu1 %9722 }
 0x595   : > { %9712 = vrot.lane.b32.xlu0 %v20189_v60, %s13581_s4  ;;  %20197 = vst [vmem:[#allocation72_spill] sm:$0xff] %v17664_v51 }
 0x598   : > { %8572 = vxpose.xlu1.c.b16.cont [6/8] (narrow) %v17416_v52, 64  ;;  %v20194_v52 = vld [vmem:[#allocation50_spill] sm:$0xff] }
 0x599   : > { %7394 = vrot.lane.b32.xlu0 %v17315_v47, %s13581_s4  ;;  %v17655_v32 = vrot.slane %v5234_v50, %v20194_v52  ;;  %v20195_v47 = vld [vmem:[#allocation81_spill] sm:$0xff] }
 0x59a   : > { %v17659_v30 = vrot.slane %v5234_v50, %v20195_v47 }
 0x59c   : > { %8573 = vxpose.xlu1.c.b16.cont [7/8] (narrow) %v17450_v53, 64 }
 0x59d   : > { %8942 = vrot.lane.b32.xlu0 %v20184_v36, %s13581_s4  ;;  %v17668_v36 = vpop.trf.xlu0 }
 0x5a0   : > { %8574 = vxpose.xlu1.c.b16.end [8/8] (narrow) %v17480_v22, 64 }
 0x5a1   : > { %8168 = vrot.lane.b32.xlu0 %v20198_v33, %s13581_s4 }
 0x5a2   : > { %v6123_v62 = vpop.f32.mrb[128].mxu0  ;;  %v6509_v56 = vpop.f32.mrb[128].mxu1 }
 0x5a3   : > { %v11946_v52 = vadd.f32 %v6123_v62, %v17652_v20  ;;  %v12010_v9 = vadd.f32 %v6509_v56, %v17655_v32  ;;  %v6125_v0 = vpop.f32.mrb[129].mxu0  ;;  %v6511_v47 = vpop.f32.mrb[129].mxu1 }
 0x5a4   : > { %v11947_v37 = vadd.f32 %v6125_v0, %v17659_v30  ;;  %v12011_v50 = vadd.f32 %v6511_v47, %v17662_v23  ;;  %8952 = vrot.lane.b32.xlu1 %v17480_v22, %s13581_s4  ;;  %v6127_v62 = vpop.f32.mrb[130].mxu0  ;;  %v6513_v51 = vpop.f32.mrb[130].mxu1  ;;  %v20202_v47 = vld [vmem:[#allocation18_spill] sm:$0xff] }
 0x5a5   : > { %v17684_v56 = vpack.c.bf16 %v11946_v52, %v11946_v52  ;;  %v17686_v15 = vpack.c.bf16 %v12010_v9, %v12010_v9  ;;  %v11948_v10 = vadd.f32 %v6127_v62, %v17652_v20  ;;  %v12012_v0 = vadd.f32 %v6513_v51, %v17655_v32  ;;  %9716 = vrot.lane.b32.xlu0 %v20202_v47, %s13581_s4  ;;  %v6129_v12 = vpop.f32.mrb[131].mxu0  ;;  %v6515_v25 = vpop.f32.mrb[131].mxu1 }
 0x5a6   : > { %v17692_v22 = vpack.c.bf16 %v11947_v37, %v11947_v37  ;;  %v17694_v2 = vpack.c.bf16 %v12011_v50, %v12011_v50  ;;  %v11949_v52 = vadd.f32 %v6129_v12, %v17659_v30  ;;  %v12013_v9 = vadd.f32 %v6515_v25, %v17662_v23 }
 0x5a7   : > { %20200 = vst [vmem:[#allocation85_spill] sm:$0xff] %v17684_v56  ;;  %20201 = vst [vmem:[#allocation68_spill] sm:$0xff] %v17686_v15  ;;  %v17704_v51 = vpack.c.bf16 %v11948_v10, %v11948_v10  ;;  %v17706_v62 = vpack.c.bf16 %v12012_v0, %v12012_v0  ;;  %v7029_v37 = vpop.trf.xlu1  ;;  %v17726_v10 = vpop.trf.xlu0 }
 0x5a8   : > { %20203 = vst [vmem:[#allocation88_spill] sm:$0xff] %v17692_v22  ;;  %20204 = vst [vmem:[#allocation97_spill] sm:$0xff] %v17694_v2  ;;  %v17714_v12 = vpack.c.bf16 %v11949_v52, %v11949_v52  ;;  %v17716_v25 = vpack.c.bf16 %v12013_v9, %v12013_v9  ;;  %v10633_v50 = vcombine.low %v7013_v39, %v7029_v37 }
 0x5a9   : > { %7197 = vst.msk [vmem:[%s17677_s10] sm:$0xf] %vm6972_vm0, %v17684_v56  ;;  %11089 = vst.msk [vmem:[%s17677_s10 + $0x200] sm:$0xf] %vm6972_vm0, %v17686_v15  ;;  %v10634_v56 = vcombine.high %v7013_v39, %v7029_v37  ;;  %7398 = vrot.lane.b32.xlu0 %v17380_v41, %s13581_s4 }
 0x5aa   : > { %20205 = vst [vmem:[#allocation91_spill] sm:$0xff] %v17704_v51  ;;  %20206 = vst [vmem:[#allocation104_spill] sm:$0xff] %v17706_v62  ;;  %v6133_v0 = vpop.f32.mrb[132].mxu0  ;;  %v6519_v52 = vpop.f32.mrb[132].mxu1 }
 0x5ab   : > { %10865 = vst.msk [vmem:[%s17677_s10 + $0x100] sm:$0xf] %vm6972_vm0, %v17692_v22  ;;  %11313 = vst.msk [vmem:[%s17677_s10 + $0x300] sm:$0xf] %vm6972_vm0, %v17694_v2  ;;  %v11950_v39 = vadd.f32 %v6133_v0, %v17652_v20  ;;  %v12014_v41 = vadd.f32 %v6519_v52, %v17655_v32  ;;  %v6135_v9 = vpop.f32.mrb[133].mxu0  ;;  %v6521_v37 = vpop.f32.mrb[133].mxu1 }
 0x5ac   : > { %20207 = vst [vmem:[#allocation106_spill] sm:$0xff] %v17714_v12  ;;  %20208 = vst [vmem:[#allocation111_spill] sm:$0xff] %v17716_v25 }
 0x5ad   : > { %7198 = vst.msk [vmem:[%s17677_s10 + $0x4] sm:$0xf] %vm6972_vm0, %v17704_v51  ;;  %11090 = vst.msk [vmem:[%s17677_s10 + $0x204] sm:$0xf] %vm6972_vm0, %v17706_v62  ;;  %v6137_v62 = vpop.f32.mrb[134].mxu0  ;;  %v6523_v51 = vpop.f32.mrb[134].mxu1  ;;  %v17744_v2 = vpack.c.bf16 %v11950_v39, %v11950_v39  ;;  %v17746_v22 = vpack.c.bf16 %v12014_v41, %v12014_v41  ;;  %8946 = vrot.lane.b32.xlu0 %v20187_v34, %s13581_s4 }
 0x5ae   : > { %10866 = vst.msk [vmem:[%s17677_s10 + $0x104] sm:$0xf] %vm6972_vm0, %v17714_v12  ;;  %11314 = vst.msk [vmem:[%s17677_s10 + $0x304] sm:$0xf] %vm6972_vm0, %v17716_v25  ;;  %v11951_v12 = vadd.f32 %v6135_v9, %v17659_v30  ;;  %v12015_v25 = vadd.f32 %v6521_v37, %v17662_v23  ;;  %v6139_v0 = vpop.f32.mrb[135].mxu0  ;;  %v6525_v52 = vpop.f32.mrb[135].mxu1 }
 0x5af   : > { %7077 = vst [vmem:[%s17736_s23] sm:$0xff] %v10633_v50  ;;  %7078 = vst [vmem:[%s17736_s23 + $0x8] sm:$0xff] %v10634_v56  ;;  %v11952_v56 = vadd.f32 %v6137_v62, %v17652_v20  ;;  %v12016_v50 = vadd.f32 %v6523_v51, %v17655_v32  ;;  %v11953_v39 = vadd.f32 %v6139_v0, %v17659_v30  ;;  %v7030_v41 = vpop.trf.xlu1 }
 0x5b0   : > { %20209 = vst [vmem:[#allocation114_spill] sm:$0xff] %v17744_v2  ;;  %20210 = vst [vmem:[#allocation90_spill] sm:$0xff] %v17746_v22  ;;  %v17752_v9 = vpack.c.bf16 %v11951_v12, %v11951_v12  ;;  %v17754_v37 = vpack.c.bf16 %v12015_v25, %v12015_v25  ;;  %v12017_v62 = vadd.f32 %v6525_v52, %v17662_v23 }
 0x5b1   : > { %7199 = vst.msk [vmem:[%s17677_s10 + $0x8] sm:$0xf] %vm6972_vm0, %v17744_v2  ;;  %11091 = vst.msk [vmem:[%s17677_s10 + $0x208] sm:$0xf] %vm6972_vm0, %v17746_v22  ;;  %v17764_v34 = vpack.c.bf16 %v11952_v56, %v11952_v56  ;;  %v17766_v51 = vpack.c.bf16 %v12016_v50, %v12016_v50  ;;  %v10635_v12 = vcombine.low %v17668_v36, %v7030_v41  ;;  %v20217_v56 = vld [vmem:[#allocation20_spill] sm:$0xff] }
 0x5b2   : > { %20211 = vst [vmem:[#allocation117_spill] sm:$0xff] %v17752_v9  ;;  %20212 = vst [vmem:[#allocation118_spill] sm:$0xff] %v17754_v37  ;;  %v10636_v25 = vcombine.high %v17668_v36, %v7030_v41  ;;  %v17776_v0 = vpack.c.bf16 %v11953_v39, %v11953_v39  ;;  %v17778_v52 = vpack.c.bf16 %v12017_v62, %v12017_v62  ;;  %8172 = vrot.lane.b32.xlu0 %v20217_v56, %s13581_s4  ;;  %v17790_v36 = vpop.trf.xlu0  ;;  %v6143_v50 = vpop.f32.mrb[136].mxu0 }
 0x5b3   : > { %20213 = vst [vmem:[#allocation92_spill] sm:$0xff] %v17764_v34  ;;  %20214 = vst [vmem:[#allocation119_spill] sm:$0xff] %v17766_v51  ;;  %v6529_v39 = vpop.f32.mrb[136].mxu1  ;;  %v11954_v62 = vadd.f32 %v6143_v50, %v17652_v20 }
 0x5b4   : > { %10867 = vst.msk [vmem:[%s17677_s10 + $0x108] sm:$0xf] %vm6972_vm0, %v17752_v9  ;;  %11315 = vst.msk [vmem:[%s17677_s10 + $0x308] sm:$0xf] %vm6972_vm0, %v17754_v37  ;;  %v12018_v41 = vadd.f32 %v6529_v39, %v17655_v32  ;;  %v20219_v39 = vld [vmem:[#allocation80_spill] sm:$0xff] }
 0x5b5   : > { %20215 = vst [vmem:[#allocation87_spill] sm:$0xff] %v17776_v0  ;;  %20216 = vst [vmem:[#allocation120_spill] sm:$0xff] %v17778_v52 }
 0x5b6   : > { %7200 = vst.msk [vmem:[%s17677_s10 + $0xc] sm:$0xf] %vm6972_vm0, %v17764_v34  ;;  %11092 = vst.msk [vmem:[%s17677_s10 + $0x20c] sm:$0xf] %vm6972_vm0, %v17766_v51  ;;  %v6145_v51 = vpop.f32.mrb[137].mxu0  ;;  %v6531_v34 = vpop.f32.mrb[137].mxu1  ;;  %v17804_v22 = vpack.c.bf16 %v12018_v41, %v12018_v41  ;;  %9720 = vrot.lane.b32.xlu0 %v20219_v39, %s13581_s4 }
 0x5b7   : > { %7079 = vst [vmem:[%s17736_s23 + $0x10] sm:$0xff] %v10635_v12  ;;  %7080 = vst [vmem:[%s17736_s23 + $0x18] sm:$0xff] %v10636_v25  ;;  %v11955_v37 = vadd.f32 %v6145_v51, %v17659_v30  ;;  %v12019_v12 = vadd.f32 %v6531_v34, %v17662_v23  ;;  %v6147_v25 = vpop.f32.mrb[138].mxu0  ;;  %v6533_v9 = vpop.f32.mrb[138].mxu1 }
 0x5b8   : > { %10868 = vst.msk [vmem:[%s17677_s10 + $0x10c] sm:$0xf] %vm6972_vm0, %v17776_v0  ;;  %11316 = vst.msk [vmem:[%s17677_s10 + $0x30c] sm:$0xf] %vm6972_vm0, %v17778_v52  ;;  %v17802_v0 = vpack.c.bf16 %v11954_v62, %v11954_v62  ;;  %v11956_v52 = vadd.f32 %v6147_v25, %v17652_v20  ;;  %v12020_v50 = vadd.f32 %v6533_v9, %v17655_v32  ;;  %v6149_v51 = vpop.f32.mrb[139].mxu0  ;;  %v6535_v2 = vpop.f32.mrb[139].mxu1 }
 0x5b9   : > { %v17810_v34 = vpack.c.bf16 %v11955_v37, %v11955_v37  ;;  %v17812_v15 = vpack.c.bf16 %v12019_v12, %v12019_v12  ;;  %v11957_v62 = vadd.f32 %v6149_v51, %v17659_v30  ;;  %v12021_v41 = vadd.f32 %v6535_v2, %v17662_v23  ;;  %v7031_v25 = vpop.trf.xlu1  ;;  %11093 = vst.msk [vmem:[%s17677_s10 + $0x210] sm:$0xf] %vm6972_vm0, %v17804_v22 }
 0x5ba   : > { %20218 = vst [vmem:[#allocation94_spill] sm:$0xff] %v17802_v0  ;;  %7201 = vst.msk [vmem:[%s17677_s10 + $0x10] sm:$0xf] %vm6972_vm0, %v17802_v0  ;;  %v17822_v9 = vpack.c.bf16 %v11956_v52, %v11956_v52  ;;  %v17824_v37 = vpack.c.bf16 %v12020_v50, %v12020_v50  ;;  %v10637_v12 = vcombine.low %v17726_v10, %v7031_v25  ;;  %7402 = vrot.lane.b32.xlu0 %v17448_v27, %s13581_s4  ;;  %v6153_v52 = vpop.f32.mrb[140].mxu0  ;;  %v6539_v50 = vpop.f32.mrb[140].mxu1 }
 0x5bb   : > { %20220 = vst [vmem:[#allocation121_spill] sm:$0xff] %v17810_v34  ;;  %20221 = vst [vmem:[#allocation122_spill] sm:$0xff] %v17812_v15  ;;  %v10638_v51 = vcombine.high %v17726_v10, %v7031_v25  ;;  %v17834_v2 = vpack.c.bf16 %v11957_v62, %v11957_v62  ;;  %v17836_v0 = vpack.c.bf16 %v12021_v41, %v12021_v41  ;;  %v17848_v10 = vpop.trf.xlu0  ;;  %v6155_v25 = vpop.f32.mrb[141].mxu0 }
 0x5bc   : > { %20222 = vst [vmem:[#allocation123_spill] sm:$0xff] %v17822_v9  ;;  %20223 = vst [vmem:[#allocation96_spill] sm:$0xff] %v17824_v37  ;;  %v11958_v62 = vadd.f32 %v6153_v52, %v17652_v20  ;;  %v12022_v41 = vadd.f32 %v6539_v50, %v17655_v32  ;;  %v11959_v27 = vadd.f32 %v6155_v25, %v17659_v30 }
 0x5bd   : > { %10869 = vst.msk [vmem:[%s17677_s10 + $0x110] sm:$0xf] %vm6972_vm0, %v17810_v34  ;;  %11317 = vst.msk [vmem:[%s17677_s10 + $0x310] sm:$0xf] %vm6972_vm0, %v17812_v15 }
 0x5be   : > { %20224 = vst [vmem:[#allocation124_spill] sm:$0xff] %v17834_v2  ;;  %20225 = vst [vmem:[#allocation95_spill] sm:$0xff] %v17836_v0  ;;  %v17862_v15 = vpack.c.bf16 %v12022_v41, %v12022_v41  ;;  %8950 = vrot.lane.b32.xlu0 %v17450_v53, %s13581_s4 }
 0x5bf   : > { %7202 = vst.msk [vmem:[%s17677_s10 + $0x14] sm:$0xf] %vm6972_vm0, %v17822_v9  ;;  %11094 = vst.msk [vmem:[%s17677_s10 + $0x214] sm:$0xf] %vm6972_vm0, %v17824_v37  ;;  %v6541_v37 = vpop.f32.mrb[141].mxu1 }
 0x5c0   : > { %7081 = vst [vmem:[%s17736_s23 + $0x20] sm:$0xff] %v10637_v12  ;;  %7082 = vst [vmem:[%s17736_s23 + $0x28] sm:$0xff] %v10638_v51  ;;  %v12023_v12 = vadd.f32 %v6541_v37, %v17662_v23  ;;  %v6157_v51 = vpop.f32.mrb[142].mxu0  ;;  %v6543_v9 = vpop.f32.mrb[142].mxu1  ;;  %v17868_v37 = vpack.c.bf16 %v11959_v27, %v11959_v27 }
 0x5c1   : > { %10870 = vst.msk [vmem:[%s17677_s10 + $0x114] sm:$0xf] %vm6972_vm0, %v17834_v2  ;;  %11318 = vst.msk [vmem:[%s17677_s10 + $0x314] sm:$0xf] %vm6972_vm0, %v17836_v0  ;;  %v17860_v2 = vpack.c.bf16 %v11958_v62, %v11958_v62  ;;  %v11960_v0 = vadd.f32 %v6157_v51, %v17652_v20  ;;  %v12024_v52 = vadd.f32 %v6543_v9, %v17655_v32  ;;  %v6159_v50 = vpop.f32.mrb[143].mxu0  ;;  %v6545_v25 = vpop.f32.mrb[143].mxu1 }
 0x5c2   : > { %20227 = vst [vmem:[#allocation98_spill] sm:$0xff] %v17862_v15  ;;  %20228 = vst [vmem:[#allocation51_spill] sm:$0xff] %v17868_v37  ;;  %v17870_v34 = vpack.c.bf16 %v12023_v12, %v12023_v12  ;;  %v11961_v62 = vadd.f32 %v6159_v50, %v17659_v30  ;;  %v12025_v41 = vadd.f32 %v6545_v25, %v17662_v23  ;;  %v7032_v51 = vpop.trf.xlu1  ;;  %8176 = vrot.lane.b32.xlu0 %v17456_v21, %s13581_s4 }
 0x5c3   : > { %20226 = vst [vmem:[#allocation55_spill] sm:$0xff] %v17860_v2  ;;  %7203 = vst.msk [vmem:[%s17677_s10 + $0x18] sm:$0xf] %vm6972_vm0, %v17860_v2  ;;  %v17880_v53 = vpack.c.bf16 %v11960_v0, %v11960_v0  ;;  %v17882_v9 = vpack.c.bf16 %v12024_v52, %v12024_v52  ;;  %v10639_v27 = vcombine.low %v17790_v36, %v7032_v51  ;;  %v17906_v0 = vpop.trf.xlu0  ;;  %v6549_v52 = vpop.f32.mrb[144].mxu1 }
 0x5c4   : > { %20229 = vst [vmem:[#allocation100_spill] sm:$0xff] %v17870_v34  ;;  %11095 = vst.msk [vmem:[%s17677_s10 + $0x218] sm:$0xf] %vm6972_vm0, %v17862_v15  ;;  %v10640_v12 = vcombine.high %v17790_v36, %v7032_v51  ;;  %v17892_v50 = vpack.c.bf16 %v11961_v62, %v11961_v62  ;;  %v17894_v25 = vpack.c.bf16 %v12025_v41, %v12025_v41  ;;  %v6163_v36 = vpop.f32.mrb[144].mxu0 }
 0x5c5   : > { %20230 = vst [vmem:[#allocation103_spill] sm:$0xff] %v17880_v53  ;;  %20231 = vst [vmem:[#allocation63_spill] sm:$0xff] %v17882_v9  ;;  %v11962_v62 = vadd.f32 %v6163_v36, %v17652_v20  ;;  %v12026_v41 = vadd.f32 %v6549_v52, %v17655_v32  ;;  %v6165_v51 = vpop.f32.mrb[145].mxu0 }
 0x5c6   : > { %10871 = vst.msk [vmem:[%s17677_s10 + $0x118] sm:$0xf] %vm6972_vm0, %v17868_v37  ;;  %11319 = vst.msk [vmem:[%s17677_s10 + $0x318] sm:$0xf] %vm6972_vm0, %v17870_v34  ;;  %9724 = vrot.lane.b32.xlu0 %v17458_v63, %s13581_s4 }
 0x5c7   : > { %20232 = vst [vmem:[#allocation101_spill] sm:$0xff] %v17892_v50  ;;  %20233 = vst [vmem:[#allocation59_spill] sm:$0xff] %v17894_v25  ;;  %7793 = vxpose.xlu1.c.b16.start [1/8] (narrow) %v20186_v61, 64 }
 0x5c8   : > { %7204 = vst.msk [vmem:[%s17677_s10 + $0x1c] sm:$0xf] %vm6972_vm0, %v17880_v53  ;;  %11096 = vst.msk [vmem:[%s17677_s10 + $0x21c] sm:$0xf] %vm6972_vm0, %v17882_v9  ;;  %v6551_v9 = vpop.f32.mrb[145].mxu1  ;;  %v6167_v53 = vpop.f32.mrb[146].mxu0 }
 0x5c9   : > { %7083 = vst [vmem:[%s17736_s23 + $0x30] sm:$0xff] %v10639_v27  ;;  %7084 = vst [vmem:[%s17736_s23 + $0x38] sm:$0xff] %v10640_v12  ;;  %v11963_v27 = vadd.f32 %v6165_v51, %v17659_v30  ;;  %v12027_v12 = vadd.f32 %v6551_v9, %v17662_v23  ;;  %v6553_v34 = vpop.f32.mrb[146].mxu1  ;;  %v11964_v36 = vadd.f32 %v6167_v53, %v17652_v20  ;;  %v6169_v51 = vpop.f32.mrb[147].mxu0 }
 0x5ca   : > { %10872 = vst.msk [vmem:[%s17677_s10 + $0x11c] sm:$0xf] %vm6972_vm0, %v17892_v50  ;;  %11320 = vst.msk [vmem:[%s17677_s10 + $0x31c] sm:$0xf] %vm6972_vm0, %v17894_v25  ;;  %v17918_v50 = vpack.c.bf16 %v11962_v62, %v11962_v62  ;;  %v17920_v25 = vpack.c.bf16 %v12026_v41, %v12026_v41  ;;  %v12028_v52 = vadd.f32 %v6553_v34, %v17655_v32  ;;  %v6555_v37 = vpop.f32.mrb[147].mxu1  ;;  %v6173_v61 = vpop.f32.mrb[148].mxu0 }
 0x5cb   : > { %v17926_v9 = vpack.c.bf16 %v11963_v27, %v11963_v27  ;;  %v17928_v62 = vpack.c.bf16 %v12027_v12, %v12027_v12  ;;  %v11965_v41 = vadd.f32 %v6169_v51, %v17659_v30  ;;  %v12029_v15 = vadd.f32 %v6555_v37, %v17662_v23  ;;  %v17959_v12 = vpop.trf.xlu0  ;;  %v20242_v51 = vld [vmem:[#allocation115_spill] sm:$0xff] }
 0x5cc   : > { %20234 = vst [vmem:[#allocation105_spill] sm:$0xff] %v17918_v50  ;;  %20235 = vst [vmem:[#allocation62_spill] sm:$0xff] %v17920_v25  ;;  %v17938_v34 = vpack.c.bf16 %v11964_v36, %v11964_v36  ;;  %v17940_v53 = vpack.c.bf16 %v12028_v52, %v12028_v52  ;;  %v6559_v36 = vpop.f32.mrb[148].mxu1  ;;  %v11966_v52 = vadd.f32 %v6173_v61, %v17652_v20  ;;  %7794 = vxpose.xlu1.c.b16.cont [2/8] (narrow) %v20242_v51, 64 }
 0x5cd   : > { %20236 = vst [vmem:[#allocation58_spill] sm:$0xff] %v17926_v9  ;;  %20237 = vst [vmem:[#allocation71_spill] sm:$0xff] %v17928_v62  ;;  %v17949_v27 = vpack.c.bf16 %v11965_v41, %v11965_v41  ;;  %v17951_v37 = vpack.c.bf16 %v12029_v15, %v12029_v15  ;;  %v12030_v15 = vadd.f32 %v6559_v36, %v17655_v32  ;;  %v6175_v41 = vpop.f32.mrb[149].mxu0 }
 0x5ce   : > { %7205 = vst.msk [vmem:[%s17677_s10 + $0x20] sm:$0xf] %vm6972_vm0, %v17918_v50  ;;  %11097 = vst.msk [vmem:[%s17677_s10 + $0x220] sm:$0xf] %vm6972_vm0, %v17920_v25 }
 0x5cf   : > { %20238 = vst [vmem:[#allocation108_spill] sm:$0xff] %v17938_v34  ;;  %20239 = vst [vmem:[#allocation67_spill] sm:$0xff] %v17940_v53  ;;  %v17974_v25 = vpack.c.bf16 %v12030_v15, %v12030_v15 }
 0x5d0   : > { %10873 = vst.msk [vmem:[%s17677_s10 + $0x120] sm:$0xf] %vm6972_vm0, %v17926_v9  ;;  %11321 = vst.msk [vmem:[%s17677_s10 + $0x320] sm:$0xf] %vm6972_vm0, %v17928_v62  ;;  %7795 = vxpose.xlu1.c.b16.cont [3/8] (narrow) %v20198_v33, 64 }
 0x5d1   : > { %20240 = vst [vmem:[#allocation107_spill] sm:$0xff] %v17949_v27  ;;  %20241 = vst [vmem:[#allocation70_spill] sm:$0xff] %v17951_v37 }
 0x5d2   : > { %7206 = vst.msk [vmem:[%s17677_s10 + $0x24] sm:$0xf] %vm6972_vm0, %v17938_v34  ;;  %11098 = vst.msk [vmem:[%s17677_s10 + $0x224] sm:$0xf] %vm6972_vm0, %v17940_v53  ;;  %v6561_v34 = vpop.f32.mrb[149].mxu1  ;;  %v11967_v53 = vadd.f32 %v6175_v41, %v17659_v30 }
 0x5d3   : > { %10874 = vst.msk [vmem:[%s17677_s10 + $0x124] sm:$0xf] %vm6972_vm0, %v17949_v27  ;;  %11322 = vst.msk [vmem:[%s17677_s10 + $0x324] sm:$0xf] %vm6972_vm0, %v17951_v37  ;;  %v12031_v62 = vadd.f32 %v6561_v34, %v17662_v23  ;;  %v6177_v27 = vpop.f32.mrb[150].mxu0  ;;  %v6563_v9 = vpop.f32.mrb[150].mxu1  ;;  %v17972_v37 = vpack.c.bf16 %v11966_v52, %v11966_v52 }
 0x5d4   : > { %20244 = vst [vmem:[#allocation43_spill] sm:$0xff] %v17974_v25  ;;  %v11968_v61 = vadd.f32 %v6177_v27, %v17652_v20  ;;  %v12032_v36 = vadd.f32 %v6563_v9, %v17655_v32  ;;  %v6179_v51 = vpop.f32.mrb[151].mxu0  ;;  %v6565_v50 = vpop.f32.mrb[151].mxu1  ;;  %v17978_v41 = vpack.c.bf16 %v11967_v53, %v11967_v53  ;;  %11099 = vst.msk [vmem:[%s17677_s10 + $0x228] sm:$0xf] %vm6972_vm0, %v17974_v25 }
 0x5d5   : > { %20243 = vst [vmem:[#allocation45_spill] sm:$0xff] %v17972_v37  ;;  %v17980_v34 = vpack.c.bf16 %v12031_v62, %v12031_v62  ;;  %v11969_v52 = vadd.f32 %v6179_v51, %v17659_v30  ;;  %v12033_v2 = vadd.f32 %v6565_v50, %v17662_v23  ;;  %7207 = vst.msk [vmem:[%s17677_s10 + $0x28] sm:$0xf] %vm6972_vm0, %v17972_v37  ;;  %v6183_v33 = vpop.f32.mrb[152].mxu0  ;;  %v6569_v53 = vpop.f32.mrb[152].mxu1 }
 0x5d6   : > { %20245 = vst [vmem:[#allocation49_spill] sm:$0xff] %v17978_v41  ;;  %v17990_v9 = vpack.c.bf16 %v11968_v61, %v11968_v61  ;;  %v17992_v27 = vpack.c.bf16 %v12032_v36, %v12032_v36  ;;  %10875 = vst.msk [vmem:[%s17677_s10 + $0x128] sm:$0xf] %vm6972_vm0, %v17978_v41  ;;  %v11970_v15 = vadd.f32 %v6183_v33, %v17652_v20  ;;  %v6185_v36 = vpop.f32.mrb[153].mxu0  ;;  %v18020_v51 = vpop.trf.xlu0 }
 0x5d7   : > { %20246 = vst [vmem:[#allocation47_spill] sm:$0xff] %v17980_v34  ;;  %11323 = vst.msk [vmem:[%s17677_s10 + $0x328] sm:$0xf] %vm6972_vm0, %v17980_v34  ;;  %v18001_v62 = vpack.c.bf16 %v11969_v52, %v11969_v52  ;;  %v18003_v50 = vpack.c.bf16 %v12033_v2, %v12033_v2  ;;  %v12034_v61 = vadd.f32 %v6569_v53, %v17655_v32  ;;  %v20251_v2 = vld [vmem:[#allocation21_spill] sm:$0xff] }
 0x5d8   : > { %20247 = vst [vmem:[#allocation57_spill] sm:$0xff] %v17990_v9  ;;  %20248 = vst [vmem:[#allocation53_spill] sm:$0xff] %v17992_v27  ;;  %7796 = vxpose.xlu1.c.b16.cont [4/8] (narrow) %v20251_v2, 64  ;;  %v11971_v52 = vadd.f32 %v6185_v36, %v17659_v30 }
 0x5d9   : > { %20249 = vst [vmem:[#allocation65_spill] sm:$0xff] %v18001_v62  ;;  %20250 = vst [vmem:[#allocation61_spill] sm:$0xff] %v18003_v50 }
 0x5da   : > { %7208 = vst.msk [vmem:[%s17677_s10 + $0x2c] sm:$0xf] %vm6972_vm0, %v17990_v9  ;;  %11100 = vst.msk [vmem:[%s17677_s10 + $0x22c] sm:$0xf] %vm6972_vm0, %v17992_v27  ;;  %v6571_v27 = vpop.f32.mrb[153].mxu1  ;;  %v18023_v9 = vpack.c.bf16 %v11970_v15, %v11970_v15  ;;  %v18029_v41 = vpack.c.bf16 %v11971_v52, %v11971_v52 }
 0x5db   : > { %10876 = vst.msk [vmem:[%s17677_s10 + $0x12c] sm:$0xf] %vm6972_vm0, %v18001_v62  ;;  %11324 = vst.msk [vmem:[%s17677_s10 + $0x32c] sm:$0xf] %vm6972_vm0, %v18003_v50  ;;  %v6187_v62 = vpop.f32.mrb[154].mxu0  ;;  %v18025_v50 = vpack.c.bf16 %v12034_v61, %v12034_v61  ;;  %v12035_v33 = vadd.f32 %v6571_v27, %v17662_v23  ;;  %v6573_v2 = vpop.f32.mrb[154].mxu1 }
 0x5dc   : > { %20252 = vst [vmem:[#allocation73_spill] sm:$0xff] %v18023_v9  ;;  %v11972_v53 = vadd.f32 %v6187_v62, %v17652_v20  ;;  %v6189_v34 = vpop.f32.mrb[155].mxu0  ;;  %20254 = vst [vmem:[#allocation75_spill] sm:$0xff] %v18029_v41  ;;  %v12036_v25 = vadd.f32 %v6573_v2, %v17655_v32  ;;  %v6575_v15 = vpop.f32.mrb[155].mxu1  ;;  %7797 = vxpose.xlu1.c.b16.cont [5/8] (narrow) %v20217_v56, 64 }
 0x5dd   : > { %20253 = vst [vmem:[#allocation69_spill] sm:$0xff] %v18025_v50  ;;  %v11973_v36 = vadd.f32 %v6189_v34, %v17659_v30  ;;  %7209 = vst.msk [vmem:[%s17677_s10 + $0x30] sm:$0xf] %vm6972_vm0, %v18023_v9  ;;  %v18039_v27 = vpack.c.bf16 %v12035_v33, %v12035_v33  ;;  %v12037_v61 = vadd.f32 %v6575_v15, %v17662_v23  ;;  %v6193_v56 = vpop.f32.mrb[156].mxu0  ;;  %v20260_v15 = vld [vmem:[#allocation38_spill] sm:$0xff] }
 0x5de   : > { %11101 = vst.msk [vmem:[%s17677_s10 + $0x230] sm:$0xf] %vm6972_vm0, %v18025_v50  ;;  %v18041_v62 = vpack.c.bf16 %v11972_v53, %v11972_v53  ;;  %10877 = vst.msk [vmem:[%s17677_s10 + $0x130] sm:$0xf] %vm6972_vm0, %v18029_v41  ;;  %v18048_v34 = vpack.c.bf16 %v12036_v25, %v12036_v25  ;;  %v18060_v53 = vpop.trf.xlu0  ;;  %v6579_v25 = vpop.f32.mrb[156].mxu1  ;;  %v11974_v2 = vadd.f32 %v6193_v56, %v17652_v20 }
 0x5df   : > { %20255 = vst [vmem:[#allocation74_spill] sm:$0xff] %v18039_v27  ;;  %v18050_v52 = vpack.c.bf16 %v11973_v36, %v11973_v36  ;;  %11325 = vst.msk [vmem:[%s17677_s10 + $0x330] sm:$0xf] %vm6972_vm0, %v18039_v27  ;;  %v18058_v33 = vpack.c.bf16 %v12037_v61, %v12037_v61  ;;  %v12038_v36 = vadd.f32 %v6579_v25, %v17655_v32  ;;  %v6195_v61 = vpop.f32.mrb[157].mxu0 }
 0x5e0   : > { %20256 = vst [vmem:[#allocation77_spill] sm:$0xff] %v18041_v62  ;;  %20257 = vst [vmem:[#allocation76_spill] sm:$0xff] %v18048_v34  ;;  %7798 = vxpose.xlu1.c.b16.cont [6/8] (narrow) %v20260_v15, 64  ;;  %v18076_v50 = vpack.c.bf16 %v11974_v2, %v11974_v2 }
 0x5e1   : > { %20258 = vst [vmem:[#allocation66_spill] sm:$0xff] %v18050_v52  ;;  %7210 = vst.msk [vmem:[%s17677_s10 + $0x34] sm:$0xf] %vm6972_vm0, %v18041_v62  ;;  %v6581_v62 = vpop.f32.mrb[157].mxu1 }
 0x5e2   : > { %20259 = vst [vmem:[#allocation78_spill] sm:$0xff] %v18058_v33  ;;  %11102 = vst.msk [vmem:[%s17677_s10 + $0x234] sm:$0xf] %vm6972_vm0, %v18048_v34  ;;  %v11975_v34 = vadd.f32 %v6195_v61, %v17659_v30  ;;  %v12039_v27 = vadd.f32 %v6581_v62, %v17662_v23  ;;  %v6583_v41 = vpop.f32.mrb[158].mxu1 }
 0x5e3   : > { %10878 = vst.msk [vmem:[%s17677_s10 + $0x134] sm:$0xf] %vm6972_vm0, %v18050_v52  ;;  %11326 = vst.msk [vmem:[%s17677_s10 + $0x334] sm:$0xf] %vm6972_vm0, %v18058_v33  ;;  %v6197_v52 = vpop.f32.mrb[158].mxu0  ;;  %v18078_v33 = vpack.c.bf16 %v12038_v36, %v12038_v36  ;;  %v12040_v25 = vadd.f32 %v6583_v41, %v17655_v32  ;;  %v6585_v9 = vpop.f32.mrb[159].mxu1 }
 0x5e4   : > { %v11976_v56 = vadd.f32 %v6197_v52, %v17652_v20  ;;  %v6199_v15 = vpop.f32.mrb[159].mxu0  ;;  %v18082_v37 = vpack.c.bf16 %v11975_v34, %v11975_v34  ;;  %v18084_v62 = vpack.c.bf16 %v12039_v27, %v12039_v27  ;;  %v12041_v61 = vadd.f32 %v6585_v9, %v17662_v23  ;;  %7211 = vst.msk [vmem:[%s17677_s10 + $0x38] sm:$0xf] %vm6972_vm0, %v18076_v50  ;;  %v18115_v34 = vpop.trf.xlu0 }
 0x5e5   : > { %20261 = vst [vmem:[#allocation27_spill] sm:$0xff] %v18078_v33  ;;  %v11977_v2 = vadd.f32 %v6199_v15, %v17659_v30  ;;  %11103 = vst.msk [vmem:[%s17677_s10 + $0x238] sm:$0xf] %vm6972_vm0, %v18078_v33  ;;  %v18096_v52 = vpack.c.bf16 %v12040_v25, %v12040_v25  ;;  %7799 = vxpose.xlu1.c.b16.cont [7/8] (narrow) %v17456_v21, 64  ;;  %v6203_v21 = vpop.f32.mrb[160].mxu0  ;;  %v6589_v36 = vpop.f32.mrb[160].mxu1 }
 0x5e6   : > { %20262 = vst [vmem:[#allocation29_spill] sm:$0xff] %v18082_v37  ;;  %20263 = vst [vmem:[#allocation26_spill] sm:$0xff] %v18084_v62  ;;  %v18094_v41 = vpack.c.bf16 %v11976_v56, %v11976_v56  ;;  %v18107_v9 = vpack.c.bf16 %v12041_v61, %v12041_v61  ;;  %v11978_v56 = vadd.f32 %v6203_v21, %v17652_v20  ;;  %7422 = vxpose.xlu0.c.b16.start [1/8] (narrow) %v17524_v4, 64  ;;  %v6205_v15 = vpop.f32.mrb[161].mxu0 }
 0x5e7   : > { %20265 = vst [vmem:[#allocation31_spill] sm:$0xff] %v18096_v52  ;;  %10879 = vst.msk [vmem:[%s17677_s10 + $0x138] sm:$0xf] %vm6972_vm0, %v18082_v37  ;;  %v18105_v27 = vpack.c.bf16 %v11977_v2, %v11977_v2  ;;  %v12042_v25 = vadd.f32 %v6589_v36, %v17655_v32  ;;  %v6591_v2 = vpop.f32.mrb[161].mxu1  ;;  %v11979_v61 = vadd.f32 %v6205_v15, %v17659_v30 }
 0x5e8   : > { %20264 = vst [vmem:[#allocation28_spill] sm:$0xff] %v18094_v41  ;;  %11327 = vst.msk [vmem:[%s17677_s10 + $0x338] sm:$0xf] %vm6972_vm0, %v18084_v62 }
 0x5e9   : > { %20266 = vst [vmem:[#allocation33_spill] sm:$0xff] %v18105_v27  ;;  %20267 = vst [vmem:[#allocation30_spill] sm:$0xff] %v18107_v9  ;;  %7800 = vxpose.xlu1.c.b16.end [8/8] (narrow) %v17486_v29, 64  ;;  %v18131_v21 = vpack.c.bf16 %v12042_v25, %v12042_v25  ;;  %v18135_v33 = vpack.c.bf16 %v11979_v61, %v11979_v61  ;;  %v18166_v25 = vpop.trf.xlu0 }
 0x5ea   : > { %7212 = vst.msk [vmem:[%s17677_s10 + $0x3c] sm:$0xf] %vm6972_vm0, %v18094_v41  ;;  %11104 = vst.msk [vmem:[%s17677_s10 + $0x23c] sm:$0xf] %vm6972_vm0, %v18096_v52  ;;  %v6207_v52 = vpop.f32.mrb[162].mxu0  ;;  %v18129_v41 = vpack.c.bf16 %v11978_v56, %v11978_v56  ;;  %7423 = vxpose.xlu0.c.b16.cont [2/8] (narrow) %v17491_v6, 64 }
 0x5eb   : > { %10880 = vst.msk [vmem:[%s17677_s10 + $0x13c] sm:$0xf] %vm6972_vm0, %v18105_v27  ;;  %11328 = vst.msk [vmem:[%s17677_s10 + $0x33c] sm:$0xf] %vm6972_vm0, %v18107_v9  ;;  %v12043_v27 = vadd.f32 %v6591_v2, %v17662_v23  ;;  %v6593_v9 = vpop.f32.mrb[162].mxu1  ;;  %v11980_v36 = vadd.f32 %v6207_v52, %v17652_v20  ;;  %v6209_v62 = vpop.f32.mrb[163].mxu0 }
 0x5ec   : > { %20268 = vst [vmem:[#allocation32_spill] sm:$0xff] %v18131_v21  ;;  %v12044_v4 = vadd.f32 %v6593_v9, %v17655_v32  ;;  %v6595_v37 = vpop.f32.mrb[163].mxu1  ;;  %20269 = vst [vmem:[#allocation35_spill] sm:$0xff] %v18135_v33  ;;  %v11981_v2 = vadd.f32 %v6209_v62, %v17659_v30 }
 0x5ed   : > { %v18137_v15 = vpack.c.bf16 %v12043_v27, %v12043_v27  ;;  %v12045_v56 = vadd.f32 %v6595_v37, %v17662_v23  ;;  %7213 = vst.msk [vmem:[%s17677_s10 + $0x40] sm:$0xf] %vm6972_vm0, %v18129_v41  ;;  %11105 = vst.msk [vmem:[%s17677_s10 + $0x240] sm:$0xf] %vm6972_vm0, %v18131_v21  ;;  %v18147_v52 = vpack.c.bf16 %v11980_v36, %v11980_v36  ;;  %8178 = vrot.lane.b32.xlu1 %v17486_v29, %s13581_s4  ;;  %v18164_v27 = vpop.permute.xlu1 %7404  ;;  %v6213_v29 = vpop.f32.mrb[164].mxu0 }
 0x5ee   : > { %v18149_v9 = vpack.c.bf16 %v12044_v4, %v12044_v4  ;;  %10881 = vst.msk [vmem:[%s17677_s10 + $0x140] sm:$0xf] %vm6972_vm0, %v18135_v33  ;;  %v18160_v37 = vpack.c.bf16 %v11981_v2, %v11981_v2  ;;  %v6599_v6 = vpop.f32.mrb[164].mxu1  ;;  %v11982_v61 = vadd.f32 %v6213_v29, %v17652_v20  ;;  %7424 = vxpose.xlu0.c.b16.cont [3/8] (narrow) %v17561_v7, 64  ;;  %v6215_v4 = vpop.f32.mrb[165].mxu0 }
 0x5ef   : > { %20270 = vst [vmem:[#allocation37_spill] sm:$0xff] %v18137_v15  ;;  %20271 = vst [vmem:[#allocation34_spill] sm:$0xff] %v18147_v52  ;;  %v18162_v62 = vpack.c.bf16 %v12045_v56, %v12045_v56  ;;  %v12046_v36 = vadd.f32 %v6599_v6, %v17655_v32  ;;  %v6601_v2 = vpop.f32.mrb[165].mxu1  ;;  %v11983_v56 = vadd.f32 %v6215_v4, %v17659_v30 }
 0x5f0   : > { %20272 = vst [vmem:[#allocation36_spill] sm:$0xff] %v18149_v9  ;;  %11329 = vst.msk [vmem:[%s17677_s10 + $0x340] sm:$0xf] %vm6972_vm0, %v18137_v15  ;;  %v18185_v15 = vpack.c.bf16 %v11982_v61, %v11982_v61 }
 0x5f1   : > { %20273 = vst [vmem:[#allocation41_spill] sm:$0xff] %v18160_v37  ;;  %20274 = vst [vmem:[#allocation39_spill] sm:$0xff] %v18162_v62  ;;  %v18191_v21 = vpack.c.bf16 %v11983_v56, %v11983_v56 }
 0x5f2   : > { %7214 = vst.msk [vmem:[%s17677_s10 + $0x44] sm:$0xf] %vm6972_vm0, %v18147_v52  ;;  %11106 = vst.msk [vmem:[%s17677_s10 + $0x244] sm:$0xf] %vm6972_vm0, %v18149_v9  ;;  %v12047_v9 = vadd.f32 %v6601_v2, %v17662_v23  ;;  %v6603_v52 = vpop.f32.mrb[166].mxu1  ;;  %7425 = vxpose.xlu0.c.b16.cont [4/8] (narrow) %v17511_v42, 64 }
 0x5f3   : > { %10882 = vst.msk [vmem:[%s17677_s10 + $0x144] sm:$0xf] %vm6972_vm0, %v18160_v37  ;;  %11330 = vst.msk [vmem:[%s17677_s10 + $0x344] sm:$0xf] %vm6972_vm0, %v18162_v62  ;;  %v6217_v37 = vpop.f32.mrb[166].mxu0  ;;  %v18187_v62 = vpack.c.bf16 %v12046_v36, %v12046_v36  ;;  %v12048_v6 = vadd.f32 %v6603_v52, %v17655_v32  ;;  %v6605_v33 = vpop.f32.mrb[167].mxu1 }
 0x5f4   : > { %v11984_v29 = vadd.f32 %v6217_v37, %v17652_v20  ;;  %v6219_v7 = vpop.f32.mrb[167].mxu0  ;;  %20275 = vst [vmem:[#allocation40_spill] sm:$0xff] %v18191_v21  ;;  %v18193_v4 = vpack.c.bf16 %v12047_v9, %v12047_v9  ;;  %v12049_v61 = vadd.f32 %v6605_v33, %v17662_v23  ;;  %v8575_v36 = vpop.trf.xlu1  ;;  %7215 = vst.msk [vmem:[%s17677_s10 + $0x48] sm:$0xf] %vm6972_vm0, %v18185_v15 }
 0x5f5   : > { %v11985_v2 = vadd.f32 %v6219_v7, %v17659_v30  ;;  %11107 = vst.msk [vmem:[%s17677_s10 + $0x248] sm:$0xf] %vm6972_vm0, %v18187_v62  ;;  %v18205_v9 = vpack.c.bf16 %v12048_v6, %v12048_v6  ;;  %v11041_v37 = vcombine.low %v17848_v10, %v8575_v36  ;;  %v11042_v33 = vcombine.high %v17848_v10, %v8575_v36  ;;  %v6223_v42 = vpop.f32.mrb[168].mxu0  ;;  %v6609_v10 = vpop.f32.mrb[168].mxu1 }
 0x5f6   : > { %20276 = vst [vmem:[#allocation110_spill] sm:$0xff] %v18193_v4  ;;  %v18203_v52 = vpack.c.bf16 %v11984_v29, %v11984_v29  ;;  %10883 = vst.msk [vmem:[%s17677_s10 + $0x148] sm:$0xf] %vm6972_vm0, %v18191_v21  ;;  %v18218_v7 = vpack.c.bf16 %v12049_v61, %v12049_v61  ;;  %v18220_v29 = vpop.trf.xlu0  ;;  %v11986_v6 = vadd.f32 %v6223_v42, %v17652_v20  ;;  %7426 = vxpose.xlu0.c.b16.cont [5/8] (narrow) %v17592_v54, 64  ;;  %v6225_v61 = vpop.f32.mrb[169].mxu0 }
 0x5f7   : > { %20278 = vst [vmem:[#allocation23_spill] sm:$0xff] %v18205_v9  ;;  %11331 = vst.msk [vmem:[%s17677_s10 + $0x348] sm:$0xf] %vm6972_vm0, %v18193_v4  ;;  %v18216_v56 = vpack.c.bf16 %v11985_v2, %v11985_v2  ;;  %v12050_v2 = vadd.f32 %v6609_v10, %v17655_v32  ;;  %v6611_v36 = vpop.f32.mrb[169].mxu1 }
 0x5f8   : > { %20277 = vst [vmem:[#allocation109_spill] sm:$0xff] %v18203_v52  ;;  %20280 = vst [vmem:[#allocation113_spill] sm:$0xff] %v18218_v7 }
 0x5f9   : > { %20279 = vst [vmem:[#allocation93_spill] sm:$0xff] %v18216_v56  ;;  %7216 = vst.msk [vmem:[%s17677_s10 + $0x4c] sm:$0xf] %vm6972_vm0, %v18203_v52  ;;  %v18241_v52 = vpack.c.bf16 %v11986_v6, %v11986_v6 }
 0x5fa   : > { %11108 = vst.msk [vmem:[%s17677_s10 + $0x24c] sm:$0xf] %vm6972_vm0, %v18205_v9  ;;  %11049 = vst [vmem:[%s17736_s23 + $0x100] sm:$0xff] %v11041_v37  ;;  %v11987_v37 = vadd.f32 %v6225_v61, %v17659_v30  ;;  %v6613_v9 = vpop.f32.mrb[170].mxu1  ;;  %7427 = vxpose.xlu0.c.b16.cont [6/8] (narrow) %v17536_v44, 64 }
 0x5fb   : > { %11050 = vst [vmem:[%s17736_s23 + $0x108] sm:$0xff] %v11042_v33  ;;  %10884 = vst.msk [vmem:[%s17677_s10 + $0x14c] sm:$0xf] %vm6972_vm0, %v18216_v56  ;;  %v12051_v33 = vadd.f32 %v6611_v36, %v17662_v23  ;;  %v6227_v56 = vpop.f32.mrb[170].mxu0  ;;  %v12052_v10 = vadd.f32 %v6613_v9, %v17655_v32  ;;  %v6615_v4 = vpop.f32.mrb[171].mxu1 }
 0x5fc   : > { %11332 = vst.msk [vmem:[%s17677_s10 + $0x34c] sm:$0xf] %vm6972_vm0, %v18218_v7  ;;  %v18243_v7 = vpack.c.bf16 %v12050_v2, %v12050_v2  ;;  %v11988_v42 = vadd.f32 %v6227_v56, %v17652_v20  ;;  %v6229_v54 = vpop.f32.mrb[171].mxu0  ;;  %v18247_v21 = vpack.c.bf16 %v11987_v37, %v11987_v37  ;;  %v12053_v6 = vadd.f32 %v6615_v4, %v17662_v23  ;;  %v8576_v2 = vpop.trf.xlu1 }
 0x5fd   : > { %v18249_v61 = vpack.c.bf16 %v12051_v33, %v12051_v33  ;;  %v11989_v36 = vadd.f32 %v6229_v54, %v17659_v30  ;;  %7217 = vst.msk [vmem:[%s17677_s10 + $0x50] sm:$0xf] %vm6972_vm0, %v18241_v52  ;;  %v18261_v56 = vpack.c.bf16 %v12052_v10, %v12052_v10  ;;  %v11043_v37 = vcombine.low %v17906_v0, %v8576_v2  ;;  %v6233_v44 = vpop.f32.mrb[172].mxu0 }
 0x5fe   : > { %20281 = vst [vmem:[#allocation112_spill] sm:$0xff] %v18247_v21  ;;  %11109 = vst.msk [vmem:[%s17677_s10 + $0x250] sm:$0xf] %vm6972_vm0, %v18243_v7  ;;  %v18259_v9 = vpack.c.bf16 %v11988_v42, %v11988_v42  ;;  %v11044_v4 = vcombine.high %v17906_v0, %v8576_v2  ;;  %v18274_v54 = vpack.c.bf16 %v12053_v6, %v12053_v6  ;;  %v6619_v0 = vpop.f32.mrb[172].mxu1  ;;  %v18290_v42 = vpop.trf.xlu0  ;;  %7428 = vxpose.xlu0.c.b16.cont [7/8] (narrow) %v17614_v1, 64 }
 0x5ff   : > { %20282 = vst [vmem:[#allocation116_spill] sm:$0xff] %v18249_v61  ;;  %20284 = vst [vmem:[#allocation19_spill] sm:$0xff] %v18261_v56  ;;  %v18272_v33 = vpack.c.bf16 %v11989_v36, %v11989_v36  ;;  %v11990_v10 = vadd.f32 %v6233_v44, %v17652_v20  ;;  %v12054_v36 = vadd.f32 %v6619_v0, %v17655_v32  ;;  %v6235_v6 = vpop.f32.mrb[173].mxu0 }
 0x600   : > { %20283 = vst [vmem:[#allocation25_spill] sm:$0xff] %v18259_v9  ;;  %10885 = vst.msk [vmem:[%s17677_s10 + $0x150] sm:$0xf] %vm6972_vm0, %v18247_v21  ;;  %v11991_v2 = vadd.f32 %v6235_v6, %v17659_v30 }
 0x601   : > { %11333 = vst.msk [vmem:[%s17677_s10 + $0x350] sm:$0xf] %vm6972_vm0, %v18249_v61  ;;  %20285 = vst [vmem:[#allocation24_spill] sm:$0xff] %v18272_v33 }
 0x602   : > { %20286 = vst [vmem:[#allocation89_spill] sm:$0xff] %v18274_v54  ;;  %7218 = vst.msk [vmem:[%s17677_s10 + $0x54] sm:$0xf] %vm6972_vm0, %v18259_v9  ;;  %v18302_v61 = vpack.c.bf16 %v11991_v2, %v11991_v2  ;;  %7429 = vxpose.xlu0.c.b16.end [8/8] (narrow) %v17558_v28, 64 }
 0x603   : > { %11110 = vst.msk [vmem:[%s17677_s10 + $0x254] sm:$0xf] %vm6972_vm0, %v18261_v56  ;;  %11051 = vst [vmem:[%s17736_s23 + $0x110] sm:$0xff] %v11043_v37  ;;  %v6621_v37 = vpop.f32.mrb[173].mxu1 }
 0x604   : > { %11052 = vst [vmem:[%s17736_s23 + $0x118] sm:$0xff] %v11044_v4  ;;  %10886 = vst.msk [vmem:[%s17677_s10 + $0x154] sm:$0xf] %vm6972_vm0, %v18272_v33  ;;  %v6237_v4 = vpop.f32.mrb[174].mxu0  ;;  %v18296_v33 = vpack.c.bf16 %v11990_v10, %v11990_v10  ;;  %v12055_v56 = vadd.f32 %v6621_v37, %v17662_v23  ;;  %v6623_v9 = vpop.f32.mrb[174].mxu1 }
 0x605   : > { %11334 = vst.msk [vmem:[%s17677_s10 + $0x354] sm:$0xf] %vm6972_vm0, %v18274_v54  ;;  %v18298_v54 = vpack.c.bf16 %v12054_v36, %v12054_v36  ;;  %v11992_v44 = vadd.f32 %v6237_v4, %v17652_v20  ;;  %v6239_v0 = vpop.f32.mrb[175].mxu0  ;;  %20287 = vst [vmem:[#allocation84_spill] sm:$0xff] %v18302_v61  ;;  %v12056_v1 = vadd.f32 %v6623_v9, %v17655_v32  ;;  %v6625_v21 = vpop.f32.mrb[175].mxu1 }
 0x606   : > { %v11993_v6 = vadd.f32 %v6239_v0, %v17659_v30  ;;  %v8577_v10 = vpop.trf.xlu1  ;;  %7219 = vst.msk [vmem:[%s17677_s10 + $0x58] sm:$0xf] %vm6972_vm0, %v18296_v33  ;;  %v18312_v36 = vpack.c.bf16 %v12055_v56, %v12055_v56  ;;  %v12057_v9 = vadd.f32 %v6625_v21, %v17662_v23  ;;  %10887 = vst.msk [vmem:[%s17677_s10 + $0x158] sm:$0xf] %vm6972_vm0, %v18302_v61  ;;  %v6243_v28 = vpop.f32.mrb[176].mxu0  ;;  %8970 = vxpose.xlu0.c.b16.start [1/8] (narrow) %v17534_v35, 64 }
 0x607   : > { %11111 = vst.msk [vmem:[%s17677_s10 + $0x258] sm:$0xf] %vm6972_vm0, %v18298_v54  ;;  %v18314_v2 = vpack.c.bf16 %v11992_v44, %v11992_v44  ;;  %v11045_v37 = vcombine.low %v17959_v12, %v8577_v10  ;;  %v18322_v4 = vpack.c.bf16 %v12056_v1, %v12056_v1  ;;  %v11046_v56 = vcombine.high %v17959_v12, %v8577_v10  ;;  %v6629_v44 = vpop.f32.mrb[176].mxu1  ;;  %v18343_v1 = vpop.trf.xlu0 }
 0x608   : > { %20288 = vst [vmem:[#allocation50_spill] sm:$0xff] %v18312_v36  ;;  %v18324_v0 = vpack.c.bf16 %v11993_v6, %v11993_v6  ;;  %11335 = vst.msk [vmem:[%s17677_s10 + $0x358] sm:$0xf] %vm6972_vm0, %v18312_v36  ;;  %v18333_v21 = vpack.c.bf16 %v12057_v9, %v12057_v9  ;;  %v11994_v12 = vadd.f32 %v6243_v28, %v17652_v20  ;;  %v6245_v10 = vpop.f32.mrb[177].mxu0 }
 0x609   : > { %20289 = vst [vmem:[#allocation81_spill] sm:$0xff] %v18314_v2  ;;  %20290 = vst [vmem:[#allocation54_spill] sm:$0xff] %v18322_v4  ;;  %v12058_v6 = vadd.f32 %v6629_v44, %v17655_v32  ;;  %v11995_v9 = vadd.f32 %v6245_v10, %v17659_v30 }
 0x60a   : > { %20291 = vst [vmem:[#allocation102_spill] sm:$0xff] %v18324_v0  ;;  %7220 = vst.msk [vmem:[%s17677_s10 + $0x5c] sm:$0xf] %vm6972_vm0, %v18314_v2  ;;  %8971 = vxpose.xlu0.c.b16.cont [2/8] (narrow) %v17496_v40, 64 }
 0x60b   : > { %20292 = vst [vmem:[#allocation18_spill] sm:$0xff] %v18333_v21  ;;  %11053 = vst [vmem:[%s17736_s23 + $0x120] sm:$0xff] %v11045_v37  ;;  %v6631_v37 = vpop.f32.mrb[177].mxu1  ;;  %v18358_v36 = vpack.c.bf16 %v11995_v9, %v11995_v9 }
 0x60c   : > { %11112 = vst.msk [vmem:[%s17677_s10 + $0x25c] sm:$0xf] %vm6972_vm0, %v18322_v4  ;;  %10888 = vst.msk [vmem:[%s17677_s10 + $0x15c] sm:$0xf] %vm6972_vm0, %v18324_v0  ;;  %v6247_v0 = vpop.f32.mrb[178].mxu0  ;;  %v18352_v4 = vpack.c.bf16 %v11994_v12, %v11994_v12  ;;  %v12059_v2 = vadd.f32 %v6631_v37, %v17662_v23  ;;  %v8578_v12 = vpop.trf.xlu1 }
 0x60d   : > { %11054 = vst [vmem:[%s17736_s23 + $0x128] sm:$0xff] %v11046_v56  ;;  %11336 = vst.msk [vmem:[%s17677_s10 + $0x35c] sm:$0xf] %vm6972_vm0, %v18333_v21  ;;  %v18354_v56 = vpack.c.bf16 %v12058_v6, %v12058_v6  ;;  %v11996_v28 = vadd.f32 %v6247_v0, %v17652_v20  ;;  %v6633_v21 = vpop.f32.mrb[178].mxu1  ;;  %v6249_v44 = vpop.f32.mrb[179].mxu0  ;;  %v11047_v9 = vcombine.low %v18020_v51, %v8578_v12 }
 0x60e   : > { %v12060_v35 = vadd.f32 %v6633_v21, %v17655_v32  ;;  %v11997_v10 = vadd.f32 %v6249_v44, %v17659_v30  ;;  %v6635_v61 = vpop.f32.mrb[179].mxu1  ;;  %7221 = vst.msk [vmem:[%s17677_s10 + $0x60] sm:$0xf] %vm6972_vm0, %v18352_v4  ;;  %v18368_v0 = vpack.c.bf16 %v12059_v2, %v12059_v2  ;;  %10889 = vst.msk [vmem:[%s17677_s10 + $0x160] sm:$0xf] %vm6972_vm0, %v18358_v36  ;;  %v6253_v40 = vpop.f32.mrb[180].mxu0 }
 0x60f   : > { %11113 = vst.msk [vmem:[%s17677_s10 + $0x260] sm:$0xf] %vm6972_vm0, %v18354_v56  ;;  %v18370_v6 = vpack.c.bf16 %v11996_v28, %v11996_v28  ;;  %v12061_v21 = vadd.f32 %v6635_v61, %v17662_v23  ;;  %v11048_v2 = vcombine.high %v18020_v51, %v8578_v12  ;;  %11055 = vst [vmem:[%s17736_s23 + $0x130] sm:$0xff] %v11047_v9  ;;  %v6639_v28 = vpop.f32.mrb[180].mxu1  ;;  %v18400_v51 = vpop.trf.xlu0  ;;  %8972 = vxpose.xlu0.c.b16.cont [3/8] (narrow) %v17568_v8, 64 }
 0x610   : > { %v18378_v37 = vpack.c.bf16 %v12060_v35, %v12060_v35  ;;  %v18380_v44 = vpack.c.bf16 %v11997_v10, %v11997_v10  ;;  %11337 = vst.msk [vmem:[%s17677_s10 + $0x360] sm:$0xf] %vm6972_vm0, %v18368_v0  ;;  %9341 = vxpose.xlu1.c.b16.start [1/8] (narrow) %v20189_v60, 64  ;;  %v11998_v35 = vadd.f32 %v6253_v40, %v17652_v20  ;;  %v6255_v12 = vpop.f32.mrb[181].mxu0  ;;  %v6641_v60 = vpop.f32.mrb[181].mxu1 }
 0x611   : > { %20293 = vst [vmem:[#allocation20_spill] sm:$0xff] %v18370_v6  ;;  %7222 = vst.msk [vmem:[%s17677_s10 + $0x64] sm:$0xf] %vm6972_vm0, %v18370_v6  ;;  %v18389_v61 = vpack.c.bf16 %v12061_v21, %v12061_v21  ;;  %v12062_v10 = vadd.f32 %v6639_v28, %v17655_v32  ;;  %v11999_v21 = vadd.f32 %v6255_v12, %v17659_v30  ;;  %v6257_v9 = vpop.f32.mrb[182].mxu0 }
 0x612   : > { %20294 = vst [vmem:[#allocation80_spill] sm:$0xff] %v18378_v37  ;;  %20295 = vst [vmem:[#allocation115_spill] sm:$0xff] %v18380_v44  ;;  %v12000_v40 = vadd.f32 %v6257_v9, %v17652_v20  ;;  %v6259_v28 = vpop.f32.mrb[183].mxu0 }
 0x613   : > { %20296 = vst [vmem:[#allocation21_spill] sm:$0xff] %v18389_v61  ;;  %11114 = vst.msk [vmem:[%s17677_s10 + $0x264] sm:$0xf] %vm6972_vm0, %v18378_v37  ;;  %v6643_v37 = vpop.f32.mrb[182].mxu1  ;;  %v18415_v8 = vpack.c.bf16 %v11999_v21, %v11999_v21  ;;  %v12001_v12 = vadd.f32 %v6259_v28, %v17659_v30  ;;  %8973 = vxpose.xlu0.c.b16.cont [4/8] (narrow) %v17516_v55, 64  ;;  %v6263_v55 = vpop.f32.mrb[184].mxu0 }
 0x614   : > { %10890 = vst.msk [vmem:[%s17677_s10 + $0x164] sm:$0xf] %vm6972_vm0, %v18380_v44  ;;  %11056 = vst [vmem:[%s17736_s23 + $0x138] sm:$0xff] %v11048_v2  ;;  %v18409_v44 = vpack.c.bf16 %v11998_v35, %v11998_v35  ;;  %v18411_v2 = vpack.c.bf16 %v12062_v10, %v12062_v10  ;;  %v12064_v6 = vadd.f32 %v6643_v37, %v17655_v32  ;;  %v6645_v35 = vpop.f32.mrb[183].mxu1  ;;  %v20298_v10 = vld [vmem:[#allocation22_spill] sm:$0xff] }
 0x615   : > { %11338 = vst.msk [vmem:[%s17677_s10 + $0x364] sm:$0xf] %vm6972_vm0, %v18389_v61  ;;  %v12063_v61 = vadd.f32 %v6641_v60, %v17662_v23  ;;  %20297 = vst [vmem:[#allocation38_spill] sm:$0xff] %v18415_v8  ;;  %9342 = vxpose.xlu1.c.b16.cont [2/8] (narrow) %v20298_v10, 64  ;;  %v18428_v21 = vpack.c.bf16 %v12000_v40, %v12000_v40  ;;  %v12065_v37 = vadd.f32 %v6645_v35, %v17662_v23  ;;  %v18454_v40 = vpop.trf.xlu0  ;;  %v6265_v10 = vpop.f32.mrb[185].mxu0 }
 0x616   : > { %7223 = vst.msk [vmem:[%s17677_s10 + $0x68] sm:$0xf] %vm6972_vm0, %v18409_v44  ;;  %11115 = vst.msk [vmem:[%s17677_s10 + $0x268] sm:$0xf] %vm6972_vm0, %v18411_v2  ;;  %v18435_v9 = vpack.c.bf16 %v12064_v6, %v12064_v6  ;;  %v18437_v28 = vpack.c.bf16 %v12001_v12, %v12001_v12  ;;  %v6649_v6 = vpop.f32.mrb[184].mxu1  ;;  %v12002_v12 = vadd.f32 %v6263_v55, %v17652_v20 }
 0x617   : > { %v18426_v60 = vpack.c.bf16 %v12063_v61, %v12063_v61  ;;  %20300 = vst [vmem:[#allocation125_spill] sm:$0xff] %v18428_v21  ;;  %10891 = vst.msk [vmem:[%s17677_s10 + $0x168] sm:$0xf] %vm6972_vm0, %v18415_v8  ;;  %v18445_v61 = vpack.c.bf16 %v12065_v37, %v12065_v37  ;;  %v12066_v35 = vadd.f32 %v6649_v6, %v17655_v32  ;;  %8974 = vxpose.xlu0.c.b16.cont [5/8] (narrow) %v17597_v5, 64 }
 0x618   : > { %20301 = vst [vmem:[#allocation126_spill] sm:$0xff] %v18435_v9  ;;  %20302 = vst [vmem:[#allocation127_spill] sm:$0xff] %v18437_v28  ;;  %v12003_v37 = vadd.f32 %v6265_v10, %v17659_v30 }
 0x619   : > { %20299 = vst [vmem:[#allocation22_spill] sm:$0xff] %v18426_v60  ;;  %11339 = vst.msk [vmem:[%s17677_s10 + $0x368] sm:$0xf] %vm6972_vm0, %v18426_v60  ;;  %9343 = vxpose.xlu1.c.b16.cont [3/8] (narrow) %v20202_v47, 64  ;;  %v6267_v47 = vpop.f32.mrb[186].mxu0 }
 0x61a   : > { %7224 = vst.msk [vmem:[%s17677_s10 + $0x6c] sm:$0xf] %vm6972_vm0, %v18428_v21  ;;  %20303 = vst [vmem:[#allocation128_spill] sm:$0xff] %v18445_v61  ;;  %v18465_v21 = vpack.c.bf16 %v12066_v35, %v12066_v35  ;;  %v12004_v55 = vadd.f32 %v6267_v47, %v17652_v20  ;;  %v6269_v6 = vpop.f32.mrb[187].mxu0  ;;  %v18469_v5 = vpack.c.bf16 %v12003_v37, %v12003_v37  ;;  %v20305_v35 = vld [vmem:[#allocation99_spill] sm:$0xff] }
 0x61b   : > { %11116 = vst.msk [vmem:[%s17677_s10 + $0x26c] sm:$0xf] %vm6972_vm0, %v18435_v9  ;;  %10892 = vst.msk [vmem:[%s17677_s10 + $0x16c] sm:$0xf] %vm6972_vm0, %v18437_v28  ;;  %v6651_v28 = vpop.f32.mrb[185].mxu1  ;;  %v18463_v9 = vpack.c.bf16 %v12002_v12, %v12002_v12  ;;  %v12005_v10 = vadd.f32 %v6269_v6, %v17659_v30  ;;  %8975 = vxpose.xlu0.c.b16.cont [6/8] (narrow) %v17542_v48, 64 }
 0x61c   : > { %11340 = vst.msk [vmem:[%s17677_s10 + $0x36c] sm:$0xf] %vm6972_vm0, %v18445_v61  ;;  %v12067_v61 = vadd.f32 %v6651_v28, %v17662_v23  ;;  %v6653_v60 = vpop.f32.mrb[186].mxu1  ;;  %20304 = vst [vmem:[#allocation129_spill] sm:$0xff] %v18469_v5  ;;  %v18482_v37 = vpack.c.bf16 %v12004_v55, %v12004_v55  ;;  %v6273_v48 = vpop.f32.mrb[188].mxu0 }
 0x61d   : > { %v12068_v8 = vadd.f32 %v6653_v60, %v17655_v32  ;;  %v6655_v12 = vpop.f32.mrb[187].mxu1  ;;  %9344 = vxpose.xlu1.c.b16.cont [4/8] (narrow) %v20305_v35, 64  ;;  %7225 = vst.msk [vmem:[%s17677_s10 + $0x70] sm:$0xf] %vm6972_vm0, %v18463_v9  ;;  %11117 = vst.msk [vmem:[%s17677_s10 + $0x270] sm:$0xf] %vm6972_vm0, %v18465_v21  ;;  %v18491_v6 = vpack.c.bf16 %v12005_v10, %v12005_v10  ;;  %v18508_v55 = vpop.permute.xlu0 %7390  ;;  %v12006_v10 = vadd.f32 %v6273_v48, %v17652_v20 }
 0x61e   : > { %v18480_v28 = vpack.c.bf16 %v12067_v61, %v12067_v61  ;;  %20307 = vst [vmem:[#allocation130_spill] sm:$0xff] %v18482_v37  ;;  %v12069_v60 = vadd.f32 %v6655_v12, %v17662_v23  ;;  %10893 = vst.msk [vmem:[%s17677_s10 + $0x170] sm:$0xf] %vm6972_vm0, %v18469_v5  ;;  %v6275_v35 = vpop.f32.mrb[189].mxu0 }
 0x61f   : > { %v18489_v47 = vpack.c.bf16 %v12068_v8, %v12068_v8  ;;  %20309 = vst [vmem:[#allocation132_spill] sm:$0xff] %v18491_v6  ;;  %7226 = vst.msk [vmem:[%s17677_s10 + $0x74] sm:$0xf] %vm6972_vm0, %v18482_v37  ;;  %v6659_v8 = vpop.f32.mrb[188].mxu1  ;;  %8976 = vxpose.xlu0.c.b16.cont [7/8] (narrow) %v17621_v46, 64 }
 0x620   : > { %20306 = vst [vmem:[#allocation99_spill] sm:$0xff] %v18480_v28  ;;  %11341 = vst.msk [vmem:[%s17677_s10 + $0x370] sm:$0xf] %vm6972_vm0, %v18480_v28  ;;  %v18499_v61 = vpack.c.bf16 %v12069_v60, %v12069_v60  ;;  %v12070_v12 = vadd.f32 %v6659_v8, %v17655_v32  ;;  %v12007_v60 = vadd.f32 %v6275_v35, %v17659_v30 }
 0x621   : > { %20308 = vst [vmem:[#allocation131_spill] sm:$0xff] %v18489_v47  ;;  %11118 = vst.msk [vmem:[%s17677_s10 + $0x274] sm:$0xf] %vm6972_vm0, %v18489_v47  ;;  %9345 = vxpose.xlu1.c.b16.cont [5/8] (narrow) %v20219_v39, 64  ;;  %v6277_v39 = vpop.f32.mrb[190].mxu0  ;;  %v18517_v47 = vpack.c.bf16 %v12006_v10, %v12006_v10 }
 0x622   : > { %20310 = vst [vmem:[#allocation133_spill] sm:$0xff] %v18499_v61  ;;  %10894 = vst.msk [vmem:[%s17677_s10 + $0x174] sm:$0xf] %vm6972_vm0, %v18491_v6  ;;  %v6661_v6 = vpop.f32.mrb[189].mxu1  ;;  %v18519_v37 = vpack.c.bf16 %v12070_v12, %v12070_v12  ;;  %v12008_v48 = vadd.f32 %v6277_v39, %v17652_v20  ;;  %v6279_v8 = vpop.f32.mrb[191].mxu0  ;;  %v18523_v46 = vpack.c.bf16 %v12007_v60, %v12007_v60 }
 0x623   : > { %11342 = vst.msk [vmem:[%s17677_s10 + $0x374] sm:$0xf] %vm6972_vm0, %v18499_v61  ;;  %v12071_v61 = vadd.f32 %v6661_v6, %v17662_v23  ;;  %v6663_v28 = vpop.f32.mrb[190].mxu1  ;;  %v12009_v35 = vadd.f32 %v6279_v8, %v17659_v30  ;;  %7227 = vst.msk [vmem:[%s17677_s10 + $0x78] sm:$0xf] %vm6972_vm0, %v18517_v47  ;;  %8977 = vxpose.xlu0.c.b16.end [8/8] (narrow) %v17564_v58, 64 }
 0x624   : > { %v12072_v5 = vadd.f32 %v6663_v28, %v17655_v32  ;;  %v6665_v10 = vpop.f32.mrb[191].mxu1  ;;  %11119 = vst.msk [vmem:[%s17677_s10 + $0x278] sm:$0xf] %vm6972_vm0, %v18519_v37  ;;  %v18536_v6 = vpack.c.bf16 %v12008_v48, %v12008_v48  ;;  %10895 = vst.msk [vmem:[%s17677_s10 + $0x178] sm:$0xf] %vm6972_vm0, %v18523_v46 }
 0x625   : > { %9346 = vxpose.xlu1.c.b16.cont [6/8] (narrow) %v17424_v19, 64  ;;  %v18534_v20 = vpack.c.bf16 %v12071_v61, %v12071_v61  ;;  %v12073_v32 = vadd.f32 %v6665_v10, %v17662_v23  ;;  %v18545_v19 = vpack.c.bf16 %v12009_v35, %v12009_v35  ;;  %v18555_v61 = vpop.permute.xlu0 %8938  ;;  %v18572_v23 = vpop.permute.xlu1 %8952  ;;  %v20316_v10 = vld [vmem:[#allocation68_spill] sm:$0xff] }
 0x626   : > { %v18543_v30 = vpack.c.bf16 %v12072_v5, %v12072_v5  ;;  %7228 = vst.msk [vmem:[%s17677_s10 + $0x7c] sm:$0xf] %vm6972_vm0, %v18536_v6 }
 0x627   : > { %11343 = vst.msk [vmem:[%s17677_s10 + $0x378] sm:$0xf] %vm6972_vm0, %v18534_v20  ;;  %v18553_v28 = vpack.c.bf16 %v12073_v32, %v12073_v32  ;;  %10896 = vst.msk [vmem:[%s17677_s10 + $0x17c] sm:$0xf] %vm6972_vm0, %v18545_v19  ;;  %8196 = vxpose.xlu0.c.b16.start [1/8] (narrow) %v17545_v17, 64 }
 0x628   : > { %11120 = vst.msk [vmem:[%s17677_s10 + $0x27c] sm:$0xf] %vm6972_vm0, %v18543_v30 }
 0x629   : > { %9347 = vxpose.xlu1.c.b16.cont [7/8] (narrow) %v17458_v63, 64  ;;  %11344 = vst.msk [vmem:[%s17677_s10 + $0x37c] sm:$0xf] %vm6972_vm0, %v18553_v28  ;;  %v18570_v58 = vpop.permute.xlu0 %8164 }
 0x62b   : > { %8197 = vxpose.xlu0.c.b16.cont [2/8] (narrow) %v17501_v16, 64 }
 0x62d   : > { %9348 = vxpose.xlu1.c.b16.end [8/8] (narrow) %v17488_v24, 64  ;;  %v18577_v5 = vpop.permute.xlu0 %9712 }
 0x62f   : > { %8198 = vxpose.xlu0.c.b16.cont [3/8] (narrow) %v17577_v43, 64 }
 0x631   : > { %9726 = vrot.lane.b32.xlu1 %v17488_v24, %s13581_s4  ;;  %v7395_v43 = vpop.permute.xlu0 %7394 }
 0x633   : > { %v7801_v63 = vpop.trf.xlu1  ;;  %8199 = vxpose.xlu0.c.b16.cont [4/8] (narrow) %v17521_v57, 64 }
 0x634   : > { %v10817_v17 = vcombine.low %v18060_v53, %v7801_v63  ;;  %v10818_v12 = vcombine.high %v18060_v53, %v7801_v63 }
 0x635   : > { %v8943_v8 = vpop.permute.xlu0 %8942 }
 0x636   : > { %10825 = vst [vmem:[%s17736_s23 + $0x80] sm:$0xff] %v10817_v17  ;;  %10826 = vst [vmem:[%s17736_s23 + $0x88] sm:$0xff] %v10818_v12  ;;  %v20317_v17 = vld [vmem:[#allocation88_spill] sm:$0xff] }
 0x637   : > { %v7802_v16 = vpop.trf.xlu1  ;;  %8200 = vxpose.xlu0.c.b16.cont [5/8] (narrow) %v17603_v59, 64 }
 0x638   : > { %v10819_v60 = vcombine.low %v18115_v34, %v7802_v16  ;;  %v10820_v24 = vcombine.high %v18115_v34, %v7802_v16 }
 0x639   : > { %v18600_v59 = vpop.permute.xlu0 %8168 }
 0x63a   : > { %10827 = vst [vmem:[%s17736_s23 + $0x90] sm:$0xff] %v10819_v60  ;;  %10828 = vst [vmem:[%s17736_s23 + $0x98] sm:$0xff] %v10820_v24  ;;  %v20318_v60 = vld [vmem:[#allocation79_spill] sm:$0xff]  ;;  %v20319_v24 = vld [vmem:[#allocation97_spill] sm:$0xff] }
 0x63b   : > { %v7803_v39 = vpop.trf.xlu1  ;;  %8201 = vxpose.xlu0.c.b16.cont [6/8] (narrow) %v17548_v26, 64 }
 0x63c   : > { %v10821_v53 = vcombine.low %v18166_v25, %v7803_v39  ;;  %v10822_v48 = vcombine.high %v18166_v25, %v7803_v39 }
 0x63d   : > { %v18603_v25 = vpop.permute.xlu0 %9716 }
 0x63e   : > { %10829 = vst [vmem:[%s17736_s23 + $0xa0] sm:$0xff] %v10821_v53  ;;  %10830 = vst [vmem:[%s17736_s23 + $0xa8] sm:$0xff] %v10822_v48  ;;  %v20320_v53 = vld [vmem:[#allocation114_spill] sm:$0xff] }
 0x63f   : > { %v7804_v57 = vpop.trf.xlu1  ;;  %8202 = vxpose.xlu0.c.b16.cont [7/8] (narrow) %v17629_v31, 64 }
 0x640   : > { %v10823_v34 = vcombine.low %v18220_v29, %v7804_v57  ;;  %v10824_v35 = vcombine.high %v18220_v29, %v7804_v57  ;;  %v20313_v29 = vld [vmem:[#allocation44_spill] sm:$0xff] }
 0x641   : > { %v7399_v26 = vpop.permute.xlu0 %7398 }
 0x642   : > { %10831 = vst [vmem:[%s17736_s23 + $0xb0] sm:$0xff] %v10823_v34  ;;  %10832 = vst [vmem:[%s17736_s23 + $0xb8] sm:$0xff] %v10824_v35  ;;  %v20321_v34 = vld [vmem:[#allocation82_spill] sm:$0xff] }
 0x643   : > { %8203 = vxpose.xlu0.c.b16.end [8/8] (narrow) %v17570_v18, 64  ;;  %v20311_v18 = vld [vmem:[#allocation48_spill] sm:$0xff] }
 0x645   : > { %v8947_v31 = vpop.permute.xlu0 %8946 }
 0x647   : > { %9744 = vxpose.xlu0.c.b16.start [1/8] (narrow) %v17552_v14, 64 }
 0x649   : > { %v18612_v14 = vpop.permute.xlu0 %8172 }
 0x64b   : > { %9745 = vxpose.xlu0.c.b16.cont [2/8] (narrow) %v17506_v38, 64  ;;  %v20312_v38 = vld [vmem:[#allocation86_spill] sm:$0xff] }
 0x64f   : > { %9746 = vxpose.xlu0.c.b16.cont [3/8] (narrow) %v17584_v45, 64  ;;  %v18616_v45 = vpop.permute.xlu0 %9720 }
 0x653   : > { %9747 = vxpose.xlu0.c.b16.cont [4/8] (narrow) %v17528_v13, 64  ;;  %v20314_v13 = vld [vmem:[#allocation52_spill] sm:$0xff] }
 0x654   : > { %7438 = vxpose.xlu1.c.b16.start [1/8] (narrow) %v18508_v55, 64 }
 0x657   : > { %9748 = vxpose.xlu0.c.b16.cont [5/8] (narrow) %v17608_v3, 64  ;;  %v20315_v3 = vld [vmem:[#allocation85_spill] sm:$0xff] }
 0x658   : > { %7439 = vxpose.xlu1.c.b16.cont [2/8] (narrow) %v17581_v11, 64  ;;  %v7403_v11 = vpop.permute.xlu0 %7402 }
 0x65b   : > { %9749 = vxpose.xlu0.c.b16.cont [6/8] (narrow) %v17554_v49, 64 }
 0x65c   : > { %7440 = vxpose.xlu1.c.b16.cont [3/8] (narrow) %v7395_v43, 64  ;;  %v8951_v49 = vpop.permute.xlu0 %8950 }
 0x65f   : > { %9750 = vxpose.xlu0.c.b16.cont [7/8] (narrow) %v20312_v38, 64  ;;  %v8179_v55 = vpop.permute.xlu1 %8178  ;;  %v20323_v38 = vld [vmem:[#allocation117_spill] sm:$0xff] }
 0x660   : > { %7441 = vxpose.xlu1.c.b16.cont [4/8] (narrow) %v20311_v18, 64  ;;  %v8177_v32 = vpop.permute.xlu0 %8176 }
 0x663   : > { %9751 = vxpose.xlu0.c.b16.end [8/8] (narrow) %v20313_v29, 64  ;;  %v20324_v29 = vld [vmem:[#allocation64_spill] sm:$0xff] }
 0x664   : > { %7442 = vxpose.xlu1.c.b16.cont [5/8] (narrow) %v7399_v26, 64  ;;  %v18637_v39 = vpop.permute.xlu0 %9724 }
 0x668   : > { %7443 = vxpose.xlu1.c.b16.cont [6/8] (narrow) %v20314_v13, 64  ;;  %v7430_v35 = vpop.trf.xlu0  ;;  %v20325_v13 = vld [vmem:[#allocation118_spill] sm:$0xff] }
 0x66c   : > { %7444 = vxpose.xlu1.c.b16.cont [7/8] (narrow) %v7403_v11, 64  ;;  %7503 = vrot.lane.b32.xlu0 %v20315_v3, %s13581_s4  ;;  %v20326_v3 = vld [vmem:[#allocation94_spill] sm:$0xff] }
 0x670   : > { %7445 = vxpose.xlu1.c.b16.end [8/8] (narrow) %v18164_v27, 64  ;;  %9051 = vrot.lane.b32.xlu0 %v20316_v10, %s13581_s4  ;;  %v20328_v10 = vld [vmem:[#allocation42_spill] sm:$0xff] }
 0x674   : > { %8986 = vxpose.xlu1.c.b16.start [1/8] (narrow) %v18555_v61, 64  ;;  %8277 = vrot.lane.b32.xlu0 %v20317_v17, %s13581_s4 }
 0x677   : > { %v9349_v63 = vpop.trf.xlu1 }
 0x678   : > { %v11265_v12 = vcombine.low %v18290_v42, %v9349_v63  ;;  %v11266_v16 = vcombine.high %v18290_v42, %v9349_v63  ;;  %8987 = vxpose.xlu1.c.b16.cont [2/8] (narrow) %v20318_v60, 64  ;;  %9825 = vrot.lane.b32.xlu0 %v20319_v24, %s13581_s4  ;;  %v20334_v60 = vld [vmem:[#allocation60_spill] sm:$0xff]  ;;  %v20336_v24 = vld [vmem:[#allocation105_spill] sm:$0xff] }
 0x67a   : > { %11273 = vst [vmem:[%s17736_s23 + $0x180] sm:$0xff] %v11265_v12  ;;  %11274 = vst [vmem:[%s17736_s23 + $0x188] sm:$0xff] %v11266_v16  ;;  %v20333_v16 = vld [vmem:[#allocation51_spill] sm:$0xff] }
 0x67b   : > { %v9350_v27 = vpop.trf.xlu1 }
 0x67c   : > { %v11267_v61 = vcombine.low %v18343_v1, %v9350_v27  ;;  %v11268_v43 = vcombine.high %v18343_v1, %v9350_v27  ;;  %8988 = vxpose.xlu1.c.b16.cont [3/8] (narrow) %v8943_v8, 64  ;;  %7507 = vrot.lane.b32.xlu0 %v20320_v53, %s13581_s4  ;;  %v20322_v8 = vld [vmem:[#allocation90_spill] sm:$0xff] }
 0x67e   : > { %11275 = vst [vmem:[%s17736_s23 + $0x190] sm:$0xff] %v11267_v61  ;;  %11276 = vst [vmem:[%s17736_s23 + $0x198] sm:$0xff] %v11268_v43  ;;  %v20337_v61 = vld [vmem:[#allocation62_spill] sm:$0xff] }
 0x67f   : > { %v9351_v42 = vpop.trf.xlu1 }
 0x680   : > { %v11269_v48 = vcombine.low %v18400_v51, %v9351_v42  ;;  %v11270_v57 = vcombine.high %v18400_v51, %v9351_v42  ;;  %8989 = vxpose.xlu1.c.b16.cont [4/8] (narrow) %v20321_v34, 64  ;;  %9055 = vrot.lane.b32.xlu0 %v20322_v8, %s13581_s4  ;;  %v7431_v51 = vpop.trf.xlu0  ;;  %v20338_v42 = vld [vmem:[#allocation58_spill] sm:$0xff]  ;;  %v20341_v8 = vld [vmem:[#allocation45_spill] sm:$0xff] }
 0x682   : > { %11277 = vst [vmem:[%s17736_s23 + $0x1a0] sm:$0xff] %v11269_v48  ;;  %11278 = vst [vmem:[%s17736_s23 + $0x1a8] sm:$0xff] %v11270_v57 }
 0x683   : > { %v9352_v1 = vpop.trf.xlu1 }
 0x684   : > { %v11271_v26 = vcombine.low %v18454_v40, %v9352_v1  ;;  %v11272_v18 = vcombine.high %v18454_v40, %v9352_v1  ;;  %8990 = vxpose.xlu1.c.b16.cont [5/8] (narrow) %v8947_v31, 64  ;;  %8281 = vrot.lane.b32.xlu0 %v20323_v38, %s13581_s4  ;;  %v7432_v11 = vpop.trf.xlu0  ;;  %v20327_v31 = vld [vmem:[#allocation121_spill] sm:$0xff]  ;;  %v20342_v38 = vld [vmem:[#allocation56_spill] sm:$0xff] }
 0x686   : > { %11279 = vst [vmem:[%s17736_s23 + $0x1b0] sm:$0xff] %v11271_v26  ;;  %11280 = vst [vmem:[%s17736_s23 + $0x1b8] sm:$0xff] %v11272_v18 }
 0x688   : > { %8991 = vxpose.xlu1.c.b16.cont [6/8] (narrow) %v20324_v29, 64  ;;  %9829 = vrot.lane.b32.xlu0 %v20325_v13, %s13581_s4  ;;  %v7433_v40 = vpop.trf.xlu0 }
 0x68c   : > { %8992 = vxpose.xlu1.c.b16.cont [7/8] (narrow) %v8951_v49, 64  ;;  %7511 = vrot.lane.b32.xlu0 %v20326_v3, %s13581_s4  ;;  %v18668_v63 = vpop.trf.xlu0  ;;  %v20329_v49 = vld [vmem:[#allocation122_spill] sm:$0xff] }
 0x690   : > { %8993 = vxpose.xlu1.c.b16.end [8/8] (narrow) %v18572_v23, 64  ;;  %9059 = vrot.lane.b32.xlu0 %v17804_v22, %s13581_s4  ;;  %v20330_v23 = vld [vmem:[#allocation55_spill] sm:$0xff]  ;;  %v18675_v17 = vpop.trf.xlu0  ;;  %v20331_v22 = vld [vmem:[#allocation46_spill] sm:$0xff] }
 0x694   : > { %8212 = vxpose.xlu1.c.b16.start [1/8] (narrow) %v18570_v58, 64  ;;  %8285 = vrot.lane.b32.xlu0 %v20327_v31, %s13581_s4  ;;  %v20332_v58 = vld [vmem:[#allocation98_spill] sm:$0xff]  ;;  %v18681_v12 = vpop.trf.xlu0 }
 0x698   : > { %8213 = vxpose.xlu1.c.b16.cont [2/8] (narrow) %v20328_v10, 64  ;;  %9833 = vrot.lane.b32.xlu0 %v20329_v49, %s13581_s4  ;;  %v18688_v27 = vpop.trf.xlu0 }
 0x69c   : > { %8214 = vxpose.xlu1.c.b16.cont [3/8] (narrow) %v18600_v59, 64  ;;  %7515 = vrot.lane.b32.xlu0 %v20330_v23, %s13581_s4  ;;  %v20335_v59 = vld [vmem:[#allocation100_spill] sm:$0xff] }
 0x69d   : > { %v20345_v23 = vld [vmem:[#allocation72_spill] sm:$0xff] }
 0x6a0   : > { %8215 = vxpose.xlu1.c.b16.cont [4/8] (narrow) %v20331_v22, 64  ;;  %9063 = vrot.lane.b32.xlu0 %v20332_v58, %s13581_s4  ;;  %v20346_v58 = vld [vmem:[#allocation47_spill] sm:$0xff] }
 0x6a3   : > { %v9727_v43 = vpop.permute.xlu1 %9726 }
 0x6a4   : > { %8216 = vxpose.xlu1.c.b16.cont [5/8] (narrow) %v18612_v14, 64  ;;  %8289 = vrot.lane.b32.xlu0 %v20333_v16, %s13581_s4  ;;  %v18692_v14 = vpop.trf.xlu0  ;;  %v20349_v16 = vld [vmem:[#allocation91_spill] sm:$0xff] }
 0x6a8   : > { %8217 = vxpose.xlu1.c.b16.cont [6/8] (narrow) %v20334_v60, 64  ;;  %9837 = vrot.lane.b32.xlu0 %v20335_v59, %s13581_s4  ;;  %v18699_v53 = vpop.trf.xlu0  ;;  %v20350_v59 = vld [vmem:[#allocation75_spill] sm:$0xff] }
 0x6ac   : > { %8218 = vxpose.xlu1.c.b16.cont [7/8] (narrow) %v8177_v32, 64  ;;  %7519 = vrot.lane.b32.xlu0 %v20336_v24, %s13581_s4  ;;  %v20339_v32 = vld [vmem:[#allocation83_spill] sm:$0xff]  ;;  %v18705_v1 = vpop.trf.xlu0 }
 0x6b0   : > { %8219 = vxpose.xlu1.c.b16.end [8/8] (narrow) %v8179_v55, 64  ;;  %9067 = vrot.lane.b32.xlu0 %v20337_v61, %s13581_s4  ;;  %v20340_v55 = vld [vmem:[#allocation71_spill] sm:$0xff]  ;;  %v18716_v29 = vpop.trf.xlu0  ;;  %v20352_v61 = vld [vmem:[#allocation74_spill] sm:$0xff] }
 0x6b4   : > { %9760 = vxpose.xlu1.c.b16.start [1/8] (narrow) %v18577_v5, 64  ;;  %8293 = vrot.lane.b32.xlu0 %v20338_v42, %s13581_s4  ;;  %v18724_v22 = vpop.trf.xlu0 }
 0x6b8   : > { %9761 = vxpose.xlu1.c.b16.cont [2/8] (narrow) %v20339_v32, 64  ;;  %9841 = vrot.lane.b32.xlu0 %v20340_v55, %s13581_s4 }
 0x6ba   : > { %v7446_v48 = vpop.trf.xlu1 }
 0x6bb   : > { %v10705_v57 = vcombine.low %v7430_v35, %v7446_v48  ;;  %v10706_v34 = vcombine.high %v7430_v35, %v7446_v48  ;;  %v20353_v48 = vld [vmem:[#allocation106_spill] sm:$0xff] }
 0x6bc   : > { %9762 = vxpose.xlu1.c.b16.cont [3/8] (narrow) %v18603_v25, 64  ;;  %7523 = vrot.lane.b32.xlu0 %v20341_v8, %s13581_s4  ;;  %v20343_v25 = vld [vmem:[#allocation43_spill] sm:$0xff] }
 0x6bd   : > { %10713 = vst [vmem:[%s17736_s23 + $0x40] sm:$0xff] %v10705_v57  ;;  %10714 = vst [vmem:[%s17736_s23 + $0x48] sm:$0xff] %v10706_v34 }
 0x6be   : > { %v7447_v5 = vpop.trf.xlu1 }
 0x6bf   : > { %v10707_v26 = vcombine.low %v7431_v51, %v7447_v5  ;;  %v10708_v18 = vcombine.high %v7431_v51, %v7447_v5  ;;  %v20344_v51 = vld [vmem:[#allocation49_spill] sm:$0xff]  ;;  %v20354_v5 = vld [vmem:[#allocation111_spill] sm:$0xff] }
 0x6c0   : > { %9763 = vxpose.xlu1.c.b16.cont [4/8] (narrow) %v20342_v38, 64  ;;  %9071 = vrot.lane.b32.xlu0 %v20343_v25, %s13581_s4  ;;  %v20357_v25 = vld [vmem:[#allocation29_spill] sm:$0xff] }
 0x6c1   : > { %10715 = vst [vmem:[%s17736_s23 + $0x50] sm:$0xff] %v10707_v26  ;;  %10716 = vst [vmem:[%s17736_s23 + $0x58] sm:$0xff] %v10708_v18  ;;  %v20355_v26 = vld [vmem:[#allocation27_spill] sm:$0xff] }
 0x6c2   : > { %v7448_v35 = vpop.trf.xlu1 }
 0x6c3   : > { %v10709_v13 = vcombine.low %v7432_v11, %v7448_v35  ;;  %v10710_v3 = vcombine.high %v7432_v11, %v7448_v35  ;;  %v18733_v11 = vpop.trf.xlu0 }
 0x6c4   : > { %9764 = vxpose.xlu1.c.b16.cont [5/8] (narrow) %v18616_v45, 64  ;;  %8297 = vrot.lane.b32.xlu0 %v20344_v51, %s13581_s4  ;;  %v20347_v45 = vld [vmem:[#allocation73_spill] sm:$0xff]  ;;  %v20359_v51 = vld [vmem:[#allocation26_spill] sm:$0xff] }
 0x6c5   : > { %10717 = vst [vmem:[%s17736_s23 + $0x60] sm:$0xff] %v10709_v13  ;;  %10718 = vst [vmem:[%s17736_s23 + $0x68] sm:$0xff] %v10710_v3 }
 0x6c6   : > { %v7449_v31 = vpop.trf.xlu1 }
 0x6c7   : > { %v10711_v10 = vcombine.low %v7433_v40, %v7449_v31  ;;  %v10712_v49 = vcombine.high %v7433_v40, %v7449_v31  ;;  %v20348_v40 = vld [vmem:[#allocation69_spill] sm:$0xff]  ;;  %v18739_v60 = vpop.trf.xlu0 }
 0x6c8   : > { %9765 = vxpose.xlu1.c.b16.cont [6/8] (narrow) %v20345_v23, 64  ;;  %9845 = vrot.lane.b32.xlu0 %v20346_v58, %s13581_s4  ;;  %v20362_v58 = vld [vmem:[#allocation32_spill] sm:$0xff] }
 0x6c9   : > { %10719 = vst [vmem:[%s17736_s23 + $0x70] sm:$0xff] %v10711_v10  ;;  %10720 = vst [vmem:[%s17736_s23 + $0x78] sm:$0xff] %v10712_v49  ;;  %v20360_v10 = vld [vmem:[#allocation87_spill] sm:$0xff] }
 0x6cc   : > { %9766 = vxpose.xlu1.c.b16.cont [7/8] (narrow) %v18637_v39, 64  ;;  %7527 = vrot.lane.b32.xlu0 %v20347_v45, %s13581_s4  ;;  %v20351_v39 = vld [vmem:[#allocation104_spill] sm:$0xff]  ;;  %v20363_v45 = vld [vmem:[#allocation123_spill] sm:$0xff] }
 0x6d0   : > { %9767 = vxpose.xlu1.c.b16.end [8/8] (narrow) %v9727_v43, 64  ;;  %9075 = vrot.lane.b32.xlu0 %v20348_v40, %s13581_s4  ;;  %v18747_v43 = vpop.trf.xlu0 }
 0x6d4   : > { %7505 = vrot.lane.b32.xlu1 %v20349_v16, %s13581_s4  ;;  %8301 = vrot.lane.b32.xlu0 %v20350_v59, %s13581_s4  ;;  %v20365_v16 = vld [vmem:[#allocation96_spill] sm:$0xff] }
 0x6d8   : > { %9053 = vrot.lane.b32.xlu1 %v20351_v39, %s13581_s4  ;;  %9849 = vrot.lane.b32.xlu0 %v20352_v61, %s13581_s4 }
 0x6da   : > { %v8994_v24 = vpop.trf.xlu1 }
 0x6db   : > { %v11153_v42 = vcombine.low %v18668_v63, %v8994_v24  ;;  %v11154_v32 = vcombine.high %v18668_v63, %v8994_v24  ;;  %v20366_v24 = vld [vmem:[#allocation37_spill] sm:$0xff] }
 0x6dc   : > { %8279 = vrot.lane.b32.xlu1 %v20353_v48, %s13581_s4  ;;  %7531 = vrot.lane.b32.xlu0 %v18076_v50, %s13581_s4 }
 0x6dd   : > { %11161 = vst [vmem:[%s17736_s23 + $0x140] sm:$0xff] %v11153_v42  ;;  %11162 = vst [vmem:[%s17736_s23 + $0x148] sm:$0xff] %v11154_v32  ;;  %v20367_v32 = vld [vmem:[#allocation124_spill] sm:$0xff] }
 0x6de   : > { %v8995_v55 = vpop.trf.xlu1  ;;  %v7504_v63 = vpop.permute.xlu0 %7503 }
 0x6df   : > { %v11155_v57 = vcombine.low %v18675_v17, %v8995_v55  ;;  %v11156_v34 = vcombine.high %v18675_v17, %v8995_v55  ;;  %10721 = vst.msk [vmem:[%s17677_s10 + $0x80] sm:$0xf] %vm6972_vm0, %v7504_v63  ;;  %v20356_v17 = vld [vmem:[#allocation92_spill] sm:$0xff] }
 0x6e0   : > { %9827 = vrot.lane.b32.xlu1 %v20354_v5, %s13581_s4  ;;  %9079 = vrot.lane.b32.xlu0 %v20355_v26, %s13581_s4 }
 0x6e1   : > { %11163 = vst [vmem:[%s17736_s23 + $0x150] sm:$0xff] %v11155_v57  ;;  %11164 = vst [vmem:[%s17736_s23 + $0x158] sm:$0xff] %v11156_v34 }
 0x6e2   : > { %v8996_v8 = vpop.trf.xlu1  ;;  %v9052_v38 = vpop.permute.xlu0 %9051 }
 0x6e3   : > { %v11157_v50 = vcombine.low %v18681_v12, %v8996_v8  ;;  %v11158_v18 = vcombine.high %v18681_v12, %v8996_v8  ;;  %11169 = vst.msk [vmem:[%s17677_s10 + $0x280] sm:$0xf] %vm6972_vm0, %v9052_v38  ;;  %v20358_v12 = vld [vmem:[#allocation119_spill] sm:$0xff] }
 0x6e4   : > { %7509 = vrot.lane.b32.xlu1 %v20356_v17, %s13581_s4  ;;  %8305 = vrot.lane.b32.xlu0 %v20357_v25, %s13581_s4  ;;  %v20373_v25 = vld [vmem:[#allocation101_spill] sm:$0xff] }
 0x6e5   : > { %11165 = vst [vmem:[%s17736_s23 + $0x160] sm:$0xff] %v11157_v50  ;;  %11166 = vst [vmem:[%s17736_s23 + $0x168] sm:$0xff] %v11158_v18  ;;  %v20370_v18 = vld [vmem:[#allocation40_spill] sm:$0xff] }
 0x6e6   : > { %v8997_v35 = vpop.trf.xlu1  ;;  %v8278_v31 = vpop.permute.xlu0 %8277 }
 0x6e7   : > { %v11159_v13 = vcombine.low %v18688_v27, %v8997_v35  ;;  %v11160_v3 = vcombine.high %v18688_v27, %v8997_v35  ;;  %10945 = vst.msk [vmem:[%s17677_s10 + $0x180] sm:$0xf] %vm6972_vm0, %v8278_v31  ;;  %v20361_v27 = vld [vmem:[#allocation120_spill] sm:$0xff]  ;;  %v20372_v35 = vld [vmem:[#allocation110_spill] sm:$0xff] }
 0x6e8   : > { %9057 = vrot.lane.b32.xlu1 %v20358_v12, %s13581_s4  ;;  %9853 = vrot.lane.b32.xlu0 %v20359_v51, %s13581_s4  ;;  %v20375_v12 = vld [vmem:[#allocation108_spill] sm:$0xff]  ;;  %v20377_v51 = vld [vmem:[#allocation67_spill] sm:$0xff] }
 0x6e9   : > { %11167 = vst [vmem:[%s17736_s23 + $0x170] sm:$0xff] %v11159_v13  ;;  %11168 = vst [vmem:[%s17736_s23 + $0x178] sm:$0xff] %v11160_v3 }
 0x6ea   : > { %v9826_v49 = vpop.permute.xlu0 %9825 }
 0x6eb   : > { %11393 = vst.msk [vmem:[%s17677_s10 + $0x380] sm:$0xf] %vm6972_vm0, %v9826_v49 }
 0x6ec   : > { %8283 = vrot.lane.b32.xlu1 %v20360_v10, %s13581_s4  ;;  %7535 = vrot.lane.b32.xlu0 %v18129_v41, %s13581_s4  ;;  %v20364_v41 = vld [vmem:[#allocation35_spill] sm:$0xff] }
 0x6ee   : > { %v7508_v23 = vpop.permute.xlu0 %7507 }
 0x6ef   : > { %10723 = vst.msk [vmem:[%s17677_s10 + $0x88] sm:$0xf] %vm6972_vm0, %v7508_v23 }
 0x6f0   : > { %9831 = vrot.lane.b32.xlu1 %v20361_v27, %s13581_s4  ;;  %9083 = vrot.lane.b32.xlu0 %v20362_v58, %s13581_s4  ;;  %v20379_v58 = vld [vmem:[#allocation107_spill] sm:$0xff] }
 0x6f2   : > { %v9056_v40 = vpop.permute.xlu0 %9055 }
 0x6f3   : > { %11171 = vst.msk [vmem:[%s17677_s10 + $0x288] sm:$0xf] %vm6972_vm0, %v9056_v40 }
 0x6f4   : > { %7513 = vrot.lane.b32.xlu1 %v20363_v45, %s13581_s4  ;;  %8309 = vrot.lane.b32.xlu0 %v20364_v41, %s13581_s4 }
 0x6f6   : > { %v8282_v59 = vpop.permute.xlu0 %8281 }
 0x6f7   : > { %10947 = vst.msk [vmem:[%s17677_s10 + $0x188] sm:$0xf] %vm6972_vm0, %v8282_v59 }
 0x6f8   : > { %9061 = vrot.lane.b32.xlu1 %v20365_v16, %s13581_s4  ;;  %9857 = vrot.lane.b32.xlu0 %v20366_v24, %s13581_s4 }
 0x6fa   : > { %v8220_v39 = vpop.trf.xlu1  ;;  %v9830_v48 = vpop.permute.xlu0 %9829 }
 0x6fb   : > { %v10929_v61 = vcombine.low %v18692_v14, %v8220_v39  ;;  %v10930_v42 = vcombine.high %v18692_v14, %v8220_v39  ;;  %11395 = vst.msk [vmem:[%s17677_s10 + $0x388] sm:$0xf] %vm6972_vm0, %v9830_v48  ;;  %v20368_v14 = vld [vmem:[#allocation95_spill] sm:$0xff] }
 0x6fc   : > { %8287 = vrot.lane.b32.xlu1 %v20367_v32, %s13581_s4  ;;  %7539 = vrot.lane.b32.xlu0 %v18185_v15, %s13581_s4  ;;  %v20382_v32 = vld [vmem:[#allocation84_spill] sm:$0xff] }
 0x6fd   : > { %10937 = vst [vmem:[%s17736_s23 + $0xc0] sm:$0xff] %v10929_v61  ;;  %10938 = vst [vmem:[%s17736_s23 + $0xc8] sm:$0xff] %v10930_v42 }
 0x6fe   : > { %v8221_v55 = vpop.trf.xlu1  ;;  %v7512_v5 = vpop.permute.xlu0 %7511 }
 0x6ff   : > { %v10931_v57 = vcombine.low %v18699_v53, %v8221_v55  ;;  %v10932_v34 = vcombine.high %v18699_v53, %v8221_v55  ;;  %10725 = vst.msk [vmem:[%s17677_s10 + $0x90] sm:$0xf] %vm6972_vm0, %v7512_v5  ;;  %v20369_v53 = vld [vmem:[#allocation103_spill] sm:$0xff] }
 0x700   : > { %9835 = vrot.lane.b32.xlu1 %v20368_v14, %s13581_s4  ;;  %9087 = vrot.lane.b32.xlu0 %v18187_v62, %s13581_s4 }
 0x701   : > { %10939 = vst [vmem:[%s17736_s23 + $0xd0] sm:$0xff] %v10931_v57  ;;  %10940 = vst [vmem:[%s17736_s23 + $0xd8] sm:$0xff] %v10932_v34  ;;  %v20384_v57 = vld [vmem:[#allocation50_spill] sm:$0xff]  ;;  %v20385_v34 = vld [vmem:[#allocation65_spill] sm:$0xff] }
 0x702   : > { %v8222_v63 = vpop.trf.xlu1  ;;  %v9060_v26 = vpop.permute.xlu0 %9059 }
 0x703   : > { %v10933_v15 = vcombine.low %v18705_v1, %v8222_v63  ;;  %v10934_v8 = vcombine.high %v18705_v1, %v8222_v63  ;;  %11173 = vst.msk [vmem:[%s17677_s10 + $0x290] sm:$0xf] %vm6972_vm0, %v9060_v26  ;;  %v20371_v1 = vld [vmem:[#allocation63_spill] sm:$0xff]  ;;  %v20387_v63 = vld [vmem:[#allocation77_spill] sm:$0xff] }
 0x704   : > { %7517 = vrot.lane.b32.xlu1 %v20369_v53, %s13581_s4  ;;  %8313 = vrot.lane.b32.xlu0 %v20370_v18, %s13581_s4 }
 0x705   : > { %10941 = vst [vmem:[%s17736_s23 + $0xe0] sm:$0xff] %v10933_v15  ;;  %10942 = vst [vmem:[%s17736_s23 + $0xe8] sm:$0xff] %v10934_v8 }
 0x706   : > { %v8223_v50 = vpop.trf.xlu1  ;;  %v8286_v38 = vpop.permute.xlu0 %8285 }
 0x707   : > { %v10935_v62 = vcombine.low %v18716_v29, %v8223_v50  ;;  %v10936_v17 = vcombine.high %v18716_v29, %v8223_v50  ;;  %10949 = vst.msk [vmem:[%s17677_s10 + $0x190] sm:$0xf] %vm6972_vm0, %v8286_v38  ;;  %v20374_v29 = vld [vmem:[#allocation59_spill] sm:$0xff]  ;;  %v20395_v38 = vld [vmem:[#allocation33_spill] sm:$0xff] }
 0x708   : > { %9065 = vrot.lane.b32.xlu1 %v20371_v1, %s13581_s4  ;;  %9861 = vrot.lane.b32.xlu0 %v20372_v35, %s13581_s4  ;;  %v20394_v1 = vld [vmem:[#allocation22_spill] sm:$0xff] }
 0x709   : > { %10943 = vst [vmem:[%s17736_s23 + $0xf0] sm:$0xff] %v10935_v62  ;;  %10944 = vst [vmem:[%s17736_s23 + $0xf8] sm:$0xff] %v10936_v17  ;;  %v20393_v62 = vld [vmem:[#allocation31_spill] sm:$0xff] }
 0x70a   : > { %v9834_v13 = vpop.permute.xlu0 %9833 }
 0x70b   : > { %11397 = vst.msk [vmem:[%s17677_s10 + $0x390] sm:$0xf] %vm6972_vm0, %v9834_v13  ;;  %v20396_v13 = vld [vmem:[#allocation30_spill] sm:$0xff] }
 0x70c   : > { %8291 = vrot.lane.b32.xlu1 %v20373_v25, %s13581_s4  ;;  %7543 = vrot.lane.b32.xlu0 %v18241_v52, %s13581_s4  ;;  %v20376_v52 = vld [vmem:[#allocation112_spill] sm:$0xff] }
 0x70e   : > { %v7516_v3 = vpop.permute.xlu0 %7515 }
 0x70f   : > { %10727 = vst.msk [vmem:[%s17677_s10 + $0x98] sm:$0xf] %vm6972_vm0, %v7516_v3 }
 0x710   : > { %9839 = vrot.lane.b32.xlu1 %v20374_v29, %s13581_s4  ;;  %9091 = vrot.lane.b32.xlu0 %v18243_v7, %s13581_s4  ;;  %v20378_v7 = vld [vmem:[#allocation116_spill] sm:$0xff] }
 0x712   : > { %v9064_v31 = vpop.permute.xlu0 %9063 }
 0x713   : > { %11175 = vst.msk [vmem:[%s17677_s10 + $0x298] sm:$0xf] %vm6972_vm0, %v9064_v31 }
 0x714   : > { %7521 = vrot.lane.b32.xlu1 %v20375_v12, %s13581_s4  ;;  %8317 = vrot.lane.b32.xlu0 %v20376_v52, %s13581_s4  ;;  %v20397_v12 = vld [vmem:[#allocation34_spill] sm:$0xff]  ;;  %v20398_v52 = vld [vmem:[#allocation129_spill] sm:$0xff] }
 0x716   : > { %v8290_v10 = vpop.permute.xlu0 %8289 }
 0x717   : > { %10951 = vst.msk [vmem:[%s17677_s10 + $0x198] sm:$0xf] %vm6972_vm0, %v8290_v10 }
 0x718   : > { %9069 = vrot.lane.b32.xlu1 %v20377_v51, %s13581_s4  ;;  %9865 = vrot.lane.b32.xlu0 %v20378_v7, %s13581_s4  ;;  %v20399_v51 = vld [vmem:[#allocation36_spill] sm:$0xff]  ;;  %v20401_v7 = vld [vmem:[#allocation41_spill] sm:$0xff] }
 0x71a   : > { %v9768_v49 = vpop.trf.xlu1  ;;  %v9838_v45 = vpop.permute.xlu0 %9837 }
 0x71b   : > { %v11377_v27 = vcombine.low %v18724_v22, %v9768_v49  ;;  %v11378_v23 = vcombine.high %v18724_v22, %v9768_v49  ;;  %11399 = vst.msk [vmem:[%s17677_s10 + $0x398] sm:$0xf] %vm6972_vm0, %v9838_v45  ;;  %v20380_v22 = vld [vmem:[#allocation70_spill] sm:$0xff]  ;;  %v20400_v49 = vld [vmem:[#allocation99_spill] sm:$0xff] }
 0x71c   : > { %8295 = vrot.lane.b32.xlu1 %v20379_v58, %s13581_s4  ;;  %7547 = vrot.lane.b32.xlu0 %v18296_v33, %s13581_s4  ;;  %v20402_v58 = vld [vmem:[#allocation39_spill] sm:$0xff] }
 0x71d   : > { %11385 = vst [vmem:[%s17736_s23 + $0x1c0] sm:$0xff] %v11377_v27  ;;  %11386 = vst [vmem:[%s17736_s23 + $0x1c8] sm:$0xff] %v11378_v23 }
 0x71e   : > { %v9769_v40 = vpop.trf.xlu1  ;;  %v7520_v59 = vpop.permute.xlu0 %7519 }
 0x71f   : > { %v11379_v41 = vcombine.low %v18733_v11, %v9769_v40  ;;  %v11380_v16 = vcombine.high %v18733_v11, %v9769_v40  ;;  %10729 = vst.msk [vmem:[%s17677_s10 + $0xa0] sm:$0xf] %vm6972_vm0, %v7520_v59  ;;  %v20381_v11 = vld [vmem:[#allocation57_spill] sm:$0xff] }
 0x720   : > { %9843 = vrot.lane.b32.xlu1 %v20380_v22, %s13581_s4  ;;  %9095 = vrot.lane.b32.xlu0 %v18298_v54, %s13581_s4  ;;  %v20404_v22 = vld [vmem:[#allocation23_spill] sm:$0xff] }
 0x721   : > { %11387 = vst [vmem:[%s17736_s23 + $0x1d0] sm:$0xff] %v11379_v41  ;;  %11388 = vst [vmem:[%s17736_s23 + $0x1d8] sm:$0xff] %v11380_v16  ;;  %v20403_v41 = vld [vmem:[#allocation109_spill] sm:$0xff] }
 0x722   : > { %v9770_v39 = vpop.trf.xlu1  ;;  %v9068_v61 = vpop.permute.xlu0 %9067 }
 0x723   : > { %v11381_v33 = vcombine.low %v18739_v60, %v9770_v39  ;;  %v11382_v24 = vcombine.high %v18739_v60, %v9770_v39  ;;  %11177 = vst.msk [vmem:[%s17677_s10 + $0x2a0] sm:$0xf] %vm6972_vm0, %v9068_v61  ;;  %v20383_v60 = vld [vmem:[#allocation53_spill] sm:$0xff] }
 0x724   : > { %7525 = vrot.lane.b32.xlu1 %v20381_v11, %s13581_s4  ;;  %8321 = vrot.lane.b32.xlu0 %v20382_v32, %s13581_s4  ;;  %v20405_v39 = vld [vmem:[#allocation93_spill] sm:$0xff] }
 0x725   : > { %11389 = vst [vmem:[%s17736_s23 + $0x1e0] sm:$0xff] %v11381_v33  ;;  %11390 = vst [vmem:[%s17736_s23 + $0x1e8] sm:$0xff] %v11382_v24  ;;  %v20406_v24 = vld [vmem:[#allocation113_spill] sm:$0xff] }
 0x726   : > { %v9771_v42 = vpop.trf.xlu1  ;;  %v8294_v55 = vpop.permute.xlu0 %8293 }
 0x727   : > { %v11383_v54 = vcombine.low %v18747_v43, %v9771_v42  ;;  %v11384_v48 = vcombine.high %v18747_v43, %v9771_v42  ;;  %10953 = vst.msk [vmem:[%s17677_s10 + $0x1a0] sm:$0xf] %vm6972_vm0, %v8294_v55  ;;  %v20386_v43 = vld [vmem:[#allocation61_spill] sm:$0xff]  ;;  %v20409_v55 = vld [vmem:[#allocation24_spill] sm:$0xff] }
 0x728   : > { %9073 = vrot.lane.b32.xlu1 %v20383_v60, %s13581_s4  ;;  %9869 = vrot.lane.b32.xlu0 %v20384_v57, %s13581_s4 }
 0x729   : > { %11391 = vst [vmem:[%s17736_s23 + $0x1f0] sm:$0xff] %v11383_v54  ;;  %11392 = vst [vmem:[%s17736_s23 + $0x1f8] sm:$0xff] %v11384_v48  ;;  %v20408_v54 = vld [vmem:[#allocation19_spill] sm:$0xff] }
 0x72a   : > { %v9842_v14 = vpop.permute.xlu0 %9841 }
 0x72b   : > { %11401 = vst.msk [vmem:[%s17677_s10 + $0x3a0] sm:$0xf] %vm6972_vm0, %v9842_v14  ;;  %v20410_v14 = vld [vmem:[#allocation89_spill] sm:$0xff] }
 0x72c   : > { %8299 = vrot.lane.b32.xlu1 %v20385_v34, %s13581_s4  ;;  %7551 = vrot.lane.b32.xlu0 %v18352_v4, %s13581_s4  ;;  %v20388_v4 = vld [vmem:[#allocation76_spill] sm:$0xff] }
 0x72e   : > { %v7524_v5 = vpop.permute.xlu0 %7523 }
 0x72f   : > { %10731 = vst.msk [vmem:[%s17677_s10 + $0xa8] sm:$0xf] %vm6972_vm0, %v7524_v5 }
 0x730   : > { %9847 = vrot.lane.b32.xlu1 %v20386_v43, %s13581_s4  ;;  %9099 = vrot.lane.b32.xlu0 %v18354_v56, %s13581_s4  ;;  %v20389_v56 = vld [vmem:[#allocation66_spill] sm:$0xff] }
 0x732   : > { %v9072_v15 = vpop.permute.xlu0 %9071 }
 0x733   : > { %11179 = vst.msk [vmem:[%s17677_s10 + $0x2a8] sm:$0xf] %vm6972_vm0, %v9072_v15 }
 0x734   : > { %7529 = vrot.lane.b32.xlu1 %v20387_v63, %s13581_s4  ;;  %8325 = vrot.lane.b32.xlu0 %v18358_v36, %s13581_s4  ;;  %v20390_v36 = vld [vmem:[#allocation78_spill] sm:$0xff]  ;;  %v20411_v63 = vld [vmem:[#allocation81_spill] sm:$0xff] }
 0x736   : > { %v8298_v8 = vpop.permute.xlu0 %8297 }
 0x737   : > { %10955 = vst.msk [vmem:[%s17677_s10 + $0x1a8] sm:$0xf] %vm6972_vm0, %v8298_v8  ;;  %v20412_v8 = vld [vmem:[#allocation54_spill] sm:$0xff] }
 0x738   : > { %9077 = vrot.lane.b32.xlu1 %v20388_v4, %s13581_s4  ;;  %9873 = vrot.lane.b32.xlu0 %v18368_v0, %s13581_s4  ;;  %v20391_v0 = vld [vmem:[#allocation28_spill] sm:$0xff] }
 0x73a   : > { %v9846_v53 = vpop.permute.xlu0 %9845 }
 0x73b   : > { %11403 = vst.msk [vmem:[%s17677_s10 + $0x3a8] sm:$0xf] %vm6972_vm0, %v9846_v53 }
 0x73c   : > { %8303 = vrot.lane.b32.xlu1 %v20389_v56, %s13581_s4  ;;  %7555 = vrot.lane.b32.xlu0 %v18409_v44, %s13581_s4  ;;  %v20392_v44 = vld [vmem:[#allocation38_spill] sm:$0xff] }
 0x73e   : > { %v7528_v26 = vpop.permute.xlu0 %7527 }
 0x73f   : > { %10733 = vst.msk [vmem:[%s17677_s10 + $0xb0] sm:$0xf] %vm6972_vm0, %v7528_v26 }
 0x740   : > { %9851 = vrot.lane.b32.xlu1 %v20390_v36, %s13581_s4  ;;  %9103 = vrot.lane.b32.xlu0 %v18411_v2, %s13581_s4  ;;  %v20413_v36 = vld [vmem:[#allocation102_spill] sm:$0xff] }
 0x742   : > { %v9076_v50 = vpop.permute.xlu0 %9075 }
 0x743   : > { %11181 = vst.msk [vmem:[%s17677_s10 + $0x2b0] sm:$0xf] %vm6972_vm0, %v9076_v50  ;;  %v20414_v50 = vld [vmem:[#allocation18_spill] sm:$0xff] }
 0x744   : > { %7533 = vrot.lane.b32.xlu1 %v20391_v0, %s13581_s4  ;;  %8329 = vrot.lane.b32.xlu0 %v20392_v44, %s13581_s4 }
 0x746   : > { %v7506_v18 = vpop.permute.xlu1 %7505  ;;  %v8302_v17 = vpop.permute.xlu0 %8301 }
 0x747   : > { %10722 = vst.msk [vmem:[%s17677_s10 + $0x84] sm:$0xf] %vm6972_vm0, %v7506_v18  ;;  %10957 = vst.msk [vmem:[%s17677_s10 + $0x1b0] sm:$0xf] %vm6972_vm0, %v8302_v17 }
 0x748   : > { %9081 = vrot.lane.b32.xlu1 %v20393_v62, %s13581_s4  ;;  %9877 = vrot.lane.b32.xlu0 %v20394_v1, %s13581_s4  ;;  %v20415_v62 = vld [vmem:[#allocation20_spill] sm:$0xff] }
 0x749   : > { %v20416_v1 = vld [vmem:[#allocation80_spill] sm:$0xff] }
 0x74a   : > { %v9054_v2 = vpop.permute.xlu1 %9053  ;;  %v9850_v35 = vpop.permute.xlu0 %9849 }
 0x74b   : > { %11170 = vst.msk [vmem:[%s17677_s10 + $0x284] sm:$0xf] %vm6972_vm0, %v9054_v2  ;;  %11405 = vst.msk [vmem:[%s17677_s10 + $0x3b0] sm:$0xf] %vm6972_vm0, %v9850_v35 }
 0x74c   : > { %8307 = vrot.lane.b32.xlu1 %v20395_v38, %s13581_s4  ;;  %7559 = vrot.lane.b32.xlu0 %v18463_v9, %s13581_s4 }
 0x74e   : > { %v8280_v25 = vpop.permute.xlu1 %8279  ;;  %v7532_v29 = vpop.permute.xlu0 %7531 }
 0x74f   : > { %10946 = vst.msk [vmem:[%s17677_s10 + $0x184] sm:$0xf] %vm6972_vm0, %v8280_v25  ;;  %10735 = vst.msk [vmem:[%s17677_s10 + $0xb8] sm:$0xf] %vm6972_vm0, %v7532_v29  ;;  %v20417_v25 = vld [vmem:[#allocation115_spill] sm:$0xff] }
 0x750   : > { %9855 = vrot.lane.b32.xlu1 %v20396_v13, %s13581_s4  ;;  %9107 = vrot.lane.b32.xlu0 %v18465_v21, %s13581_s4 }
 0x752   : > { %v9828_v3 = vpop.permute.xlu1 %9827  ;;  %v9080_v31 = vpop.permute.xlu0 %9079 }
 0x753   : > { %11394 = vst.msk [vmem:[%s17677_s10 + $0x384] sm:$0xf] %vm6972_vm0, %v9828_v3  ;;  %11183 = vst.msk [vmem:[%s17677_s10 + $0x2b8] sm:$0xf] %vm6972_vm0, %v9080_v31  ;;  %v20418_v3 = vld [vmem:[#allocation21_spill] sm:$0xff] }
 0x754   : > { %7537 = vrot.lane.b32.xlu1 %v20397_v12, %s13581_s4  ;;  %8333 = vrot.lane.b32.xlu0 %v20398_v52, %s13581_s4 }
 0x756   : > { %v7510_v9 = vpop.permute.xlu1 %7509  ;;  %v8306_v10 = vpop.permute.xlu0 %8305 }
 0x757   : > { %10724 = vst.msk [vmem:[%s17677_s10 + $0x8c] sm:$0xf] %vm6972_vm0, %v7510_v9  ;;  %10959 = vst.msk [vmem:[%s17677_s10 + $0x1b8] sm:$0xf] %vm6972_vm0, %v8306_v10  ;;  %v20419_v9 = vld [vmem:[#allocation125_spill] sm:$0xff]  ;;  %v20420_v10 = vld [vmem:[#allocation126_spill] sm:$0xff] }
 0x758   : > { %9085 = vrot.lane.b32.xlu1 %v20399_v51, %s13581_s4  ;;  %9881 = vrot.lane.b32.xlu0 %v20400_v49, %s13581_s4 }
 0x75a   : > { %v9058_v21 = vpop.permute.xlu1 %9057  ;;  %v9854_v27 = vpop.permute.xlu0 %9853 }
 0x75b   : > { %11172 = vst.msk [vmem:[%s17677_s10 + $0x28c] sm:$0xf] %vm6972_vm0, %v9058_v21  ;;  %11407 = vst.msk [vmem:[%s17677_s10 + $0x3b8] sm:$0xf] %vm6972_vm0, %v9854_v27 }
 0x75c   : > { %8311 = vrot.lane.b32.xlu1 %v20401_v7, %s13581_s4  ;;  %7563 = vrot.lane.b32.xlu0 %v18517_v47, %s13581_s4  ;;  %v20421_v7 = vld [vmem:[#allocation127_spill] sm:$0xff] }
 0x75e   : > { %v8284_v23 = vpop.permute.xlu1 %8283  ;;  %v7536_v45 = vpop.permute.xlu0 %7535 }
 0x75f   : > { %10948 = vst.msk [vmem:[%s17677_s10 + $0x18c] sm:$0xf] %vm6972_vm0, %v8284_v23  ;;  %10737 = vst.msk [vmem:[%s17677_s10 + $0xc0] sm:$0xf] %vm6972_vm0, %v7536_v45 }
 0x760   : > { %9859 = vrot.lane.b32.xlu1 %v20402_v58, %s13581_s4  ;;  %9111 = vrot.lane.b32.xlu0 %v18519_v37, %s13581_s4  ;;  %v20422_v58 = vld [vmem:[#allocation128_spill] sm:$0xff] }
 0x762   : > { %v9832_v40 = vpop.permute.xlu1 %9831  ;;  %v9084_v16 = vpop.permute.xlu0 %9083 }
 0x763   : > { %11396 = vst.msk [vmem:[%s17677_s10 + $0x38c] sm:$0xf] %vm6972_vm0, %v9832_v40  ;;  %11185 = vst.msk [vmem:[%s17677_s10 + $0x2c0] sm:$0xf] %vm6972_vm0, %v9084_v16 }
 0x764   : > { %7541 = vrot.lane.b32.xlu1 %v20403_v41, %s13581_s4  ;;  %8337 = vrot.lane.b32.xlu0 %v18523_v46, %s13581_s4  ;;  %v20423_v41 = vld [vmem:[#allocation130_spill] sm:$0xff] }
 0x766   : > { %v7514_v47 = vpop.permute.xlu1 %7513  ;;  %v8310_v59 = vpop.permute.xlu0 %8309 }
 0x767   : > { %10726 = vst.msk [vmem:[%s17677_s10 + $0x94] sm:$0xf] %vm6972_vm0, %v7514_v47  ;;  %10961 = vst.msk [vmem:[%s17677_s10 + $0x1c0] sm:$0xf] %vm6972_vm0, %v8310_v59 }
 0x768   : > { %9089 = vrot.lane.b32.xlu1 %v20404_v22, %s13581_s4  ;;  %9885 = vrot.lane.b32.xlu0 %v18534_v20, %s13581_s4  ;;  %v20407_v20 = vld [vmem:[#allocation25_spill] sm:$0xff]  ;;  %v20424_v22 = vld [vmem:[#allocation131_spill] sm:$0xff] }
 0x76a   : > { %v9062_v37 = vpop.permute.xlu1 %9061  ;;  %v9858_v33 = vpop.permute.xlu0 %9857 }
 0x76b   : > { %11174 = vst.msk [vmem:[%s17677_s10 + $0x294] sm:$0xf] %vm6972_vm0, %v9062_v37  ;;  %11409 = vst.msk [vmem:[%s17677_s10 + $0x3c0] sm:$0xf] %vm6972_vm0, %v9858_v33 }
 0x76c   : > { %8315 = vrot.lane.b32.xlu1 %v20405_v39, %s13581_s4  ;;  %v20425_v39 = vld [vmem:[#allocation132_spill] sm:$0xff] }
 0x76e   : > { %v8288_v46 = vpop.permute.xlu1 %8287  ;;  %v7540_v11 = vpop.permute.xlu0 %7539 }
 0x76f   : > { %10950 = vst.msk [vmem:[%s17677_s10 + $0x194] sm:$0xf] %vm6972_vm0, %v8288_v46  ;;  %10739 = vst.msk [vmem:[%s17677_s10 + $0xc8] sm:$0xf] %vm6972_vm0, %v7540_v11 }
 0x770   : > { %9863 = vrot.lane.b32.xlu1 %v20406_v24, %s13581_s4  ;;  %v20426_v24 = vld [vmem:[#allocation133_spill] sm:$0xff] }
 0x772   : > { %v9836_v61 = vpop.permute.xlu1 %9835  ;;  %v9088_v42 = vpop.permute.xlu0 %9087 }
 0x773   : > { %11398 = vst.msk [vmem:[%s17677_s10 + $0x394] sm:$0xf] %vm6972_vm0, %v9836_v61  ;;  %11187 = vst.msk [vmem:[%s17677_s10 + $0x2c8] sm:$0xf] %vm6972_vm0, %v9088_v42 }
 0x774   : > { %7545 = vrot.lane.b32.xlu1 %v20407_v20, %s13581_s4 }
 0x776   : > { %v7518_v32 = vpop.permute.xlu1 %7517  ;;  %v8314_v48 = vpop.permute.xlu0 %8313 }
 0x777   : > { %10728 = vst.msk [vmem:[%s17677_s10 + $0x9c] sm:$0xf] %vm6972_vm0, %v7518_v32  ;;  %10963 = vst.msk [vmem:[%s17677_s10 + $0x1c8] sm:$0xf] %vm6972_vm0, %v8314_v48 }
 0x778   : > { %9093 = vrot.lane.b32.xlu1 %v20408_v54, %s13581_s4 }
 0x77a   : > { %v9066_v60 = vpop.permute.xlu1 %9065  ;;  %v9862_v57 = vpop.permute.xlu0 %9861 }
 0x77b   : > { %11176 = vst.msk [vmem:[%s17677_s10 + $0x29c] sm:$0xf] %vm6972_vm0, %v9066_v60  ;;  %11411 = vst.msk [vmem:[%s17677_s10 + $0x3c8] sm:$0xf] %vm6972_vm0, %v9862_v57 }
 0x77c   : > { %8319 = vrot.lane.b32.xlu1 %v20409_v55, %s13581_s4 }
 0x77e   : > { %v8292_v34 = vpop.permute.xlu1 %8291  ;;  %v7544_v43 = vpop.permute.xlu0 %7543 }
 0x77f   : > { %10952 = vst.msk [vmem:[%s17677_s10 + $0x19c] sm:$0xf] %vm6972_vm0, %v8292_v34  ;;  %10741 = vst.msk [vmem:[%s17677_s10 + $0xd0] sm:$0xf] %vm6972_vm0, %v7544_v43 }
 0x780   : > { %9867 = vrot.lane.b32.xlu1 %v20410_v14, %s13581_s4 }
 0x782   : > { %v9840_v5 = vpop.permute.xlu1 %9839  ;;  %v9092_v15 = vpop.permute.xlu0 %9091 }
 0x783   : > { %11400 = vst.msk [vmem:[%s17677_s10 + $0x39c] sm:$0xf] %vm6972_vm0, %v9840_v5  ;;  %11189 = vst.msk [vmem:[%s17677_s10 + $0x2d0] sm:$0xf] %vm6972_vm0, %v9092_v15 }
 0x784   : > { %7549 = vrot.lane.b32.xlu1 %v20411_v63, %s13581_s4 }
 0x786   : > { %v7522_v4 = vpop.permute.xlu1 %7521  ;;  %v8318_v56 = vpop.permute.xlu0 %8317 }
 0x787   : > { %10730 = vst.msk [vmem:[%s17677_s10 + $0xa4] sm:$0xf] %vm6972_vm0, %v7522_v4  ;;  %10965 = vst.msk [vmem:[%s17677_s10 + $0x1d0] sm:$0xf] %vm6972_vm0, %v8318_v56 }
 0x788   : > { %9097 = vrot.lane.b32.xlu1 %v20412_v8, %s13581_s4 }
 0x78a   : > { %v9070_v53 = vpop.permute.xlu1 %9069  ;;  %v9866_v26 = vpop.permute.xlu0 %9865 }
 0x78b   : > { %11178 = vst.msk [vmem:[%s17677_s10 + $0x2a4] sm:$0xf] %vm6972_vm0, %v9070_v53  ;;  %11413 = vst.msk [vmem:[%s17677_s10 + $0x3d0] sm:$0xf] %vm6972_vm0, %v9866_v26 }
 0x78c   : > { %8323 = vrot.lane.b32.xlu1 %v20413_v36, %s13581_s4 }
 0x78e   : > { %v8296_v0 = vpop.permute.xlu1 %8295  ;;  %v7548_v18 = vpop.permute.xlu0 %7547 }
 0x78f   : > { %10954 = vst.msk [vmem:[%s17677_s10 + $0x1a4] sm:$0xf] %vm6972_vm0, %v8296_v0  ;;  %10743 = vst.msk [vmem:[%s17677_s10 + $0xd8] sm:$0xf] %vm6972_vm0, %v7548_v18 }
 0x790   : > { %9871 = vrot.lane.b32.xlu1 %v20414_v50, %s13581_s4 }
 0x792   : > { %v9844_v44 = vpop.permute.xlu1 %9843  ;;  %v9096_v17 = vpop.permute.xlu0 %9095 }
 0x793   : > { %11402 = vst.msk [vmem:[%s17677_s10 + $0x3a4] sm:$0xf] %vm6972_vm0, %v9844_v44  ;;  %11191 = vst.msk [vmem:[%s17677_s10 + $0x2d8] sm:$0xf] %vm6972_vm0, %v9096_v17 }
 0x794   : > { %7553 = vrot.lane.b32.xlu1 %v20415_v62, %s13581_s4 }
 0x796   : > { %v7526_v2 = vpop.permute.xlu1 %7525  ;;  %v8322_v38 = vpop.permute.xlu0 %8321 }
 0x797   : > { %10732 = vst.msk [vmem:[%s17677_s10 + $0xac] sm:$0xf] %vm6972_vm0, %v7526_v2  ;;  %10967 = vst.msk [vmem:[%s17677_s10 + $0x1d8] sm:$0xf] %vm6972_vm0, %v8322_v38 }
 0x798   : > { %9101 = vrot.lane.b32.xlu1 %v20416_v1, %s13581_s4 }
 0x79a   : > { %v9074_v35 = vpop.permute.xlu1 %9073  ;;  %v9870_v13 = vpop.permute.xlu0 %9869 }
 0x79b   : > { %11180 = vst.msk [vmem:[%s17677_s10 + $0x2ac] sm:$0xf] %vm6972_vm0, %v9074_v35  ;;  %11415 = vst.msk [vmem:[%s17677_s10 + $0x3d8] sm:$0xf] %vm6972_vm0, %v9870_v13 }
 0x79c   : > { %8327 = vrot.lane.b32.xlu1 %v20417_v25, %s13581_s4 }
 0x79e   : > { %v8300_v29 = vpop.permute.xlu1 %8299  ;;  %v7552_v12 = vpop.permute.xlu0 %7551 }
 0x79f   : > { %10956 = vst.msk [vmem:[%s17677_s10 + $0x1ac] sm:$0xf] %vm6972_vm0, %v8300_v29  ;;  %10745 = vst.msk [vmem:[%s17677_s10 + $0xe0] sm:$0xf] %vm6972_vm0, %v7552_v12 }
 0x7a0   : > { %9875 = vrot.lane.b32.xlu1 %v20418_v3, %s13581_s4 }
 0x7a2   : > { %v9848_v31 = vpop.permute.xlu1 %9847  ;;  %v9100_v52 = vpop.permute.xlu0 %9099 }
 0x7a3   : > { %11404 = vst.msk [vmem:[%s17677_s10 + $0x3ac] sm:$0xf] %vm6972_vm0, %v9848_v31  ;;  %11193 = vst.msk [vmem:[%s17677_s10 + $0x2e0] sm:$0xf] %vm6972_vm0, %v9100_v52 }
 0x7a4   : > { %7557 = vrot.lane.b32.xlu1 %v20419_v9, %s13581_s4 }
 0x7a6   : > { %v7530_v51 = vpop.permute.xlu1 %7529  ;;  %v8326_v21 = vpop.permute.xlu0 %8325 }
 0x7a7   : > { %10734 = vst.msk [vmem:[%s17677_s10 + $0xb4] sm:$0xf] %vm6972_vm0, %v7530_v51  ;;  %10969 = vst.msk [vmem:[%s17677_s10 + $0x1e0] sm:$0xf] %vm6972_vm0, %v8326_v21 }
 0x7a8   : > { %9105 = vrot.lane.b32.xlu1 %v20420_v10, %s13581_s4 }
 0x7aa   : > { %v9078_v49 = vpop.permute.xlu1 %9077  ;;  %v9874_v27 = vpop.permute.xlu0 %9873 }
 0x7ab   : > { %11182 = vst.msk [vmem:[%s17677_s10 + $0x2b4] sm:$0xf] %vm6972_vm0, %v9078_v49  ;;  %11417 = vst.msk [vmem:[%s17677_s10 + $0x3e0] sm:$0xf] %vm6972_vm0, %v9874_v27 }
 0x7ac   : > { %8331 = vrot.lane.b32.xlu1 %v20421_v7, %s13581_s4 }
 0x7ae   : > { %v8304_v23 = vpop.permute.xlu1 %8303  ;;  %v7556_v45 = vpop.permute.xlu0 %7555 }
 0x7af   : > { %10958 = vst.msk [vmem:[%s17677_s10 + $0x1b4] sm:$0xf] %vm6972_vm0, %v8304_v23  ;;  %10747 = vst.msk [vmem:[%s17677_s10 + $0xe8] sm:$0xf] %vm6972_vm0, %v7556_v45 }
 0x7b0   : > { %9879 = vrot.lane.b32.xlu1 %v20422_v58, %s13581_s4 }
 0x7b2   : > { %v9852_v40 = vpop.permute.xlu1 %9851  ;;  %v9104_v16 = vpop.permute.xlu0 %9103 }
 0x7b3   : > { %11406 = vst.msk [vmem:[%s17677_s10 + $0x3b4] sm:$0xf] %vm6972_vm0, %v9852_v40  ;;  %11195 = vst.msk [vmem:[%s17677_s10 + $0x2e8] sm:$0xf] %vm6972_vm0, %v9104_v16 }
 0x7b4   : > { %7561 = vrot.lane.b32.xlu1 %v20423_v41, %s13581_s4 }
 0x7b6   : > { %v7534_v47 = vpop.permute.xlu1 %7533  ;;  %v8330_v59 = vpop.permute.xlu0 %8329 }
 0x7b7   : > { %10736 = vst.msk [vmem:[%s17677_s10 + $0xbc] sm:$0xf] %vm6972_vm0, %v7534_v47  ;;  %10971 = vst.msk [vmem:[%s17677_s10 + $0x1e8] sm:$0xf] %vm6972_vm0, %v8330_v59 }
 0x7b8   : > { %9109 = vrot.lane.b32.xlu1 %v20424_v22, %s13581_s4 }
 0x7ba   : > { %v9082_v37 = vpop.permute.xlu1 %9081  ;;  %v9878_v33 = vpop.permute.xlu0 %9877 }
 0x7bb   : > { %11184 = vst.msk [vmem:[%s17677_s10 + $0x2bc] sm:$0xf] %vm6972_vm0, %v9082_v37  ;;  %11419 = vst.msk [vmem:[%s17677_s10 + $0x3e8] sm:$0xf] %vm6972_vm0, %v9878_v33 }
 0x7bc   : > { %8335 = vrot.lane.b32.xlu1 %v20425_v39, %s13581_s4 }
 0x7be   : > { %v8308_v46 = vpop.permute.xlu1 %8307  ;;  %v7560_v11 = vpop.permute.xlu0 %7559 }
 0x7bf   : > { %10960 = vst.msk [vmem:[%s17677_s10 + $0x1bc] sm:$0xf] %vm6972_vm0, %v8308_v46  ;;  %10749 = vst.msk [vmem:[%s17677_s10 + $0xf0] sm:$0xf] %vm6972_vm0, %v7560_v11 }
 0x7c0   : > { %9883 = vrot.lane.b32.xlu1 %v20426_v24, %s13581_s4 }
 0x7c2   : > { %v9856_v61 = vpop.permute.xlu1 %9855  ;;  %v9108_v20 = vpop.permute.xlu0 %9107 }
 0x7c3   : > { %11408 = vst.msk [vmem:[%s17677_s10 + $0x3bc] sm:$0xf] %vm6972_vm0, %v9856_v61  ;;  %11197 = vst.msk [vmem:[%s17677_s10 + $0x2f0] sm:$0xf] %vm6972_vm0, %v9108_v20 }
 0x7c4   : > { %7565 = vrot.lane.b32.xlu1 %v18536_v6, %s13581_s4 }
 0x7c6   : > { %v7538_v42 = vpop.permute.xlu1 %7537 }
 0x7c7   : > { %10738 = vst.msk [vmem:[%s17677_s10 + $0xc4] sm:$0xf] %vm6972_vm0, %v7538_v42 }
 0x7c8   : > { %13493 = shalt.err (!%p13490_p10)
}
 0x7c9   : > { %s13494_s28 = scalar_lea.hbm %s19169_s17, 8192  ;;  %s13498_s23 = scalar_lea.hbm %s20427_s1, 16384 }
 0x7ca   : > { %p13495_p13 = scmp.ne.s32.totalorder %s19169_s17, %s13494_s28  ;;  %p13499_p7 = scmp.lt.u32.totalorder %s19169_s17, %s20427_s1 }
 0x7cb   : > { %p13500_p11 = scmp.lt.u32.totalorder %s13498_s23, %s13494_s28  ;;  %p13502_p1 = scmp.lt.u32.totalorder %s13494_s28, %s19169_s17 }
 0x7cc   : > { %p13496_p9 = pnand %p13495_p13, %p13819_p6 }
 0x7cd   : > { %p13501_p12 = por %p13500_p11, %p13499_p7 }
 0x7ce   : > { %p13497_p3 = pneg %p13496_p9 }
 0x7cf   : > { %p13503_p2 = por %p13502_p1, %p13501_p12 }
 0x7d1   : > { %p13504_p4 = pnand %p13503_p2, %p13497_p3 }
 0x7d3   : > { %13507 = shalt.err (!%p13504_p4)
}
 0x7d4   : > { %s13583_s26 = smov 128   ;;  %s13584_s7 = smov 8   ;;  %9113 = vrot.lane.b32.xlu1 %v18543_v30, %s13581_s4  ;;  %v8334_v6 = vpop.permute.xlu0 %8333  ;;  %v9086_v32 = vpop.permute.xlu1 %9085 }
 0x7d5   : > { %12476 = dma.vmem_to_hbm [thread:$0]  (%p13819_p6), %s19172_s8, 8192, %s19169_s17, %s9964_s20, %s13583_s26, %s13583_s26, %s13584_s7  }
 0x7d6   : > { %10973 = vst.msk [vmem:[%s17677_s10 + $0x1f0] sm:$0xf] %vm6972_vm0, %v8334_v6  ;;  %11186 = vst.msk [vmem:[%s17677_s10 + $0x2c4] sm:$0xf] %vm6972_vm0, %v9086_v32 }
 0x7d8   : > { %8339 = vrot.lane.b32.xlu1 %v18545_v19, %s13581_s4  ;;  %v9882_v54 = vpop.permute.xlu0 %9881  ;;  %v8312_v48 = vpop.permute.xlu1 %8311 }
 0x7d9   : > { %11421 = vst.msk [vmem:[%s17677_s10 + $0x3f0] sm:$0xf] %vm6972_vm0, %v9882_v54  ;;  %10962 = vst.msk [vmem:[%s17677_s10 + $0x1c4] sm:$0xf] %vm6972_vm0, %v8312_v48 }
 0x7dc   : > { %9887 = vrot.lane.b32.xlu1 %v18553_v28, %s13581_s4  ;;  %v7564_v30 = vpop.permute.xlu0 %7563  ;;  %v9860_v60 = vpop.permute.xlu1 %9859 }
 0x7dd   : > { %10751 = vst.msk [vmem:[%s17677_s10 + $0xf8] sm:$0xf] %vm6972_vm0, %v7564_v30  ;;  %11410 = vst.msk [vmem:[%s17677_s10 + $0x3c4] sm:$0xf] %vm6972_vm0, %v9860_v60 }
 0x7e0   : > { %v9112_v19 = vpop.permute.xlu0 %9111  ;;  %v7542_v55 = vpop.permute.xlu1 %7541 }
 0x7e1   : > { %11199 = vst.msk [vmem:[%s17677_s10 + $0x2f8] sm:$0xf] %vm6972_vm0, %v9112_v19  ;;  %10740 = vst.msk [vmem:[%s17677_s10 + $0xcc] sm:$0xf] %vm6972_vm0, %v7542_v55 }
 0x7e4   : > { %v8338_v57 = vpop.permute.xlu0 %8337  ;;  %v9090_v28 = vpop.permute.xlu1 %9089 }
 0x7e5   : > { %10975 = vst.msk [vmem:[%s17677_s10 + $0x1f8] sm:$0xf] %vm6972_vm0, %v8338_v57  ;;  %11188 = vst.msk [vmem:[%s17677_s10 + $0x2cc] sm:$0xf] %vm6972_vm0, %v9090_v28 }
 0x7e8   : > { %v9886_v34 = vpop.permute.xlu0 %9885  ;;  %v8316_v14 = vpop.permute.xlu1 %8315 }
 0x7e9   : > { %11423 = vst.msk [vmem:[%s17677_s10 + $0x3f8] sm:$0xf] %vm6972_vm0, %v9886_v34  ;;  %10964 = vst.msk [vmem:[%s17677_s10 + $0x1cc] sm:$0xf] %vm6972_vm0, %v8316_v14 }
 0x7ec   : > { %v9864_v43 = vpop.permute.xlu1 %9863 }
 0x7ed   : > { %11412 = vst.msk [vmem:[%s17677_s10 + $0x3cc] sm:$0xf] %vm6972_vm0, %v9864_v43 }
 0x7f0   : > { %v7546_v5 = vpop.permute.xlu1 %7545 }
 0x7f1   : > { %10742 = vst.msk [vmem:[%s17677_s10 + $0xd4] sm:$0xf] %vm6972_vm0, %v7546_v5 }
 0x7f4   : > { %v9094_v63 = vpop.permute.xlu1 %9093 }
 0x7f5   : > { %11190 = vst.msk [vmem:[%s17677_s10 + $0x2d4] sm:$0xf] %vm6972_vm0, %v9094_v63 }
 0x7f8   : > { %v8320_v15 = vpop.permute.xlu1 %8319 }
 0x7f9   : > { %10966 = vst.msk [vmem:[%s17677_s10 + $0x1d4] sm:$0xf] %vm6972_vm0, %v8320_v15 }
 0x7fc   : > { %v9868_v4 = vpop.permute.xlu1 %9867 }
 0x7fd   : > { %11414 = vst.msk [vmem:[%s17677_s10 + $0x3d4] sm:$0xf] %vm6972_vm0, %v9868_v4 }
 0x800   : > { %v7550_v8 = vpop.permute.xlu1 %7549 }
 0x801   : > { %10744 = vst.msk [vmem:[%s17677_s10 + $0xdc] sm:$0xf] %vm6972_vm0, %v7550_v8 }
 0x804   : > { %v9098_v56 = vpop.permute.xlu1 %9097 }
 0x805   : > { %11192 = vst.msk [vmem:[%s17677_s10 + $0x2dc] sm:$0xf] %vm6972_vm0, %v9098_v56 }
 0x808   : > { %v8324_v53 = vpop.permute.xlu1 %8323 }
 0x809   : > { %10968 = vst.msk [vmem:[%s17677_s10 + $0x1dc] sm:$0xf] %vm6972_vm0, %v8324_v53 }
 0x80c   : > { %v9872_v36 = vpop.permute.xlu1 %9871 }
 0x80d   : > { %11416 = vst.msk [vmem:[%s17677_s10 + $0x3dc] sm:$0xf] %vm6972_vm0, %v9872_v36 }
 0x810   : > { %v7554_v26 = vpop.permute.xlu1 %7553 }
 0x811   : > { %10746 = vst.msk [vmem:[%s17677_s10 + $0xe4] sm:$0xf] %vm6972_vm0, %v7554_v26 }
 0x814   : > { %v9102_v0 = vpop.permute.xlu1 %9101 }
 0x815   : > { %11194 = vst.msk [vmem:[%s17677_s10 + $0x2e4] sm:$0xf] %vm6972_vm0, %v9102_v0 }
 0x818   : > { %v8328_v50 = vpop.permute.xlu1 %8327 }
 0x819   : > { %10970 = vst.msk [vmem:[%s17677_s10 + $0x1e4] sm:$0xf] %vm6972_vm0, %v8328_v50 }
 0x81c   : > { %v9876_v18 = vpop.permute.xlu1 %9875 }
 0x81d   : > { %11418 = vst.msk [vmem:[%s17677_s10 + $0x3e4] sm:$0xf] %vm6972_vm0, %v9876_v18 }
 0x820   : > { %v7558_v44 = vpop.permute.xlu1 %7557 }
 0x821   : > { %10748 = vst.msk [vmem:[%s17677_s10 + $0xec] sm:$0xf] %vm6972_vm0, %v7558_v44 }
 0x824   : > { %v9106_v62 = vpop.permute.xlu1 %9105 }
 0x825   : > { %11196 = vst.msk [vmem:[%s17677_s10 + $0x2ec] sm:$0xf] %vm6972_vm0, %v9106_v62 }
 0x828   : > { %v8332_v17 = vpop.permute.xlu1 %8331 }
 0x829   : > { %10972 = vst.msk [vmem:[%s17677_s10 + $0x1ec] sm:$0xf] %vm6972_vm0, %v8332_v17 }
 0x82c   : > { %v9880_v2 = vpop.permute.xlu1 %9879 }
 0x82d   : > { %11420 = vst.msk [vmem:[%s17677_s10 + $0x3ec] sm:$0xf] %vm6972_vm0, %v9880_v2 }
 0x830   : > { %v7562_v1 = vpop.permute.xlu1 %7561 }
 0x831   : > { %10750 = vst.msk [vmem:[%s17677_s10 + $0xf4] sm:$0xf] %vm6972_vm0, %v7562_v1 }
 0x834   : > { %v9110_v38 = vpop.permute.xlu1 %9109 }
 0x835   : > { %11198 = vst.msk [vmem:[%s17677_s10 + $0x2f4] sm:$0xf] %vm6972_vm0, %v9110_v38 }
 0x838   : > { %v8336_v35 = vpop.permute.xlu1 %8335 }
 0x839   : > { %10974 = vst.msk [vmem:[%s17677_s10 + $0x1f4] sm:$0xf] %vm6972_vm0, %v8336_v35 }
 0x83c   : > { %v9884_v25 = vpop.permute.xlu1 %9883 }
 0x83d   : > { %11422 = vst.msk [vmem:[%s17677_s10 + $0x3f4] sm:$0xf] %vm6972_vm0, %v9884_v25 }
 0x840   : > { %v7566_v13 = vpop.permute.xlu1 %7565 }
 0x841   : > { %10752 = vst.msk [vmem:[%s17677_s10 + $0xfc] sm:$0xf] %vm6972_vm0, %v7566_v13 }
 0x846   : > { %v9114_v29 = vpop.permute.xlu1 %9113 }
 0x847   : > { %11200 = vst.msk [vmem:[%s17677_s10 + $0x2fc] sm:$0xf] %vm6972_vm0, %v9114_v29 }
 0x84a   : > { %v8340_v3 = vpop.permute.xlu1 %8339 }
 0x84b   : > { %10976 = vst.msk [vmem:[%s17677_s10 + $0x1fc] sm:$0xf] %vm6972_vm0, %v8340_v3 }
 0x84e   : > { %v9888_v12 = vpop.permute.xlu1 %9887 }
 0x84f   : > { %11424 = vst.msk [vmem:[%s17677_s10 + $0x3fc] sm:$0xf] %vm6972_vm0, %v9888_v12 }
 0x850 PF: > { %s20428_s15 = sld [smem:[#allocation16_spill]]  ;;  %s20429_s13 = sld [smem:[#allocation17_spill]] }
 0x851   : > { %p20431_p8 = scmp.ge.s32.totalorder %s13570_s22, 2 }
 0x856   : > { %s10023_s4 = sand.u32 1, %s20428_s15   ;;  %p20430_p6 = scmp.ne.s32.totalorder %s20429_s13, 0 }
 0x857   : > { %s10024_s17 = scalar_lea.sflag [#allocation4], %s10023_s4 }
 0x858   : > { %p12496_p0 = pnand %p20431_p8, %p20430_p6 }
 0x85a   : > { %13545 = dma.done.wait (!%p12496_p0), %s10024_s17, 8192  }
 0x85b   : > { %13547 = vsyncadd (!%p12496_p0), %s10024_s17, 4294959104  ;;  %s30_s22 = sadd.s32 1, %s13570_s22   ;;  %s20432_s17 = smov %s13554_s18 }
 0x85c   : > { %p27_p5 = scmp.ge.s32.totalorder %s30_s22, 4   ;;  %s20433_s18 = smov %s13558_s19 }
 0x85d   : > { %s20434_s19 = smov %s13828_s24  ;;  %s20435_s20 = smov %s13566_s21 }
 0x85e   : > { %s20436_s21 = smov %s20438_s11  ;;  %29 = sbr.rel (!%p27_p5) target bundleno = 15 (0xf), region = 162 }
 0x865   :  { %10041 = vsyncpa [#allocation3], 1 }
 0x866   :  { %10043 = vsyncpa [#allocation3 + $0x1], 1 }
 0x867   :  { %10044 = vsyncpa [#allocation6], 1 }
 0x868   :  { %10045 = vsyncpa [#allocation9], 1 }
 0x869   :  { %10046 = vsyncpa [#allocation4], 1 }
 0x86a   :  { %10048 = vsyncpa [#allocation4 + $0x1], 1 }

</bundles_post_ra>
